<compile_context>
chip_gen: v7x
topology: tpu7x:2x2x1
jax: 0.10.0
libtpu: 0.0.40
codegen_flags: <defaults>
</compile_context>

<pallas_src>
import functools

import jax
import jax.numpy as jnp
from jax.experimental import pallas as pl
from jax.experimental.pallas import tpu as pltpu

LRELU_SLOPE = 0.2
BN_EPS = 1e-5


# ----------------------------------------------------------------------------- helpers
def _ceil_to(x, m):
    return ((x + m - 1) // m) * m


def _pad_rows(x2d, rows_padded):
    r = x2d.shape[0]
    if rows_padded == r:
        return x2d
    return jnp.pad(x2d, ((0, rows_padded - r), (0, 0)))


def _pick_tm(M, K, N, budget_bytes=4 * 1024 * 1024):
    """Row-tile size: biggest multiple of 8 whose (tm,K) bf16 + (tm,N) f32 tiles
    fit the per-buffer budget, capped at 512 and at the (padded) row count."""
    per_row = K * 2 + N * 4
    tm = max(8, min(512, budget_bytes // max(1, per_row)))
    tm = (tm // 8) * 8
    tm = min(tm, _ceil_to(M, 8))
    return max(8, tm)


# ----------------------------------------------------------------------------- conv matmul kernel (bf16 MXU, fused bias + LeakyReLU epilogue)
def _conv_mm_kernel(a_ref, b_ref, bias_ref, o_ref, *, fuse_lrelu):
    # bf16 operands -> f32 accumulate on the MXU
    acc = jnp.dot(a_ref[...], b_ref[...], preferred_element_type=jnp.float32)
    acc = acc + bias_ref[...]                       # f32 epilogue (v5e-safe)
    if fuse_lrelu:
        acc = jnp.where(acc >= 0.0, acc, LRELU_SLOPE * acc)
    o_ref[...] = acc.astype(o_ref.dtype)


def conv_matmul(a_bf16, b_bf16, bias_f32, *, fuse_lrelu, out_dtype):
    """(M, K) bf16 @ (K, N) bf16 -> (M, N), + bias (+ LeakyReLU)."""
    M, K = a_bf16.shape
    K2, N = b_bf16.shape
    assert K == K2
    tm = _pick_tm(M, K, N)
    Mp = _ceil_to(M, tm)
    a_p = _pad_rows(a_bf16, Mp)
    bias2 = bias_f32.reshape(1, N).astype(jnp.float32)
    out = pl.pallas_call(
        functools.partial(_conv_mm_kernel, fuse_lrelu=fuse_lrelu),
        out_shape=jax.ShapeDtypeStruct((Mp, N), out_dtype),
        grid=(Mp // tm,),
        in_specs=[
            pl.BlockSpec((tm, K), lambda i: (i, 0)),    # activation patches (full K)
            pl.BlockSpec((K, N), lambda i: (0, 0)),     # weights resident, DMA'd once
            pl.BlockSpec((1, N), lambda i: (0, 0)),     # per-channel bias resident
        ],
        out_specs=pl.BlockSpec((tm, N), lambda i: (i, 0)),
        compiler_params=pltpu.CompilerParams(
            dimension_semantics=("parallel",)),
    )(a_p, b_bf16, bias2)
    return out[:M]


# ----------------------------------------------------------------------------- conv matmul kernel with fused BN statistics accumulation
def _conv_mm_stats_kernel(a_ref, b_ref, o_ref, sum_ref, sq_ref):
    @pl.when(pl.program_id(0) == 0)
    def _():
        sum_ref[...] = jnp.zeros_like(sum_ref)
        sq_ref[...] = jnp.zeros_like(sq_ref)
    acc = jnp.dot(a_ref[...], b_ref[...], preferred_element_type=jnp.float32)
    o_ref[...] = acc
    # padded rows are all-zero (no bias) -> contribute nothing to the sums
    sum_ref[...] += jnp.sum(acc, axis=0, keepdims=True)
    sq_ref[...] += jnp.sum(acc * acc, axis=0, keepdims=True)


def conv_matmul_stats(a_bf16, b_bf16):
    """(M, K) bf16 @ (K, N) bf16 -> (M, N) f32, plus per-channel sum / sum-of-squares."""
    M, K = a_bf16.shape
    K2, N = b_bf16.shape
    assert K == K2
    tm = _pick_tm(M, K, N)
    Mp = _ceil_to(M, tm)
    a_p = _pad_rows(a_bf16, Mp)
    y, s, sq = pl.pallas_call(
        _conv_mm_stats_kernel,
        out_shape=(jax.ShapeDtypeStruct((Mp, N), jnp.float32),
                   jax.ShapeDtypeStruct((1, N), jnp.float32),
                   jax.ShapeDtypeStruct((1, N), jnp.float32)),
        grid=(Mp // tm,),
        in_specs=[
            pl.BlockSpec((tm, K), lambda i: (i, 0)),
            pl.BlockSpec((K, N), lambda i: (0, 0)),
        ],
        out_specs=(pl.BlockSpec((tm, N), lambda i: (i, 0)),
                   pl.BlockSpec((1, N), lambda i: (0, 0)),     # resident accumulators
                   pl.BlockSpec((1, N), lambda i: (0, 0))),
        compiler_params=pltpu.CompilerParams(
            dimension_semantics=("arbitrary",)),               # reduction over row tiles
    )(a_p, b_bf16)
    return y[:M], s, sq


# ----------------------------------------------------------------------------- BN affine + LeakyReLU (pass 2), bf16 output
def _affine_act_kernel(x_ref, s_ref, b_ref, o_ref, *, slope):
    y = x_ref[...] * s_ref[...] + b_ref[...]
    o_ref[...] = jnp.where(y >= 0.0, y, slope * y).astype(o_ref.dtype)


def bn_affine_lrelu(y2d, sum_c, sq_c, gamma, beta, n_rows):
    """BatchNorm (biased batch variance, PyTorch train-mode normalization) + LeakyReLU."""
    R, C = y2d.shape
    mean = sum_c / n_rows
    var = sq_c / n_rows - mean * mean
    scale = gamma.reshape(1, C) * jax.lax.rsqrt(var + BN_EPS)
    shift = beta.reshape(1, C) - mean * scale

    tr = _pick_tm(R, C, C, budget_bytes=2 * 1024 * 1024)
    Rp = _ceil_to(R, tr)
    y_p = _pad_rows(y2d, Rp)
    out = pl.pallas_call(
        functools.partial(_affine_act_kernel, slope=LRELU_SLOPE),
        out_shape=jax.ShapeDtypeStruct((Rp, C), jnp.bfloat16),
        grid=(Rp // tr,),
        in_specs=[pl.BlockSpec((tr, C), lambda i: (i, 0)),
                  pl.BlockSpec((1, C), lambda i: (0, 0)),
                  pl.BlockSpec((1, C), lambda i: (0, 0))],
        out_specs=pl.BlockSpec((tr, C), lambda i: (i, 0)),
        compiler_params=pltpu.CompilerParams(
            dimension_semantics=("parallel",)),
    )(y_p, scale, shift)
    return out[:R]


# ----------------------------------------------------------------------------- conv glue (im2col, bf16)
def _im2col(x_nhwc, k, stride, padding):
    N, H, W, C = x_nhwc.shape
    x_p = jnp.pad(x_nhwc, ((0, 0), (padding, padding), (padding, padding), (0, 0)))
    Ho = (H + 2 * padding - k) // stride + 1
    Wo = (W + 2 * padding - k) // stride + 1
    cols = []
    for di in range(k):
        for dj in range(k):
            cols.append(x_p[:, di:di + stride * Ho:stride, dj:dj + stride * Wo:stride, :])
    patches = jnp.concatenate(cols, axis=-1)        # (N, Ho, Wo, k*k*C), taps-major / C-minor
    return patches.reshape(N * Ho * Wo, k * k * C), Ho, Wo


def _weight_to_mat(w):
    """PyTorch (Cout, Cin, kh, kw) -> (kh*kw*Cin, Cout) bf16, matching im2col layout."""
    Cout, Cin, kh, kw = w.shape
    return jnp.transpose(w, (2, 3, 1, 0)).reshape(kh * kw * Cin, Cout).astype(jnp.bfloat16)


def conv_layer(x_nhwc, w, bias, *, stride, padding, fuse_lrelu, out_dtype):
    Cout = w.shape[0]
    N = x_nhwc.shape[0]
    a, Ho, Wo = _im2col(x_nhwc.astype(jnp.bfloat16), w.shape[2], stride, padding)
    b = _weight_to_mat(w)
    if bias is None:
        bias = jnp.zeros((Cout,), jnp.float32)
    y = conv_matmul(a, b, bias, fuse_lrelu=fuse_lrelu, out_dtype=out_dtype)
    return y.reshape(N, Ho, Wo, Cout)


def conv_bn_lrelu_layer(x_nhwc, w, gamma, beta, *, stride, padding):
    """Conv (no bias) with fused batch-stat accumulation, then BN affine + LeakyReLU."""
    Cout = w.shape[0]
    N = x_nhwc.shape[0]
    a, Ho, Wo = _im2col(x_nhwc.astype(jnp.bfloat16), w.shape[2], stride, padding)
    b = _weight_to_mat(w)
    y2d, s, sq = conv_matmul_stats(a, b)                    # (M, Cout) f32 + stats
    out2d = bn_affine_lrelu(y2d, s, sq, gamma, beta, n_rows=y2d.shape[0])
    return out2d.reshape(N, Ho, Wo, Cout)


# ----------------------------------------------------------------------------- parameters
def init_params(key, input_nc, ndf=64, n_layers=3):
    keys = iter(jax.random.split(key, 4 * (n_layers + 2)))

    def conv_w(cout, cin, k):
        fan_in = cin * k * k
        std = (2.0 / fan_in) ** 0.5
        return std * jax.random.normal(next(keys), (cout, cin, k, k), jnp.float32)

    params = {"conv0": {"w": conv_w(ndf, input_nc, 4),
                        "b": jnp.zeros((ndf,), jnp.float32)}}
    mid = []
    nf_mult = 1
    for n in range(1, n_layers):
        nf_mult_prev, nf_mult = nf_mult, min(2 ** n, 8)
        mid.append({"w": conv_w(ndf * nf_mult, ndf * nf_mult_prev, 4),
                    "gamma": jnp.ones((ndf * nf_mult,), jnp.float32),
                    "beta": jnp.zeros((ndf * nf_mult,), jnp.float32)})
    nf_mult_prev, nf_mult = nf_mult, min(2 ** n_layers, 8)
    mid.append({"w": conv_w(ndf * nf_mult, ndf * nf_mult_prev, 4),
                "gamma": jnp.ones((ndf * nf_mult,), jnp.float32),
                "beta": jnp.zeros((ndf * nf_mult,), jnp.float32)})
    params["mid"] = mid
    params["convL"] = {"w": conv_w(1, ndf * nf_mult, 4),
                       "b": jnp.zeros((1,), jnp.float32)}
    return params


# ----------------------------------------------------------------------------- forward
def nlayer_discriminator_forward(params, x_nchw):
    x = jnp.transpose(x_nchw, (0, 2, 3, 1)).astype(jnp.float32)      # NCHW -> NHWC

    # layer 0: conv(s2) + bias + LeakyReLU (fused in matmul epilogue), bf16 activations
    x = conv_layer(x, params["conv0"]["w"], params["conv0"]["b"],
                   stride=2, padding=1, fuse_lrelu=True, out_dtype=jnp.bfloat16)

    # middle layers: conv (no bias, fused batch stats) -> BN affine -> LeakyReLU (bf16)
    n_mid = len(params["mid"])
    for idx, lyr in enumerate(params["mid"]):
        stride = 2 if idx < n_mid - 1 else 1       # last "n_layers" conv has stride 1
        x = conv_bn_lrelu_layer(x, lyr["w"], lyr["gamma"], lyr["beta"],
                                stride=stride, padding=1)

    # output layer: conv(s1) + bias, 1-channel patch map, no activation, f32 output
    x = conv_layer(x, params["convL"]["w"], params["convL"]["b"],
                   stride=1, padding=1, fuse_lrelu=False, out_dtype=jnp.float32)
    return jnp.transpose(x, (0, 3, 1, 2))          # NHWC -> NCHW


class NLayerDiscriminatorPallas:
    """Pallas-TPU port of the PatchGAN NLayerDiscriminator (ndf=64, n_layers=3, BatchNorm)."""

    def __init__(self, input_nc, ndf=64, n_layers=3, key=None):
        key = jax.random.PRNGKey(0) if key is None else key
        self.params = init_params(key, input_nc, ndf=ndf, n_layers=n_layers)
        self._fwd = jax.jit(nlayer_discriminator_forward)

    def __call__(self, x_nchw):
        return self._fwd(self.params, x_nchw)


# ----------------------------------------------------------------------------- main
if __name__ == "__main__":
    key = jax.random.PRNGKey(0)
    kp, kx = jax.random.split(key)
    input_nc = 3
    # 32x32 is the smallest input that keeps every 4x4 conv's output non-empty.
    x = jax.random.normal(kx, (2, input_nc, 32, 32), jnp.float32)    # NCHW like PyTorch
    model = NLayerDiscriminatorPallas(input_nc, key=kp)
    out = model(x)
    out = jax.block_until_ready(out)
    assert out.shape == (2, 1, 2, 2), out.shape
    assert bool(jnp.all(jnp.isfinite(out)))
    print("KERNEL_OK")
</pallas_src>

<mosaic_0001>
module attributes {stable_mosaic.version = 11 : i64} {
  func.func @_conv_mm_kernel(%arg0: i32, %arg1: memref<512x48xbf16, #tpu.memory_space<vmem>>, %arg2: memref<48x64xbf16, #tpu.memory_space<vmem>>, %arg3: memref<1x64xf32, #tpu.memory_space<vmem>>, %arg4: memref<512x64xbf16, #tpu.memory_space<vmem>>) attributes {dimension_semantics = [#tpu.dimension_semantics<parallel>], iteration_bounds = array<i64: 1>, scalar_prefetch = 0 : i64, scratch_operands = 0 : i64, tpu.core_type = #tpu.core_type<tc>, window_params = [{transform_indices = @transform_0, window_bounds = array<i64: 512, 48>}, {pipeline_mode = #tpu.pipeline_mode<synchronous>, transform_indices = @transform_1, window_bounds = array<i64: 48, 64>}, {pipeline_mode = #tpu.pipeline_mode<synchronous>, transform_indices = @transform_2, window_bounds = array<i64: 1, 64>}, {transform_indices = @transform_3, window_bounds = array<i64: 512, 64>}]} {
    %c0 = arith.constant 0 : index
    %c0_0 = arith.constant 0 : index
    %0 = vector.load %arg1[%c0, %c0_0] : memref<512x48xbf16, #tpu.memory_space<vmem>>, vector<512x48xbf16>
    %c0_1 = arith.constant 0 : index
    %c0_2 = arith.constant 0 : index
    %1 = vector.load %arg2[%c0_1, %c0_2] : memref<48x64xbf16, #tpu.memory_space<vmem>>, vector<48x64xbf16>
    %cst = arith.constant dense<0.000000e+00> : vector<512x64xf32>
    %2 = tpu.matmul %0, %1, %cst {dimension_numbers = #tpu.dot_dimension_numbers<[1], [0], [0], [1], [0, 0, 1, 1], [], []>} : vector<512x48xbf16>, vector<48x64xbf16>, vector<512x64xf32> -> vector<512x64xf32>
    %c0_3 = arith.constant 0 : index
    %c0_4 = arith.constant 0 : index
    %3 = vector.load %arg3[%c0_3, %c0_4] : memref<1x64xf32, #tpu.memory_space<vmem>>, vector<1x64xf32>
    %4 = vector.broadcast %3 : vector<1x64xf32> to vector<512x64xf32>
    %5 = arith.addf %2, %4 : vector<512x64xf32>
    %cst_5 = arith.constant 0.000000e+00 : f32
    %6 = vector.broadcast %cst_5 : f32 to vector<512x64xf32>
    %7 = arith.cmpf oge, %5, %6 : vector<512x64xf32>
    %cst_6 = arith.constant 2.000000e-01 : f32
    %8 = vector.broadcast %cst_6 : f32 to vector<512x64xf32>
    %9 = arith.mulf %8, %5 : vector<512x64xf32>
    %10 = arith.select %7, %5, %9 : vector<512x64xi1>, vector<512x64xf32>
    %11 = arith.truncf %10 : vector<512x64xf32> to vector<512x64xbf16>
    %c0_7 = arith.constant 0 : index
    %c0_8 = arith.constant 0 : index
    %12 = vector.load %arg4[%c0_7, %c0_8] : memref<512x64xbf16, #tpu.memory_space<vmem>>, vector<512x64xbf16>
    tpu.vector_store %arg4[%c0_7, %c0_8], %11 {strides = array<i32>} : memref<512x64xbf16, #tpu.memory_space<vmem>>, vector<512x64xbf16>,
    return
  }
  func.func @transform_0(%arg0: i32) -> (i32, i32) {
    %c0_i32 = arith.constant 0 : i32
    %c0_i32_0 = arith.constant 0 : i32
    return %arg0, %c0_i32 : i32, i32
  }
  func.func @transform_1(%arg0: i32) -> (i32, i32) {
    %c0_i32 = arith.constant 0 : i32
    %c0_i32_0 = arith.constant 0 : i32
    %c0_i32_1 = arith.constant 0 : i32
    return %c0_i32, %c0_i32_0 : i32, i32
  }
  func.func @transform_2(%arg0: i32) -> (i32, i32) {
    %c0_i32 = arith.constant 0 : i32
    %c0_i32_0 = arith.constant 0 : i32
    %c0_i32_1 = arith.constant 0 : i32
    return %c0_i32, %c0_i32_0 : i32, i32
  }
  func.func @transform_3(%arg0: i32) -> (i32, i32) {
    %c0_i32 = arith.constant 0 : i32
    %c0_i32_0 = arith.constant 0 : i32
    return %arg0, %c0_i32 : i32, i32
  }
}

module attributes {stable_mosaic.version = 11 : i64} {
  func.func @_conv_mm_stats_kernel(%arg0: i32, %arg1: memref<128x1024xbf16, #tpu.memory_space<vmem>>, %arg2: memref<1024x128xbf16, #tpu.memory_space<vmem>>, %arg3: memref<128x128xf32, #tpu.memory_space<vmem>>, %arg4: memref<1x128xf32, #tpu.memory_space<vmem>>, %arg5: memref<1x128xf32, #tpu.memory_space<vmem>>) attributes {dimension_semantics = [#tpu.dimension_semantics<arbitrary>], iteration_bounds = array<i64: 1>, scalar_prefetch = 0 : i64, scratch_operands = 0 : i64, tpu.core_type = #tpu.core_type<tc>, window_params = [{transform_indices = @transform_0, window_bounds = array<i64: 128, 1024>}, {pipeline_mode = #tpu.pipeline_mode<synchronous>, transform_indices = @transform_1, window_bounds = array<i64: 1024, 128>}, {transform_indices = @transform_2, window_bounds = array<i64: 128, 128>}, {pipeline_mode = #tpu.pipeline_mode<synchronous>, transform_indices = @transform_3, window_bounds = array<i64: 1, 128>}, {pipeline_mode = #tpu.pipeline_mode<synchronous>, transform_indices = @transform_4, window_bounds = array<i64: 1, 128>}]} {
    %c0_i32 = arith.constant 0 : i32
    %0 = arith.cmpi eq, %arg0, %c0_i32 : i32
    %1 = arith.extui %0 : i1 to i32
    %c0_i32_0 = arith.constant 0 : i32
    %2 = arith.cmpi ne, %1, %c0_i32_0 : i32
    scf.if %2 {
      %cst_16 = arith.constant 0.000000e+00 : f32
      %18 = vector.broadcast %cst_16 : f32 to vector<1x128xf32>
      %c0_17 = arith.constant 0 : index
      %c0_18 = arith.constant 0 : index
      %19 = vector.load %arg4[%c0_17, %c0_18] : memref<1x128xf32, #tpu.memory_space<vmem>>, vector<1x128xf32>
      tpu.vector_store %arg4[%c0_17, %c0_18], %18 {strides = array<i32>} : memref<1x128xf32, #tpu.memory_space<vmem>>, vector<1x128xf32>,
      %cst_19 = arith.constant 0.000000e+00 : f32
      %20 = vector.broadcast %cst_19 : f32 to vector<1x128xf32>
      %c0_20 = arith.constant 0 : index
      %c0_21 = arith.constant 0 : index
      %21 = vector.load %arg5[%c0_20, %c0_21] : memref<1x128xf32, #tpu.memory_space<vmem>>, vector<1x128xf32>
      tpu.vector_store %arg5[%c0_20, %c0_21], %20 {strides = array<i32>} : memref<1x128xf32, #tpu.memory_space<vmem>>, vector<1x128xf32>,
    } else {
    }
    %c0 = arith.constant 0 : index
    %c0_1 = arith.constant 0 : index
    %3 = vector.load %arg1[%c0, %c0_1] : memref<128x1024xbf16, #tpu.memory_space<vmem>>, vector<128x1024xbf16>
    %c0_2 = arith.constant 0 : index
    %c0_3 = arith.constant 0 : index
    %4 = vector.load %arg2[%c0_2, %c0_3] : memref<1024x128xbf16, #tpu.memory_space<vmem>>, vector<1024x128xbf16>
    %cst = arith.constant dense<0.000000e+00> : vector<128x128xf32>
    %5 = tpu.matmul %3, %4, %cst {dimension_numbers = #tpu.dot_dimension_numbers<[1], [0], [0], [1], [0, 0, 1, 1], [], []>} : vector<128x1024xbf16>, vector<1024x128xbf16>, vector<128x128xf32> -> vector<128x128xf32>
    %c0_4 = arith.constant 0 : index
    %c0_5 = arith.constant 0 : index
    %6 = vector.load %arg3[%c0_4, %c0_5] : memref<128x128xf32, #tpu.memory_space<vmem>>, vector<128x128xf32>
    tpu.vector_store %arg3[%c0_4, %c0_5], %5 {strides = array<i32>} : memref<128x128xf32, #tpu.memory_space<vmem>>, vector<128x128xf32>,
    %c0_6 = arith.constant 0 : index
    %c0_7 = arith.constant 0 : index
    %7 = vector.load %arg4[%c0_6, %c0_7] : memref<1x128xf32, #tpu.memory_space<vmem>>, vector<1x128xf32>
    %cst_8 = arith.constant dense<0.000000e+00> : vector<128xf32>
    %8 = vector.multi_reduction <add>, %5, %cst_8 [0] : vector<128x128xf32> to vector<128xf32>
    %9 = vector.shape_cast %8 : vector<128xf32> to vector<1x128xf32>
    %10 = arith.addf %7, %9 : vector<1x128xf32>
    %c0_9 = arith.constant 0 : index
    %c0_10 = arith.constant 0 : index
    %11 = vector.load %arg4[%c0_9, %c0_10] : memref<1x128xf32, #tpu.memory_space<vmem>>, vector<1x128xf32>
    tpu.vector_store %arg4[%c0_9, %c0_10], %10 {strides = array<i32>} : memref<1x128xf32, #tpu.memory_space<vmem>>, vector<1x128xf32>,
    %c0_11 = arith.constant 0 : index
    %c0_12 = arith.constant 0 : index
    %12 = vector.load %arg5[%c0_11, %c0_12] : memref<1x128xf32, #tpu.memory_space<vmem>>, vector<1x128xf32>
    %13 = arith.mulf %5, %5 : vector<128x128xf32>
    %cst_13 = arith.constant dense<0.000000e+00> : vector<128xf32>
    %14 = vector.multi_reduction <add>, %13, %cst_13 [0] : vector<128x128xf32> to vector<128xf32>
    %15 = vector.shape_cast %14 : vector<128xf32> to vector<1x128xf32>
    %16 = arith.addf %12, %15 : vector<1x128xf32>
    %c0_14 = arith.constant 0 : index
    %c0_15 = arith.constant 0 : index
    %17 = vector.load %arg5[%c0_14, %c0_15] : memref<1x128xf32, #tpu.memory_space<vmem>>, vector<1x128xf32>
    tpu.vector_store %arg5[%c0_14, %c0_15], %16 {strides = array<i32>} : memref<1x128xf32, #tpu.memory_space<vmem>>, vector<1x128xf32>,
    return
  }
  func.func @transform_0(%arg0: i32) -> (i32, i32) {
    %c0_i32 = arith.constant 0 : i32
    %c0_i32_0 = arith.constant 0 : i32
    return %arg0, %c0_i32 : i32, i32
  }
  func.func @transform_1(%arg0: i32) -> (i32, i32) {
    %c0_i32 = arith.constant 0 : i32
    %c0_i32_0 = arith.constant 0 : i32
    %c0_i32_1 = arith.constant 0 : i32
    return %c0_i32, %c0_i32_0 : i32, i32
  }
  func.func @transform_2(%arg0: i32) -> (i32, i32) {
    %c0_i32 = arith.constant 0 : i32
    %c0_i32_0 = arith.constant 0 : i32
    return %arg0, %c0_i32 : i32, i32
  }
  func.func @transform_3(%arg0: i32) -> (i32, i32) {
    %c0_i32 = arith.constant 0 : i32
    %c0_i32_0 = arith.constant 0 : i32
    %c0_i32_1 = arith.constant 0 : i32
    return %c0_i32, %c0_i32_0 : i32, i32
  }
  func.func @transform_4(%arg0: i32) -> (i32, i32) {
    %c0_i32 = arith.constant 0 : i32
    %c0_i32_0 = arith.constant 0 : i32
    %c0_i32_1 = arith.constant 0 : i32
    return %c0_i32, %c0_i32_0 : i32, i32
  }
}

module attributes {stable_mosaic.version = 11 : i64} {
  func.func @_affine_act_kernel(%arg0: i32, %arg1: memref<128x128xf32, #tpu.memory_space<vmem>>, %arg2: memref<1x128xf32, #tpu.memory_space<vmem>>, %arg3: memref<1x128xf32, #tpu.memory_space<vmem>>, %arg4: memref<128x128xbf16, #tpu.memory_space<vmem>>) attributes {dimension_semantics = [#tpu.dimension_semantics<parallel>], iteration_bounds = array<i64: 1>, scalar_prefetch = 0 : i64, scratch_operands = 0 : i64, tpu.core_type = #tpu.core_type<tc>, window_params = [{transform_indices = @transform_0, window_bounds = array<i64: 128, 128>}, {pipeline_mode = #tpu.pipeline_mode<synchronous>, transform_indices = @transform_1, window_bounds = array<i64: 1, 128>}, {pipeline_mode = #tpu.pipeline_mode<synchronous>, transform_indices = @transform_2, window_bounds = array<i64: 1, 128>}, {transform_indices = @transform_3, window_bounds = array<i64: 128, 128>}]} {
    %c0 = arith.constant 0 : index
    %c0_0 = arith.constant 0 : index
    %0 = vector.load %arg1[%c0, %c0_0] : memref<128x128xf32, #tpu.memory_space<vmem>>, vector<128x128xf32>
    %c0_1 = arith.constant 0 : index
    %c0_2 = arith.constant 0 : index
    %1 = vector.load %arg2[%c0_1, %c0_2] : memref<1x128xf32, #tpu.memory_space<vmem>>, vector<1x128xf32>
    %2 = vector.broadcast %1 : vector<1x128xf32> to vector<128x128xf32>
    %3 = arith.mulf %0, %2 : vector<128x128xf32>
    %c0_3 = arith.constant 0 : index
    %c0_4 = arith.constant 0 : index
    %4 = vector.load %arg3[%c0_3, %c0_4] : memref<1x128xf32, #tpu.memory_space<vmem>>, vector<1x128xf32>
    %5 = vector.broadcast %4 : vector<1x128xf32> to vector<128x128xf32>
    %6 = arith.addf %3, %5 : vector<128x128xf32>
    %cst = arith.constant 0.000000e+00 : f32
    %7 = vector.broadcast %cst : f32 to vector<128x128xf32>
    %8 = arith.cmpf oge, %6, %7 : vector<128x128xf32>
    %cst_5 = arith.constant 2.000000e-01 : f32
    %9 = vector.broadcast %cst_5 : f32 to vector<128x128xf32>
    %10 = arith.mulf %9, %6 : vector<128x128xf32>
    %11 = arith.select %8, %6, %10 : vector<128x128xi1>, vector<128x128xf32>
    %12 = arith.truncf %11 : vector<128x128xf32> to vector<128x128xbf16>
    %c0_6 = arith.constant 0 : index
    %c0_7 = arith.constant 0 : index
    %13 = vector.load %arg4[%c0_6, %c0_7] : memref<128x128xbf16, #tpu.memory_space<vmem>>, vector<128x128xbf16>
    tpu.vector_store %arg4[%c0_6, %c0_7], %12 {strides = array<i32>} : memref<128x128xbf16, #tpu.memory_space<vmem>>, vector<128x128xbf16>,
    return
  }
  func.func @transform_0(%arg0: i32) -> (i32, i32) {
    %c0_i32 = arith.constant 0 : i32
    %c0_i32_0 = arith.constant 0 : i32
    return %arg0, %c0_i32 : i32, i32
  }
  func.func @transform_1(%arg0: i32) -> (i32, i32) {
    %c0_i32 = arith.constant 0 : i32
    %c0_i32_0 = arith.constant 0 : i32
    %c0_i32_1 = arith.constant 0 : i32
    return %c0_i32, %c0_i32_0 : i32, i32
  }
  func.func @transform_2(%arg0: i32) -> (i32, i32) {
    %c0_i32 = arith.constant 0 : i32
    %c0_i32_0 = arith.constant 0 : i32
    %c0_i32_1 = arith.constant 0 : i32
    return %c0_i32, %c0_i32_0 : i32, i32
  }
  func.func @transform_3(%arg0: i32) -> (i32, i32) {
    %c0_i32 = arith.constant 0 : i32
    %c0_i32_0 = arith.constant 0 : i32
    return %arg0, %c0_i32 : i32, i32
  }
}

module attributes {stable_mosaic.version = 11 : i64} {
  func.func @_conv_mm_stats_kernel(%arg0: i32, %arg1: memref<32x2048xbf16, #tpu.memory_space<vmem>>, %arg2: memref<2048x256xbf16, #tpu.memory_space<vmem>>, %arg3: memref<32x256xf32, #tpu.memory_space<vmem>>, %arg4: memref<1x256xf32, #tpu.memory_space<vmem>>, %arg5: memref<1x256xf32, #tpu.memory_space<vmem>>) attributes {dimension_semantics = [#tpu.dimension_semantics<arbitrary>], iteration_bounds = array<i64: 1>, scalar_prefetch = 0 : i64, scratch_operands = 0 : i64, tpu.core_type = #tpu.core_type<tc>, window_params = [{transform_indices = @transform_0, window_bounds = array<i64: 32, 2048>}, {pipeline_mode = #tpu.pipeline_mode<synchronous>, transform_indices = @transform_1, window_bounds = array<i64: 2048, 256>}, {transform_indices = @transform_2, window_bounds = array<i64: 32, 256>}, {pipeline_mode = #tpu.pipeline_mode<synchronous>, transform_indices = @transform_3, window_bounds = array<i64: 1, 256>}, {pipeline_mode = #tpu.pipeline_mode<synchronous>, transform_indices = @transform_4, window_bounds = array<i64: 1, 256>}]} {
    %c0_i32 = arith.constant 0 : i32
    %0 = arith.cmpi eq, %arg0, %c0_i32 : i32
    %1 = arith.extui %0 : i1 to i32
    %c0_i32_0 = arith.constant 0 : i32
    %2 = arith.cmpi ne, %1, %c0_i32_0 : i32
    scf.if %2 {
      %cst_16 = arith.constant 0.000000e+00 : f32
      %18 = vector.broadcast %cst_16 : f32 to vector<1x256xf32>
      %c0_17 = arith.constant 0 : index
      %c0_18 = arith.constant 0 : index
      %19 = vector.load %arg4[%c0_17, %c0_18] : memref<1x256xf32, #tpu.memory_space<vmem>>, vector<1x256xf32>
      tpu.vector_store %arg4[%c0_17, %c0_18], %18 {strides = array<i32>} : memref<1x256xf32, #tpu.memory_space<vmem>>, vector<1x256xf32>,
      %cst_19 = arith.constant 0.000000e+00 : f32
      %20 = vector.broadcast %cst_19 : f32 to vector<1x256xf32>
      %c0_20 = arith.constant 0 : index
      %c0_21 = arith.constant 0 : index
      %21 = vector.load %arg5[%c0_20, %c0_21] : memref<1x256xf32, #tpu.memory_space<vmem>>, vector<1x256xf32>
      tpu.vector_store %arg5[%c0_20, %c0_21], %20 {strides = array<i32>} : memref<1x256xf32, #tpu.memory_space<vmem>>, vector<1x256xf32>,
    } else {
    }
    %c0 = arith.constant 0 : index
    %c0_1 = arith.constant 0 : index
    %3 = vector.load %arg1[%c0, %c0_1] : memref<32x2048xbf16, #tpu.memory_space<vmem>>, vector<32x2048xbf16>
    %c0_2 = arith.constant 0 : index
    %c0_3 = arith.constant 0 : index
    %4 = vector.load %arg2[%c0_2, %c0_3] : memref<2048x256xbf16, #tpu.memory_space<vmem>>, vector<2048x256xbf16>
    %cst = arith.constant dense<0.000000e+00> : vector<32x256xf32>
    %5 = tpu.matmul %3, %4, %cst {dimension_numbers = #tpu.dot_dimension_numbers<[1], [0], [0], [1], [0, 0, 1, 1], [], []>} : vector<32x2048xbf16>, vector<2048x256xbf16>, vector<32x256xf32> -> vector<32x256xf32>
    %c0_4 = arith.constant 0 : index
    %c0_5 = arith.constant 0 : index
    %6 = vector.load %arg3[%c0_4, %c0_5] : memref<32x256xf32, #tpu.memory_space<vmem>>, vector<32x256xf32>
    tpu.vector_store %arg3[%c0_4, %c0_5], %5 {strides = array<i32>} : memref<32x256xf32, #tpu.memory_space<vmem>>, vector<32x256xf32>,
    %c0_6 = arith.constant 0 : index
    %c0_7 = arith.constant 0 : index
    %7 = vector.load %arg4[%c0_6, %c0_7] : memref<1x256xf32, #tpu.memory_space<vmem>>, vector<1x256xf32>
    %cst_8 = arith.constant dense<0.000000e+00> : vector<256xf32>
    %8 = vector.multi_reduction <add>, %5, %cst_8 [0] : vector<32x256xf32> to vector<256xf32>
    %9 = vector.shape_cast %8 : vector<256xf32> to vector<1x256xf32>
    %10 = arith.addf %7, %9 : vector<1x256xf32>
    %c0_9 = arith.constant 0 : index
    %c0_10 = arith.constant 0 : index
    %11 = vector.load %arg4[%c0_9, %c0_10] : memref<1x256xf32, #tpu.memory_space<vmem>>, vector<1x256xf32>
    tpu.vector_store %arg4[%c0_9, %c0_10], %10 {strides = array<i32>} : memref<1x256xf32, #tpu.memory_space<vmem>>, vector<1x256xf32>,
    %c0_11 = arith.constant 0 : index
    %c0_12 = arith.constant 0 : index
    %12 = vector.load %arg5[%c0_11, %c0_12] : memref<1x256xf32, #tpu.memory_space<vmem>>, vector<1x256xf32>
    %13 = arith.mulf %5, %5 : vector<32x256xf32>
    %cst_13 = arith.constant dense<0.000000e+00> : vector<256xf32>
    %14 = vector.multi_reduction <add>, %13, %cst_13 [0] : vector<32x256xf32> to vector<256xf32>
    %15 = vector.shape_cast %14 : vector<256xf32> to vector<1x256xf32>
    %16 = arith.addf %12, %15 : vector<1x256xf32>
    %c0_14 = arith.constant 0 : index
    %c0_15 = arith.constant 0 : index
    %17 = vector.load %arg5[%c0_14, %c0_15] : memref<1x256xf32, #tpu.memory_space<vmem>>, vector<1x256xf32>
    tpu.vector_store %arg5[%c0_14, %c0_15], %16 {strides = array<i32>} : memref<1x256xf32, #tpu.memory_space<vmem>>, vector<1x256xf32>,
    return
  }
  func.func @transform_0(%arg0: i32) -> (i32, i32) {
    %c0_i32 = arith.constant 0 : i32
    %c0_i32_0 = arith.constant 0 : i32
    return %arg0, %c0_i32 : i32, i32
  }
  func.func @transform_1(%arg0: i32) -> (i32, i32) {
    %c0_i32 = arith.constant 0 : i32
    %c0_i32_0 = arith.constant 0 : i32
    %c0_i32_1 = arith.constant 0 : i32
    return %c0_i32, %c0_i32_0 : i32, i32
  }
  func.func @transform_2(%arg0: i32) -> (i32, i32) {
    %c0_i32 = arith.constant 0 : i32
    %c0_i32_0 = arith.constant 0 : i32
    return %arg0, %c0_i32 : i32, i32
  }
  func.func @transform_3(%arg0: i32) -> (i32, i32) {
    %c0_i32 = arith.constant 0 : i32
    %c0_i32_0 = arith.constant 0 : i32
    %c0_i32_1 = arith.constant 0 : i32
    return %c0_i32, %c0_i32_0 : i32, i32
  }
  func.func @transform_4(%arg0: i32) -> (i32, i32) {
    %c0_i32 = arith.constant 0 : i32
    %c0_i32_0 = arith.constant 0 : i32
    %c0_i32_1 = arith.constant 0 : i32
    return %c0_i32, %c0_i32_0 : i32, i32
  }
}

module attributes {stable_mosaic.version = 11 : i64} {
  func.func @_affine_act_kernel(%arg0: i32, %arg1: memref<32x256xf32, #tpu.memory_space<vmem>>, %arg2: memref<1x256xf32, #tpu.memory_space<vmem>>, %arg3: memref<1x256xf32, #tpu.memory_space<vmem>>, %arg4: memref<32x256xbf16, #tpu.memory_space<vmem>>) attributes {dimension_semantics = [#tpu.dimension_semantics<parallel>], iteration_bounds = array<i64: 1>, scalar_prefetch = 0 : i64, scratch_operands = 0 : i64, tpu.core_type = #tpu.core_type<tc>, window_params = [{transform_indices = @transform_0, window_bounds = array<i64: 32, 256>}, {pipeline_mode = #tpu.pipeline_mode<synchronous>, transform_indices = @transform_1, window_bounds = array<i64: 1, 256>}, {pipeline_mode = #tpu.pipeline_mode<synchronous>, transform_indices = @transform_2, window_bounds = array<i64: 1, 256>}, {transform_indices = @transform_3, window_bounds = array<i64: 32, 256>}]} {
    %c0 = arith.constant 0 : index
    %c0_0 = arith.constant 0 : index
    %0 = vector.load %arg1[%c0, %c0_0] : memref<32x256xf32, #tpu.memory_space<vmem>>, vector<32x256xf32>
    %c0_1 = arith.constant 0 : index
    %c0_2 = arith.constant 0 : index
    %1 = vector.load %arg2[%c0_1, %c0_2] : memref<1x256xf32, #tpu.memory_space<vmem>>, vector<1x256xf32>
    %2 = vector.broadcast %1 : vector<1x256xf32> to vector<32x256xf32>
    %3 = arith.mulf %0, %2 : vector<32x256xf32>
    %c0_3 = arith.constant 0 : index
    %c0_4 = arith.constant 0 : index
    %4 = vector.load %arg3[%c0_3, %c0_4] : memref<1x256xf32, #tpu.memory_space<vmem>>, vector<1x256xf32>
    %5 = vector.broadcast %4 : vector<1x256xf32> to vector<32x256xf32>
    %6 = arith.addf %3, %5 : vector<32x256xf32>
    %cst = arith.constant 0.000000e+00 : f32
    %7 = vector.broadcast %cst : f32 to vector<32x256xf32>
    %8 = arith.cmpf oge, %6, %7 : vector<32x256xf32>
    %cst_5 = arith.constant 2.000000e-01 : f32
    %9 = vector.broadcast %cst_5 : f32 to vector<32x256xf32>
    %10 = arith.mulf %9, %6 : vector<32x256xf32>
    %11 = arith.select %8, %6, %10 : vector<32x256xi1>, vector<32x256xf32>
    %12 = arith.truncf %11 : vector<32x256xf32> to vector<32x256xbf16>
    %c0_6 = arith.constant 0 : index
    %c0_7 = arith.constant 0 : index
    %13 = vector.load %arg4[%c0_6, %c0_7] : memref<32x256xbf16, #tpu.memory_space<vmem>>, vector<32x256xbf16>
    tpu.vector_store %arg4[%c0_6, %c0_7], %12 {strides = array<i32>} : memref<32x256xbf16, #tpu.memory_space<vmem>>, vector<32x256xbf16>,
    return
  }
  func.func @transform_0(%arg0: i32) -> (i32, i32) {
    %c0_i32 = arith.constant 0 : i32
    %c0_i32_0 = arith.constant 0 : i32
    return %arg0, %c0_i32 : i32, i32
  }
  func.func @transform_1(%arg0: i32) -> (i32, i32) {
    %c0_i32 = arith.constant 0 : i32
    %c0_i32_0 = arith.constant 0 : i32
    %c0_i32_1 = arith.constant 0 : i32
    return %c0_i32, %c0_i32_0 : i32, i32
  }
  func.func @transform_2(%arg0: i32) -> (i32, i32) {
    %c0_i32 = arith.constant 0 : i32
    %c0_i32_0 = arith.constant 0 : i32
    %c0_i32_1 = arith.constant 0 : i32
    return %c0_i32, %c0_i32_0 : i32, i32
  }
  func.func @transform_3(%arg0: i32) -> (i32, i32) {
    %c0_i32 = arith.constant 0 : i32
    %c0_i32_0 = arith.constant 0 : i32
    return %arg0, %c0_i32 : i32, i32
  }
}

module attributes {stable_mosaic.version = 11 : i64} {
  func.func @_conv_mm_stats_kernel(%arg0: i32, %arg1: memref<24x4096xbf16, #tpu.memory_space<vmem>>, %arg2: memref<4096x512xbf16, #tpu.memory_space<vmem>>, %arg3: memref<24x512xf32, #tpu.memory_space<vmem>>, %arg4: memref<1x512xf32, #tpu.memory_space<vmem>>, %arg5: memref<1x512xf32, #tpu.memory_space<vmem>>) attributes {dimension_semantics = [#tpu.dimension_semantics<arbitrary>], iteration_bounds = array<i64: 1>, scalar_prefetch = 0 : i64, scratch_operands = 0 : i64, tpu.core_type = #tpu.core_type<tc>, window_params = [{transform_indices = @transform_0, window_bounds = array<i64: 24, 4096>}, {pipeline_mode = #tpu.pipeline_mode<synchronous>, transform_indices = @transform_1, window_bounds = array<i64: 4096, 512>}, {transform_indices = @transform_2, window_bounds = array<i64: 24, 512>}, {pipeline_mode = #tpu.pipeline_mode<synchronous>, transform_indices = @transform_3, window_bounds = array<i64: 1, 512>}, {pipeline_mode = #tpu.pipeline_mode<synchronous>, transform_indices = @transform_4, window_bounds = array<i64: 1, 512>}]} {
    %c0_i32 = arith.constant 0 : i32
    %0 = arith.cmpi eq, %arg0, %c0_i32 : i32
    %1 = arith.extui %0 : i1 to i32
    %c0_i32_0 = arith.constant 0 : i32
    %2 = arith.cmpi ne, %1, %c0_i32_0 : i32
    scf.if %2 {
      %cst_16 = arith.constant 0.000000e+00 : f32
      %18 = vector.broadcast %cst_16 : f32 to vector<1x512xf32>
      %c0_17 = arith.constant 0 : index
      %c0_18 = arith.constant 0 : index
      %19 = vector.load %arg4[%c0_17, %c0_18] : memref<1x512xf32, #tpu.memory_space<vmem>>, vector<1x512xf32>
      tpu.vector_store %arg4[%c0_17, %c0_18], %18 {strides = array<i32>} : memref<1x512xf32, #tpu.memory_space<vmem>>, vector<1x512xf32>,
      %cst_19 = arith.constant 0.000000e+00 : f32
      %20 = vector.broadcast %cst_19 : f32 to vector<1x512xf32>
      %c0_20 = arith.constant 0 : index
      %c0_21 = arith.constant 0 : index
      %21 = vector.load %arg5[%c0_20, %c0_21] : memref<1x512xf32, #tpu.memory_space<vmem>>, vector<1x512xf32>
      tpu.vector_store %arg5[%c0_20, %c0_21], %20 {strides = array<i32>} : memref<1x512xf32, #tpu.memory_space<vmem>>, vector<1x512xf32>,
    } else {
    }
    %c0 = arith.constant 0 : index
    %c0_1 = arith.constant 0 : index
    %3 = vector.load %arg1[%c0, %c0_1] : memref<24x4096xbf16, #tpu.memory_space<vmem>>, vector<24x4096xbf16>
    %c0_2 = arith.constant 0 : index
    %c0_3 = arith.constant 0 : index
    %4 = vector.load %arg2[%c0_2, %c0_3] : memref<4096x512xbf16, #tpu.memory_space<vmem>>, vector<4096x512xbf16>
    %cst = arith.constant dense<0.000000e+00> : vector<24x512xf32>
    %5 = tpu.matmul %3, %4, %cst {dimension_numbers = #tpu.dot_dimension_numbers<[1], [0], [0], [1], [0, 0, 1, 1], [], []>} : vector<24x4096xbf16>, vector<4096x512xbf16>, vector<24x512xf32> -> vector<24x512xf32>
    %c0_4 = arith.constant 0 : index
    %c0_5 = arith.constant 0 : index
    %6 = vector.load %arg3[%c0_4, %c0_5] : memref<24x512xf32, #tpu.memory_space<vmem>>, vector<24x512xf32>
    tpu.vector_store %arg3[%c0_4, %c0_5], %5 {strides = array<i32>} : memref<24x512xf32, #tpu.memory_space<vmem>>, vector<24x512xf32>,
    %c0_6 = arith.constant 0 : index
    %c0_7 = arith.constant 0 : index
    %7 = vector.load %arg4[%c0_6, %c0_7] : memref<1x512xf32, #tpu.memory_space<vmem>>, vector<1x512xf32>
    %cst_8 = arith.constant dense<0.000000e+00> : vector<512xf32>
    %8 = vector.multi_reduction <add>, %5, %cst_8 [0] : vector<24x512xf32> to vector<512xf32>
    %9 = vector.shape_cast %8 : vector<512xf32> to vector<1x512xf32>
    %10 = arith.addf %7, %9 : vector<1x512xf32>
    %c0_9 = arith.constant 0 : index
    %c0_10 = arith.constant 0 : index
    %11 = vector.load %arg4[%c0_9, %c0_10] : memref<1x512xf32, #tpu.memory_space<vmem>>, vector<1x512xf32>
    tpu.vector_store %arg4[%c0_9, %c0_10], %10 {strides = array<i32>} : memref<1x512xf32, #tpu.memory_space<vmem>>, vector<1x512xf32>,
    %c0_11 = arith.constant 0 : index
    %c0_12 = arith.constant 0 : index
    %12 = vector.load %arg5[%c0_11, %c0_12] : memref<1x512xf32, #tpu.memory_space<vmem>>, vector<1x512xf32>
    %13 = arith.mulf %5, %5 : vector<24x512xf32>
    %cst_13 = arith.constant dense<0.000000e+00> : vector<512xf32>
    %14 = vector.multi_reduction <add>, %13, %cst_13 [0] : vector<24x512xf32> to vector<512xf32>
    %15 = vector.shape_cast %14 : vector<512xf32> to vector<1x512xf32>
    %16 = arith.addf %12, %15 : vector<1x512xf32>
    %c0_14 = arith.constant 0 : index
    %c0_15 = arith.constant 0 : index
    %17 = vector.load %arg5[%c0_14, %c0_15] : memref<1x512xf32, #tpu.memory_space<vmem>>, vector<1x512xf32>
    tpu.vector_store %arg5[%c0_14, %c0_15], %16 {strides = array<i32>} : memref<1x512xf32, #tpu.memory_space<vmem>>, vector<1x512xf32>,
    return
  }
  func.func @transform_0(%arg0: i32) -> (i32, i32) {
    %c0_i32 = arith.constant 0 : i32
    %c0_i32_0 = arith.constant 0 : i32
    return %arg0, %c0_i32 : i32, i32
  }
  func.func @transform_1(%arg0: i32) -> (i32, i32) {
    %c0_i32 = arith.constant 0 : i32
    %c0_i32_0 = arith.constant 0 : i32
    %c0_i32_1 = arith.constant 0 : i32
    return %c0_i32, %c0_i32_0 : i32, i32
  }
  func.func @transform_2(%arg0: i32) -> (i32, i32) {
    %c0_i32 = arith.constant 0 : i32
    %c0_i32_0 = arith.constant 0 : i32
    return %arg0, %c0_i32 : i32, i32
  }
  func.func @transform_3(%arg0: i32) -> (i32, i32) {
    %c0_i32 = arith.constant 0 : i32
    %c0_i32_0 = arith.constant 0 : i32
    %c0_i32_1 = arith.constant 0 : i32
    return %c0_i32, %c0_i32_0 : i32, i32
  }
  func.func @transform_4(%arg0: i32) -> (i32, i32) {
    %c0_i32 = arith.constant 0 : i32
    %c0_i32_0 = arith.constant 0 : i32
    %c0_i32_1 = arith.constant 0 : i32
    return %c0_i32, %c0_i32_0 : i32, i32
  }
}

module attributes {stable_mosaic.version = 11 : i64} {
  func.func @_affine_act_kernel(%arg0: i32, %arg1: memref<24x512xf32, #tpu.memory_space<vmem>>, %arg2: memref<1x512xf32, #tpu.memory_space<vmem>>, %arg3: memref<1x512xf32, #tpu.memory_space<vmem>>, %arg4: memref<24x512xbf16, #tpu.memory_space<vmem>>) attributes {dimension_semantics = [#tpu.dimension_semantics<parallel>], iteration_bounds = array<i64: 1>, scalar_prefetch = 0 : i64, scratch_operands = 0 : i64, tpu.core_type = #tpu.core_type<tc>, window_params = [{transform_indices = @transform_0, window_bounds = array<i64: 24, 512>}, {pipeline_mode = #tpu.pipeline_mode<synchronous>, transform_indices = @transform_1, window_bounds = array<i64: 1, 512>}, {pipeline_mode = #tpu.pipeline_mode<synchronous>, transform_indices = @transform_2, window_bounds = array<i64: 1, 512>}, {transform_indices = @transform_3, window_bounds = array<i64: 24, 512>}]} {
    %c0 = arith.constant 0 : index
    %c0_0 = arith.constant 0 : index
    %0 = vector.load %arg1[%c0, %c0_0] : memref<24x512xf32, #tpu.memory_space<vmem>>, vector<24x512xf32>
    %c0_1 = arith.constant 0 : index
    %c0_2 = arith.constant 0 : index
    %1 = vector.load %arg2[%c0_1, %c0_2] : memref<1x512xf32, #tpu.memory_space<vmem>>, vector<1x512xf32>
    %2 = vector.broadcast %1 : vector<1x512xf32> to vector<24x512xf32>
    %3 = arith.mulf %0, %2 : vector<24x512xf32>
    %c0_3 = arith.constant 0 : index
    %c0_4 = arith.constant 0 : index
    %4 = vector.load %arg3[%c0_3, %c0_4] : memref<1x512xf32, #tpu.memory_space<vmem>>, vector<1x512xf32>
    %5 = vector.broadcast %4 : vector<1x512xf32> to vector<24x512xf32>
    %6 = arith.addf %3, %5 : vector<24x512xf32>
    %cst = arith.constant 0.000000e+00 : f32
    %7 = vector.broadcast %cst : f32 to vector<24x512xf32>
    %8 = arith.cmpf oge, %6, %7 : vector<24x512xf32>
    %cst_5 = arith.constant 2.000000e-01 : f32
    %9 = vector.broadcast %cst_5 : f32 to vector<24x512xf32>
    %10 = arith.mulf %9, %6 : vector<24x512xf32>
    %11 = arith.select %8, %6, %10 : vector<24x512xi1>, vector<24x512xf32>
    %12 = arith.truncf %11 : vector<24x512xf32> to vector<24x512xbf16>
    %c0_6 = arith.constant 0 : index
    %c0_7 = arith.constant 0 : index
    %13 = vector.load %arg4[%c0_6, %c0_7] : memref<24x512xbf16, #tpu.memory_space<vmem>>, vector<24x512xbf16>
    tpu.vector_store %arg4[%c0_6, %c0_7], %12 {strides = array<i32>} : memref<24x512xbf16, #tpu.memory_space<vmem>>, vector<24x512xbf16>,
    return
  }
  func.func @transform_0(%arg0: i32) -> (i32, i32) {
    %c0_i32 = arith.constant 0 : i32
    %c0_i32_0 = arith.constant 0 : i32
    return %arg0, %c0_i32 : i32, i32
  }
  func.func @transform_1(%arg0: i32) -> (i32, i32) {
    %c0_i32 = arith.constant 0 : i32
    %c0_i32_0 = arith.constant 0 : i32
    %c0_i32_1 = arith.constant 0 : i32
    return %c0_i32, %c0_i32_0 : i32, i32
  }
  func.func @transform_2(%arg0: i32) -> (i32, i32) {
    %c0_i32 = arith.constant 0 : i32
    %c0_i32_0 = arith.constant 0 : i32
    %c0_i32_1 = arith.constant 0 : i32
    return %c0_i32, %c0_i32_0 : i32, i32
  }
  func.func @transform_3(%arg0: i32) -> (i32, i32) {
    %c0_i32 = arith.constant 0 : i32
    %c0_i32_0 = arith.constant 0 : i32
    return %arg0, %c0_i32 : i32, i32
  }
}

module attributes {stable_mosaic.version = 11 : i64} {
  func.func @_conv_mm_kernel(%arg0: i32, %arg1: memref<8x8192xbf16, #tpu.memory_space<vmem>>, %arg2: memref<8192x1xbf16, #tpu.memory_space<vmem>>, %arg3: memref<1x1xf32, #tpu.memory_space<vmem>>, %arg4: memref<8x1xf32, #tpu.memory_space<vmem>>) attributes {dimension_semantics = [#tpu.dimension_semantics<parallel>], iteration_bounds = array<i64: 1>, scalar_prefetch = 0 : i64, scratch_operands = 0 : i64, tpu.core_type = #tpu.core_type<tc>, window_params = [{transform_indices = @transform_0, window_bounds = array<i64: 8, 8192>}, {pipeline_mode = #tpu.pipeline_mode<synchronous>, transform_indices = @transform_1, window_bounds = array<i64: 8192, 1>}, {pipeline_mode = #tpu.pipeline_mode<synchronous>, transform_indices = @transform_2, window_bounds = array<i64: 1, 1>}, {transform_indices = @transform_3, window_bounds = array<i64: 8, 1>}]} {
    %c0 = arith.constant 0 : index
    %c0_0 = arith.constant 0 : index
    %0 = vector.load %arg1[%c0, %c0_0] : memref<8x8192xbf16, #tpu.memory_space<vmem>>, vector<8x8192xbf16>
    %c0_1 = arith.constant 0 : index
    %c0_2 = arith.constant 0 : index
    %1 = vector.load %arg2[%c0_1, %c0_2] : memref<8192x1xbf16, #tpu.memory_space<vmem>>, vector<8192x1xbf16>
    %cst = arith.constant dense<0.000000e+00> : vector<8x1xf32>
    %2 = tpu.matmul %0, %1, %cst {dimension_numbers = #tpu.dot_dimension_numbers<[1], [0], [0], [1], [0, 0, 1, 1], [], []>} : vector<8x8192xbf16>, vector<8192x1xbf16>, vector<8x1xf32> -> vector<8x1xf32>
    %c0_3 = arith.constant 0 : index
    %c0_4 = arith.constant 0 : index
    %3 = vector.load %arg3[%c0_3, %c0_4] : memref<1x1xf32, #tpu.memory_space<vmem>>, vector<1x1xf32>
    %4 = vector.broadcast %3 : vector<1x1xf32> to vector<8x1xf32>
    %5 = arith.addf %2, %4 : vector<8x1xf32>
    %c0_5 = arith.constant 0 : index
    %c0_6 = arith.constant 0 : index
    %6 = vector.load %arg4[%c0_5, %c0_6] : memref<8x1xf32, #tpu.memory_space<vmem>>, vector<8x1xf32>
    tpu.vector_store %arg4[%c0_5, %c0_6], %5 {strides = array<i32>} : memref<8x1xf32, #tpu.memory_space<vmem>>, vector<8x1xf32>,
    return
  }
  func.func @transform_0(%arg0: i32) -> (i32, i32) {
    %c0_i32 = arith.constant 0 : i32
    %c0_i32_0 = arith.constant 0 : i32
    return %arg0, %c0_i32 : i32, i32
  }
  func.func @transform_1(%arg0: i32) -> (i32, i32) {
    %c0_i32 = arith.constant 0 : i32
    %c0_i32_0 = arith.constant 0 : i32
    %c0_i32_1 = arith.constant 0 : i32
    return %c0_i32, %c0_i32_0 : i32, i32
  }
  func.func @transform_2(%arg0: i32) -> (i32, i32) {
    %c0_i32 = arith.constant 0 : i32
    %c0_i32_0 = arith.constant 0 : i32
    %c0_i32_1 = arith.constant 0 : i32
    return %c0_i32, %c0_i32_0 : i32, i32
  }
  func.func @transform_3(%arg0: i32) -> (i32, i32) {
    %c0_i32 = arith.constant 0 : i32
    %c0_i32_0 = arith.constant 0 : i32
    return %arg0, %c0_i32 : i32, i32
  }
}

</mosaic_0001>

<bundles_post_ra>
// kernel: nlayer_discriminator_forward.8
= control target key start
LH: loop header
LB: loop body
LE: loop exit
PB: predicated region body
PF: predicated region fallthrough
CT: control target
= control target key end

     0   :  { %vm270_vm0 = vcmask 392192   ;;  %vm1104_vm1 = vcmask 519168   ;;  %s2076_s1 = inlined_call_operand.vmem [shape: bf16[48,64], index: 1, kind: input, shape index: {}]   ;;  %s2077_s0 = inlined_call_operand.vmem [shape: bf16[512,48], index: 0, kind: input, shape index: {}]   ;;  %s2078_s2 = inlined_call_operand.vmem [shape: f32[1,64], index: 2, kind: input, shape index: {}]   ;;  %s2079_s3 = inlined_call_operand.vmem [shape: bf16[512,64], index: 3, kind: output, shape index: {}]  }
   0x1   :  { %v1480_v0 = vld [vmem:[%s2076_s1] sm:$0xff]   ;;  %v1481_v1 = vld [vmem:[%s2076_s1 + $0x8] sm:$0xff]   ;;  %v1482_v2 = vld [vmem:[%s2076_s1 + $0x10] sm:$0xff]  }
   0x2   :  { %1404 = vmatprep.subr.bf16.mxu0 %v1480_v0  ;;  %1474 = vmatprep.subr.bf16.mxu1 %v1480_v0  ;;  %v1483_v3 = vld [vmem:[%s2077_s0] sm:$0xff]   ;;  %v1485_v5 = vld [vmem:[%s2077_s0 + $0x8] sm:$0xff]   ;;  %v1487_v7 = vld [vmem:[%s2077_s0 + $0x10] sm:$0xff]  }
   0x3   :  { %1405 = vmatpush3.bf16.msra.mxu0 %v1480_v0  ;;  %1477 = vmatpush3.bf16.msra.mxu1 %v1480_v0  ;;  %v1484_v4 = vld [vmem:[%s2077_s0 + $0x80] sm:$0xff]   ;;  %v1486_v6 = vld [vmem:[%s2077_s0 + $0x88] sm:$0xff]   ;;  %v1488_v8 = vld [vmem:[%s2077_s0 + $0x90] sm:$0xff]  }
   0x4   :  { %1406 = vmatprep.subr.bf16.mxu0 %v1481_v1  ;;  %1475 = vmatprep.subr.bf16.mxu1 %v1481_v1  ;;  %v1489_v9 = vld [vmem:[%s2077_s0 + $0x18] sm:$0xff]   ;;  %v1491_v11 = vld [vmem:[%s2077_s0 + $0x20] sm:$0xff]   ;;  %v1493_v13 = vld [vmem:[%s2077_s0 + $0x28] sm:$0xff]  }
   0x5   :  { %1410 = vmatprep.mubr.msk.bf16.mxu0 %vm270_vm0, %v1483_v3  ;;  %1442 = vmatprep.mubr.msk.bf16.mxu1 %vm270_vm0, %v1484_v4  ;;  %v1490_v10 = vld [vmem:[%s2077_s0 + $0x98] sm:$0xff]   ;;  %v1492_v12 = vld [vmem:[%s2077_s0 + $0xa0] sm:$0xff]   ;;  %v1494_v14 = vld [vmem:[%s2077_s0 + $0xa8] sm:$0xff]  }
   0x6   :  { %v1495_v15 = vld [vmem:[%s2077_s0 + $0x30] sm:$0xff]   ;;  %v1497_v17 = vld [vmem:[%s2077_s0 + $0x38] sm:$0xff]   ;;  %v1499_v19 = vld [vmem:[%s2077_s0 + $0x40] sm:$0xff]  }
   0x7   :  { %1407 = vmatpush3.bf16.msra.mxu0 %v1481_v1  ;;  %1478 = vmatpush3.bf16.msra.mxu1 %v1481_v1  ;;  %v1496_v16 = vld [vmem:[%s2077_s0 + $0xb0] sm:$0xff]   ;;  %v1498_v18 = vld [vmem:[%s2077_s0 + $0xb8] sm:$0xff]   ;;  %v1500_v20 = vld [vmem:[%s2077_s0 + $0xc0] sm:$0xff]  }
   0x8   :  { %1408 = vmatprep.subr.bf16.mxu0 %v1482_v2  ;;  %1476 = vmatprep.subr.bf16.mxu1 %v1482_v2  ;;  %v1501_v21 = vld [vmem:[%s2077_s0 + $0x48] sm:$0xff]   ;;  %v1503_v23 = vld [vmem:[%s2077_s0 + $0x50] sm:$0xff]   ;;  %v1505_v25 = vld [vmem:[%s2077_s0 + $0x58] sm:$0xff]  }
   0x9   :  { %v1502_v22 = vld [vmem:[%s2077_s0 + $0xc8] sm:$0xff]   ;;  %v1504_v24 = vld [vmem:[%s2077_s0 + $0xd0] sm:$0xff]   ;;  %v1506_v26 = vld [vmem:[%s2077_s0 + $0xd8] sm:$0xff]  }
   0xa   :  { %v1507_v27 = vld [vmem:[%s2077_s0 + $0x60] sm:$0xff]   ;;  %v1509_v29 = vld [vmem:[%s2077_s0 + $0x68] sm:$0xff]   ;;  %v1511_v31 = vld [vmem:[%s2077_s0 + $0x70] sm:$0xff]  }
   0xb   :  { %1409 = vmatpush3.bf16.msra.mxu0 %v1482_v2  ;;  %1479 = vmatpush3.bf16.msra.mxu1 %v1482_v2  ;;  %v1508_v28 = vld [vmem:[%s2077_s0 + $0xe0] sm:$0xff]   ;;  %v1510_v30 = vld [vmem:[%s2077_s0 + $0xe8] sm:$0xff]   ;;  %v1512_v32 = vld [vmem:[%s2077_s0 + $0xf0] sm:$0xff]  }
   0xc   :  { %v1513_v33 = vld [vmem:[%s2077_s0 + $0x78] sm:$0xff]   ;;  %v1675_v35 = vld [vmem:[%s2078_s2] ss:$0 sm:$0xff] }
   0xd   :  { %v1514_v34 = vld [vmem:[%s2077_s0 + $0xf8] sm:$0xff]  }
   0xe   :  { %1411 = vmatmul.mubr.msk.bf16.vlgmr.msra.gmra.mrb[0].mxu0 %vm270_vm0, %v1485_v5  ;;  %1443 = vmatmul.mubr.msk.bf16.vlgmr.msra.gmra.mrb[0].mxu1 %vm270_vm0, %v1486_v6 }
   0xf   :  { %1414 = vmatprep.mubr.msk.bf16.mxu0 %vm270_vm0, %v1487_v7  ;;  %1446 = vmatprep.mubr.msk.bf16.mxu1 %vm270_vm0, %v1488_v8 }
  0x16   :  { %1415 = vmatmul.mubr.msk.bf16.gmra.mrb[4].mxu0 %vm270_vm0, %v1489_v9  ;;  %1447 = vmatmul.mubr.msk.bf16.gmra.mrb[4].mxu1 %vm270_vm0, %v1490_v10 }
  0x17   :  { %1418 = vmatprep.mubr.msk.bf16.mxu0 %vm270_vm0, %v1491_v11  ;;  %1450 = vmatprep.mubr.msk.bf16.mxu1 %vm270_vm0, %v1492_v12 }
  0x1e   :  { %1419 = vmatmul.mubr.msk.bf16.gmra.mrb[8].mxu0 %vm270_vm0, %v1493_v13  ;;  %1451 = vmatmul.mubr.msk.bf16.gmra.mrb[8].mxu1 %vm270_vm0, %v1494_v14 }
  0x1f   :  { %1422 = vmatprep.mubr.msk.bf16.mxu0 %vm270_vm0, %v1495_v15  ;;  %1454 = vmatprep.mubr.msk.bf16.mxu1 %vm270_vm0, %v1496_v16 }
  0x26   :  { %1423 = vmatmul.mubr.msk.bf16.gmra.mrb[12].mxu0 %vm270_vm0, %v1497_v17  ;;  %1455 = vmatmul.mubr.msk.bf16.gmra.mrb[12].mxu1 %vm270_vm0, %v1498_v18 }
  0x27   :  { %1426 = vmatprep.mubr.msk.bf16.mxu0 %vm270_vm0, %v1499_v19  ;;  %1458 = vmatprep.mubr.msk.bf16.mxu1 %vm270_vm0, %v1500_v20 }
  0x2e   :  { %1427 = vmatmul.mubr.msk.bf16.gmra.mrb[16].mxu0 %vm270_vm0, %v1501_v21  ;;  %1459 = vmatmul.mubr.msk.bf16.gmra.mrb[16].mxu1 %vm270_vm0, %v1502_v22 }
  0x2f   :  { %1430 = vmatprep.mubr.msk.bf16.mxu0 %vm270_vm0, %v1503_v23  ;;  %1462 = vmatprep.mubr.msk.bf16.mxu1 %vm270_vm0, %v1504_v24 }
  0x36   :  { %1431 = vmatmul.mubr.msk.bf16.gmra.mrb[20].mxu0 %vm270_vm0, %v1505_v25  ;;  %1463 = vmatmul.mubr.msk.bf16.gmra.mrb[20].mxu1 %vm270_vm0, %v1506_v26 }
  0x37   :  { %1434 = vmatprep.mubr.msk.bf16.mxu0 %vm270_vm0, %v1507_v27  ;;  %1466 = vmatprep.mubr.msk.bf16.mxu1 %vm270_vm0, %v1508_v28 }
  0x3e   :  { %1435 = vmatmul.mubr.msk.bf16.gmra.mrb[24].mxu0 %vm270_vm0, %v1509_v29  ;;  %1467 = vmatmul.mubr.msk.bf16.gmra.mrb[24].mxu1 %vm270_vm0, %v1510_v30 }
  0x3f   :  { %1438 = vmatprep.mubr.msk.bf16.mxu0 %vm270_vm0, %v1511_v31  ;;  %1470 = vmatprep.mubr.msk.bf16.mxu1 %vm270_vm0, %v1512_v32 }
  0x46   :  { %1439 = vmatmul.mubr.msk.bf16.gmra.mrb[28].mxu0 %vm270_vm0, %v1513_v33  ;;  %1471 = vmatmul.mubr.msk.bf16.gmra.mrb[28].mxu1 %vm270_vm0, %v1514_v34 }
  0xe1   :  { %v1412_v36 = vpop.f32.mrb[0].mxu0  ;;  %v1444_v37 = vpop.f32.mrb[0].mxu1 }
  0xe2   :  { %v410_v38 = vadd.f32 %v1412_v36, %v1675_v35  ;;  %v538_v39 = vadd.f32 %v1444_v37, %v1675_v35  ;;  %v401_v40 = vpop.f32.mrb[1].mxu0  ;;  %v529_v41 = vpop.f32.mrb[1].mxu1 }
  0xe3   :  { %v402_v42 = vadd.f32 %v1675_v35, %v401_v40  ;;  %v530_v43 = vadd.f32 %v1675_v35, %v529_v41  ;;  %v1413_v44 = vpop.f32.mrb[2].mxu0  ;;  %v1445_v45 = vpop.f32.mrb[2].mxu1 }
  0xe4   :  { %vm658_vm2 = vcmp.ge.f32.partialorder %v410_v38, 0.0  ;;  %v722_v46 = vmul.f32 0.2, %v410_v38  ;;  %vm690_vm3 = vcmp.ge.f32.partialorder %v538_v39, 0.0  ;;  %v754_v47 = vmul.f32 0.2, %v538_v39 }
  0xe5   :  { %vm656_vm4 = vcmp.ge.f32.partialorder %v402_v42, 0.0  ;;  %v720_v48 = vmul.f32 0.2, %v402_v42  ;;  %vm688_vm5 = vcmp.ge.f32.partialorder %v530_v43, 0.0  ;;  %v752_v49 = vmul.f32 0.2, %v530_v43 }
  0xe6   :  { %v786_v50 = vsel %vm658_vm2, %v410_v38, %v722_v46  ;;  %v818_v51 = vsel %vm690_vm3, %v538_v39, %v754_v47  ;;  %v413_v52 = vadd.f32 %v1413_v44, %v1675_v35  ;;  %v541_v53 = vadd.f32 %v1445_v45, %v1675_v35  ;;  %v404_v54 = vpop.f32.mrb[3].mxu0  ;;  %v532_v55 = vpop.f32.mrb[3].mxu1 }
  0xe7   :  { %v1307_v56 = vpack.c.bf16 %v786_v50, %v786_v50  ;;  %v1339_v57 = vpack.c.bf16 %v818_v51, %v818_v51  ;;  %v784_v58 = vsel %vm656_vm4, %v402_v42, %v720_v48  ;;  %v816_v59 = vsel %vm688_vm5, %v530_v43, %v752_v49 }
  0xe8   :  { %v1305_v60 = vpack.c.bf16 %v784_v58, %v784_v58  ;;  %v1337_v61 = vpack.c.bf16 %v816_v59, %v816_v59  ;;  %vm659_vm6 = vcmp.ge.f32.partialorder %v413_v52, 0.0  ;;  %v723_v62 = vmul.f32 0.2, %v413_v52 }
  0xe9   :  { %1107 = vst.msk [vmem:[%s2079_s3 + $0x8] sm:$0xf] %vm1104_vm1, %v1307_v56  ;;  %1139 = vst.msk [vmem:[%s2079_s3 + $0x88] sm:$0xf] %vm1104_vm1, %v1339_v57  ;;  %vm691_vm7 = vcmp.ge.f32.partialorder %v541_v53, 0.0  ;;  %v405_v0 = vadd.f32 %v1675_v35, %v404_v54  ;;  %v533_v1 = vadd.f32 %v1675_v35, %v532_v55  ;;  %v1416_v2 = vpop.f32.mrb[4].mxu0 }
  0xea   :  { %v755_v63 = vmul.f32 0.2, %v541_v53  ;;  %v1448_v3 = vpop.f32.mrb[4].mxu1  ;;  %1105 = vst.msk [vmem:[%s2079_s3] sm:$0xf] %vm1104_vm1, %v1305_v60  ;;  %v787_v4 = vsel %vm659_vm6, %v413_v52, %v723_v62  ;;  %v426_v5 = vadd.f32 %v1416_v2, %v1675_v35  ;;  %v417_v7 = vpop.f32.mrb[5].mxu0 }
  0xeb   :  { %1137 = vst.msk [vmem:[%s2079_s3 + $0x80] sm:$0xf] %vm1104_vm1, %v1337_v61  ;;  %v554_v6 = vadd.f32 %v1448_v3, %v1675_v35  ;;  %v545_v8 = vpop.f32.mrb[5].mxu1  ;;  %v1308_v9 = vpack.c.bf16 %v787_v4, %v787_v4  ;;  %vm657_vm8 = vcmp.ge.f32.partialorder %v405_v0, 0.0  ;;  %v721_v11 = vmul.f32 0.2, %v405_v0 }
  0xec   :  { %v819_v10 = vsel %vm691_vm7, %v541_v53, %v755_v63  ;;  %v1417_v12 = vpop.f32.mrb[6].mxu0  ;;  %v1449_v13 = vpop.f32.mrb[6].mxu1  ;;  %vm689_vm9 = vcmp.ge.f32.partialorder %v533_v1, 0.0  ;;  %v753_v15 = vmul.f32 0.2, %v533_v1  ;;  %vm662_vm10 = vcmp.ge.f32.partialorder %v426_v5, 0.0 }
  0xed   :  { %v1340_v14 = vpack.c.bf16 %v819_v10, %v819_v10  ;;  %v420_v16 = vpop.f32.mrb[7].mxu0  ;;  %v548_v17 = vpop.f32.mrb[7].mxu1  ;;  %1108 = vst.msk [vmem:[%s2079_s3 + $0xc] sm:$0xf] %vm1104_vm1, %v1308_v9  ;;  %v785_v18 = vsel %vm657_vm8, %v405_v0, %v721_v11  ;;  %v726_v19 = vmul.f32 0.2, %v426_v5  ;;  %v418_v23 = vadd.f32 %v1675_v35, %v417_v7 }
  0xee   :  { %vm694_vm11 = vcmp.ge.f32.partialorder %v554_v6, 0.0  ;;  %v758_v20 = vmul.f32 0.2, %v554_v6  ;;  %v1306_v21 = vpack.c.bf16 %v785_v18, %v785_v18  ;;  %v817_v22 = vsel %vm689_vm9, %v533_v1, %v753_v15 }
  0xef   :  { %1140 = vst.msk [vmem:[%s2079_s3 + $0x8c] sm:$0xf] %vm1104_vm1, %v1340_v14  ;;  %v546_v24 = vadd.f32 %v1675_v35, %v545_v8  ;;  %v1338_v25 = vpack.c.bf16 %v817_v22, %v817_v22  ;;  %v790_v26 = vsel %vm662_vm10, %v426_v5, %v726_v19  ;;  %v429_v28 = vadd.f32 %v1417_v12, %v1675_v35 }
  0xf0   :  { %v822_v27 = vsel %vm694_vm11, %v554_v6, %v758_v20  ;;  %1106 = vst.msk [vmem:[%s2079_s3 + $0x4] sm:$0xf] %vm1104_vm1, %v1306_v21  ;;  %v1311_v29 = vpack.c.bf16 %v790_v26, %v790_v26  ;;  %vm660_vm12 = vcmp.ge.f32.partialorder %v418_v23, 0.0  ;;  %v724_v31 = vmul.f32 0.2, %v418_v23 }
  0xf1   :  { %v1343_v30 = vpack.c.bf16 %v822_v27, %v822_v27  ;;  %1138 = vst.msk [vmem:[%s2079_s3 + $0x84] sm:$0xf] %vm1104_vm1, %v1338_v25  ;;  %vm692_vm13 = vcmp.ge.f32.partialorder %v546_v24, 0.0  ;;  %v756_v32 = vmul.f32 0.2, %v546_v24  ;;  %vm663_vm14 = vcmp.ge.f32.partialorder %v429_v28, 0.0 }
  0xf2   :  { %v727_v33 = vmul.f32 0.2, %v429_v28  ;;  %1111 = vst.msk [vmem:[%s2079_s3 + $0x18] sm:$0xf] %vm1104_vm1, %v1311_v29  ;;  %v788_v34 = vsel %vm660_vm12, %v418_v23, %v724_v31  ;;  %v557_v36 = vadd.f32 %v1449_v13, %v1675_v35  ;;  %v421_v37 = vadd.f32 %v1675_v35, %v420_v16  ;;  %v1420_v39 = vpop.f32.mrb[8].mxu0  ;;  %v1452_v40 = vpop.f32.mrb[8].mxu1 }
  0xf3   :  { %1143 = vst.msk [vmem:[%s2079_s3 + $0x98] sm:$0xf] %vm1104_vm1, %v1343_v30  ;;  %v549_v38 = vadd.f32 %v1675_v35, %v548_v17  ;;  %v1309_v41 = vpack.c.bf16 %v788_v34, %v788_v34  ;;  %v820_v42 = vsel %vm692_vm13, %v546_v24, %v756_v32  ;;  %v442_v44 = vadd.f32 %v1420_v39, %v1675_v35  ;;  %v433_v45 = vpop.f32.mrb[9].mxu0  ;;  %v561_v46 = vpop.f32.mrb[9].mxu1 }
  0xf4   :  { %v791_v43 = vsel %vm663_vm14, %v429_v28, %v727_v33  ;;  %v1341_v47 = vpack.c.bf16 %v820_v42, %v820_v42  ;;  %vm695_vm15 = vcmp.ge.f32.partialorder %v557_v36, 0.0  ;;  %v759_v49 = vmul.f32 0.2, %v557_v36  ;;  %v1421_v50 = vpop.f32.mrb[10].mxu0  ;;  %v1453_v51 = vpop.f32.mrb[10].mxu1 }
  0xf5   :  { %v1312_v48 = vpack.c.bf16 %v791_v43, %v791_v43  ;;  %1109 = vst.msk [vmem:[%s2079_s3 + $0x10] sm:$0xf] %vm1104_vm1, %v1309_v41  ;;  %vm661_vm0 = vcmp.ge.f32.partialorder %v421_v37, 0.0  ;;  %v725_v52 = vmul.f32 0.2, %v421_v37  ;;  %vm693_vm2 = vcmp.ge.f32.partialorder %v549_v38, 0.0 }
  0xf6   :  { %v757_v53 = vmul.f32 0.2, %v549_v38  ;;  %1141 = vst.msk [vmem:[%s2079_s3 + $0x90] sm:$0xf] %vm1104_vm1, %v1341_v47  ;;  %v823_v54 = vsel %vm695_vm15, %v557_v36, %v759_v49  ;;  %vm666_vm3 = vcmp.ge.f32.partialorder %v442_v44, 0.0  ;;  %v570_v56 = vadd.f32 %v1452_v40, %v1675_v35  ;;  %v436_v57 = vpop.f32.mrb[11].mxu0 }
  0xf7   :  { %1112 = vst.msk [vmem:[%s2079_s3 + $0x1c] sm:$0xf] %vm1104_vm1, %v1312_v48  ;;  %v730_v55 = vmul.f32 0.2, %v442_v44  ;;  %v564_v58 = vpop.f32.mrb[11].mxu1  ;;  %v1344_v59 = vpack.c.bf16 %v823_v54, %v823_v54  ;;  %v789_v60 = vsel %vm661_vm0, %v421_v37, %v725_v52  ;;  %v434_v62 = vadd.f32 %v1675_v35, %v433_v45 }
  0xf8   :  { %v821_v61 = vsel %vm693_vm2, %v549_v38, %v757_v53  ;;  %v1310_v63 = vpack.c.bf16 %v789_v60, %v789_v60  ;;  %vm698_vm4 = vcmp.ge.f32.partialorder %v570_v56, 0.0  ;;  %v762_v3 = vmul.f32 0.2, %v570_v56 }
  0xf9   :  { %v1342_v0 = vpack.c.bf16 %v821_v61, %v821_v61  ;;  %v794_v1 = vsel %vm666_vm3, %v442_v44, %v730_v55  ;;  %1144 = vst.msk [vmem:[%s2079_s3 + $0x9c] sm:$0xf] %vm1104_vm1, %v1344_v59  ;;  %vm664_vm5 = vcmp.ge.f32.partialorder %v434_v62, 0.0  ;;  %v728_v4 = vmul.f32 0.2, %v434_v62  ;;  %v1424_v5 = vpop.f32.mrb[12].mxu0 }
  0xfa   :  { %v1315_v2 = vpack.c.bf16 %v794_v1, %v794_v1  ;;  %1110 = vst.msk [vmem:[%s2079_s3 + $0x14] sm:$0xf] %vm1104_vm1, %v1310_v63  ;;  %v562_v6 = vadd.f32 %v1675_v35, %v561_v46  ;;  %v445_v7 = vadd.f32 %v1421_v50, %v1675_v35  ;;  %v573_v8 = vadd.f32 %v1453_v51, %v1675_v35  ;;  %v1456_v10 = vpop.f32.mrb[12].mxu1  ;;  %v449_v11 = vpop.f32.mrb[13].mxu0 }
  0xfb   :  { %1142 = vst.msk [vmem:[%s2079_s3 + $0x94] sm:$0xf] %vm1104_vm1, %v1342_v0  ;;  %v437_v9 = vadd.f32 %v1675_v35, %v436_v57  ;;  %v826_v12 = vsel %vm698_vm4, %v570_v56, %v762_v3  ;;  %v792_v13 = vsel %vm664_vm5, %v434_v62, %v728_v4  ;;  %v565_v14 = vadd.f32 %v1675_v35, %v564_v58  ;;  %v577_v16 = vpop.f32.mrb[13].mxu1  ;;  %v1425_v17 = vpop.f32.mrb[14].mxu0 }
  0xfc   :  { %1115 = vst.msk [vmem:[%s2079_s3 + $0x28] sm:$0xf] %vm1104_vm1, %v1315_v2  ;;  %v458_v15 = vadd.f32 %v1424_v5, %v1675_v35  ;;  %v1347_v18 = vpack.c.bf16 %v826_v12, %v826_v12  ;;  %v1313_v19 = vpack.c.bf16 %v792_v13, %v792_v13  ;;  %vm696_vm6 = vcmp.ge.f32.partialorder %v562_v6, 0.0  ;;  %v1457_v21 = vpop.f32.mrb[14].mxu1  ;;  %v452_v22 = vpop.f32.mrb[15].mxu0 }
  0xfd   :  { %v760_v20 = vmul.f32 0.2, %v562_v6  ;;  %vm667_vm7 = vcmp.ge.f32.partialorder %v445_v7, 0.0  ;;  %v731_v23 = vmul.f32 0.2, %v445_v7  ;;  %vm699_vm8 = vcmp.ge.f32.partialorder %v573_v8, 0.0 }
  0xfe   :  { %v763_v24 = vmul.f32 0.2, %v573_v8  ;;  %1147 = vst.msk [vmem:[%s2079_s3 + $0xa8] sm:$0xf] %vm1104_vm1, %v1347_v18  ;;  %1113 = vst.msk [vmem:[%s2079_s3 + $0x20] sm:$0xf] %vm1104_vm1, %v1313_v19  ;;  %v586_v39 = vadd.f32 %v1456_v10, %v1675_v35  ;;  %v450_v43 = vadd.f32 %v1675_v35, %v449_v11  ;;  %v578_v44 = vadd.f32 %v1675_v35, %v577_v16 }
  0xff   :  { %v824_v25 = vsel %vm696_vm6, %v562_v6, %v760_v20  ;;  %vm665_vm9 = vcmp.ge.f32.partialorder %v437_v9, 0.0  ;;  %v729_v26 = vmul.f32 0.2, %v437_v9  ;;  %vm697_vm10 = vcmp.ge.f32.partialorder %v565_v14, 0.0  ;;  %v580_v27 = vpop.f32.mrb[15].mxu1 }
 0x100   :  { %v1345_v28 = vpack.c.bf16 %v824_v25, %v824_v25  ;;  %v795_v29 = vsel %vm667_vm7, %v445_v7, %v731_v23  ;;  %v827_v30 = vsel %vm699_vm8, %v573_v8, %v763_v24  ;;  %v761_v31 = vmul.f32 0.2, %v565_v14 }
 0x101   :  { %v1316_v32 = vpack.c.bf16 %v795_v29, %v795_v29  ;;  %v1348_v33 = vpack.c.bf16 %v827_v30, %v827_v30  ;;  %v793_v34 = vsel %vm665_vm9, %v437_v9, %v729_v26  ;;  %vm670_vm11 = vcmp.ge.f32.partialorder %v458_v15, 0.0  ;;  %v1428_v40 = vpop.f32.mrb[16].mxu0  ;;  %v1460_v41 = vpop.f32.mrb[16].mxu1 }
 0x102   :  { %1145 = vst.msk [vmem:[%s2079_s3 + $0xa0] sm:$0xf] %vm1104_vm1, %v1345_v28  ;;  %v1314_v36 = vpack.c.bf16 %v793_v34, %v793_v34  ;;  %v825_v37 = vsel %vm697_vm10, %v565_v14, %v761_v31  ;;  %v734_v38 = vmul.f32 0.2, %v458_v15  ;;  %v461_v45 = vadd.f32 %v1425_v17, %v1675_v35  ;;  %v465_v46 = vpop.f32.mrb[17].mxu0  ;;  %v593_v47 = vpop.f32.mrb[17].mxu1 }
 0x103   :  { %1116 = vst.msk [vmem:[%s2079_s3 + $0x2c] sm:$0xf] %vm1104_vm1, %v1316_v32  ;;  %1148 = vst.msk [vmem:[%s2079_s3 + $0xac] sm:$0xf] %vm1104_vm1, %v1348_v33  ;;  %v1346_v42 = vpack.c.bf16 %v825_v37, %v825_v37  ;;  %vm702_vm12 = vcmp.ge.f32.partialorder %v586_v39, 0.0  ;;  %v589_v50 = vadd.f32 %v1457_v21, %v1675_v35  ;;  %v1801_v51 = vpop.f32.mrb[18].mxu0  ;;  %v453_v2 = vadd.f32 %v1675_v35, %v452_v22 }
 0x104   :  { %1114 = vst.msk [vmem:[%s2079_s3 + $0x24] sm:$0xf] %vm1104_vm1, %v1314_v36  ;;  %v798_v48 = vsel %vm670_vm11, %v458_v15, %v734_v38  ;;  %v766_v49 = vmul.f32 0.2, %v586_v39  ;;  %v1803_v52 = vpop.f32.mrb[18].mxu1  ;;  %vm668_vm13 = vcmp.ge.f32.partialorder %v450_v43, 0.0  ;;  %v581_v6 = vadd.f32 %v1675_v35, %v580_v27 }
 0x105   :  { %1146 = vst.msk [vmem:[%s2079_s3 + $0xa4] sm:$0xf] %vm1104_vm1, %v1346_v42  ;;  %v1319_v53 = vpack.c.bf16 %v798_v48, %v798_v48  ;;  %v732_v54 = vmul.f32 0.2, %v450_v43  ;;  %vm700_vm14 = vcmp.ge.f32.partialorder %v578_v44, 0.0  ;;  %v1809_v55 = vpop.f32.mrb[19].mxu0  ;;  %v474_v9 = vadd.f32 %v1428_v40, %v1675_v35 }
 0x106   :  { %v1811_v56 = vpop.f32.mrb[19].mxu1  ;;  %v830_v57 = vsel %vm702_vm12, %v586_v39, %v766_v49  ;;  %v764_v58 = vmul.f32 0.2, %v578_v44  ;;  %vm671_vm15 = vcmp.ge.f32.partialorder %v461_v45, 0.0  ;;  %v735_v59 = vmul.f32 0.2, %v461_v45 }
 0x107   :  { %1119 = vst.msk [vmem:[%s2079_s3 + $0x38] sm:$0xf] %vm1104_vm1, %v1319_v53  ;;  %v1351_v60 = vpack.c.bf16 %v830_v57, %v830_v57  ;;  %v796_v61 = vsel %vm668_vm13, %v450_v43, %v732_v54  ;;  %vm703_vm0 = vcmp.ge.f32.partialorder %v589_v50, 0.0  ;;  %v767_v62 = vmul.f32 0.2, %v589_v50 }
 0x108   :  { %v1317_v63 = vpack.c.bf16 %v796_v61, %v796_v61  ;;  %v828_v0 = vsel %vm700_vm14, %v578_v44, %v764_v58  ;;  %v799_v1 = vsel %vm671_vm15, %v461_v45, %v735_v59  ;;  %vm669_vm2 = vcmp.ge.f32.partialorder %v453_v2, 0.0 }
 0x109   :  { %1151 = vst.msk [vmem:[%s2079_s3 + $0xb8] sm:$0xf] %vm1104_vm1, %v1351_v60  ;;  %v1349_v3 = vpack.c.bf16 %v828_v0, %v828_v0  ;;  %v1320_v4 = vpack.c.bf16 %v799_v1, %v799_v1  ;;  %v831_v5 = vsel %vm703_vm0, %v589_v50, %v767_v62  ;;  %v733_v8 = vmul.f32 0.2, %v453_v2  ;;  %v1432_v10 = vpop.f32.mrb[20].mxu0  ;;  %v1464_v11 = vpop.f32.mrb[20].mxu1 }
 0x10a   :  { %1117 = vst.msk [vmem:[%s2079_s3 + $0x30] sm:$0xf] %vm1104_vm1, %v1317_v63  ;;  %v1352_v7 = vpack.c.bf16 %v831_v5, %v831_v5  ;;  %vm701_vm3 = vcmp.ge.f32.partialorder %v581_v6, 0.0  ;;  %v765_v12 = vmul.f32 0.2, %v581_v6  ;;  %v602_v13 = vadd.f32 %v1460_v41, %v1675_v35  ;;  %v481_v15 = vpop.f32.mrb[21].mxu0 }
 0x10b   :  { %1149 = vst.msk [vmem:[%s2079_s3 + $0xb0] sm:$0xf] %vm1104_vm1, %v1349_v3  ;;  %1120 = vst.msk [vmem:[%s2079_s3 + $0x3c] sm:$0xf] %vm1104_vm1, %v1320_v4  ;;  %v466_v14 = vadd.f32 %v1675_v35, %v465_v46  ;;  %v1838_v16 = vpop.f32.mrb[21].mxu1  ;;  %v797_v17 = vsel %vm669_vm2, %v453_v2, %v733_v8  ;;  %vm674_vm4 = vcmp.ge.f32.partialorder %v474_v9, 0.0  ;;  %v594_v19 = vadd.f32 %v1675_v35, %v593_v47 }
 0x10c   :  { %1152 = vst.msk [vmem:[%s2079_s3 + $0xbc] sm:$0xf] %vm1104_vm1, %v1352_v7  ;;  %v738_v18 = vmul.f32 0.2, %v474_v9  ;;  %v1845_v20 = vpop.f32.mrb[22].mxu0  ;;  %v1847_v21 = vpop.f32.mrb[22].mxu1  ;;  %v1318_v22 = vpack.c.bf16 %v797_v17, %v797_v17  ;;  %v829_v23 = vsel %vm701_vm3, %v581_v6, %v765_v12  ;;  %v477_v36 = vadd.f32 %v1801_v51, %v1675_v35 }
 0x10d   :  { %vm706_vm5 = vcmp.ge.f32.partialorder %v602_v13, 0.0  ;;  %v770_v24 = vmul.f32 0.2, %v602_v13  ;;  %v1849_v25 = vpop.f32.mrb[23].mxu0  ;;  %v1851_v26 = vpop.f32.mrb[23].mxu1  ;;  %v1350_v27 = vpack.c.bf16 %v829_v23, %v829_v23  ;;  %vm672_vm6 = vcmp.ge.f32.partialorder %v466_v14, 0.0 }
 0x10e   :  { %v802_v28 = vsel %vm674_vm4, %v474_v9, %v738_v18  ;;  %v736_v29 = vmul.f32 0.2, %v466_v14  ;;  %1118 = vst.msk [vmem:[%s2079_s3 + $0x34] sm:$0xf] %vm1104_vm1, %v1318_v22  ;;  %vm704_vm7 = vcmp.ge.f32.partialorder %v594_v19, 0.0  ;;  %v605_v37 = vadd.f32 %v1803_v52, %v1675_v35 }
 0x10f   :  { %v1323_v30 = vpack.c.bf16 %v802_v28, %v802_v28  ;;  %v834_v31 = vsel %vm706_vm5, %v602_v13, %v770_v24  ;;  %v768_v32 = vmul.f32 0.2, %v594_v19  ;;  %1150 = vst.msk [vmem:[%s2079_s3 + $0xb4] sm:$0xf] %vm1104_vm1, %v1350_v27  ;;  %v469_v40 = vadd.f32 %v1675_v35, %v1809_v55 }
 0x110   :  { %v1355_v33 = vpack.c.bf16 %v834_v31, %v834_v31  ;;  %v800_v34 = vsel %vm672_vm6, %v466_v14, %v736_v29  ;;  %v597_v41 = vadd.f32 %v1675_v35, %v1811_v56  ;;  %vm675_vm8 = vcmp.ge.f32.partialorder %v477_v36, 0.0 }
 0x111   :  { %1123 = vst.msk [vmem:[%s2079_s3 + $0x48] sm:$0xf] %vm1104_vm1, %v1323_v30  ;;  %v1321_v38 = vpack.c.bf16 %v800_v34, %v800_v34  ;;  %v832_v39 = vsel %vm704_vm7, %v594_v19, %v768_v32  ;;  %v739_v43 = vmul.f32 0.2, %v477_v36  ;;  %vm707_vm9 = vcmp.ge.f32.partialorder %v605_v37, 0.0  ;;  %v1877_v44 = vpop.f32.mrb[24].mxu0 }
 0x112   :  { %1155 = vst.msk [vmem:[%s2079_s3 + $0xc8] sm:$0xf] %vm1104_vm1, %v1355_v33  ;;  %v1353_v42 = vpack.c.bf16 %v832_v39, %v832_v39  ;;  %v1879_v45 = vpop.f32.mrb[24].mxu1  ;;  %v771_v46 = vmul.f32 0.2, %v605_v37  ;;  %vm673_vm10 = vcmp.ge.f32.partialorder %v469_v40, 0.0  ;;  %v490_v50 = vadd.f32 %v1432_v10, %v1675_v35 }
 0x113   :  { %1121 = vst.msk [vmem:[%s2079_s3 + $0x40] sm:$0xf] %vm1104_vm1, %v1321_v38  ;;  %v737_v47 = vmul.f32 0.2, %v469_v40  ;;  %vm705_vm11 = vcmp.ge.f32.partialorder %v597_v41, 0.0  ;;  %v803_v48 = vsel %vm675_vm8, %v477_v36, %v739_v43  ;;  %v618_v51 = vadd.f32 %v1464_v11, %v1675_v35  ;;  %v1891_v52 = vpop.f32.mrb[25].mxu0 }
 0x114   :  { %1153 = vst.msk [vmem:[%s2079_s3 + $0xc0] sm:$0xf] %vm1104_vm1, %v1353_v42  ;;  %v769_v49 = vmul.f32 0.2, %v597_v41  ;;  %v1893_v53 = vpop.f32.mrb[25].mxu1  ;;  %v1324_v54 = vpack.c.bf16 %v803_v48, %v803_v48  ;;  %v835_v55 = vsel %vm707_vm9, %v605_v37, %v771_v46  ;;  %v482_v57 = vadd.f32 %v1675_v35, %v481_v15  ;;  %v1897_v58 = vpop.f32.mrb[26].mxu0 }
 0x115   :  { %v801_v56 = vsel %vm673_vm10, %v469_v40, %v737_v47  ;;  %v1899_v59 = vpop.f32.mrb[26].mxu1  ;;  %v1356_v60 = vpack.c.bf16 %v835_v55, %v835_v55  ;;  %vm678_vm12 = vcmp.ge.f32.partialorder %v490_v50, 0.0  ;;  %v1902_v63 = vpop.f32.mrb[27].mxu0  ;;  %v742_v2 = vmul.f32 0.2, %v490_v50 }
 0x116   :  { %v1322_v61 = vpack.c.bf16 %v801_v56, %v801_v56  ;;  %v833_v62 = vsel %vm705_vm11, %v597_v41, %v769_v49  ;;  %v1904_v0 = vpop.f32.mrb[27].mxu1  ;;  %1124 = vst.msk [vmem:[%s2079_s3 + $0x4c] sm:$0xf] %vm1104_vm1, %v1324_v54  ;;  %vm710_vm13 = vcmp.ge.f32.partialorder %v618_v51, 0.0  ;;  %v774_v3 = vmul.f32 0.2, %v618_v51 }
 0x117   :  { %v1354_v1 = vpack.c.bf16 %v833_v62, %v833_v62  ;;  %1156 = vst.msk [vmem:[%s2079_s3 + $0xcc] sm:$0xf] %vm1104_vm1, %v1356_v60  ;;  %vm676_vm14 = vcmp.ge.f32.partialorder %v482_v57, 0.0  ;;  %v740_v4 = vmul.f32 0.2, %v482_v57  ;;  %v610_v5 = vadd.f32 %v1675_v35, %v1838_v16 }
 0x118   :  { %1122 = vst.msk [vmem:[%s2079_s3 + $0x44] sm:$0xf] %vm1104_vm1, %v1322_v61  ;;  %v493_v6 = vadd.f32 %v1845_v20, %v1675_v35  ;;  %v806_v7 = vsel %vm678_vm12, %v490_v50, %v742_v2  ;;  %v838_v8 = vsel %vm710_vm13, %v618_v51, %v774_v3  ;;  %v621_v9 = vadd.f32 %v1847_v21, %v1675_v35 }
 0x119   :  { %1154 = vst.msk [vmem:[%s2079_s3 + $0xc4] sm:$0xf] %vm1104_vm1, %v1354_v1  ;;  %v485_v10 = vadd.f32 %v1675_v35, %v1849_v25  ;;  %v1327_v11 = vpack.c.bf16 %v806_v7, %v806_v7  ;;  %v1359_v12 = vpack.c.bf16 %v838_v8, %v838_v8  ;;  %v804_v13 = vsel %vm676_vm14, %v482_v57, %v740_v4  ;;  %v1930_v14 = vpop.f32.mrb[28].mxu0  ;;  %v1932_v15 = vpop.f32.mrb[28].mxu1 }
 0x11a   :  { %vm708_vm15 = vcmp.ge.f32.partialorder %v610_v5, 0.0  ;;  %v1325_v16 = vpack.c.bf16 %v804_v13, %v804_v13  ;;  %v772_v17 = vmul.f32 0.2, %v610_v5  ;;  %vm679_vm0 = vcmp.ge.f32.partialorder %v493_v6, 0.0  ;;  %v1934_v19 = vpop.f32.mrb[29].mxu0  ;;  %v1952_v27 = vpop.f32.mrb[29].mxu1 }
 0x11b   :  { %v743_v18 = vmul.f32 0.2, %v493_v6  ;;  %1127 = vst.msk [vmem:[%s2079_s3 + $0x58] sm:$0xf] %vm1104_vm1, %v1327_v11  ;;  %1159 = vst.msk [vmem:[%s2079_s3 + $0xd8] sm:$0xf] %vm1104_vm1, %v1359_v12  ;;  %v613_v24 = vadd.f32 %v1675_v35, %v1851_v26  ;;  %v506_v25 = vadd.f32 %v1877_v44, %v1675_v35  ;;  %v634_v40 = vadd.f32 %v1879_v45, %v1675_v35 }
 0x11c   :  { %vm711_vm2 = vcmp.ge.f32.partialorder %v621_v9, 0.0  ;;  %v775_v20 = vmul.f32 0.2, %v621_v9  ;;  %vm677_vm3 = vcmp.ge.f32.partialorder %v485_v10, 0.0  ;;  %v741_v21 = vmul.f32 0.2, %v485_v10 }
 0x11d   :  { %1125 = vst.msk [vmem:[%s2079_s3 + $0x50] sm:$0xf] %vm1104_vm1, %v1325_v16  ;;  %v836_v22 = vsel %vm708_vm15, %v610_v5, %v772_v17  ;;  %v807_v23 = vsel %vm679_vm0, %v493_v6, %v743_v18  ;;  %v1954_v28 = vpop.f32.mrb[30].mxu0  ;;  %v1956_v33 = vpop.f32.mrb[30].mxu1  ;;  %vm709_vm4 = vcmp.ge.f32.partialorder %v613_v24, 0.0  ;;  %vm682_vm5 = vcmp.ge.f32.partialorder %v506_v25, 0.0 }
 0x11e   :  { %v1357_v29 = vpack.c.bf16 %v836_v22, %v836_v22  ;;  %v1328_v30 = vpack.c.bf16 %v807_v23, %v807_v23  ;;  %v839_v31 = vsel %vm711_vm2, %v621_v9, %v775_v20  ;;  %v805_v32 = vsel %vm677_vm3, %v485_v10, %v741_v21  ;;  %v1958_v34 = vpop.f32.mrb[31].mxu0  ;;  %v1960_v26 = vpop.f32.mrb[31].mxu1 }
 0x11f   :  { %v1360_v36 = vpack.c.bf16 %v839_v31, %v839_v31  ;;  %v1326_v37 = vpack.c.bf16 %v805_v32, %v805_v32  ;;  %v773_v38 = vmul.f32 0.2, %v613_v24  ;;  %v746_v39 = vmul.f32 0.2, %v506_v25 }
 0x120   :  { %1157 = vst.msk [vmem:[%s2079_s3 + $0xd0] sm:$0xf] %vm1104_vm1, %v1357_v29  ;;  %1128 = vst.msk [vmem:[%s2079_s3 + $0x5c] sm:$0xf] %vm1104_vm1, %v1328_v30  ;;  %v498_v41 = vadd.f32 %v1675_v35, %v1891_v52  ;;  %v626_v43 = vadd.f32 %v1675_v35, %v1893_v53  ;;  %v509_v44 = vadd.f32 %v1897_v58, %v1675_v35  ;;  %vm714_vm6 = vcmp.ge.f32.partialorder %v634_v40, 0.0 }
 0x121   :  { %1160 = vst.msk [vmem:[%s2079_s3 + $0xdc] sm:$0xf] %vm1104_vm1, %v1360_v36  ;;  %1126 = vst.msk [vmem:[%s2079_s3 + $0x54] sm:$0xf] %vm1104_vm1, %v1326_v37  ;;  %v837_v42 = vsel %vm709_vm4, %v613_v24, %v773_v38  ;;  %v637_v45 = vadd.f32 %v1899_v59, %v1675_v35  ;;  %v810_v47 = vsel %vm682_vm5, %v506_v25, %v746_v39  ;;  %v778_v48 = vmul.f32 0.2, %v634_v40 }
 0x122   :  { %v1358_v46 = vpack.c.bf16 %v837_v42, %v837_v42  ;;  %v1331_v49 = vpack.c.bf16 %v810_v47, %v810_v47  ;;  %vm680_vm7 = vcmp.ge.f32.partialorder %v498_v41, 0.0  ;;  %v744_v50 = vmul.f32 0.2, %v498_v41 }
 0x123   :  { %vm712_vm8 = vcmp.ge.f32.partialorder %v626_v43, 0.0  ;;  %v842_v51 = vsel %vm714_vm6, %v634_v40, %v778_v48  ;;  %v776_v52 = vmul.f32 0.2, %v626_v43  ;;  %vm683_vm9 = vcmp.ge.f32.partialorder %v509_v44, 0.0 }
 0x124   :  { %1158 = vst.msk [vmem:[%s2079_s3 + $0xd4] sm:$0xf] %vm1104_vm1, %v1358_v46  ;;  %v747_v53 = vmul.f32 0.2, %v509_v44  ;;  %1131 = vst.msk [vmem:[%s2079_s3 + $0x68] sm:$0xf] %vm1104_vm1, %v1331_v49  ;;  %v1363_v54 = vpack.c.bf16 %v842_v51, %v842_v51  ;;  %v808_v55 = vsel %vm680_vm7, %v498_v41, %v744_v50  ;;  %v501_v60 = vadd.f32 %v1675_v35, %v1902_v63 }
 0x125   :  { %vm715_vm10 = vcmp.ge.f32.partialorder %v637_v45, 0.0  ;;  %v779_v56 = vmul.f32 0.2, %v637_v45  ;;  %v1329_v57 = vpack.c.bf16 %v808_v55, %v808_v55  ;;  %v840_v58 = vsel %vm712_vm8, %v626_v43, %v776_v52 }
 0x126   :  { %v811_v59 = vsel %vm683_vm9, %v509_v44, %v747_v53  ;;  %1163 = vst.msk [vmem:[%s2079_s3 + $0xe8] sm:$0xf] %vm1104_vm1, %v1363_v54  ;;  %v1361_v61 = vpack.c.bf16 %v840_v58, %v840_v58  ;;  %v629_v2 = vadd.f32 %v1675_v35, %v1904_v0  ;;  %vm681_vm11 = vcmp.ge.f32.partialorder %v501_v60, 0.0 }
 0x127   :  { %v1332_v62 = vpack.c.bf16 %v811_v59, %v811_v59  ;;  %v843_v1 = vsel %vm715_vm10, %v637_v45, %v779_v56  ;;  %1129 = vst.msk [vmem:[%s2079_s3 + $0x60] sm:$0xf] %vm1104_vm1, %v1329_v57  ;;  %v745_v4 = vmul.f32 0.2, %v501_v60  ;;  %v522_v63 = vadd.f32 %v1930_v14, %v1675_v35 }
 0x128   :  { %v1364_v3 = vpack.c.bf16 %v843_v1, %v843_v1  ;;  %1161 = vst.msk [vmem:[%s2079_s3 + $0xe0] sm:$0xf] %vm1104_vm1, %v1361_v61  ;;  %vm713_vm12 = vcmp.ge.f32.partialorder %v629_v2, 0.0  ;;  %v777_v0 = vmul.f32 0.2, %v629_v2  ;;  %v650_v5 = vadd.f32 %v1932_v15, %v1675_v35 }
 0x129   :  { %1132 = vst.msk [vmem:[%s2079_s3 + $0x6c] sm:$0xf] %vm1104_vm1, %v1332_v62  ;;  %v514_v6 = vadd.f32 %v1675_v35, %v1934_v19  ;;  %v809_v7 = vsel %vm681_vm11, %v501_v60, %v745_v4  ;;  %vm686_vm13 = vcmp.ge.f32.partialorder %v522_v63, 0.0  ;;  %v750_v8 = vmul.f32 0.2, %v522_v63 }
 0x12a   :  { %1164 = vst.msk [vmem:[%s2079_s3 + $0xec] sm:$0xf] %vm1104_vm1, %v1364_v3  ;;  %v642_v9 = vadd.f32 %v1675_v35, %v1952_v27  ;;  %v1330_v10 = vpack.c.bf16 %v809_v7, %v809_v7  ;;  %v841_v11 = vsel %vm713_vm12, %v629_v2, %v777_v0  ;;  %vm718_vm14 = vcmp.ge.f32.partialorder %v650_v5, 0.0 }
 0x12b   :  { %v782_v12 = vmul.f32 0.2, %v650_v5  ;;  %v1362_v13 = vpack.c.bf16 %v841_v11, %v841_v11  ;;  %v814_v14 = vsel %vm686_vm13, %v522_v63, %v750_v8  ;;  %vm684_vm15 = vcmp.ge.f32.partialorder %v514_v6, 0.0 }
 0x12c   :  { %v748_v15 = vmul.f32 0.2, %v514_v6  ;;  %1130 = vst.msk [vmem:[%s2079_s3 + $0x64] sm:$0xf] %vm1104_vm1, %v1330_v10  ;;  %v1335_v16 = vpack.c.bf16 %v814_v14, %v814_v14  ;;  %vm716_vm0 = vcmp.ge.f32.partialorder %v642_v9, 0.0  ;;  %v525_v21 = vadd.f32 %v1954_v28, %v1675_v35 }
 0x12d   :  { %v846_v17 = vsel %vm718_vm14, %v650_v5, %v782_v12  ;;  %v780_v18 = vmul.f32 0.2, %v642_v9  ;;  %1162 = vst.msk [vmem:[%s2079_s3 + $0xe4] sm:$0xf] %vm1104_vm1, %v1362_v13  ;;  %v653_v22 = vadd.f32 %v1956_v33, %v1675_v35  ;;  %v517_v25 = vadd.f32 %v1675_v35, %v1958_v34 }
 0x12e   :  { %v1367_v19 = vpack.c.bf16 %v846_v17, %v846_v17  ;;  %v812_v20 = vsel %vm684_vm15, %v514_v6, %v748_v15  ;;  %1135 = vst.msk [vmem:[%s2079_s3 + $0x78] sm:$0xf] %vm1104_vm1, %v1335_v16  ;;  %v645_v27 = vadd.f32 %v1675_v35, %v1960_v26  ;;  %vm687_vm2 = vcmp.ge.f32.partialorder %v525_v21, 0.0 }
 0x12f   :  { %v1333_v23 = vpack.c.bf16 %v812_v20, %v812_v20  ;;  %v844_v24 = vsel %vm716_vm0, %v642_v9, %v780_v18  ;;  %v751_v29 = vmul.f32 0.2, %v525_v21  ;;  %vm719_vm3 = vcmp.ge.f32.partialorder %v653_v22, 0.0 }
 0x130   :  { %1167 = vst.msk [vmem:[%s2079_s3 + $0xf8] sm:$0xf] %vm1104_vm1, %v1367_v19  ;;  %v1365_v28 = vpack.c.bf16 %v844_v24, %v844_v24  ;;  %v783_v30 = vmul.f32 0.2, %v653_v22  ;;  %vm685_vm4 = vcmp.ge.f32.partialorder %v517_v25, 0.0  ;;  %vm717_vm5 = vcmp.ge.f32.partialorder %v645_v27, 0.0 }
 0x131   :  { %1133 = vst.msk [vmem:[%s2079_s3 + $0x70] sm:$0xf] %vm1104_vm1, %v1333_v23  ;;  %v749_v31 = vmul.f32 0.2, %v517_v25  ;;  %v815_v35 = vsel %vm687_vm2, %v525_v21, %v751_v29  ;;  %v781_v32 = vmul.f32 0.2, %v645_v27 }
 0x132   :  { %1165 = vst.msk [vmem:[%s2079_s3 + $0xf0] sm:$0xf] %vm1104_vm1, %v1365_v28  ;;  %v1336_v33 = vpack.c.bf16 %v815_v35, %v815_v35  ;;  %v847_v34 = vsel %vm719_vm3, %v653_v22, %v783_v30 }
 0x133   :  { %v813_v36 = vsel %vm685_vm4, %v517_v25, %v749_v31  ;;  %v1368_v37 = vpack.c.bf16 %v847_v34, %v847_v34  ;;  %v845_v26 = vsel %vm717_vm5, %v645_v27, %v781_v32 }
 0x134   :  { %v1334_v38 = vpack.c.bf16 %v813_v36, %v813_v36  ;;  %1136 = vst.msk [vmem:[%s2079_s3 + $0x7c] sm:$0xf] %vm1104_vm1, %v1336_v33  ;;  %v1366_v39 = vpack.c.bf16 %v845_v26, %v845_v26 }
 0x135   :  { %1168 = vst.msk [vmem:[%s2079_s3 + $0xfc] sm:$0xf] %vm1104_vm1, %v1368_v37 }
 0x136   :  { %1134 = vst.msk [vmem:[%s2079_s3 + $0x74] sm:$0xf] %vm1104_vm1, %v1334_v38  ;;  %1166 = vst.msk [vmem:[%s2079_s3 + $0xf4] sm:$0xf] %vm1104_vm1, %v1366_v39 }

// kernel: nlayer_discriminator_forward.10
= control target key start
LH: loop header
LB: loop body
LE: loop exit
PB: predicated region body
PF: predicated region fallthrough
CT: control target
= control target key end

     0   :  { %s423_s0 = inlined_call_operand.vmem [shape: f32[128,128], index: 0, kind: input, shape index: {}]   ;;  %s424_s1 = inlined_call_operand.vmem [shape: f32[1,128], index: 1, kind: input, shape index: {}]   ;;  %s425_s2 = inlined_call_operand.vmem [shape: f32[1,128], index: 2, kind: input, shape index: {}]   ;;  %s426_s3 = inlined_call_operand.vmem [shape: bf16[128,128], index: 3, kind: output, shape index: {}]  }
   0x1   :  { %v14_v0 = vld [vmem:[%s423_s0] sm:$0xff]  ;;  %v15_v1 = vld [vmem:[%s423_s0 + $0x8] sm:$0xff]  ;;  %v16_v6 = vld [vmem:[%s423_s0 + $0x10] sm:$0xff] }
   0x2   :  { %v318_v2 = vld [vmem:[%s424_s1] ss:$0 sm:$0xff]  ;;  %v17_v7 = vld [vmem:[%s423_s0 + $0x18] sm:$0xff]  ;;  %v19_v11 = vld [vmem:[%s423_s0 + $0x28] sm:$0xff] }
   0x3   :  { %v37_v3 = vmul.f32 %v318_v2, %v14_v0  ;;  %v38_v4 = vmul.f32 %v318_v2, %v15_v1  ;;  %v325_v5 = vld [vmem:[%s425_s2] ss:$0 sm:$0xff]  ;;  %v39_v8 = vmul.f32 %v318_v2, %v16_v6  ;;  %v40_v9 = vmul.f32 %v318_v2, %v17_v7  ;;  %v20_v12 = vld [vmem:[%s423_s0 + $0x30] sm:$0xff]  ;;  %v21_v17 = vld [vmem:[%s423_s0 + $0x38] sm:$0xff] }
   0x4   :  { %v18_v10 = vld [vmem:[%s423_s0 + $0x20] sm:$0xff]  ;;  %v42_v16 = vmul.f32 %v318_v2, %v19_v11  ;;  %v43_v20 = vmul.f32 %v318_v2, %v20_v12  ;;  %v44_v21 = vmul.f32 %v318_v2, %v21_v17  ;;  %v23_v35 = vld [vmem:[%s423_s0 + $0x48] sm:$0xff]  ;;  %v24_v36 = vld [vmem:[%s423_s0 + $0x50] sm:$0xff] }
   0x5   :  { %v60_v13 = vadd.f32 %v325_v5, %v37_v3  ;;  %v61_v14 = vadd.f32 %v325_v5, %v38_v4  ;;  %v41_v15 = vmul.f32 %v318_v2, %v18_v10  ;;  %v62_v18 = vadd.f32 %v325_v5, %v39_v8  ;;  %v22_v34 = vld [vmem:[%s423_s0 + $0x40] sm:$0xff]  ;;  %v25_v42 = vld [vmem:[%s423_s0 + $0x58] sm:$0xff]  ;;  %v27_v48 = vld [vmem:[%s423_s0 + $0x68] sm:$0xff] }
   0x6   :  { %v63_v19 = vadd.f32 %v325_v5, %v40_v9  ;;  %v65_v29 = vadd.f32 %v325_v5, %v42_v16  ;;  %v66_v33 = vadd.f32 %v325_v5, %v43_v20  ;;  %v67_v40 = vadd.f32 %v325_v5, %v44_v21  ;;  %v26_v47 = vld [vmem:[%s423_s0 + $0x60] sm:$0xff]  ;;  %v28_v60 = vld [vmem:[%s423_s0 + $0x70] sm:$0xff]  ;;  %v29_v7 = vld [vmem:[%s423_s0 + $0x78] sm:$0xff] }
   0x7   :  { %vm76_vm0 = vcmp.ge.f32.partialorder %v60_v13, 0.0  ;;  %vm77_vm1 = vcmp.ge.f32.partialorder %v61_v14, 0.0  ;;  %v92_v22 = vmul.f32 0.2, %v60_v13  ;;  %v93_v23 = vmul.f32 0.2, %v61_v14 }
   0x8   :  { %vm78_vm2 = vcmp.ge.f32.partialorder %v62_v18, 0.0  ;;  %vm79_vm3 = vcmp.ge.f32.partialorder %v63_v19, 0.0  ;;  %v94_v24 = vmul.f32 0.2, %v62_v18  ;;  %v95_v25 = vmul.f32 0.2, %v63_v19 }
   0x9   :  { %v108_v26 = vsel %vm76_vm0, %v60_v13, %v92_v22  ;;  %v109_v27 = vsel %vm77_vm1, %v61_v14, %v93_v23  ;;  %v64_v28 = vadd.f32 %v325_v5, %v41_v15  ;;  %vm81_vm5 = vcmp.ge.f32.partialorder %v65_v29, 0.0 }
   0xa   :  { %v245_v30 = vpack.c.bf16 %v109_v27, %v108_v26  ;;  %v110_v31 = vsel %vm78_vm2, %v62_v18, %v94_v24  ;;  %v111_v32 = vsel %vm79_vm3, %v63_v19, %v95_v25  ;;  %v97_v39 = vmul.f32 0.2, %v65_v29 }
   0xb   :  { %v250_v37 = vpack.c.bf16 %v111_v32, %v110_v31  ;;  %vm80_vm4 = vcmp.ge.f32.partialorder %v64_v28, 0.0  ;;  %v96_v38 = vmul.f32 0.2, %v64_v28  ;;  %vm82_vm6 = vcmp.ge.f32.partialorder %v66_v33, 0.0 }
   0xc   :  { %246 = vst [vmem:[%s426_s3] sm:$0xff] %v245_v30   ;;  %v98_v41 = vmul.f32 0.2, %v66_v33  ;;  %v45_v44 = vmul.f32 %v318_v2, %v22_v34  ;;  %v46_v45 = vmul.f32 %v318_v2, %v23_v35  ;;  %v47_v46 = vmul.f32 %v318_v2, %v24_v36 }
   0xd   :  { %282 = vst [vmem:[%s426_s3 + $0x8] sm:$0xff] %v250_v37   ;;  %v112_v43 = vsel %vm80_vm4, %v64_v28, %v96_v38  ;;  %v113_v49 = vsel %vm81_vm5, %v65_v29, %v97_v39  ;;  %vm83_vm7 = vcmp.ge.f32.partialorder %v67_v40, 0.0  ;;  %v99_v50 = vmul.f32 0.2, %v67_v40 }
   0xe   :  { %v114_v51 = vsel %vm82_vm6, %v66_v33, %v98_v41  ;;  %v255_v52 = vpack.c.bf16 %v113_v49, %v112_v43  ;;  %v68_v53 = vadd.f32 %v325_v5, %v45_v44  ;;  %v69_v54 = vadd.f32 %v325_v5, %v46_v45 }
   0xf   :  { %v48_v55 = vmul.f32 %v318_v2, %v25_v42  ;;  %v115_v56 = vsel %vm83_vm7, %v67_v40, %v99_v50  ;;  %v70_v57 = vadd.f32 %v325_v5, %v47_v46  ;;  %v49_v58 = vmul.f32 %v318_v2, %v26_v47 }
  0x10   :  { %v50_v59 = vmul.f32 %v318_v2, %v27_v48  ;;  %283 = vst [vmem:[%s426_s3 + $0x10] sm:$0xff] %v255_v52   ;;  %v260_v61 = vpack.c.bf16 %v115_v56, %v114_v51  ;;  %vm84_vm8 = vcmp.ge.f32.partialorder %v68_v53, 0.0  ;;  %vm85_vm9 = vcmp.ge.f32.partialorder %v69_v54, 0.0 }
  0x11   :  { %v100_v62 = vmul.f32 0.2, %v68_v53  ;;  %v101_v63 = vmul.f32 0.2, %v69_v54  ;;  %v71_v0 = vadd.f32 %v325_v5, %v48_v55  ;;  %vm86_vm10 = vcmp.ge.f32.partialorder %v70_v57, 0.0 }
  0x12   :  { %v102_v1 = vmul.f32 0.2, %v70_v57  ;;  %284 = vst [vmem:[%s426_s3 + $0x18] sm:$0xff] %v260_v61   ;;  %v72_v4 = vadd.f32 %v325_v5, %v49_v58  ;;  %v73_v6 = vadd.f32 %v325_v5, %v50_v59  ;;  %v51_v8 = vmul.f32 %v318_v2, %v28_v60 }
  0x13   :  { %v116_v3 = vsel %vm84_vm8, %v68_v53, %v100_v62  ;;  %v117_v9 = vsel %vm85_vm9, %v69_v54, %v101_v63  ;;  %vm87_vm11 = vcmp.ge.f32.partialorder %v71_v0, 0.0  ;;  %v103_v10 = vmul.f32 0.2, %v71_v0 }
  0x14   :  { %v118_v11 = vsel %vm86_vm10, %v70_v57, %v102_v1  ;;  %v265_v12 = vpack.c.bf16 %v117_v9, %v116_v3  ;;  %vm88_vm12 = vcmp.ge.f32.partialorder %v72_v4, 0.0  ;;  %vm89_vm13 = vcmp.ge.f32.partialorder %v73_v6, 0.0 }
  0x15   :  { %v104_v13 = vmul.f32 0.2, %v72_v4  ;;  %v119_v14 = vsel %vm87_vm11, %v71_v0, %v103_v10  ;;  %v105_v15 = vmul.f32 0.2, %v73_v6  ;;  %v52_v16 = vmul.f32 %v318_v2, %v29_v7 }
  0x16   :  { %v74_v17 = vadd.f32 %v325_v5, %v51_v8  ;;  %285 = vst [vmem:[%s426_s3 + $0x20] sm:$0xff] %v265_v12   ;;  %v270_v18 = vpack.c.bf16 %v119_v14, %v118_v11 }
  0x17   :  { %v120_v19 = vsel %vm88_vm12, %v72_v4, %v104_v13  ;;  %v121_v20 = vsel %vm89_vm13, %v73_v6, %v105_v15  ;;  %v75_v21 = vadd.f32 %v325_v5, %v52_v16 }
  0x18   :  { %vm90_vm14 = vcmp.ge.f32.partialorder %v74_v17, 0.0  ;;  %v106_v22 = vmul.f32 0.2, %v74_v17  ;;  %286 = vst [vmem:[%s426_s3 + $0x28] sm:$0xff] %v270_v18   ;;  %v275_v23 = vpack.c.bf16 %v121_v20, %v120_v19 }
  0x19   :  { %vm91_vm15 = vcmp.ge.f32.partialorder %v75_v21, 0.0  ;;  %v107_v2 = vmul.f32 0.2, %v75_v21 }
  0x1a   :  { %v122_v24 = vsel %vm90_vm14, %v74_v17, %v106_v22  ;;  %287 = vst [vmem:[%s426_s3 + $0x30] sm:$0xff] %v275_v23  }
  0x1b   :  { %v123_v25 = vsel %vm91_vm15, %v75_v21, %v107_v2 }
  0x1c   :  { %v280_v26 = vpack.c.bf16 %v123_v25, %v122_v24 }
  0x1e   :  { %288 = vst [vmem:[%s426_s3 + $0x38] sm:$0xff] %v280_v26  }

// kernel: nlayer_discriminator_forward.9
= control target key start
LH: loop header
LB: loop body
LE: loop exit
PB: predicated region body
PF: predicated region fallthrough
CT: control target
= control target key end

     0   :  { %s2370_s1 = inlined_call_operand.vmem [shape: bf16[1024,128], index: 1, kind: input, shape index: {}]   ;;  %s2371_s0 = inlined_call_operand.vmem [shape: bf16[128,1024], index: 0, kind: input, shape index: {}]   ;;  %s2372_s3 = inlined_call_operand.vmem [shape: f32[1,128], index: 3, kind: output, shape index: {1}]   ;;  %s2373_s4 = inlined_call_operand.vmem [shape: f32[1,128], index: 4, kind: output, shape index: {2}]   ;;  %s2374_s2 = inlined_call_operand.vmem [shape: f32[128,128], index: 2, kind: output, shape index: {0}]  }
   0x1   :  { %v1782_v0 = vld [vmem:[%s2370_s1 + $0x40] sm:$0xff]   ;;  %v1786_v4 = vld [vmem:[%s2370_s1 + $0x48] sm:$0xff]   ;;  %v1790_v8 = vld [vmem:[%s2370_s1 + $0x50] sm:$0xff]  }
   0x2   :  { %v1783_v1 = vld [vmem:[%s2370_s1 + $0xc0] sm:$0xff]   ;;  %1525 = vmatprep.subr.bf16.mxu0 %v1782_v0  ;;  %v1787_v5 = vld [vmem:[%s2370_s1 + $0xc8] sm:$0xff]   ;;  %v1791_v9 = vld [vmem:[%s2370_s1 + $0xd0] sm:$0xff]  }
   0x3   :  { %v1784_v2 = vld [vmem:[%s2370_s1] sm:$0xff]   ;;  %1589 = vmatprep.subr.bf16.mxu1 %v1783_v1  ;;  %v1788_v6 = vld [vmem:[%s2370_s1 + $0x8] sm:$0xff]   ;;  %v1792_v10 = vld [vmem:[%s2370_s1 + $0x10] sm:$0xff]  }
   0x4   :  { %v1785_v3 = vld [vmem:[%s2370_s1 + $0x80] sm:$0xff]   ;;  %1526 = vmatpush3.bf16.msra.mxu0 %v1784_v2  ;;  %v1789_v7 = vld [vmem:[%s2370_s1 + $0x88] sm:$0xff]   ;;  %v1793_v11 = vld [vmem:[%s2370_s1 + $0x90] sm:$0xff]  }
   0x5   :  { %1590 = vmatpush3.bf16.msra.mxu1 %v1785_v3  ;;  %1527 = vmatprep.subr.bf16.mxu0 %v1786_v4  ;;  %v1794_v12 = vld [vmem:[%s2370_s1 + $0x58] sm:$0xff]   ;;  %v1798_v16 = vld [vmem:[%s2370_s1 + $0x60] sm:$0xff]   ;;  %v1802_v20 = vld [vmem:[%s2370_s1 + $0x68] sm:$0xff]  }
   0x6   :  { %1591 = vmatprep.subr.bf16.mxu1 %v1787_v5  ;;  %v1795_v13 = vld [vmem:[%s2370_s1 + $0xd8] sm:$0xff]   ;;  %v1799_v17 = vld [vmem:[%s2370_s1 + $0xe0] sm:$0xff]   ;;  %v1803_v21 = vld [vmem:[%s2370_s1 + $0xe8] sm:$0xff]  }
   0x7   :  { %v1796_v14 = vld [vmem:[%s2370_s1 + $0x18] sm:$0xff]   ;;  %v1800_v18 = vld [vmem:[%s2370_s1 + $0x20] sm:$0xff]   ;;  %v1804_v22 = vld [vmem:[%s2370_s1 + $0x28] sm:$0xff]  }
   0x8   :  { %1528 = vmatpush3.bf16.msra.mxu0 %v1788_v6  ;;  %v1797_v15 = vld [vmem:[%s2370_s1 + $0x98] sm:$0xff]   ;;  %v1801_v19 = vld [vmem:[%s2370_s1 + $0xa0] sm:$0xff]   ;;  %v1805_v23 = vld [vmem:[%s2370_s1 + $0xa8] sm:$0xff]  }
   0x9   :  { %1592 = vmatpush3.bf16.msra.mxu1 %v1789_v7  ;;  %1529 = vmatprep.subr.bf16.mxu0 %v1790_v8  ;;  %v1806_v24 = vld [vmem:[%s2370_s1 + $0x70] sm:$0xff]   ;;  %v1810_v28 = vld [vmem:[%s2370_s1 + $0x78] sm:$0xff]   ;;  %v21_v32 = vld [vmem:[%s2371_s0] sm:$0xff] }
   0xa   :  { %1593 = vmatprep.subr.bf16.mxu1 %v1791_v9  ;;  %v1807_v25 = vld [vmem:[%s2370_s1 + $0xf0] sm:$0xff]   ;;  %v1811_v29 = vld [vmem:[%s2370_s1 + $0xf8] sm:$0xff]   ;;  %v25_v33 = vld [vmem:[%s2371_s0 + $0x20] sm:$0xff] }
   0xb   :  { %v1808_v26 = vld [vmem:[%s2370_s1 + $0x30] sm:$0xff]   ;;  %v1812_v30 = vld [vmem:[%s2370_s1 + $0x38] sm:$0xff]   ;;  %v22_v34 = vld [vmem:[%s2371_s0 + $0x8] sm:$0xff]  ;;  %v1397_v35 = vcombine.low %v21_v32, %v25_v33  ;;  %v1398_v36 = vcombine.high %v21_v32, %v25_v33 }
   0xc   :  { %1530 = vmatpush3.bf16.msra.mxu0 %v1792_v10  ;;  %v1809_v27 = vld [vmem:[%s2370_s1 + $0xb0] sm:$0xff]   ;;  %v1813_v31 = vld [vmem:[%s2370_s1 + $0xb8] sm:$0xff]   ;;  %v26_v37 = vld [vmem:[%s2371_s0 + $0x28] sm:$0xff] }
   0xd   :  { %1594 = vmatpush3.bf16.msra.mxu1 %v1793_v11  ;;  %1531 = vmatprep.subr.bf16.mxu0 %v1794_v12  ;;  %v1399_v38 = vcombine.low %v22_v34, %v26_v37  ;;  %v1400_v39 = vcombine.high %v22_v34, %v26_v37  ;;  %v1814_v40 = vld [vmem:[%s2370_s1 + $0x140] sm:$0xff]   ;;  %v30_v47 = vld [vmem:[%s2371_s0 + $0x48] sm:$0xff]  ;;  %v1822_v62 = vld [vmem:[%s2370_s1 + $0x150] sm:$0xff]  }
   0xe   :  { %1595 = vmatprep.subr.bf16.mxu1 %v1795_v13  ;;  %949 = vmatprep.mubr.bf16.mxu0 %v1398_v36  ;;  %v1815_v41 = vld [vmem:[%s2370_s1 + $0x100] sm:$0xff]   ;;  %v34_v48 = vld [vmem:[%s2371_s0 + $0x68] sm:$0xff]  ;;  %v1823_v63 = vld [vmem:[%s2370_s1 + $0x110] sm:$0xff]  }
   0xf   :  { %1046 = vmatprep.mubr.bf16.mxu1 %v1400_v39  ;;  %v1816_v42 = vld [vmem:[%s2370_s1 + $0x1c0] sm:$0xff]   ;;  %v1408_v49 = vcombine.high %v30_v47, %v34_v48  ;;  %v1818_v50 = vld [vmem:[%s2370_s1 + $0x148] sm:$0xff]   ;;  %v1407_v53 = vcombine.low %v30_v47, %v34_v48  ;;  %v1824_v0 = vld [vmem:[%s2370_s1 + $0x1d0] sm:$0xff]  }
  0x10   :  { %1532 = vmatpush3.bf16.msra.mxu0 %v1796_v14  ;;  %v1817_v43 = vld [vmem:[%s2370_s1 + $0x180] sm:$0xff]   ;;  %v1819_v52 = vld [vmem:[%s2370_s1 + $0x108] sm:$0xff]   ;;  %v1825_v1 = vld [vmem:[%s2370_s1 + $0x190] sm:$0xff]  }
  0x11   :  { %1596 = vmatpush3.bf16.msra.mxu1 %v1797_v15  ;;  %1533 = vmatprep.subr.bf16.mxu0 %v1798_v16  ;;  %v29_v44 = vld [vmem:[%s2371_s0 + $0x40] sm:$0xff]  ;;  %v1820_v54 = vld [vmem:[%s2370_s1 + $0x1c8] sm:$0xff]   ;;  %v1826_v10 = vld [vmem:[%s2370_s1 + $0x158] sm:$0xff]  }
  0x12   :  { %1597 = vmatprep.subr.bf16.mxu1 %v1799_v17  ;;  %v33_v45 = vld [vmem:[%s2371_s0 + $0x60] sm:$0xff]  ;;  %v1821_v55 = vld [vmem:[%s2370_s1 + $0x188] sm:$0xff]   ;;  %v1827_v11 = vld [vmem:[%s2370_s1 + $0x118] sm:$0xff]  }
  0x13   :  { %v1406_v46 = vcombine.high %v29_v44, %v33_v45  ;;  %v1405_v51 = vcombine.low %v29_v44, %v33_v45  ;;  %v37_v56 = vld [vmem:[%s2371_s0 + $0x80] sm:$0xff]  ;;  %v38_v58 = vld [vmem:[%s2371_s0 + $0x88] sm:$0xff]  ;;  %v1828_v12 = vld [vmem:[%s2370_s1 + $0x1d8] sm:$0xff]  }
  0x14   :  { %1534 = vmatpush3.bf16.msra.mxu0 %v1800_v18  ;;  %v41_v57 = vld [vmem:[%s2371_s0 + $0xa0] sm:$0xff]  ;;  %v42_v59 = vld [vmem:[%s2371_s0 + $0xa8] sm:$0xff]  ;;  %v1829_v13 = vld [vmem:[%s2370_s1 + $0x198] sm:$0xff]  }
  0x15   :  { %1598 = vmatpush3.bf16.msra.mxu1 %v1801_v19  ;;  %1535 = vmatprep.subr.bf16.mxu0 %v1802_v20  ;;  %v1414_v60 = vcombine.high %v37_v56, %v41_v57  ;;  %v1416_v61 = vcombine.high %v38_v58, %v42_v59  ;;  %v1413_v2 = vcombine.low %v37_v56, %v41_v57  ;;  %v45_v3 = vld [vmem:[%s2371_s0 + $0xc0] sm:$0xff]  ;;  %v46_v5 = vld [vmem:[%s2371_s0 + $0xc8] sm:$0xff]  ;;  %v1839_v39 = vld [vmem:[%s2370_s1 + $0x130] sm:$0xff]  }
  0x16   :  { %1599 = vmatprep.subr.bf16.mxu1 %v1803_v21  ;;  %v49_v4 = vld [vmem:[%s2371_s0 + $0xe0] sm:$0xff]  ;;  %v1415_v6 = vcombine.low %v38_v58, %v42_v59  ;;  %v50_v8 = vld [vmem:[%s2371_s0 + $0xe8] sm:$0xff]  ;;  %v1843_v48 = vld [vmem:[%s2370_s1 + $0x138] sm:$0xff]  }
  0x17   :  { %v1422_v7 = vcombine.high %v45_v3, %v49_v4  ;;  %v1424_v9 = vcombine.high %v46_v5, %v50_v8  ;;  %v53_v14 = vld [vmem:[%s2371_s0 + $0x100] sm:$0xff]  ;;  %v54_v16 = vld [vmem:[%s2371_s0 + $0x108] sm:$0xff]  ;;  %v1421_v19 = vcombine.low %v45_v3, %v49_v4  ;;  %v1423_v21 = vcombine.low %v46_v5, %v50_v8  ;;  %v32_v8 = vld [vmem:[%s2371_s0 + $0x58] sm:$0xff] }
  0x18   :  { %1536 = vmatpush3.bf16.msra.mxu0 %v1804_v22  ;;  %v57_v15 = vld [vmem:[%s2371_s0 + $0x120] sm:$0xff]  ;;  %v58_v17 = vld [vmem:[%s2371_s0 + $0x128] sm:$0xff] }
  0x19   :  { %1600 = vmatpush3.bf16.msra.mxu1 %v1805_v23  ;;  %1537 = vmatprep.subr.bf16.mxu0 %v1806_v24  ;;  %v1830_v18 = vld [vmem:[%s2370_s1 + $0x160] sm:$0xff]   ;;  %v1430_v22 = vcombine.high %v53_v14, %v57_v15  ;;  %v1432_v24 = vcombine.high %v54_v16, %v58_v17  ;;  %v1836_v32 = vld [vmem:[%s2370_s1 + $0x1e8] sm:$0xff]   ;;  %v1429_v34 = vcombine.low %v53_v14, %v57_v15  ;;  %v39_v14 = vld [vmem:[%s2371_s0 + $0x90] sm:$0xff] }
  0x1a   :  { %1601 = vmatprep.subr.bf16.mxu1 %v1807_v25  ;;  %v1831_v20 = vld [vmem:[%s2370_s1 + $0x120] sm:$0xff]   ;;  %v1837_v33 = vld [vmem:[%s2370_s1 + $0x1a8] sm:$0xff]   ;;  %v43_v15 = vld [vmem:[%s2371_s0 + $0xb0] sm:$0xff] }
  0x1b   :  { %v1832_v23 = vld [vmem:[%s2370_s1 + $0x1e0] sm:$0xff]   ;;  %v70_v44 = vld [vmem:[%s2371_s0 + $0x188] sm:$0xff] }
  0x1c   :  { %1538 = vmatpush3.bf16.msra.mxu0 %v1808_v26  ;;  %v1833_v25 = vld [vmem:[%s2370_s1 + $0x1a0] sm:$0xff]   ;;  %v74_v45 = vld [vmem:[%s2371_s0 + $0x1a8] sm:$0xff] }
  0x1d   :  { %1602 = vmatpush3.bf16.msra.mxu1 %v1809_v27  ;;  %1539 = vmatprep.subr.bf16.mxu0 %v1810_v28  ;;  %v61_v26 = vld [vmem:[%s2371_s0 + $0x140] sm:$0xff]  ;;  %v1834_v28 = vld [vmem:[%s2370_s1 + $0x168] sm:$0xff]   ;;  %v1447_v59 = vcombine.low %v70_v44, %v74_v45 }
  0x1e   :  { %1603 = vmatprep.subr.bf16.mxu1 %v1811_v29  ;;  %v65_v27 = vld [vmem:[%s2371_s0 + $0x160] sm:$0xff]  ;;  %v62_v29 = vld [vmem:[%s2371_s0 + $0x148] sm:$0xff] }
  0x1f   :  { %v1438_v36 = vcombine.high %v61_v26, %v65_v27  ;;  %v1437_v47 = vcombine.low %v61_v26, %v65_v27  ;;  %v78_v56 = vld [vmem:[%s2371_s0 + $0x1c8] sm:$0xff]  ;;  %v1417_v26 = vcombine.low %v39_v14, %v43_v15 }
  0x20   :  { %1540 = vmatpush3.bf16.msra.mxu0 %v1812_v30  ;;  %v66_v30 = vld [vmem:[%s2371_s0 + $0x168] sm:$0xff] }
  0x21   :  { %1604 = vmatpush3.bf16.msra.mxu1 %v1813_v31  ;;  %1653 = vmatprep.subr.bf16.mxu0 %v1814_v40  ;;  %v1835_v31 = vld [vmem:[%s2370_s1 + $0x128] sm:$0xff]   ;;  %v1440_v37 = vcombine.high %v62_v29, %v66_v30  ;;  %v1840_v40 = vld [vmem:[%s2370_s1 + $0x1f0] sm:$0xff]  }
  0x22   :  { %1717 = vmatprep.subr.bf16.mxu1 %v1816_v42  ;;  %v73_v42 = vld [vmem:[%s2371_s0 + $0x1a0] sm:$0xff]  ;;  %v82_v57 = vld [vmem:[%s2371_s0 + $0x1e8] sm:$0xff] }
  0x23   :  { %950 = vmatmul.mubr.bf16.vlgmr.msra.gmra.mrb[0].mxu0 %v1397_v35  ;;  %v1431_v35 = vcombine.low %v54_v16, %v58_v17  ;;  %v1455_v3 = vcombine.low %v78_v56, %v82_v57  ;;  %v40_v16 = vld [vmem:[%s2371_s0 + $0x98] sm:$0xff] }
  0x24   :  { %1047 = vmatmul.mubr.bf16.vlgmr.msra.gmra.mrb[0].mxu1 %v1399_v38  ;;  %1654 = vmatpush3.bf16.msra.mxu0 %v1815_v41  ;;  %v1838_v38 = vld [vmem:[%s2370_s1 + $0x170] sm:$0xff]   ;;  %v69_v41 = vld [vmem:[%s2371_s0 + $0x180] sm:$0xff]  ;;  %v44_v17 = vld [vmem:[%s2371_s0 + $0xb8] sm:$0xff] }
  0x25   :  { %1718 = vmatpush3.bf16.msra.mxu1 %v1817_v43  ;;  %957 = vmatprep.mubr.bf16.mxu0 %v1406_v46  ;;  %v1841_v43 = vld [vmem:[%s2370_s1 + $0x1b0] sm:$0xff]   ;;  %v1842_v46 = vld [vmem:[%s2370_s1 + $0x178] sm:$0xff]   ;;  %v1445_v58 = vcombine.low %v69_v41, %v73_v42  ;;  %v1419_v27 = vcombine.low %v40_v16, %v44_v17 }
  0x26   :  { %1054 = vmatprep.mubr.bf16.mxu1 %v1408_v49  ;;  %1655 = vmatprep.subr.bf16.mxu0 %v1818_v50  ;;  %v1439_v49 = vcombine.low %v62_v29, %v66_v30  ;;  %v1446_v50 = vcombine.high %v69_v41, %v73_v42  ;;  %v55_v30 = vld [vmem:[%s2371_s0 + $0x110] sm:$0xff]  ;;  %v68_v41 = vld [vmem:[%s2371_s0 + $0x178] sm:$0xff] }
  0x27   :  { %1719 = vmatprep.subr.bf16.mxu1 %v1820_v54  ;;  %v77_v54 = vld [vmem:[%s2371_s0 + $0x1c0] sm:$0xff] }
  0x28   :  { %1656 = vmatpush3.bf16.msra.mxu0 %v1819_v52  ;;  %v1448_v52 = vcombine.high %v70_v44, %v74_v45 }
  0x29   :  { %1720 = vmatpush3.bf16.msra.mxu1 %v1821_v55  ;;  %1657 = vmatprep.subr.bf16.mxu0 %v1822_v62  ;;  %v81_v55 = vld [vmem:[%s2371_s0 + $0x1e0] sm:$0xff]  ;;  %v23_v62 = vld [vmem:[%s2371_s0 + $0x10] sm:$0xff] }
  0x2a   :  { %1721 = vmatprep.subr.bf16.mxu1 %v1824_v0  ;;  %v24_v0 = vld [vmem:[%s2371_s0 + $0x18] sm:$0xff] }
  0x2b   :  { %958 = vmatmul.mubr.bf16.gmra.mrb[4].mxu0 %v1405_v51  ;;  %v1844_v51 = vld [vmem:[%s2370_s1 + $0x1f8] sm:$0xff]  }
  0x2c   :  { %1055 = vmatmul.mubr.bf16.gmra.mrb[4].mxu1 %v1407_v53  ;;  %965 = vmatprep.mubr.bf16.mxu0 %v1414_v60  ;;  %v1845_v53 = vld [vmem:[%s2370_s1 + $0x1b8] sm:$0xff]   ;;  %v1454_v60 = vcombine.high %v77_v54, %v81_v55 }
  0x2d   :  { %1062 = vmatprep.mubr.bf16.mxu1 %v1416_v61  ;;  %1658 = vmatpush3.bf16.msra.mxu0 %v1823_v63  ;;  %v1456_v61 = vcombine.high %v78_v56, %v82_v57  ;;  %v27_v63 = vld [vmem:[%s2371_s0 + $0x30] sm:$0xff]  ;;  %v80_v56 = vld [vmem:[%s2371_s0 + $0x1d8] sm:$0xff] }
  0x2e   :  { %1722 = vmatpush3.bf16.msra.mxu1 %v1825_v1  ;;  %1659 = vmatprep.subr.bf16.mxu0 %v1826_v10  ;;  %v28_v1 = vld [vmem:[%s2371_s0 + $0x38] sm:$0xff]  ;;  %v1402_v4 = vcombine.high %v23_v62, %v27_v63  ;;  %v1401_v10 = vcombine.low %v23_v62, %v27_v63 }
  0x2f   :  { %1723 = vmatprep.subr.bf16.mxu1 %v1828_v12  ;;  %v1404_v5 = vcombine.high %v24_v0, %v28_v1  ;;  %v84_v57 = vld [vmem:[%s2371_s0 + $0x1f8] sm:$0xff] }
  0x30   :  { %v1459_v63 = vcombine.low %v80_v56, %v84_v57 }
  0x31   :  { %1660 = vmatpush3.bf16.msra.mxu0 %v1827_v11  ;;  %v1403_v11 = vcombine.low %v24_v0, %v28_v1 }
  0x32   :  { %1724 = vmatpush3.bf16.msra.mxu1 %v1829_v13  ;;  %1661 = vmatprep.subr.bf16.mxu0 %v1830_v18 }
  0x33   :  { %966 = vmatmul.mubr.bf16.gmra.mrb[8].mxu0 %v1413_v2  ;;  %1725 = vmatprep.subr.bf16.mxu1 %v1832_v23  ;;  %v1453_v2 = vcombine.low %v77_v54, %v81_v55  ;;  %v51_v23 = vld [vmem:[%s2371_s0 + $0xf0] sm:$0xff] }
  0x34   :  { %1063 = vmatmul.mubr.bf16.gmra.mrb[8].mxu1 %v1415_v6  ;;  %973 = vmatprep.mubr.bf16.mxu0 %v1422_v7  ;;  %v31_v6 = vld [vmem:[%s2371_s0 + $0x50] sm:$0xff] }
  0x35   :  { %1070 = vmatprep.mubr.bf16.mxu1 %v1424_v9  ;;  %1662 = vmatpush3.bf16.msra.mxu0 %v1831_v20  ;;  %v35_v7 = vld [vmem:[%s2371_s0 + $0x70] sm:$0xff]  ;;  %v36_v9 = vld [vmem:[%s2371_s0 + $0x78] sm:$0xff]  ;;  %v1418_v20 = vcombine.high %v39_v14, %v43_v15 }
  0x36   :  { %1726 = vmatpush3.bf16.msra.mxu1 %v1833_v25  ;;  %1663 = vmatprep.subr.bf16.mxu0 %v1834_v28  ;;  %v1410_v12 = vcombine.high %v31_v6, %v35_v7  ;;  %v1412_v13 = vcombine.high %v32_v8, %v36_v9  ;;  %v1409_v18 = vcombine.low %v31_v6, %v35_v7  ;;  %v52_v25 = vld [vmem:[%s2371_s0 + $0xf8] sm:$0xff]  ;;  %v79_v54 = vld [vmem:[%s2371_s0 + $0x1d0] sm:$0xff] }
  0x37   :  { %1727 = vmatprep.subr.bf16.mxu1 %v1836_v32  ;;  %v56_v32 = vld [vmem:[%s2371_s0 + $0x118] sm:$0xff]  ;;  %v83_v55 = vld [vmem:[%s2371_s0 + $0x1f0] sm:$0xff] }
  0x38   :  { %v1457_v62 = vcombine.low %v79_v54, %v83_v55 }
  0x39   :  { %1664 = vmatpush3.bf16.msra.mxu0 %v1835_v31  ;;  %v59_v31 = vld [vmem:[%s2371_s0 + $0x130] sm:$0xff] }
  0x3a   :  { %1728 = vmatpush3.bf16.msra.mxu1 %v1837_v33  ;;  %1665 = vmatprep.subr.bf16.mxu0 %v1838_v38  ;;  %v60_v33 = vld [vmem:[%s2371_s0 + $0x138] sm:$0xff]  ;;  %v63_v38 = vld [vmem:[%s2371_s0 + $0x150] sm:$0xff]  ;;  %v1433_v42 = vcombine.low %v55_v30, %v59_v31 }
  0x3b   :  { %974 = vmatmul.mubr.bf16.gmra.mrb[12].mxu0 %v1421_v19  ;;  %1729 = vmatprep.subr.bf16.mxu1 %v1840_v40  ;;  %v1411_v19 = vcombine.low %v32_v8, %v36_v9  ;;  %v64_v40 = vld [vmem:[%s2371_s0 + $0x158] sm:$0xff]  ;;  %v1846_v9 = vmov 0.0  }
  0x3c   :  { %1071 = vmatmul.mubr.bf16.gmra.mrb[12].mxu1 %v1423_v21  ;;  %981 = vmatprep.mubr.bf16.mxu0 %v1430_v22  ;;  %v1420_v21 = vcombine.high %v40_v16, %v44_v17  ;;  %v47_v22 = vld [vmem:[%s2371_s0 + $0xd0] sm:$0xff]  ;;  %v1444_v45 = vcombine.high %v64_v40, %v68_v41  ;;  %19 = vst [vmem:[%s2372_s3] sm:$0x1] %v1846_v9  ;;  %20 = vst [vmem:[%s2373_s4] sm:$0x1] %v1846_v9 }
  0x3d   :  { %1078 = vmatprep.mubr.bf16.mxu1 %v1432_v24  ;;  %1666 = vmatpush3.bf16.msra.mxu0 %v1839_v39  ;;  %v48_v24 = vld [vmem:[%s2371_s0 + $0xd8] sm:$0xff]  ;;  %v1426_v28 = vcombine.high %v47_v22, %v51_v23  ;;  %v67_v39 = vld [vmem:[%s2371_s0 + $0x170] sm:$0xff] }
  0x3e   :  { %1730 = vmatpush3.bf16.msra.mxu1 %v1841_v43  ;;  %1667 = vmatprep.subr.bf16.mxu0 %v1842_v46  ;;  %v1428_v29 = vcombine.high %v48_v24, %v52_v25  ;;  %v1435_v43 = vcombine.low %v56_v32, %v60_v33  ;;  %v1442_v44 = vcombine.high %v63_v38, %v67_v39  ;;  %v71_v46 = vld [vmem:[%s2371_s0 + $0x190] sm:$0xff] }
  0x3f   :  { %1731 = vmatprep.subr.bf16.mxu1 %v1844_v51  ;;  %v1443_v51 = vcombine.low %v64_v40, %v68_v41 }
  0x41   :  { %1668 = vmatpush3.bf16.msra.mxu0 %v1843_v48  ;;  %v72_v48 = vld [vmem:[%s2371_s0 + $0x198] sm:$0xff] }
  0x42   :  { %1732 = vmatpush3.bf16.msra.mxu1 %v1845_v53 }
  0x43   :  { %982 = vmatmul.mubr.bf16.gmra.mrb[16].mxu0 %v1429_v34  ;;  %v1425_v34 = vcombine.low %v47_v22, %v51_v23 }
  0x44   :  { %1079 = vmatmul.mubr.bf16.gmra.mrb[16].mxu1 %v1431_v35  ;;  %989 = vmatprep.mubr.bf16.mxu0 %v1438_v36  ;;  %v1427_v35 = vcombine.low %v48_v24, %v52_v25  ;;  %v1434_v36 = vcombine.high %v55_v30, %v59_v31 }
  0x45   :  { %1086 = vmatprep.mubr.bf16.mxu1 %v1440_v37  ;;  %v1436_v37 = vcombine.high %v56_v32, %v60_v33 }
  0x4b   :  { %990 = vmatmul.mubr.bf16.gmra.mrb[20].mxu0 %v1437_v47  ;;  %v75_v47 = vld [vmem:[%s2371_s0 + $0x1b0] sm:$0xff] }
  0x4c   :  { %1087 = vmatmul.mubr.bf16.gmra.mrb[20].mxu1 %v1439_v49  ;;  %997 = vmatprep.mubr.bf16.mxu0 %v1446_v50  ;;  %v76_v49 = vld [vmem:[%s2371_s0 + $0x1b8] sm:$0xff]  ;;  %v1441_v50 = vcombine.low %v63_v38, %v67_v39 }
  0x4d   :  { %1094 = vmatprep.mubr.bf16.mxu1 %v1448_v52  ;;  %v1450_v52 = vcombine.high %v71_v46, %v75_v47  ;;  %v1452_v53 = vcombine.high %v72_v48, %v76_v49 }
  0x53   :  { %998 = vmatmul.mubr.bf16.gmra.mrb[24].mxu0 %v1445_v58  ;;  %v1449_v58 = vcombine.low %v71_v46, %v75_v47 }
  0x54   :  { %1095 = vmatmul.mubr.bf16.gmra.mrb[24].mxu1 %v1447_v59  ;;  %1005 = vmatprep.mubr.bf16.mxu0 %v1454_v60  ;;  %v1451_v59 = vcombine.low %v72_v48, %v76_v49  ;;  %v1458_v60 = vcombine.high %v79_v54, %v83_v55 }
  0x55   :  { %1102 = vmatprep.mubr.bf16.mxu1 %v1456_v61  ;;  %v1460_v61 = vcombine.high %v80_v56, %v84_v57 }
  0x5b   :  { %1006 = vmatmul.mubr.bf16.gmra.mrb[28].mxu0 %v1453_v2 }
  0x5c   :  { %1103 = vmatmul.mubr.bf16.gmra.mrb[28].mxu1 %v1455_v3  ;;  %1143 = vmatprep.mubr.bf16.mxu0 %v1402_v4 }
  0x5d   :  { %1240 = vmatprep.mubr.bf16.mxu1 %v1404_v5 }
  0x63   :  { %1144 = vmatmul.mubr.bf16.vlgmr.msra.gmra.mrb[32].mxu0 %v1401_v10 }
  0x64   :  { %1241 = vmatmul.mubr.bf16.vlgmr.msra.gmra.mrb[32].mxu1 %v1403_v11  ;;  %1151 = vmatprep.mubr.bf16.mxu0 %v1410_v12 }
  0x65   :  { %1248 = vmatprep.mubr.bf16.mxu1 %v1412_v13 }
  0x6b   :  { %1152 = vmatmul.mubr.bf16.gmra.mrb[36].mxu0 %v1409_v18 }
  0x6c   :  { %1249 = vmatmul.mubr.bf16.gmra.mrb[36].mxu1 %v1411_v19  ;;  %1159 = vmatprep.mubr.bf16.mxu0 %v1418_v20 }
  0x6d   :  { %1256 = vmatprep.mubr.bf16.mxu1 %v1420_v21 }
  0x73   :  { %1160 = vmatmul.mubr.bf16.gmra.mrb[40].mxu0 %v1417_v26 }
  0x74   :  { %1257 = vmatmul.mubr.bf16.gmra.mrb[40].mxu1 %v1419_v27  ;;  %1167 = vmatprep.mubr.bf16.mxu0 %v1426_v28 }
  0x75   :  { %1264 = vmatprep.mubr.bf16.mxu1 %v1428_v29 }
  0x7b   :  { %1168 = vmatmul.mubr.bf16.gmra.mrb[44].mxu0 %v1425_v34 }
  0x7c   :  { %1265 = vmatmul.mubr.bf16.gmra.mrb[44].mxu1 %v1427_v35  ;;  %1175 = vmatprep.mubr.bf16.mxu0 %v1434_v36 }
  0x7d   :  { %1272 = vmatprep.mubr.bf16.mxu1 %v1436_v37 }
  0x83   :  { %1176 = vmatmul.mubr.bf16.gmra.mrb[48].mxu0 %v1433_v42 }
  0x84   :  { %1273 = vmatmul.mubr.bf16.gmra.mrb[48].mxu1 %v1435_v43  ;;  %1183 = vmatprep.mubr.bf16.mxu0 %v1442_v44 }
  0x85   :  { %1280 = vmatprep.mubr.bf16.mxu1 %v1444_v45 }
  0x8b   :  { %1184 = vmatmul.mubr.bf16.gmra.mrb[52].mxu0 %v1441_v50 }
  0x8c   :  { %1281 = vmatmul.mubr.bf16.gmra.mrb[52].mxu1 %v1443_v51  ;;  %1191 = vmatprep.mubr.bf16.mxu0 %v1450_v52 }
  0x8d   :  { %1288 = vmatprep.mubr.bf16.mxu1 %v1452_v53 }
  0x93   :  { %1192 = vmatmul.mubr.bf16.gmra.mrb[56].mxu0 %v1449_v58 }
  0x94   :  { %1289 = vmatmul.mubr.bf16.gmra.mrb[56].mxu1 %v1451_v59  ;;  %1199 = vmatprep.mubr.bf16.mxu0 %v1458_v60 }
  0x95   :  { %1296 = vmatprep.mubr.bf16.mxu1 %v1460_v61 }
  0x9b   :  { %1200 = vmatmul.mubr.bf16.gmra.mrb[60].mxu0 %v1457_v62 }
  0x9c   :  { %1297 = vmatmul.mubr.bf16.gmra.mrb[60].mxu1 %v1459_v63 }
  0xf6   :  { %v1541_v0 = vpop.f32.mrb[0].mxu0 }
  0xf7   :  { %v1605_v1 = vpop.f32.mrb[0].mxu1  ;;  %v1542_v2 = vpop.f32.mrb[1].mxu0 }
  0xf8   :  { %v1543_v3 = vadd.f32 %v1542_v2, %v1541_v0  ;;  %v1606_v4 = vpop.f32.mrb[1].mxu1  ;;  %v1544_v5 = vpop.f32.mrb[2].mxu0 }
  0xf9   :  { %v1607_v6 = vadd.f32 %v1606_v4, %v1605_v1  ;;  %v1608_v7 = vpop.f32.mrb[2].mxu1  ;;  %v1545_v8 = vpop.f32.mrb[3].mxu0 }
  0xfa   :  { %v1546_v10 = vadd.f32 %v1545_v8, %v1544_v5  ;;  %v1609_v11 = vpop.f32.mrb[3].mxu1 }
  0xfb   :  { %v2262_v12 = vadd.f32 %v1607_v6, %v1543_v3  ;;  %v1610_v13 = vadd.f32 %v1609_v11, %v1608_v7 }
  0xfd   :  { %v2264_v14 = vadd.f32 %v1610_v13, %v1546_v10 }
  0xfe   :  { %v1547_v15 = vpop.f32.mrb[4].mxu0 }
  0xff   :  { %v1611_v16 = vpop.f32.mrb[4].mxu1  ;;  %v1548_v17 = vpop.f32.mrb[5].mxu0 }
 0x100   :  { %v1549_v18 = vadd.f32 %v1548_v17, %v1547_v15  ;;  %v1612_v19 = vpop.f32.mrb[5].mxu1  ;;  %v1550_v20 = vpop.f32.mrb[6].mxu0 }
 0x101   :  { %v1613_v21 = vadd.f32 %v1612_v19, %v1611_v16  ;;  %v1614_v22 = vpop.f32.mrb[6].mxu1  ;;  %v1551_v23 = vpop.f32.mrb[7].mxu0 }
 0x102   :  { %v1552_v24 = vadd.f32 %v1551_v23, %v1550_v20  ;;  %v1615_v25 = vpop.f32.mrb[7].mxu1 }
 0x103   :  { %v2266_v26 = vadd.f32 %v1613_v21, %v1549_v18  ;;  %v1616_v27 = vadd.f32 %v1615_v25, %v1614_v22 }
 0x105   :  { %v2268_v28 = vadd.f32 %v1616_v27, %v1552_v24 }
 0x106   :  { %v1553_v29 = vpop.f32.mrb[8].mxu0 }
 0x107   :  { %v1617_v30 = vpop.f32.mrb[8].mxu1  ;;  %v1554_v31 = vpop.f32.mrb[9].mxu0 }
 0x108   :  { %v1555_v32 = vadd.f32 %v1554_v31, %v1553_v29  ;;  %v1618_v33 = vpop.f32.mrb[9].mxu1  ;;  %v1556_v34 = vpop.f32.mrb[10].mxu0 }
 0x109   :  { %v1619_v35 = vadd.f32 %v1618_v33, %v1617_v30  ;;  %v1620_v36 = vpop.f32.mrb[10].mxu1  ;;  %v1557_v37 = vpop.f32.mrb[11].mxu0 }
 0x10a   :  { %v1558_v38 = vadd.f32 %v1557_v37, %v1556_v34  ;;  %v1621_v39 = vpop.f32.mrb[11].mxu1 }
 0x10b   :  { %v2270_v40 = vadd.f32 %v1619_v35, %v1555_v32  ;;  %v1622_v41 = vadd.f32 %v1621_v39, %v1620_v36 }
 0x10d   :  { %v2272_v42 = vadd.f32 %v1622_v41, %v1558_v38 }
 0x10e   :  { %v1559_v43 = vpop.f32.mrb[12].mxu0 }
 0x10f   :  { %v1623_v44 = vpop.f32.mrb[12].mxu1  ;;  %v1560_v45 = vpop.f32.mrb[13].mxu0 }
 0x110   :  { %v1561_v46 = vadd.f32 %v1560_v45, %v1559_v43  ;;  %v1624_v47 = vpop.f32.mrb[13].mxu1  ;;  %v1562_v48 = vpop.f32.mrb[14].mxu0 }
 0x111   :  { %v1625_v49 = vadd.f32 %v1624_v47, %v1623_v44  ;;  %v1626_v50 = vpop.f32.mrb[14].mxu1  ;;  %v1563_v51 = vpop.f32.mrb[15].mxu0 }
 0x112   :  { %v1564_v52 = vadd.f32 %v1563_v51, %v1562_v48  ;;  %v1627_v53 = vpop.f32.mrb[15].mxu1 }
 0x113   :  { %v2274_v54 = vadd.f32 %v1625_v49, %v1561_v46  ;;  %v1628_v55 = vadd.f32 %v1627_v53, %v1626_v50 }
 0x115   :  { %v2276_v56 = vadd.f32 %v1628_v55, %v1564_v52 }
 0x116   :  { %v1565_v57 = vpop.f32.mrb[16].mxu0 }
 0x117   :  { %v1629_v58 = vpop.f32.mrb[16].mxu1  ;;  %v1566_v59 = vpop.f32.mrb[17].mxu0 }
 0x118   :  { %v1567_v60 = vadd.f32 %v1566_v59, %v1565_v57  ;;  %v1630_v61 = vpop.f32.mrb[17].mxu1  ;;  %v1568_v62 = vpop.f32.mrb[18].mxu0 }
 0x119   :  { %v1631_v63 = vadd.f32 %v1630_v61, %v1629_v58  ;;  %v1632_v0 = vpop.f32.mrb[18].mxu1  ;;  %v1569_v1 = vpop.f32.mrb[19].mxu0 }
 0x11a   :  { %v1570_v2 = vadd.f32 %v1569_v1, %v1568_v62  ;;  %v1633_v3 = vpop.f32.mrb[19].mxu1 }
 0x11b   :  { %v2278_v4 = vadd.f32 %v1631_v63, %v1567_v60  ;;  %v1634_v5 = vadd.f32 %v1633_v3, %v1632_v0 }
 0x11d   :  { %v2280_v6 = vadd.f32 %v1634_v5, %v1570_v2 }
 0x11e   :  { %v1571_v7 = vpop.f32.mrb[20].mxu0 }
 0x11f   :  { %v1635_v8 = vpop.f32.mrb[20].mxu1  ;;  %v1572_v9 = vpop.f32.mrb[21].mxu0 }
 0x120   :  { %v1573_v10 = vadd.f32 %v1572_v9, %v1571_v7  ;;  %v1636_v11 = vpop.f32.mrb[21].mxu1  ;;  %v1574_v13 = vpop.f32.mrb[22].mxu0 }
 0x121   :  { %v1637_v15 = vadd.f32 %v1636_v11, %v1635_v8  ;;  %v1638_v16 = vpop.f32.mrb[22].mxu1  ;;  %v1575_v17 = vpop.f32.mrb[23].mxu0 }
 0x122   :  { %v1576_v18 = vadd.f32 %v1575_v17, %v1574_v13  ;;  %v1639_v19 = vpop.f32.mrb[23].mxu1 }
 0x123   :  { %v2282_v20 = vadd.f32 %v1637_v15, %v1573_v10  ;;  %v1640_v21 = vadd.f32 %v1639_v19, %v1638_v16 }
 0x125   :  { %v2284_v22 = vadd.f32 %v1640_v21, %v1576_v18 }
 0x126   :  { %v1577_v23 = vpop.f32.mrb[24].mxu0 }
 0x127   :  { %v1641_v24 = vpop.f32.mrb[24].mxu1  ;;  %v1578_v25 = vpop.f32.mrb[25].mxu0 }
 0x128   :  { %v1579_v27 = vadd.f32 %v1578_v25, %v1577_v23  ;;  %v1642_v29 = vpop.f32.mrb[25].mxu1  ;;  %v1580_v30 = vpop.f32.mrb[26].mxu0 }
 0x129   :  { %v1643_v31 = vadd.f32 %v1642_v29, %v1641_v24  ;;  %v1644_v32 = vpop.f32.mrb[26].mxu1  ;;  %v1581_v33 = vpop.f32.mrb[27].mxu0 }
 0x12a   :  { %v1582_v34 = vadd.f32 %v1581_v33, %v1580_v30  ;;  %v1645_v35 = vpop.f32.mrb[27].mxu1 }
 0x12b   :  { %v2286_v36 = vadd.f32 %v1643_v31, %v1579_v27  ;;  %v1646_v37 = vadd.f32 %v1645_v35, %v1644_v32 }
 0x12d   :  { %v2288_v38 = vadd.f32 %v1646_v37, %v1582_v34 }
 0x12e   :  { %v1583_v39 = vpop.f32.mrb[28].mxu0 }
 0x12f   :  { %v1647_v41 = vpop.f32.mrb[28].mxu1  ;;  %v1584_v43 = vpop.f32.mrb[29].mxu0 }
 0x130   :  { %v1585_v44 = vadd.f32 %v1584_v43, %v1583_v39  ;;  %v1648_v45 = vpop.f32.mrb[29].mxu1  ;;  %v1586_v46 = vpop.f32.mrb[30].mxu0 }
 0x131   :  { %v1649_v47 = vadd.f32 %v1648_v45, %v1647_v41  ;;  %v1650_v48 = vpop.f32.mrb[30].mxu1  ;;  %v1587_v49 = vpop.f32.mrb[31].mxu0 }
 0x132   :  { %v1588_v50 = vadd.f32 %v1587_v49, %v1586_v46  ;;  %v1651_v51 = vpop.f32.mrb[31].mxu1 }
 0x133   :  { %v2290_v52 = vadd.f32 %v1649_v47, %v1585_v44  ;;  %v1652_v53 = vadd.f32 %v1651_v51, %v1650_v48 }
 0x135   :  { %v2292_v55 = vadd.f32 %v1652_v53, %v1588_v50 }
 0x136   :  { %v1669_v57 = vpop.f32.mrb[32].mxu0 }
 0x137   :  { %v1733_v58 = vpop.f32.mrb[32].mxu1  ;;  %v1670_v59 = vpop.f32.mrb[33].mxu0 }
 0x138   :  { %v1671_v60 = vadd.f32 %v1670_v59, %v1669_v57  ;;  %v1734_v61 = vpop.f32.mrb[33].mxu1  ;;  %v1672_v62 = vpop.f32.mrb[34].mxu0 }
 0x139   :  { %v1735_v63 = vadd.f32 %v1734_v61, %v1733_v58  ;;  %v1736_v0 = vpop.f32.mrb[34].mxu1  ;;  %v1673_v1 = vpop.f32.mrb[35].mxu0 }
 0x13a   :  { %v1146_v2 = vadd.f32 %v1671_v60, %v2262_v12  ;;  %v1674_v3 = vadd.f32 %v1673_v1, %v1672_v62  ;;  %v1737_v5 = vpop.f32.mrb[35].mxu1 }
 0x13b   :  { %v1738_v7 = vadd.f32 %v1737_v5, %v1736_v0 }
 0x13c   :  { %v1243_v8 = vadd.f32 %v1735_v63, %v1146_v2  ;;  %v1149_v9 = vadd.f32 %v1674_v3, %v2264_v14 }
 0x13e   :  { %1305 = vst [vmem:[%s2374_s2] sm:$0xff] %v1243_v8  ;;  %v1246_v10 = vadd.f32 %v1738_v7, %v1149_v9  ;;  %v1675_v11 = vpop.f32.mrb[36].mxu0  ;;  %v1346_v16 = vmul.f32 %v1243_v8, %v1243_v8 }
 0x13f   :  { %v1739_v13 = vpop.f32.mrb[36].mxu1  ;;  %v1676_v15 = vpop.f32.mrb[37].mxu0 }
 0x140   :  { %1306 = vst [vmem:[%s2374_s2 + $0x8] sm:$0xff] %v1246_v10  ;;  %v1322_v12 = vadd.f32 %v1246_v10, %v1243_v8  ;;  %v1347_v17 = vmul.f32 %v1246_v10, %v1246_v10  ;;  %v1677_v18 = vadd.f32 %v1676_v15, %v1675_v11  ;;  %v1740_v19 = vpop.f32.mrb[37].mxu1  ;;  %v1678_v21 = vpop.f32.mrb[38].mxu0 }
 0x141   :  { %v1741_v23 = vadd.f32 %v1740_v19, %v1739_v13  ;;  %v1742_v14 = vpop.f32.mrb[38].mxu1  ;;  %v1679_v24 = vpop.f32.mrb[39].mxu0 }
 0x142   :  { %v1362_v25 = vadd.f32 %v1347_v17, %v1346_v16  ;;  %v1154_v27 = vadd.f32 %v1677_v18, %v2266_v26  ;;  %v1680_v29 = vadd.f32 %v1679_v24, %v1678_v21  ;;  %v1743_v30 = vpop.f32.mrb[39].mxu1 }
 0x143   :  { %v1744_v31 = vadd.f32 %v1743_v30, %v1742_v14 }
 0x144   :  { %v1251_v32 = vadd.f32 %v1741_v23, %v1154_v27  ;;  %v1157_v33 = vadd.f32 %v1680_v29, %v2268_v28 }
 0x146   :  { %1307 = vst [vmem:[%s2374_s2 + $0x10] sm:$0xff] %v1251_v32  ;;  %v1323_v34 = vadd.f32 %v1322_v12, %v1251_v32  ;;  %v1348_v35 = vmul.f32 %v1251_v32, %v1251_v32  ;;  %v1254_v37 = vadd.f32 %v1744_v31, %v1157_v33  ;;  %v1681_v39 = vpop.f32.mrb[40].mxu0 }
 0x147   :  { %v1745_v41 = vpop.f32.mrb[40].mxu1  ;;  %v1682_v43 = vpop.f32.mrb[41].mxu0 }
 0x148   :  { %v1363_v44 = vadd.f32 %v1362_v25, %v1348_v35  ;;  %1308 = vst [vmem:[%s2374_s2 + $0x18] sm:$0xff] %v1254_v37  ;;  %v1324_v26 = vadd.f32 %v1323_v34, %v1254_v37  ;;  %v1349_v45 = vmul.f32 %v1254_v37, %v1254_v37  ;;  %v1683_v46 = vadd.f32 %v1682_v43, %v1681_v39  ;;  %v1746_v47 = vpop.f32.mrb[41].mxu1  ;;  %v1684_v28 = vpop.f32.mrb[42].mxu0 }
 0x149   :  { %v1747_v48 = vadd.f32 %v1746_v47, %v1745_v41  ;;  %v1748_v49 = vpop.f32.mrb[42].mxu1  ;;  %v1685_v50 = vpop.f32.mrb[43].mxu0 }
 0x14a   :  { %v1364_v51 = vadd.f32 %v1363_v44, %v1349_v45  ;;  %v1162_v53 = vadd.f32 %v1683_v46, %v2270_v40  ;;  %v1686_v57 = vadd.f32 %v1685_v50, %v1684_v28  ;;  %v1749_v58 = vpop.f32.mrb[43].mxu1 }
 0x14b   :  { %v1750_v59 = vadd.f32 %v1749_v58, %v1748_v49 }
 0x14c   :  { %v1259_v60 = vadd.f32 %v1747_v48, %v1162_v53  ;;  %v1165_v61 = vadd.f32 %v1686_v57, %v2272_v42 }
 0x14e   :  { %1309 = vst [vmem:[%s2374_s2 + $0x20] sm:$0xff] %v1259_v60  ;;  %v1325_v62 = vadd.f32 %v1324_v26, %v1259_v60  ;;  %v1350_v63 = vmul.f32 %v1259_v60, %v1259_v60  ;;  %v1262_v0 = vadd.f32 %v1750_v59, %v1165_v61  ;;  %v1687_v1 = vpop.f32.mrb[44].mxu0 }
 0x14f   :  { %v1751_v2 = vpop.f32.mrb[44].mxu1  ;;  %v1688_v3 = vpop.f32.mrb[45].mxu0 }
 0x150   :  { %v1365_v5 = vadd.f32 %v1364_v51, %v1350_v63  ;;  %1310 = vst [vmem:[%s2374_s2 + $0x28] sm:$0xff] %v1262_v0  ;;  %v1326_v40 = vadd.f32 %v1325_v62, %v1262_v0  ;;  %v1351_v7 = vmul.f32 %v1262_v0, %v1262_v0  ;;  %v1689_v8 = vadd.f32 %v1688_v3, %v1687_v1  ;;  %v1752_v9 = vpop.f32.mrb[45].mxu1  ;;  %v1690_v42 = vpop.f32.mrb[46].mxu0 }
 0x151   :  { %v1753_v10 = vadd.f32 %v1752_v9, %v1751_v2  ;;  %v1754_v11 = vpop.f32.mrb[46].mxu1  ;;  %v1691_v13 = vpop.f32.mrb[47].mxu0 }
 0x152   :  { %v1366_v15 = vadd.f32 %v1365_v5, %v1351_v7  ;;  %v1170_v16 = vadd.f32 %v1689_v8, %v2274_v54  ;;  %v1692_v12 = vadd.f32 %v1691_v13, %v1690_v42  ;;  %v1755_v17 = vpop.f32.mrb[47].mxu1 }
 0x153   :  { %v1756_v18 = vadd.f32 %v1755_v17, %v1754_v11 }
 0x154   :  { %v1267_v19 = vadd.f32 %v1753_v10, %v1170_v16  ;;  %v1173_v21 = vadd.f32 %v1692_v12, %v2276_v56 }
 0x156   :  { %1311 = vst [vmem:[%s2374_s2 + $0x30] sm:$0xff] %v1267_v19  ;;  %v1327_v23 = vadd.f32 %v1326_v40, %v1267_v19  ;;  %v1352_v14 = vmul.f32 %v1267_v19, %v1267_v19  ;;  %v1270_v24 = vadd.f32 %v1756_v18, %v1173_v21  ;;  %v1693_v25 = vpop.f32.mrb[48].mxu0 }
 0x157   :  { %v1757_v27 = vpop.f32.mrb[48].mxu1  ;;  %v1694_v29 = vpop.f32.mrb[49].mxu0 }
 0x158   :  { %v1367_v30 = vadd.f32 %v1366_v15, %v1352_v14  ;;  %1312 = vst [vmem:[%s2374_s2 + $0x38] sm:$0xff] %v1270_v24  ;;  %v1328_v54 = vadd.f32 %v1327_v23, %v1270_v24  ;;  %v1353_v31 = vmul.f32 %v1270_v24, %v1270_v24  ;;  %v1695_v32 = vadd.f32 %v1694_v29, %v1693_v25  ;;  %v1758_v33 = vpop.f32.mrb[49].mxu1  ;;  %v1696_v56 = vpop.f32.mrb[50].mxu0 }
 0x159   :  { %v1759_v34 = vadd.f32 %v1758_v33, %v1757_v27  ;;  %v1760_v35 = vpop.f32.mrb[50].mxu1  ;;  %v1697_v37 = vpop.f32.mrb[51].mxu0 }
 0x15a   :  { %v1368_v39 = vadd.f32 %v1367_v30, %v1353_v31  ;;  %v1178_v41 = vadd.f32 %v1695_v32, %v2278_v4  ;;  %v1698_v43 = vadd.f32 %v1697_v37, %v1696_v56  ;;  %v1761_v44 = vpop.f32.mrb[51].mxu1 }
 0x15b   :  { %v1762_v26 = vadd.f32 %v1761_v44, %v1760_v35 }
 0x15c   :  { %v1275_v45 = vadd.f32 %v1759_v34, %v1178_v41  ;;  %v1181_v46 = vadd.f32 %v1698_v43, %v2280_v6 }
 0x15e   :  { %1313 = vst [vmem:[%s2374_s2 + $0x40] sm:$0xff] %v1275_v45  ;;  %v1329_v47 = vadd.f32 %v1328_v54, %v1275_v45  ;;  %v1354_v28 = vmul.f32 %v1275_v45, %v1275_v45  ;;  %v1278_v48 = vadd.f32 %v1762_v26, %v1181_v46  ;;  %v1699_v49 = vpop.f32.mrb[52].mxu0 }
 0x15f   :  { %v1763_v50 = vpop.f32.mrb[52].mxu1  ;;  %v1700_v51 = vpop.f32.mrb[53].mxu0 }
 0x160   :  { %v1369_v53 = vadd.f32 %v1368_v39, %v1354_v28  ;;  %1314 = vst [vmem:[%s2374_s2 + $0x48] sm:$0xff] %v1278_v48  ;;  %v1330_v4 = vadd.f32 %v1329_v47, %v1278_v48  ;;  %v1355_v57 = vmul.f32 %v1278_v48, %v1278_v48  ;;  %v1701_v58 = vadd.f32 %v1700_v51, %v1699_v49  ;;  %v1764_v59 = vpop.f32.mrb[53].mxu1  ;;  %v1702_v6 = vpop.f32.mrb[54].mxu0 }
 0x161   :  { %v1765_v60 = vadd.f32 %v1764_v59, %v1763_v50  ;;  %v1766_v61 = vpop.f32.mrb[54].mxu1  ;;  %v1703_v62 = vpop.f32.mrb[55].mxu0 }
 0x162   :  { %v1370_v63 = vadd.f32 %v1369_v53, %v1355_v57  ;;  %v1186_v0 = vadd.f32 %v1701_v58, %v2282_v20  ;;  %v1704_v1 = vadd.f32 %v1703_v62, %v1702_v6  ;;  %v1767_v2 = vpop.f32.mrb[55].mxu1 }
 0x163   :  { %v1768_v3 = vadd.f32 %v1767_v2, %v1766_v61  ;;  %v1321_v2 = vld [vmem:[%s2372_s3] sm:$0x1] }
 0x164   :  { %v1283_v5 = vadd.f32 %v1765_v60, %v1186_v0  ;;  %v1189_v40 = vadd.f32 %v1704_v1, %v2284_v22 }
 0x166   :  { %1315 = vst [vmem:[%s2374_s2 + $0x50] sm:$0xff] %v1283_v5  ;;  %v1331_v7 = vadd.f32 %v1330_v4, %v1283_v5  ;;  %v1356_v8 = vmul.f32 %v1283_v5, %v1283_v5  ;;  %v1286_v9 = vadd.f32 %v1768_v3, %v1189_v40  ;;  %v1705_v42 = vpop.f32.mrb[56].mxu0  ;;  %v1345_v40 = vld [vmem:[%s2373_s4] sm:$0x1] }
 0x167   :  { %v1769_v10 = vpop.f32.mrb[56].mxu1  ;;  %v1706_v11 = vpop.f32.mrb[57].mxu0 }
 0x168   :  { %v1371_v13 = vadd.f32 %v1370_v63, %v1356_v8  ;;  %1316 = vst [vmem:[%s2374_s2 + $0x58] sm:$0xff] %v1286_v9  ;;  %v1332_v20 = vadd.f32 %v1331_v7, %v1286_v9  ;;  %v1357_v15 = vmul.f32 %v1286_v9, %v1286_v9  ;;  %v1707_v16 = vadd.f32 %v1706_v11, %v1705_v42  ;;  %v1770_v12 = vpop.f32.mrb[57].mxu1  ;;  %v1708_v22 = vpop.f32.mrb[58].mxu0 }
 0x169   :  { %v1771_v17 = vadd.f32 %v1770_v12, %v1769_v10  ;;  %v1772_v18 = vpop.f32.mrb[58].mxu1  ;;  %v1709_v19 = vpop.f32.mrb[59].mxu0 }
 0x16a   :  { %v1372_v21 = vadd.f32 %v1371_v13, %v1357_v15  ;;  %v1194_v23 = vadd.f32 %v1707_v16, %v2286_v36  ;;  %v1710_v14 = vadd.f32 %v1709_v19, %v1708_v22  ;;  %v1773_v24 = vpop.f32.mrb[59].mxu1 }
 0x16b   :  { %v1774_v25 = vadd.f32 %v1773_v24, %v1772_v18 }
 0x16c   :  { %v1291_v27 = vadd.f32 %v1771_v17, %v1194_v23  ;;  %v1197_v29 = vadd.f32 %v1710_v14, %v2288_v38 }
 0x16e   :  { %1317 = vst [vmem:[%s2374_s2 + $0x60] sm:$0xff] %v1291_v27  ;;  %v1333_v30 = vadd.f32 %v1332_v20, %v1291_v27  ;;  %v1358_v54 = vmul.f32 %v1291_v27, %v1291_v27  ;;  %v1294_v31 = vadd.f32 %v1774_v25, %v1197_v29  ;;  %v1711_v32 = vpop.f32.mrb[60].mxu0 }
 0x16f   :  { %v1775_v33 = vpop.f32.mrb[60].mxu1  ;;  %v1712_v56 = vpop.f32.mrb[61].mxu0 }
 0x170   :  { %v1373_v34 = vadd.f32 %v1372_v21, %v1358_v54  ;;  %1318 = vst [vmem:[%s2374_s2 + $0x68] sm:$0xff] %v1294_v31  ;;  %v1334_v36 = vadd.f32 %v1333_v30, %v1294_v31  ;;  %v1359_v35 = vmul.f32 %v1294_v31, %v1294_v31  ;;  %v1713_v37 = vadd.f32 %v1712_v56, %v1711_v32  ;;  %v1776_v39 = vpop.f32.mrb[61].mxu1  ;;  %v1714_v38 = vpop.f32.mrb[62].mxu0 }
 0x171   :  { %v1777_v41 = vadd.f32 %v1776_v39, %v1775_v33  ;;  %v1778_v43 = vpop.f32.mrb[62].mxu1  ;;  %v1715_v44 = vpop.f32.mrb[63].mxu0 }
 0x172   :  { %v1374_v26 = vadd.f32 %v1373_v34, %v1359_v35  ;;  %v1202_v45 = vadd.f32 %v1713_v37, %v2290_v52  ;;  %v1716_v46 = vadd.f32 %v1715_v44, %v1714_v38  ;;  %v1779_v47 = vpop.f32.mrb[63].mxu1 }
 0x173   :  { %v1780_v28 = vadd.f32 %v1779_v47, %v1778_v43 }
 0x174   :  { %v1299_v48 = vadd.f32 %v1777_v41, %v1202_v45  ;;  %v1205_v49 = vadd.f32 %v1716_v46, %v2292_v55 }
 0x176   :  { %1319 = vst [vmem:[%s2374_s2 + $0x70] sm:$0xff] %v1299_v48  ;;  %v1335_v50 = vadd.f32 %v1334_v36, %v1299_v48  ;;  %v1360_v51 = vmul.f32 %v1299_v48, %v1299_v48  ;;  %v1302_v53 = vadd.f32 %v1780_v28, %v1205_v49 }
 0x178   :  { %v1375_v4 = vadd.f32 %v1374_v26, %v1360_v51  ;;  %1320 = vst [vmem:[%s2374_s2 + $0x78] sm:$0xff] %v1302_v53  ;;  %v1336_v57 = vadd.f32 %v1335_v50, %v1302_v53  ;;  %v1361_v52 = vmul.f32 %v1302_v53, %v1302_v53 }
 0x17a   :  { %v1337_v58 = vrot.slane %v1336_v57, 4  ;;  %v1376_v59 = vadd.f32 %v1375_v4, %v1361_v52 }
 0x17c   :  { %v1338_v6 = vadd.f32 %v1337_v58, %v1336_v57  ;;  %v1377_v60 = vrot.slane %v1376_v59, 4 }
 0x17e   :  { %v1339_v61 = vrot.slane %v1338_v6, 2  ;;  %v1378_v55 = vadd.f32 %v1377_v60, %v1376_v59 }
 0x180   :  { %v1340_v62 = vadd.f32 %v1339_v61, %v1338_v6  ;;  %v1379_v63 = vrot.slane %v1378_v55, 2 }
 0x182   :  { %v1341_v0 = vrot.slane %v1340_v62, 1  ;;  %v1380_v1 = vadd.f32 %v1379_v63, %v1378_v55 }
 0x184   :  { %v1342_v3 = vadd.f32 %v1341_v0, %v1340_v62  ;;  %v1381_v5 = vrot.slane %v1380_v1, 1 }
 0x186   :  { %v1343_v7 = vadd.f32 %v1342_v3, %v1321_v2  ;;  %v1382_v8 = vadd.f32 %v1381_v5, %v1380_v1 }
 0x188   :  { %1344 = vst [vmem:[%s2372_s3] sm:$0x1] %v1343_v7  ;;  %v1383_v9 = vadd.f32 %v1382_v8, %v1345_v40 }
 0x18a   :  { %1384 = vst [vmem:[%s2373_s4] sm:$0x1] %v1383_v9 }

// kernel: nlayer_discriminator_forward.12
= control target key start
LH: loop header
LB: loop body
LE: loop exit
PB: predicated region body
PF: predicated region fallthrough
CT: control target
= control target key end

     0   :  { %v24_v0 = vlaneseq  ;;  %s188_s1 = inlined_call_operand.vmem [shape: f32[1,256], index: 1, kind: input, shape index: {}]   ;;  %s189_s2 = inlined_call_operand.vmem [shape: f32[1,256], index: 2, kind: input, shape index: {}]   ;;  %s190_s0 = inlined_call_operand.vmem [shape: f32[32,256], index: 0, kind: input, shape index: {}]   ;;  %s191_s3 = inlined_call_operand.vmem [shape: bf16[32,256], index: 3, kind: output, shape index: {}]  }
   0x1   :  { %v22_v2 = vld [vmem:[%s188_s1] sm:$0x3]  ;;  %v15_v5 = vld [vmem:[%s190_s0 + $0x8] sm:$0xff]  ;;  %v16_v8 = vld [vmem:[%s190_s0 + $0x10] sm:$0xff] }
   0x2   :  { %v25_v1 = vshrl.u32 %v24_v0, 7  ;;  %v42_v3 = vld [vmem:[%s189_s2] sm:$0x3]  ;;  %v17_v9 = vld [vmem:[%s190_s0 + $0x18] sm:$0xff]  ;;  %v19_v15 = vld [vmem:[%s190_s0 + $0x28] sm:$0xff] }
   0x3   :  { %v14_v4 = vld [vmem:[%s190_s0] sm:$0xff]  ;;  %v20_v16 = vld [vmem:[%s190_s0 + $0x30] sm:$0xff]  ;;  %v21_v17 = vld [vmem:[%s190_s0 + $0x38] sm:$0xff] }
   0x4   :  { %v26_v6 = vsub.s32 0, %v25_v1  ;;  %v30_v7 = vsub.s32 1, %v25_v1  ;;  %v18_v10 = vld [vmem:[%s190_s0 + $0x20] sm:$0xff] }
   0x6   :  { %v27_v11 = vrot.slane %v22_v2, %v26_v6  ;;  %v31_v12 = vrot.slane %v22_v2, %v30_v7  ;;  %v47_v13 = vrot.slane %v42_v3, %v26_v6  ;;  %v51_v14 = vrot.slane %v42_v3, %v30_v7 }
   0x8   :  { %v34_v18 = vmul.f32 %v27_v11, %v14_v4  ;;  %v35_v19 = vmul.f32 %v31_v12, %v15_v5  ;;  %v36_v20 = vmul.f32 %v27_v11, %v16_v8  ;;  %v37_v21 = vmul.f32 %v31_v12, %v17_v9 }
   0x9   :  { %v38_v22 = vmul.f32 %v27_v11, %v18_v10  ;;  %v39_v23 = vmul.f32 %v31_v12, %v19_v15  ;;  %v40_v24 = vmul.f32 %v27_v11, %v20_v16  ;;  %v41_v25 = vmul.f32 %v31_v12, %v21_v17 }
   0xa   :  { %v54_v26 = vadd.f32 %v47_v13, %v34_v18  ;;  %v55_v27 = vadd.f32 %v51_v14, %v35_v19  ;;  %v56_v28 = vadd.f32 %v47_v13, %v36_v20  ;;  %v57_v29 = vadd.f32 %v51_v14, %v37_v21 }
   0xb   :  { %v58_v30 = vadd.f32 %v47_v13, %v38_v22  ;;  %v59_v31 = vadd.f32 %v51_v14, %v39_v23  ;;  %v60_v32 = vadd.f32 %v47_v13, %v40_v24  ;;  %v61_v33 = vadd.f32 %v51_v14, %v41_v25 }
   0xc   :  { %vm62_vm0 = vcmp.ge.f32.partialorder %v54_v26, 0.0  ;;  %vm63_vm1 = vcmp.ge.f32.partialorder %v55_v27, 0.0  ;;  %v70_v34 = vmul.f32 0.2, %v54_v26  ;;  %v71_v35 = vmul.f32 0.2, %v55_v27 }
   0xd   :  { %vm64_vm2 = vcmp.ge.f32.partialorder %v56_v28, 0.0  ;;  %vm65_vm3 = vcmp.ge.f32.partialorder %v57_v29, 0.0  ;;  %v72_v36 = vmul.f32 0.2, %v56_v28  ;;  %v73_v37 = vmul.f32 0.2, %v57_v29 }
   0xe   :  { %v78_v38 = vsel %vm62_vm0, %v54_v26, %v70_v34  ;;  %v79_v39 = vsel %vm63_vm1, %v55_v27, %v71_v35  ;;  %vm66_vm4 = vcmp.ge.f32.partialorder %v58_v30, 0.0  ;;  %vm67_vm5 = vcmp.ge.f32.partialorder %v59_v31, 0.0 }
   0xf   :  { %v122_v40 = vpack.c.bf16 %v79_v39, %v78_v38  ;;  %v80_v41 = vsel %vm64_vm2, %v56_v28, %v72_v36  ;;  %v81_v42 = vsel %vm65_vm3, %v57_v29, %v73_v37  ;;  %v74_v43 = vmul.f32 0.2, %v58_v30 }
  0x10   :  { %v123_v44 = vpack.c.bf16 %v81_v42, %v80_v41  ;;  %v75_v45 = vmul.f32 0.2, %v59_v31  ;;  %vm68_vm6 = vcmp.ge.f32.partialorder %v60_v32, 0.0  ;;  %vm69_vm7 = vcmp.ge.f32.partialorder %v61_v33, 0.0 }
  0x11   :  { %110 = vst [vmem:[%s191_s3] sm:$0xff] %v122_v40  ;;  %v82_v46 = vsel %vm66_vm4, %v58_v30, %v74_v43  ;;  %v76_v47 = vmul.f32 0.2, %v60_v32  ;;  %v77_v48 = vmul.f32 0.2, %v61_v33 }
  0x12   :  { %111 = vst [vmem:[%s191_s3 + $0x8] sm:$0xff] %v123_v44  ;;  %v83_v49 = vsel %vm67_vm5, %v59_v31, %v75_v45 }
  0x13   :  { %v124_v50 = vpack.c.bf16 %v83_v49, %v82_v46  ;;  %v84_v51 = vsel %vm68_vm6, %v60_v32, %v76_v47  ;;  %v85_v52 = vsel %vm69_vm7, %v61_v33, %v77_v48 }
  0x14   :  { %v125_v53 = vpack.c.bf16 %v85_v52, %v84_v51 }
  0x15   :  { %112 = vst [vmem:[%s191_s3 + $0x10] sm:$0xff] %v124_v50 }
  0x16   :  { %113 = vst [vmem:[%s191_s3 + $0x18] sm:$0xff] %v125_v53 }

// kernel: nlayer_discriminator_forward.11
= control target key start
LH: loop header
LB: loop body
LE: loop exit
PB: predicated region body
PF: predicated region fallthrough
CT: control target
= control target key end

     0   :  { %s4011_s1 = inlined_call_operand.vmem [shape: bf16[2048,256], index: 1, kind: input, shape index: {}]   ;;  %s4012_s0 = inlined_call_operand.vmem [shape: bf16[32,2048], index: 0, kind: input, shape index: {}]   ;;  %s4013_s3 = inlined_call_operand.vmem [shape: f32[1,256], index: 3, kind: output, shape index: {1}]   ;;  %s4014_s4 = inlined_call_operand.vmem [shape: f32[1,256], index: 4, kind: output, shape index: {2}]   ;;  %s4015_s2 = inlined_call_operand.vmem [shape: f32[32,256], index: 2, kind: output, shape index: {0}]  }
   0x1   :  { %v2632_v0 = vld [vmem:[%s4011_s1 + $0x4] ss:$8 sps:$4 sm:$0xff]   ;;  %v2636_v2 = vld [vmem:[%s4011_s1] ss:$8 sps:$4 sm:$0xff]   ;;  %v2638_v4 = vld [vmem:[%s4011_s1 + $0x14] ss:$8 sps:$4 sm:$0xff]  }
   0x2   :  { %v2634_v1 = vld [vmem:[%s4011_s1 + $0x404] ss:$8 sps:$4 sm:$0xff]   ;;  %1752 = vmatprep.subr.bf16.mxu1 %v2632_v0  ;;  %v2637_v3 = vld [vmem:[%s4011_s1 + $0x400] ss:$8 sps:$4 sm:$0xff]   ;;  %v2640_v5 = vld [vmem:[%s4011_s1 + $0x414] ss:$8 sps:$4 sm:$0xff]  }
   0x3   :  { %1964 = vmatprep.subr.bf16.mxu0 %v2634_v1  ;;  %1753 = vmatpush1.bf16.msra.mxu1 %v2636_v2  ;;  %v2642_v6 = vld [vmem:[%s4011_s1 + $0x10] ss:$8 sps:$4 sm:$0xff]   ;;  %v2644_v8 = vld [vmem:[%s4011_s1 + $0x24] ss:$8 sps:$4 sm:$0xff]   ;;  %v2648_v10 = vld [vmem:[%s4011_s1 + $0x20] ss:$8 sps:$4 sm:$0xff]  }
   0x4   :  { %1965 = vmatpush1.bf16.msra.mxu0 %v2637_v3  ;;  %1754 = vmatprep.subr.bf16.mxu1 %v2638_v4  ;;  %v2643_v7 = vld [vmem:[%s4011_s1 + $0x410] ss:$8 sps:$4 sm:$0xff]   ;;  %v2646_v9 = vld [vmem:[%s4011_s1 + $0x424] ss:$8 sps:$4 sm:$0xff]   ;;  %v2649_v11 = vld [vmem:[%s4011_s1 + $0x420] ss:$8 sps:$4 sm:$0xff]  }
   0x5   :  { %1966 = vmatprep.subr.bf16.mxu0 %v2640_v5  ;;  %v2650_v12 = vld [vmem:[%s4011_s1 + $0x34] ss:$8 sps:$4 sm:$0xff]   ;;  %v2654_v14 = vld [vmem:[%s4011_s1 + $0x30] ss:$8 sps:$4 sm:$0xff]   ;;  %v2656_v16 = vld [vmem:[%s4011_s1 + $0x44] ss:$8 sps:$4 sm:$0xff]  }
   0x6   :  { %v2652_v13 = vld [vmem:[%s4011_s1 + $0x434] ss:$8 sps:$4 sm:$0xff]   ;;  %v2655_v15 = vld [vmem:[%s4011_s1 + $0x430] ss:$8 sps:$4 sm:$0xff]   ;;  %v2658_v17 = vld [vmem:[%s4011_s1 + $0x444] ss:$8 sps:$4 sm:$0xff]  }
   0x7   :  { %1755 = vmatpush1.bf16.msra.mxu1 %v2642_v6  ;;  %v2660_v18 = vld [vmem:[%s4011_s1 + $0x40] ss:$8 sps:$4 sm:$0xff]   ;;  %v2662_v20 = vld [vmem:[%s4011_s1 + $0x54] ss:$8 sps:$4 sm:$0xff]   ;;  %v2666_v22 = vld [vmem:[%s4011_s1 + $0x50] ss:$8 sps:$4 sm:$0xff]  }
   0x8   :  { %1967 = vmatpush1.bf16.msra.mxu0 %v2643_v7  ;;  %1756 = vmatprep.subr.bf16.mxu1 %v2644_v8  ;;  %v2661_v19 = vld [vmem:[%s4011_s1 + $0x440] ss:$8 sps:$4 sm:$0xff]   ;;  %v2664_v21 = vld [vmem:[%s4011_s1 + $0x454] ss:$8 sps:$4 sm:$0xff]   ;;  %v2667_v23 = vld [vmem:[%s4011_s1 + $0x450] ss:$8 sps:$4 sm:$0xff]  }
   0x9   :  { %1968 = vmatprep.subr.bf16.mxu0 %v2646_v9  ;;  %v2668_v24 = vld [vmem:[%s4011_s1 + $0x64] ss:$8 sps:$4 sm:$0xff]   ;;  %v2672_v26 = vld [vmem:[%s4011_s1 + $0x60] ss:$8 sps:$4 sm:$0xff]   ;;  %v2674_v28 = vld [vmem:[%s4011_s1 + $0x74] ss:$8 sps:$4 sm:$0xff]  }
   0xa   :  { %v2670_v25 = vld [vmem:[%s4011_s1 + $0x464] ss:$8 sps:$4 sm:$0xff]   ;;  %v2673_v27 = vld [vmem:[%s4011_s1 + $0x460] ss:$8 sps:$4 sm:$0xff]   ;;  %v2676_v29 = vld [vmem:[%s4011_s1 + $0x474] ss:$8 sps:$4 sm:$0xff]  }
   0xb   :  { %1757 = vmatpush1.bf16.msra.mxu1 %v2648_v10  ;;  %v2678_v30 = vld [vmem:[%s4011_s1 + $0x70] ss:$8 sps:$4 sm:$0xff]   ;;  %v2680_v32 = vld [vmem:[%s4011_s1 + $0x84] ss:$8 sps:$4 sm:$0xff]   ;;  %v2684_v34 = vld [vmem:[%s4011_s1 + $0x80] ss:$8 sps:$4 sm:$0xff]  }
   0xc   :  { %1969 = vmatpush1.bf16.msra.mxu0 %v2649_v11  ;;  %1758 = vmatprep.subr.bf16.mxu1 %v2650_v12  ;;  %v2679_v31 = vld [vmem:[%s4011_s1 + $0x470] ss:$8 sps:$4 sm:$0xff]   ;;  %v2682_v33 = vld [vmem:[%s4011_s1 + $0x484] ss:$8 sps:$4 sm:$0xff]   ;;  %v2685_v35 = vld [vmem:[%s4011_s1 + $0x480] ss:$8 sps:$4 sm:$0xff]  }
   0xd   :  { %1970 = vmatprep.subr.bf16.mxu0 %v2652_v13  ;;  %v2686_v36 = vld [vmem:[%s4011_s1 + $0x94] ss:$8 sps:$4 sm:$0xff]   ;;  %v2690_v38 = vld [vmem:[%s4011_s1 + $0x90] ss:$8 sps:$4 sm:$0xff]   ;;  %v2692_v40 = vld [vmem:[%s4011_s1 + $0xa4] ss:$8 sps:$4 sm:$0xff]  }
   0xe   :  { %v2688_v37 = vld [vmem:[%s4011_s1 + $0x494] ss:$8 sps:$4 sm:$0xff]   ;;  %v2691_v39 = vld [vmem:[%s4011_s1 + $0x490] ss:$8 sps:$4 sm:$0xff]   ;;  %v2694_v41 = vld [vmem:[%s4011_s1 + $0x4a4] ss:$8 sps:$4 sm:$0xff]  }
   0xf   :  { %1759 = vmatpush1.bf16.msra.mxu1 %v2654_v14  ;;  %v2696_v42 = vld [vmem:[%s4011_s1 + $0xa0] ss:$8 sps:$4 sm:$0xff]   ;;  %v2698_v44 = vld [vmem:[%s4011_s1 + $0xb4] ss:$8 sps:$4 sm:$0xff]   ;;  %v2702_v46 = vld [vmem:[%s4011_s1 + $0xb0] ss:$8 sps:$4 sm:$0xff]  }
  0x10   :  { %1971 = vmatpush1.bf16.msra.mxu0 %v2655_v15  ;;  %1760 = vmatprep.subr.bf16.mxu1 %v2656_v16  ;;  %v2697_v43 = vld [vmem:[%s4011_s1 + $0x4a0] ss:$8 sps:$4 sm:$0xff]   ;;  %v2700_v45 = vld [vmem:[%s4011_s1 + $0x4b4] ss:$8 sps:$4 sm:$0xff]   ;;  %v2703_v47 = vld [vmem:[%s4011_s1 + $0x4b0] ss:$8 sps:$4 sm:$0xff]  }
  0x11   :  { %1972 = vmatprep.subr.bf16.mxu0 %v2658_v17  ;;  %v24_v48 = vld [vmem:[%s4012_s0] sm:$0xff]  ;;  %v2710_v58 = vld [vmem:[%s4011_s1 + $0xd4] ss:$8 sps:$4 sm:$0xff]   ;;  %v2714_v60 = vld [vmem:[%s4011_s1 + $0xd0] ss:$8 sps:$4 sm:$0xff]  }
  0x12   :  { %v32_v49 = vld [vmem:[%s4012_s0 + $0x40] sm:$0xff]  ;;  %v2712_v59 = vld [vmem:[%s4011_s1 + $0x4d4] ss:$8 sps:$4 sm:$0xff]   ;;  %v2715_v61 = vld [vmem:[%s4011_s1 + $0x4d0] ss:$8 sps:$4 sm:$0xff]  }
  0x13   :  { %1761 = vmatpush1.bf16.msra.mxu1 %v2660_v18  ;;  %v2704_v50 = vld [vmem:[%s4011_s1 + $0xc4] ss:$8 sps:$4 sm:$0xff]   ;;  %v2287_v52 = vcombine.high %v24_v48, %v32_v49  ;;  %v2708_v56 = vld [vmem:[%s4011_s1 + $0xc0] ss:$8 sps:$4 sm:$0xff]   ;;  %v2722_v2 = vld [vmem:[%s4011_s1 + $0xf4] ss:$8 sps:$4 sm:$0xff]   ;;  %v2286_v8 = vcombine.low %v24_v48, %v32_v49 }
  0x14   :  { %1973 = vmatpush1.bf16.msra.mxu0 %v2661_v19  ;;  %1762 = vmatprep.subr.bf16.mxu1 %v2662_v20  ;;  %v2706_v51 = vld [vmem:[%s4011_s1 + $0x4c4] ss:$8 sps:$4 sm:$0xff]   ;;  %v2709_v57 = vld [vmem:[%s4011_s1 + $0x4c0] ss:$8 sps:$4 sm:$0xff]   ;;  %v2724_v3 = vld [vmem:[%s4011_s1 + $0x4f4] ss:$8 sps:$4 sm:$0xff]  }
  0x15   :  { %1974 = vmatprep.subr.bf16.mxu0 %v2664_v21  ;;  %v28_v53 = vld [vmem:[%s4012_s0 + $0x20] sm:$0xff]  ;;  %1784 = vmatprep.mubr.bf16.mxu1 %v2287_v52  ;;  %v2726_v4 = vld [vmem:[%s4011_s1 + $0xf0] ss:$8 sps:$4 sm:$0xff]   ;;  %v2736_v12 = vld [vmem:[%s4011_s1 + $0x114] ss:$8 sps:$4 sm:$0xff]  }
  0x16   :  { %v36_v54 = vld [vmem:[%s4012_s0 + $0x60] sm:$0xff]  ;;  %v2727_v5 = vld [vmem:[%s4011_s1 + $0x4f0] ss:$8 sps:$4 sm:$0xff]   ;;  %v2739_v13 = vld [vmem:[%s4011_s1 + $0x514] ss:$8 sps:$4 sm:$0xff]  }
  0x17   :  { %1763 = vmatpush1.bf16.msra.mxu1 %v2666_v22  ;;  %v2295_v55 = vcombine.high %v28_v53, %v36_v54  ;;  %v2716_v62 = vld [vmem:[%s4011_s1 + $0xe4] ss:$8 sps:$4 sm:$0xff]   ;;  %v2720_v0 = vld [vmem:[%s4011_s1 + $0xe0] ss:$8 sps:$4 sm:$0xff]   ;;  %v2294_v10 = vcombine.low %v28_v53, %v36_v54  ;;  %v2734_v14 = vld [vmem:[%s4011_s1 + $0x110] ss:$8 sps:$4 sm:$0xff]  }
  0x18   :  { %1975 = vmatpush1.bf16.msra.mxu0 %v2667_v23  ;;  %1764 = vmatprep.subr.bf16.mxu1 %v2668_v24  ;;  %v2718_v63 = vld [vmem:[%s4011_s1 + $0x4e4] ss:$8 sps:$4 sm:$0xff]   ;;  %v2721_v1 = vld [vmem:[%s4011_s1 + $0x4e0] ss:$8 sps:$4 sm:$0xff]   ;;  %v2737_v15 = vld [vmem:[%s4011_s1 + $0x510] ss:$8 sps:$4 sm:$0xff]  }
  0x19   :  { %1976 = vmatprep.subr.bf16.mxu0 %v2670_v25  ;;  %1996 = vmatprep.mubr.bf16.mxu0 %v2295_v55  ;;  %v2730_v6 = vld [vmem:[%s4011_s1 + $0x104] ss:$8 sps:$4 sm:$0xff]   ;;  %v2728_v9 = vld [vmem:[%s4011_s1 + $0x100] ss:$8 sps:$4 sm:$0xff]   ;;  %v2748_v20 = vld [vmem:[%s4011_s1 + $0x134] ss:$8 sps:$4 sm:$0xff]  }
  0x1a   :  { %v2733_v7 = vld [vmem:[%s4011_s1 + $0x504] ss:$8 sps:$4 sm:$0xff]   ;;  %v2731_v11 = vld [vmem:[%s4011_s1 + $0x500] ss:$8 sps:$4 sm:$0xff]   ;;  %v2751_v21 = vld [vmem:[%s4011_s1 + $0x534] ss:$8 sps:$4 sm:$0xff]  }
  0x1b   :  { %1765 = vmatpush1.bf16.msra.mxu1 %v2672_v26  ;;  %v2742_v16 = vld [vmem:[%s4011_s1 + $0x124] ss:$8 sps:$4 sm:$0xff]   ;;  %v2740_v18 = vld [vmem:[%s4011_s1 + $0x120] ss:$8 sps:$4 sm:$0xff]   ;;  %v2746_v22 = vld [vmem:[%s4011_s1 + $0x130] ss:$8 sps:$4 sm:$0xff]  }
  0x1c   :  { %1977 = vmatpush1.bf16.msra.mxu0 %v2673_v27  ;;  %1766 = vmatprep.subr.bf16.mxu1 %v2674_v28  ;;  %v2745_v17 = vld [vmem:[%s4011_s1 + $0x524] ss:$8 sps:$4 sm:$0xff]   ;;  %v2743_v19 = vld [vmem:[%s4011_s1 + $0x520] ss:$8 sps:$4 sm:$0xff]   ;;  %v2749_v23 = vld [vmem:[%s4011_s1 + $0x530] ss:$8 sps:$4 sm:$0xff]  }
  0x1d   :  { %1978 = vmatprep.subr.bf16.mxu0 %v2676_v29  ;;  %v2754_v24 = vld [vmem:[%s4011_s1 + $0x144] ss:$8 sps:$4 sm:$0xff]   ;;  %v2752_v26 = vld [vmem:[%s4011_s1 + $0x140] ss:$8 sps:$4 sm:$0xff]   ;;  %v2760_v28 = vld [vmem:[%s4011_s1 + $0x154] ss:$8 sps:$4 sm:$0xff]  }
  0x1e   :  { %v2757_v25 = vld [vmem:[%s4011_s1 + $0x544] ss:$8 sps:$4 sm:$0xff]   ;;  %v2755_v27 = vld [vmem:[%s4011_s1 + $0x540] ss:$8 sps:$4 sm:$0xff]   ;;  %v2763_v29 = vld [vmem:[%s4011_s1 + $0x554] ss:$8 sps:$4 sm:$0xff]  }
  0x1f   :  { %1767 = vmatpush1.bf16.msra.mxu1 %v2678_v30  ;;  %v40_v30 = vld [vmem:[%s4012_s0 + $0x80] sm:$0xff]  ;;  %v3364_v49 = vld [vmem:[%s4012_s0 + $0x28] sm:$0xff]  ;;  %v2773_v52 = vld [vmem:[%s4011_s1 + $0x570] ss:$8 sps:$4 sm:$0xff]  }
  0x20   :  { %1979 = vmatpush1.bf16.msra.mxu0 %v2679_v31  ;;  %1768 = vmatprep.subr.bf16.mxu1 %v2680_v32  ;;  %v48_v31 = vld [vmem:[%s4012_s0 + $0xc0] sm:$0xff]  ;;  %v2758_v32 = vld [vmem:[%s4011_s1 + $0x150] ss:$8 sps:$4 sm:$0xff]  }
  0x21   :  { %1980 = vmatprep.subr.bf16.mxu0 %v2682_v33  ;;  %v2303_v33 = vcombine.high %v40_v30, %v48_v31  ;;  %v2778_v54 = vld [vmem:[%s4011_s1 + $0x184] ss:$8 sps:$4 sm:$0xff]  }
  0x22   :  { %v2781_v55 = vld [vmem:[%s4011_s1 + $0x584] ss:$8 sps:$4 sm:$0xff]  }
  0x23   :  { %1769 = vmatpush1.bf16.msra.mxu1 %v2684_v34  ;;  %v2761_v34 = vld [vmem:[%s4011_s1 + $0x550] ss:$8 sps:$4 sm:$0xff]  }
  0x24   :  { %1981 = vmatpush1.bf16.msra.mxu0 %v2685_v35  ;;  %1770 = vmatprep.subr.bf16.mxu1 %v2686_v36  ;;  %v44_v35 = vld [vmem:[%s4012_s0 + $0xa0] sm:$0xff] }
  0x25   :  { %1982 = vmatprep.subr.bf16.mxu0 %v2688_v37  ;;  %v52_v36 = vld [vmem:[%s4012_s0 + $0xe0] sm:$0xff]  ;;  %v2302_v37 = vcombine.low %v40_v30, %v48_v31  ;;  %v2832_v30 = vld [vmem:[%s4011_s1 + $0x214] ss:$8 sps:$4 sm:$0xff]  }
  0x26   :  { %v2835_v31 = vld [vmem:[%s4011_s1 + $0x614] ss:$8 sps:$4 sm:$0xff]  }
  0x27   :  { %1771 = vmatpush1.bf16.msra.mxu1 %v2690_v38  ;;  %v2766_v38 = vld [vmem:[%s4011_s1 + $0x164] ss:$8 sps:$4 sm:$0xff]  }
  0x28   :  { %1983 = vmatpush1.bf16.msra.mxu0 %v2691_v39  ;;  %1772 = vmatprep.subr.bf16.mxu1 %v2692_v40  ;;  %v2311_v39 = vcombine.high %v44_v35, %v52_v36  ;;  %v2310_v40 = vcombine.low %v44_v35, %v52_v36  ;;  %v2830_v36 = vld [vmem:[%s4011_s1 + $0x210] ss:$8 sps:$4 sm:$0xff]  }
  0x29   :  { %1984 = vmatprep.subr.bf16.mxu0 %v2694_v41  ;;  %v2769_v41 = vld [vmem:[%s4011_s1 + $0x564] ss:$8 sps:$4 sm:$0xff]  }
  0x2b   :  { %1773 = vmatpush1.bf16.msra.mxu1 %v2696_v42  ;;  %v2764_v42 = vld [vmem:[%s4011_s1 + $0x160] ss:$8 sps:$4 sm:$0xff]  }
  0x2c   :  { %1985 = vmatpush1.bf16.msra.mxu0 %v2697_v43  ;;  %1774 = vmatprep.subr.bf16.mxu1 %v2698_v44  ;;  %v2767_v43 = vld [vmem:[%s4011_s1 + $0x560] ss:$8 sps:$4 sm:$0xff]  }
  0x2d   :  { %1986 = vmatprep.subr.bf16.mxu0 %v2700_v45  ;;  %v3346_v44 = vld [vmem:[%s4012_s0 + $0x8] sm:$0xff] }
  0x2e   :  { %v3351_v45 = vld [vmem:[%s4012_s0 + $0x48] sm:$0xff] }
  0x2f   :  { %1775 = vmatpush1.bf16.msra.mxu1 %v2702_v46  ;;  %v2772_v46 = vld [vmem:[%s4011_s1 + $0x174] ss:$8 sps:$4 sm:$0xff]   ;;  %v2289_v48 = vcombine.high %v3346_v44, %v3351_v45 }
  0x30   :  { %1987 = vmatpush1.bf16.msra.mxu0 %v2703_v47  ;;  %1776 = vmatprep.subr.bf16.mxu1 %v2704_v50  ;;  %v2775_v47 = vld [vmem:[%s4011_s1 + $0x574] ss:$8 sps:$4 sm:$0xff]   ;;  %v3369_v50 = vld [vmem:[%s4012_s0 + $0x68] sm:$0xff] }
  0x31   :  { %1988 = vmatprep.subr.bf16.mxu0 %v2706_v51  ;;  %v2770_v51 = vld [vmem:[%s4011_s1 + $0x170] ss:$8 sps:$4 sm:$0xff]   ;;  %v2297_v53 = vcombine.high %v3364_v49, %v3369_v50 }
  0x33   :  { %1777 = vmatpush1.bf16.msra.mxu1 %v2708_v56  ;;  %v2776_v56 = vld [vmem:[%s4011_s1 + $0x180] ss:$8 sps:$4 sm:$0xff]  }
  0x34   :  { %1989 = vmatpush1.bf16.msra.mxu0 %v2709_v57  ;;  %1778 = vmatprep.subr.bf16.mxu1 %v2710_v58  ;;  %v2779_v57 = vld [vmem:[%s4011_s1 + $0x580] ss:$8 sps:$4 sm:$0xff]   ;;  %v2784_v58 = vld [vmem:[%s4011_s1 + $0x194] ss:$8 sps:$4 sm:$0xff]  }
  0x35   :  { %1990 = vmatprep.subr.bf16.mxu0 %v2712_v59  ;;  %v2787_v59 = vld [vmem:[%s4011_s1 + $0x594] ss:$8 sps:$4 sm:$0xff]  }
  0x37   :  { %1779 = vmatpush1.bf16.msra.mxu1 %v2714_v60  ;;  %v2782_v60 = vld [vmem:[%s4011_s1 + $0x190] ss:$8 sps:$4 sm:$0xff]  }
  0x38   :  { %1991 = vmatpush1.bf16.msra.mxu0 %v2715_v61  ;;  %1780 = vmatprep.subr.bf16.mxu1 %v2716_v62  ;;  %v2785_v61 = vld [vmem:[%s4011_s1 + $0x590] ss:$8 sps:$4 sm:$0xff]   ;;  %v2790_v62 = vld [vmem:[%s4011_s1 + $0x1a4] ss:$8 sps:$4 sm:$0xff]  }
  0x39   :  { %1992 = vmatprep.subr.bf16.mxu0 %v2718_v63  ;;  %v2793_v63 = vld [vmem:[%s4011_s1 + $0x5a4] ss:$8 sps:$4 sm:$0xff]  }
  0x3b   :  { %1781 = vmatpush1.bf16.msra.mxu1 %v2720_v0  ;;  %v2788_v0 = vld [vmem:[%s4011_s1 + $0x1a0] ss:$8 sps:$4 sm:$0xff]  }
  0x3c   :  { %1993 = vmatpush1.bf16.msra.mxu0 %v2721_v1  ;;  %1782 = vmatprep.subr.bf16.mxu1 %v2722_v2  ;;  %v2791_v1 = vld [vmem:[%s4011_s1 + $0x5a0] ss:$8 sps:$4 sm:$0xff]   ;;  %v2796_v2 = vld [vmem:[%s4011_s1 + $0x1b4] ss:$8 sps:$4 sm:$0xff]  }
  0x3d   :  { %1994 = vmatprep.subr.bf16.mxu0 %v2724_v3  ;;  %v2799_v3 = vld [vmem:[%s4011_s1 + $0x5b4] ss:$8 sps:$4 sm:$0xff]  }
  0x3f   :  { %1783 = vmatpush1.bf16.msra.mxu1 %v2726_v4  ;;  %v2794_v4 = vld [vmem:[%s4011_s1 + $0x1b0] ss:$8 sps:$4 sm:$0xff]  }
  0x40   :  { %1995 = vmatpush1.bf16.msra.mxu0 %v2727_v5  ;;  %1805 = vmatprep.subr.bf16.mxu1 %v2730_v6  ;;  %v2797_v5 = vld [vmem:[%s4011_s1 + $0x5b0] ss:$8 sps:$4 sm:$0xff]   ;;  %v2802_v6 = vld [vmem:[%s4011_s1 + $0x1c4] ss:$8 sps:$4 sm:$0xff]  }
  0x41   :  { %2017 = vmatprep.subr.bf16.mxu0 %v2733_v7  ;;  %v2805_v7 = vld [vmem:[%s4011_s1 + $0x5c4] ss:$8 sps:$4 sm:$0xff]  }
  0x42   :  { %1785 = vmatmul.mubr.bf16.vlgmr.msra.gmra.mrb[0].mxu1 %v2286_v8  ;;  %v2800_v8 = vld [vmem:[%s4011_s1 + $0x1c0] ss:$8 sps:$4 sm:$0xff]  }
  0x43   :  { %1997 = vmatmul.mubr.bf16.vlgmr.msra.gmra.mrb[0].mxu0 %v2294_v10  ;;  %1806 = vmatpush1.bf16.msra.mxu1 %v2728_v9  ;;  %v2803_v9 = vld [vmem:[%s4011_s1 + $0x5c0] ss:$8 sps:$4 sm:$0xff]   ;;  %v2808_v10 = vld [vmem:[%s4011_s1 + $0x1d4] ss:$8 sps:$4 sm:$0xff]  }
  0x44   :  { %2018 = vmatpush1.bf16.msra.mxu0 %v2731_v11  ;;  %1807 = vmatprep.subr.bf16.mxu1 %v2736_v12  ;;  %v2811_v11 = vld [vmem:[%s4011_s1 + $0x5d4] ss:$8 sps:$4 sm:$0xff]   ;;  %v2806_v12 = vld [vmem:[%s4011_s1 + $0x1d0] ss:$8 sps:$4 sm:$0xff]  }
  0x45   :  { %2019 = vmatprep.subr.bf16.mxu0 %v2739_v13  ;;  %1794 = vmatprep.mubr.bf16.mxu1 %v2303_v33  ;;  %v2809_v13 = vld [vmem:[%s4011_s1 + $0x5d0] ss:$8 sps:$4 sm:$0xff]   ;;  %v53_v33 = vld [vmem:[%s4012_s0 + $0xe8] sm:$0xff] }
  0x46   :  { %2006 = vmatprep.mubr.bf16.mxu0 %v2311_v39  ;;  %v2841_v39 = vld [vmem:[%s4011_s1 + $0x624] ss:$8 sps:$4 sm:$0xff]  }
  0x47   :  { %1808 = vmatpush1.bf16.msra.mxu1 %v2734_v14  ;;  %v2814_v14 = vld [vmem:[%s4011_s1 + $0x1e4] ss:$8 sps:$4 sm:$0xff]  }
  0x48   :  { %2020 = vmatpush1.bf16.msra.mxu0 %v2737_v15  ;;  %1809 = vmatprep.subr.bf16.mxu1 %v2742_v16  ;;  %v2817_v15 = vld [vmem:[%s4011_s1 + $0x5e4] ss:$8 sps:$4 sm:$0xff]   ;;  %v2812_v16 = vld [vmem:[%s4011_s1 + $0x1e0] ss:$8 sps:$4 sm:$0xff]  }
  0x49   :  { %2021 = vmatprep.subr.bf16.mxu0 %v2745_v17  ;;  %v2815_v17 = vld [vmem:[%s4011_s1 + $0x5e0] ss:$8 sps:$4 sm:$0xff]  }
  0x4a   :  { %1795 = vmatmul.mubr.bf16.gmra.mrb[4].mxu1 %v2302_v37  ;;  %v2833_v37 = vld [vmem:[%s4011_s1 + $0x610] ss:$8 sps:$4 sm:$0xff]  }
  0x4b   :  { %1810 = vmatpush1.bf16.msra.mxu1 %v2740_v18  ;;  %2007 = vmatmul.mubr.bf16.gmra.mrb[4].mxu0 %v2310_v40  ;;  %v2820_v18 = vld [vmem:[%s4011_s1 + $0x1f4] ss:$8 sps:$4 sm:$0xff]   ;;  %v2836_v40 = vld [vmem:[%s4011_s1 + $0x220] ss:$8 sps:$4 sm:$0xff]  }
  0x4c   :  { %2022 = vmatpush1.bf16.msra.mxu0 %v2743_v19  ;;  %1811 = vmatprep.subr.bf16.mxu1 %v2748_v20  ;;  %v2823_v19 = vld [vmem:[%s4011_s1 + $0x5f4] ss:$8 sps:$4 sm:$0xff]   ;;  %v2818_v20 = vld [vmem:[%s4011_s1 + $0x1f0] ss:$8 sps:$4 sm:$0xff]  }
  0x4d   :  { %2023 = vmatprep.subr.bf16.mxu0 %v2751_v21  ;;  %1837 = vmatprep.mubr.bf16.mxu1 %v2289_v48  ;;  %v2821_v21 = vld [vmem:[%s4011_s1 + $0x5f0] ss:$8 sps:$4 sm:$0xff]   ;;  %v2844_v48 = vld [vmem:[%s4011_s1 + $0x234] ss:$8 sps:$4 sm:$0xff]  }
  0x4e   :  { %2049 = vmatprep.mubr.bf16.mxu0 %v2297_v53  ;;  %v2845_v53 = vld [vmem:[%s4011_s1 + $0x630] ss:$8 sps:$4 sm:$0xff]  }
  0x4f   :  { %1812 = vmatpush1.bf16.msra.mxu1 %v2746_v22  ;;  %v2826_v22 = vld [vmem:[%s4011_s1 + $0x204] ss:$8 sps:$4 sm:$0xff]  }
  0x50   :  { %2024 = vmatpush1.bf16.msra.mxu0 %v2749_v23  ;;  %1813 = vmatprep.subr.bf16.mxu1 %v2754_v24  ;;  %v2829_v23 = vld [vmem:[%s4011_s1 + $0x604] ss:$8 sps:$4 sm:$0xff]   ;;  %v2824_v24 = vld [vmem:[%s4011_s1 + $0x200] ss:$8 sps:$4 sm:$0xff]  }
  0x51   :  { %2025 = vmatprep.subr.bf16.mxu0 %v2757_v25  ;;  %v2827_v25 = vld [vmem:[%s4011_s1 + $0x600] ss:$8 sps:$4 sm:$0xff]  }
  0x53   :  { %1814 = vmatpush1.bf16.msra.mxu1 %v2752_v26  ;;  %v41_v26 = vld [vmem:[%s4012_s0 + $0x88] sm:$0xff] }
  0x54   :  { %2026 = vmatpush1.bf16.msra.mxu0 %v2755_v27  ;;  %1815 = vmatprep.subr.bf16.mxu1 %v2760_v28  ;;  %v2288_v27 = vcombine.low %v3346_v44, %v3351_v45  ;;  %v2296_v28 = vcombine.low %v3364_v49, %v3369_v50  ;;  %v3535_v45 = vld [vmem:[%s4012_s0 + $0x50] sm:$0xff] }
  0x55   :  { %2027 = vmatprep.subr.bf16.mxu0 %v2763_v29  ;;  %v49_v29 = vld [vmem:[%s4012_s0 + $0xc8] sm:$0xff]  ;;  %v2847_v49 = vld [vmem:[%s4011_s1 + $0x634] ss:$8 sps:$4 sm:$0xff]  }
  0x57   :  { %1816 = vmatpush1.bf16.msra.mxu1 %v2758_v32  ;;  %v45_v32 = vld [vmem:[%s4012_s0 + $0xa8] sm:$0xff] }
  0x58   :  { %2028 = vmatpush1.bf16.msra.mxu0 %v2761_v34  ;;  %1817 = vmatprep.subr.bf16.mxu1 %v2766_v38  ;;  %v2305_v34 = vcombine.high %v41_v26, %v49_v29  ;;  %v2313_v35 = vcombine.high %v45_v32, %v53_v33  ;;  %v2838_v38 = vld [vmem:[%s4011_s1 + $0x224] ss:$8 sps:$4 sm:$0xff]   ;;  %v2312_v44 = vcombine.low %v45_v32, %v53_v33  ;;  %v2908_v32 = vld [vmem:[%s4011_s1 + $0x2e0] ss:$8 sps:$4 sm:$0xff]  }
  0x59   :  { %2029 = vmatprep.subr.bf16.mxu0 %v2769_v41  ;;  %v2839_v41 = vld [vmem:[%s4011_s1 + $0x620] ss:$8 sps:$4 sm:$0xff]  }
  0x5a   :  { %v2911_v33 = vld [vmem:[%s4011_s1 + $0x6e0] ss:$8 sps:$4 sm:$0xff]  }
  0x5b   :  { %1818 = vmatpush1.bf16.msra.mxu1 %v2764_v42  ;;  %v3530_v42 = vld [vmem:[%s4012_s0 + $0x10] sm:$0xff] }
  0x5c   :  { %2030 = vmatpush1.bf16.msra.mxu0 %v2767_v43  ;;  %1819 = vmatprep.subr.bf16.mxu1 %v2772_v46  ;;  %v2304_v43 = vcombine.low %v41_v26, %v49_v29  ;;  %v3540_v46 = vld [vmem:[%s4012_s0 + $0x30] sm:$0xff]  ;;  %v2291_v50 = vcombine.high %v3530_v42, %v3535_v45 }
  0x5d   :  { %2031 = vmatprep.subr.bf16.mxu0 %v2775_v47  ;;  %v3545_v47 = vld [vmem:[%s4012_s0 + $0x70] sm:$0xff] }
  0x5e   :  { %v2904_v26 = vld [vmem:[%s4011_s1 + $0x2d4] ss:$8 sps:$4 sm:$0xff]   ;;  %v2905_v29 = vld [vmem:[%s4011_s1 + $0x6d0] ss:$8 sps:$4 sm:$0xff]  }
  0x5f   :  { %1820 = vmatpush1.bf16.msra.mxu1 %v2770_v51  ;;  %v2299_v51 = vcombine.high %v3540_v46, %v3545_v47 }
  0x60   :  { %2032 = vmatpush1.bf16.msra.mxu0 %v2773_v52  ;;  %1821 = vmatprep.subr.bf16.mxu1 %v2778_v54  ;;  %v2842_v52 = vld [vmem:[%s4011_s1 + $0x230] ss:$8 sps:$4 sm:$0xff]   ;;  %v2850_v54 = vld [vmem:[%s4011_s1 + $0x244] ss:$8 sps:$4 sm:$0xff]  }
  0x61   :  { %2033 = vmatprep.subr.bf16.mxu0 %v2781_v55  ;;  %v2853_v55 = vld [vmem:[%s4011_s1 + $0x644] ss:$8 sps:$4 sm:$0xff]  }
  0x63   :  { %1822 = vmatpush1.bf16.msra.mxu1 %v2776_v56  ;;  %v2848_v56 = vld [vmem:[%s4011_s1 + $0x240] ss:$8 sps:$4 sm:$0xff]  }
  0x64   :  { %2034 = vmatpush1.bf16.msra.mxu0 %v2779_v57  ;;  %1823 = vmatprep.subr.bf16.mxu1 %v2784_v58  ;;  %v2851_v57 = vld [vmem:[%s4011_s1 + $0x640] ss:$8 sps:$4 sm:$0xff]   ;;  %v2856_v58 = vld [vmem:[%s4011_s1 + $0x254] ss:$8 sps:$4 sm:$0xff]  }
  0x65   :  { %2035 = vmatprep.subr.bf16.mxu0 %v2787_v59  ;;  %v2859_v59 = vld [vmem:[%s4011_s1 + $0x654] ss:$8 sps:$4 sm:$0xff]  }
  0x67   :  { %1824 = vmatpush1.bf16.msra.mxu1 %v2782_v60  ;;  %v2854_v60 = vld [vmem:[%s4011_s1 + $0x250] ss:$8 sps:$4 sm:$0xff]  }
  0x68   :  { %2036 = vmatpush1.bf16.msra.mxu0 %v2785_v61  ;;  %1825 = vmatprep.subr.bf16.mxu1 %v2790_v62  ;;  %v2857_v61 = vld [vmem:[%s4011_s1 + $0x650] ss:$8 sps:$4 sm:$0xff]   ;;  %v2862_v62 = vld [vmem:[%s4011_s1 + $0x264] ss:$8 sps:$4 sm:$0xff]  }
  0x69   :  { %2037 = vmatprep.subr.bf16.mxu0 %v2793_v63  ;;  %v2865_v63 = vld [vmem:[%s4011_s1 + $0x664] ss:$8 sps:$4 sm:$0xff]  }
  0x6b   :  { %1826 = vmatpush1.bf16.msra.mxu1 %v2788_v0  ;;  %v2860_v0 = vld [vmem:[%s4011_s1 + $0x260] ss:$8 sps:$4 sm:$0xff]  }
  0x6c   :  { %2038 = vmatpush1.bf16.msra.mxu0 %v2791_v1  ;;  %1827 = vmatprep.subr.bf16.mxu1 %v2796_v2  ;;  %v2863_v1 = vld [vmem:[%s4011_s1 + $0x660] ss:$8 sps:$4 sm:$0xff]   ;;  %v2868_v2 = vld [vmem:[%s4011_s1 + $0x274] ss:$8 sps:$4 sm:$0xff]  }
  0x6d   :  { %2039 = vmatprep.subr.bf16.mxu0 %v2799_v3  ;;  %v2871_v3 = vld [vmem:[%s4011_s1 + $0x674] ss:$8 sps:$4 sm:$0xff]  }
  0x6f   :  { %1828 = vmatpush1.bf16.msra.mxu1 %v2794_v4  ;;  %v2866_v4 = vld [vmem:[%s4011_s1 + $0x270] ss:$8 sps:$4 sm:$0xff]  }
  0x70   :  { %2040 = vmatpush1.bf16.msra.mxu0 %v2797_v5  ;;  %1829 = vmatprep.subr.bf16.mxu1 %v2802_v6  ;;  %v2869_v5 = vld [vmem:[%s4011_s1 + $0x670] ss:$8 sps:$4 sm:$0xff]   ;;  %v2874_v6 = vld [vmem:[%s4011_s1 + $0x284] ss:$8 sps:$4 sm:$0xff]  }
  0x71   :  { %2041 = vmatprep.subr.bf16.mxu0 %v2805_v7  ;;  %v2877_v7 = vld [vmem:[%s4011_s1 + $0x684] ss:$8 sps:$4 sm:$0xff]  }
  0x73   :  { %1830 = vmatpush1.bf16.msra.mxu1 %v2800_v8  ;;  %v2872_v8 = vld [vmem:[%s4011_s1 + $0x280] ss:$8 sps:$4 sm:$0xff]  }
  0x74   :  { %2042 = vmatpush1.bf16.msra.mxu0 %v2803_v9  ;;  %1831 = vmatprep.subr.bf16.mxu1 %v2808_v10  ;;  %v2875_v9 = vld [vmem:[%s4011_s1 + $0x680] ss:$8 sps:$4 sm:$0xff]   ;;  %v2880_v10 = vld [vmem:[%s4011_s1 + $0x294] ss:$8 sps:$4 sm:$0xff]  }
  0x75   :  { %2043 = vmatprep.subr.bf16.mxu0 %v2811_v11  ;;  %v2883_v11 = vld [vmem:[%s4011_s1 + $0x694] ss:$8 sps:$4 sm:$0xff]  }
  0x77   :  { %1832 = vmatpush1.bf16.msra.mxu1 %v2806_v12  ;;  %v2878_v12 = vld [vmem:[%s4011_s1 + $0x290] ss:$8 sps:$4 sm:$0xff]  }
  0x78   :  { %2044 = vmatpush1.bf16.msra.mxu0 %v2809_v13  ;;  %1833 = vmatprep.subr.bf16.mxu1 %v2814_v14  ;;  %v2881_v13 = vld [vmem:[%s4011_s1 + $0x690] ss:$8 sps:$4 sm:$0xff]   ;;  %v2886_v14 = vld [vmem:[%s4011_s1 + $0x2a4] ss:$8 sps:$4 sm:$0xff]  }
  0x79   :  { %2045 = vmatprep.subr.bf16.mxu0 %v2817_v15  ;;  %v2889_v15 = vld [vmem:[%s4011_s1 + $0x6a4] ss:$8 sps:$4 sm:$0xff]  }
  0x7b   :  { %1834 = vmatpush1.bf16.msra.mxu1 %v2812_v16  ;;  %v2884_v16 = vld [vmem:[%s4011_s1 + $0x2a0] ss:$8 sps:$4 sm:$0xff]  }
  0x7c   :  { %2046 = vmatpush1.bf16.msra.mxu0 %v2815_v17  ;;  %1835 = vmatprep.subr.bf16.mxu1 %v2820_v18  ;;  %v2887_v17 = vld [vmem:[%s4011_s1 + $0x6a0] ss:$8 sps:$4 sm:$0xff]   ;;  %v2892_v18 = vld [vmem:[%s4011_s1 + $0x2b4] ss:$8 sps:$4 sm:$0xff]  }
  0x7d   :  { %2047 = vmatprep.subr.bf16.mxu0 %v2823_v19  ;;  %v2895_v19 = vld [vmem:[%s4011_s1 + $0x6b4] ss:$8 sps:$4 sm:$0xff]  }
  0x7f   :  { %1836 = vmatpush1.bf16.msra.mxu1 %v2818_v20  ;;  %v2890_v20 = vld [vmem:[%s4011_s1 + $0x2b0] ss:$8 sps:$4 sm:$0xff]  }
  0x80   :  { %2048 = vmatpush1.bf16.msra.mxu0 %v2821_v21  ;;  %1858 = vmatprep.subr.bf16.mxu1 %v2826_v22  ;;  %v2893_v21 = vld [vmem:[%s4011_s1 + $0x6b0] ss:$8 sps:$4 sm:$0xff]   ;;  %v2898_v22 = vld [vmem:[%s4011_s1 + $0x2c4] ss:$8 sps:$4 sm:$0xff]  }
  0x81   :  { %2070 = vmatprep.subr.bf16.mxu0 %v2829_v23  ;;  %v2901_v23 = vld [vmem:[%s4011_s1 + $0x6c4] ss:$8 sps:$4 sm:$0xff]  }
  0x82   :  { %1838 = vmatmul.mubr.bf16.vlgmr.msra.gmra.mrb[0].mxu1 %v2288_v27  ;;  %v2907_v27 = vld [vmem:[%s4011_s1 + $0x6d4] ss:$8 sps:$4 sm:$0xff]  }
  0x83   :  { %2050 = vmatmul.mubr.bf16.vlgmr.msra.gmra.mrb[0].mxu0 %v2296_v28  ;;  %1859 = vmatpush1.bf16.msra.mxu1 %v2824_v24  ;;  %v2896_v24 = vld [vmem:[%s4011_s1 + $0x2c0] ss:$8 sps:$4 sm:$0xff]   ;;  %v2902_v28 = vld [vmem:[%s4011_s1 + $0x2d0] ss:$8 sps:$4 sm:$0xff]  }
  0x84   :  { %2071 = vmatpush1.bf16.msra.mxu0 %v2827_v25  ;;  %1860 = vmatprep.subr.bf16.mxu1 %v2832_v30  ;;  %v2899_v25 = vld [vmem:[%s4011_s1 + $0x6c0] ss:$8 sps:$4 sm:$0xff]   ;;  %v2910_v30 = vld [vmem:[%s4011_s1 + $0x2e4] ss:$8 sps:$4 sm:$0xff]  }
  0x85   :  { %2072 = vmatprep.subr.bf16.mxu0 %v2835_v31  ;;  %1847 = vmatprep.mubr.bf16.mxu1 %v2305_v34  ;;  %v2913_v31 = vld [vmem:[%s4011_s1 + $0x6e4] ss:$8 sps:$4 sm:$0xff]   ;;  %v2916_v34 = vld [vmem:[%s4011_s1 + $0x2f4] ss:$8 sps:$4 sm:$0xff]  }
  0x86   :  { %2059 = vmatprep.mubr.bf16.mxu0 %v2313_v35  ;;  %v2919_v35 = vld [vmem:[%s4011_s1 + $0x6f4] ss:$8 sps:$4 sm:$0xff]  }
  0x87   :  { %1861 = vmatpush1.bf16.msra.mxu1 %v2830_v36  ;;  %v2914_v36 = vld [vmem:[%s4011_s1 + $0x2f0] ss:$8 sps:$4 sm:$0xff]  }
  0x88   :  { %2073 = vmatpush1.bf16.msra.mxu0 %v2833_v37  ;;  %1862 = vmatprep.subr.bf16.mxu1 %v2838_v38  ;;  %v2917_v37 = vld [vmem:[%s4011_s1 + $0x6f0] ss:$8 sps:$4 sm:$0xff]   ;;  %v2922_v38 = vld [vmem:[%s4011_s1 + $0x304] ss:$8 sps:$4 sm:$0xff]  }
  0x89   :  { %2074 = vmatprep.subr.bf16.mxu0 %v2841_v39  ;;  %v2925_v39 = vld [vmem:[%s4011_s1 + $0x704] ss:$8 sps:$4 sm:$0xff]  }
  0x8a   :  { %1848 = vmatmul.mubr.bf16.gmra.mrb[4].mxu1 %v2304_v43  ;;  %v2298_v43 = vcombine.low %v3540_v46, %v3545_v47  ;;  %v2928_v46 = vld [vmem:[%s4011_s1 + $0x314] ss:$8 sps:$4 sm:$0xff]  }
  0x8b   :  { %2060 = vmatmul.mubr.bf16.gmra.mrb[4].mxu0 %v2312_v44  ;;  %1863 = vmatpush1.bf16.msra.mxu1 %v2836_v40  ;;  %v42_v40 = vld [vmem:[%s4012_s0 + $0x90] sm:$0xff] }
  0x8c   :  { %2075 = vmatpush1.bf16.msra.mxu0 %v2839_v41  ;;  %1864 = vmatprep.subr.bf16.mxu1 %v2844_v48  ;;  %v2290_v41 = vcombine.low %v3530_v42, %v3535_v45  ;;  %v50_v44 = vld [vmem:[%s4012_s0 + $0xd0] sm:$0xff]  ;;  %v2920_v42 = vld [vmem:[%s4011_s1 + $0x300] ss:$8 sps:$4 sm:$0xff]  }
  0x8d   :  { %2076 = vmatprep.subr.bf16.mxu0 %v2847_v49  ;;  %1890 = vmatprep.mubr.bf16.mxu1 %v2291_v50  ;;  %v46_v48 = vld [vmem:[%s4012_s0 + $0xb0] sm:$0xff]  ;;  %v2923_v45 = vld [vmem:[%s4011_s1 + $0x700] ss:$8 sps:$4 sm:$0xff]   ;;  %v2307_v50 = vcombine.high %v42_v40, %v50_v44 }
  0x8e   :  { %2102 = vmatprep.mubr.bf16.mxu0 %v2299_v51  ;;  %v54_v49 = vld [vmem:[%s4012_s0 + $0xf0] sm:$0xff] }
  0x8f   :  { %1865 = vmatpush1.bf16.msra.mxu1 %v2842_v52  ;;  %v2931_v47 = vld [vmem:[%s4011_s1 + $0x714] ss:$8 sps:$4 sm:$0xff]   ;;  %v2315_v51 = vcombine.high %v46_v48, %v54_v49  ;;  %v2926_v52 = vld [vmem:[%s4011_s1 + $0x310] ss:$8 sps:$4 sm:$0xff]  }
  0x90   :  { %2077 = vmatpush1.bf16.msra.mxu0 %v2845_v53  ;;  %1866 = vmatprep.subr.bf16.mxu1 %v2850_v54  ;;  %v2929_v53 = vld [vmem:[%s4011_s1 + $0x710] ss:$8 sps:$4 sm:$0xff]   ;;  %v2934_v54 = vld [vmem:[%s4011_s1 + $0x324] ss:$8 sps:$4 sm:$0xff]  }
  0x91   :  { %2078 = vmatprep.subr.bf16.mxu0 %v2853_v55  ;;  %v2937_v55 = vld [vmem:[%s4011_s1 + $0x724] ss:$8 sps:$4 sm:$0xff]  }
  0x93   :  { %1867 = vmatpush1.bf16.msra.mxu1 %v2848_v56  ;;  %v3756_v56 = vld [vmem:[%s4012_s0 + $0x18] sm:$0xff] }
  0x94   :  { %2079 = vmatpush1.bf16.msra.mxu0 %v2851_v57  ;;  %1868 = vmatprep.subr.bf16.mxu1 %v2856_v58  ;;  %v2306_v57 = vcombine.low %v42_v40, %v50_v44  ;;  %v2314_v58 = vcombine.low %v46_v48, %v54_v49  ;;  %v2992_v40 = vld [vmem:[%s4011_s1 + $0x3c0] ss:$8 sps:$4 sm:$0xff]   ;;  %v3003_v44 = vld [vmem:[%s4011_s1 + $0x7d4] ss:$8 sps:$4 sm:$0xff]   ;;  %v2998_v48 = vld [vmem:[%s4011_s1 + $0x3d0] ss:$8 sps:$4 sm:$0xff]  }
  0x95   :  { %2080 = vmatprep.subr.bf16.mxu0 %v2859_v59  ;;  %v3761_v59 = vld [vmem:[%s4012_s0 + $0x58] sm:$0xff] }
  0x96   :  { %v3001_v49 = vld [vmem:[%s4011_s1 + $0x7d0] ss:$8 sps:$4 sm:$0xff]  }
  0x97   :  { %1869 = vmatpush1.bf16.msra.mxu1 %v2854_v60  ;;  %v3766_v60 = vld [vmem:[%s4012_s0 + $0x38] sm:$0xff] }
  0x98   :  { %2081 = vmatpush1.bf16.msra.mxu0 %v2857_v61  ;;  %1870 = vmatprep.subr.bf16.mxu1 %v2862_v62  ;;  %v3771_v61 = vld [vmem:[%s4012_s0 + $0x78] sm:$0xff]  ;;  %v2932_v62 = vld [vmem:[%s4011_s1 + $0x320] ss:$8 sps:$4 sm:$0xff]  }
  0x99   :  { %2082 = vmatprep.subr.bf16.mxu0 %v2865_v63  ;;  %v2935_v63 = vld [vmem:[%s4011_s1 + $0x720] ss:$8 sps:$4 sm:$0xff]  }
  0x9b   :  { %1871 = vmatpush1.bf16.msra.mxu1 %v2860_v0  ;;  %v2940_v0 = vld [vmem:[%s4011_s1 + $0x334] ss:$8 sps:$4 sm:$0xff]  }
  0x9c   :  { %2083 = vmatpush1.bf16.msra.mxu0 %v2863_v1  ;;  %1872 = vmatprep.subr.bf16.mxu1 %v2868_v2  ;;  %v2943_v1 = vld [vmem:[%s4011_s1 + $0x734] ss:$8 sps:$4 sm:$0xff]   ;;  %v2293_v2 = vcombine.high %v3756_v56, %v3761_v59 }
  0x9d   :  { %2084 = vmatprep.subr.bf16.mxu0 %v2871_v3  ;;  %v2301_v3 = vcombine.high %v3766_v60, %v3771_v61 }
  0x9f   :  { %1873 = vmatpush1.bf16.msra.mxu1 %v2866_v4  ;;  %v2938_v4 = vld [vmem:[%s4011_s1 + $0x330] ss:$8 sps:$4 sm:$0xff]  }
  0xa0   :  { %2085 = vmatpush1.bf16.msra.mxu0 %v2869_v5  ;;  %1874 = vmatprep.subr.bf16.mxu1 %v2874_v6  ;;  %v2941_v5 = vld [vmem:[%s4011_s1 + $0x730] ss:$8 sps:$4 sm:$0xff]   ;;  %v2946_v6 = vld [vmem:[%s4011_s1 + $0x344] ss:$8 sps:$4 sm:$0xff]  }
  0xa1   :  { %2086 = vmatprep.subr.bf16.mxu0 %v2877_v7  ;;  %v2949_v7 = vld [vmem:[%s4011_s1 + $0x744] ss:$8 sps:$4 sm:$0xff]  }
  0xa3   :  { %1875 = vmatpush1.bf16.msra.mxu1 %v2872_v8  ;;  %v2944_v8 = vld [vmem:[%s4011_s1 + $0x340] ss:$8 sps:$4 sm:$0xff]  }
  0xa4   :  { %2087 = vmatpush1.bf16.msra.mxu0 %v2875_v9  ;;  %1876 = vmatprep.subr.bf16.mxu1 %v2880_v10  ;;  %v2947_v9 = vld [vmem:[%s4011_s1 + $0x740] ss:$8 sps:$4 sm:$0xff]   ;;  %v2952_v10 = vld [vmem:[%s4011_s1 + $0x354] ss:$8 sps:$4 sm:$0xff]  }
  0xa5   :  { %2088 = vmatprep.subr.bf16.mxu0 %v2883_v11  ;;  %v2955_v11 = vld [vmem:[%s4011_s1 + $0x754] ss:$8 sps:$4 sm:$0xff]  }
  0xa7   :  { %1877 = vmatpush1.bf16.msra.mxu1 %v2878_v12  ;;  %v2950_v12 = vld [vmem:[%s4011_s1 + $0x350] ss:$8 sps:$4 sm:$0xff]  }
  0xa8   :  { %2089 = vmatpush1.bf16.msra.mxu0 %v2881_v13  ;;  %1878 = vmatprep.subr.bf16.mxu1 %v2886_v14  ;;  %v2953_v13 = vld [vmem:[%s4011_s1 + $0x750] ss:$8 sps:$4 sm:$0xff]   ;;  %v2958_v14 = vld [vmem:[%s4011_s1 + $0x364] ss:$8 sps:$4 sm:$0xff]  }
  0xa9   :  { %2090 = vmatprep.subr.bf16.mxu0 %v2889_v15  ;;  %v2961_v15 = vld [vmem:[%s4011_s1 + $0x764] ss:$8 sps:$4 sm:$0xff]  }
  0xab   :  { %1879 = vmatpush1.bf16.msra.mxu1 %v2884_v16  ;;  %v2956_v16 = vld [vmem:[%s4011_s1 + $0x360] ss:$8 sps:$4 sm:$0xff]  }
  0xac   :  { %2091 = vmatpush1.bf16.msra.mxu0 %v2887_v17  ;;  %1880 = vmatprep.subr.bf16.mxu1 %v2892_v18  ;;  %v2959_v17 = vld [vmem:[%s4011_s1 + $0x760] ss:$8 sps:$4 sm:$0xff]   ;;  %v2964_v18 = vld [vmem:[%s4011_s1 + $0x374] ss:$8 sps:$4 sm:$0xff]  }
  0xad   :  { %2092 = vmatprep.subr.bf16.mxu0 %v2895_v19  ;;  %v2967_v19 = vld [vmem:[%s4011_s1 + $0x774] ss:$8 sps:$4 sm:$0xff]  }
  0xaf   :  { %1881 = vmatpush1.bf16.msra.mxu1 %v2890_v20  ;;  %v2962_v20 = vld [vmem:[%s4011_s1 + $0x370] ss:$8 sps:$4 sm:$0xff]  }
  0xb0   :  { %2093 = vmatpush1.bf16.msra.mxu0 %v2893_v21  ;;  %1882 = vmatprep.subr.bf16.mxu1 %v2898_v22  ;;  %v2965_v21 = vld [vmem:[%s4011_s1 + $0x770] ss:$8 sps:$4 sm:$0xff]   ;;  %v2970_v22 = vld [vmem:[%s4011_s1 + $0x384] ss:$8 sps:$4 sm:$0xff]  }
  0xb1   :  { %2094 = vmatprep.subr.bf16.mxu0 %v2901_v23  ;;  %v2973_v23 = vld [vmem:[%s4011_s1 + $0x784] ss:$8 sps:$4 sm:$0xff]  }
  0xb3   :  { %1883 = vmatpush1.bf16.msra.mxu1 %v2896_v24  ;;  %v2968_v24 = vld [vmem:[%s4011_s1 + $0x380] ss:$8 sps:$4 sm:$0xff]  }
  0xb4   :  { %2095 = vmatpush1.bf16.msra.mxu0 %v2899_v25  ;;  %1884 = vmatprep.subr.bf16.mxu1 %v2904_v26  ;;  %v2971_v25 = vld [vmem:[%s4011_s1 + $0x780] ss:$8 sps:$4 sm:$0xff]   ;;  %v2976_v26 = vld [vmem:[%s4011_s1 + $0x394] ss:$8 sps:$4 sm:$0xff]  }
  0xb5   :  { %2096 = vmatprep.subr.bf16.mxu0 %v2907_v27  ;;  %v2979_v27 = vld [vmem:[%s4011_s1 + $0x794] ss:$8 sps:$4 sm:$0xff]  }
  0xb7   :  { %1885 = vmatpush1.bf16.msra.mxu1 %v2902_v28  ;;  %v2974_v28 = vld [vmem:[%s4011_s1 + $0x390] ss:$8 sps:$4 sm:$0xff]  }
  0xb8   :  { %2097 = vmatpush1.bf16.msra.mxu0 %v2905_v29  ;;  %1886 = vmatprep.subr.bf16.mxu1 %v2910_v30  ;;  %v2977_v29 = vld [vmem:[%s4011_s1 + $0x790] ss:$8 sps:$4 sm:$0xff]   ;;  %v2982_v30 = vld [vmem:[%s4011_s1 + $0x3a4] ss:$8 sps:$4 sm:$0xff]  }
  0xb9   :  { %2098 = vmatprep.subr.bf16.mxu0 %v2913_v31  ;;  %v2985_v31 = vld [vmem:[%s4011_s1 + $0x7a4] ss:$8 sps:$4 sm:$0xff]  }
  0xbb   :  { %1887 = vmatpush1.bf16.msra.mxu1 %v2908_v32  ;;  %v2980_v32 = vld [vmem:[%s4011_s1 + $0x3a0] ss:$8 sps:$4 sm:$0xff]  }
  0xbc   :  { %2099 = vmatpush1.bf16.msra.mxu0 %v2911_v33  ;;  %1888 = vmatprep.subr.bf16.mxu1 %v2916_v34  ;;  %v2983_v33 = vld [vmem:[%s4011_s1 + $0x7a0] ss:$8 sps:$4 sm:$0xff]   ;;  %v2988_v34 = vld [vmem:[%s4011_s1 + $0x3b4] ss:$8 sps:$4 sm:$0xff]  }
  0xbd   :  { %2100 = vmatprep.subr.bf16.mxu0 %v2919_v35  ;;  %v2991_v35 = vld [vmem:[%s4011_s1 + $0x7b4] ss:$8 sps:$4 sm:$0xff]  }
  0xbf   :  { %1889 = vmatpush1.bf16.msra.mxu1 %v2914_v36  ;;  %v2986_v36 = vld [vmem:[%s4011_s1 + $0x3b0] ss:$8 sps:$4 sm:$0xff]  }
  0xc0   :  { %2101 = vmatpush1.bf16.msra.mxu0 %v2917_v37  ;;  %1911 = vmatprep.subr.bf16.mxu1 %v2922_v38  ;;  %v2989_v37 = vld [vmem:[%s4011_s1 + $0x7b0] ss:$8 sps:$4 sm:$0xff]   ;;  %v2994_v38 = vld [vmem:[%s4011_s1 + $0x3c4] ss:$8 sps:$4 sm:$0xff]  }
  0xc1   :  { %2123 = vmatprep.subr.bf16.mxu0 %v2925_v39  ;;  %v2997_v39 = vld [vmem:[%s4011_s1 + $0x7c4] ss:$8 sps:$4 sm:$0xff]  }
  0xc2   :  { %1891 = vmatmul.mubr.bf16.vlgmr.msra.gmra.mrb[0].mxu1 %v2290_v41  ;;  %v2995_v41 = vld [vmem:[%s4011_s1 + $0x7c0] ss:$8 sps:$4 sm:$0xff]  }
  0xc3   :  { %2103 = vmatmul.mubr.bf16.vlgmr.msra.gmra.mrb[0].mxu0 %v2298_v43  ;;  %1912 = vmatpush1.bf16.msra.mxu1 %v2920_v42  ;;  %v3000_v43 = vld [vmem:[%s4011_s1 + $0x3d4] ss:$8 sps:$4 sm:$0xff]   ;;  %v3006_v42 = vld [vmem:[%s4011_s1 + $0x3e4] ss:$8 sps:$4 sm:$0xff]  }
  0xc4   :  { %2124 = vmatpush1.bf16.msra.mxu0 %v2923_v45  ;;  %1913 = vmatprep.subr.bf16.mxu1 %v2928_v46  ;;  %v3009_v45 = vld [vmem:[%s4011_s1 + $0x7e4] ss:$8 sps:$4 sm:$0xff]   ;;  %v3004_v46 = vld [vmem:[%s4011_s1 + $0x3e0] ss:$8 sps:$4 sm:$0xff]  }
  0xc5   :  { %2125 = vmatprep.subr.bf16.mxu0 %v2931_v47  ;;  %1900 = vmatprep.mubr.bf16.mxu1 %v2307_v50  ;;  %v3007_v47 = vld [vmem:[%s4011_s1 + $0x7e0] ss:$8 sps:$4 sm:$0xff]   ;;  %v3012_v50 = vld [vmem:[%s4011_s1 + $0x3f4] ss:$8 sps:$4 sm:$0xff]  }
  0xc6   :  { %2112 = vmatprep.mubr.bf16.mxu0 %v2315_v51  ;;  %v3015_v51 = vld [vmem:[%s4011_s1 + $0x7f4] ss:$8 sps:$4 sm:$0xff]  }
  0xc7   :  { %1914 = vmatpush1.bf16.msra.mxu1 %v2926_v52  ;;  %v3010_v52 = vld [vmem:[%s4011_s1 + $0x3f0] ss:$8 sps:$4 sm:$0xff]  }
  0xc8   :  { %2126 = vmatpush1.bf16.msra.mxu0 %v2929_v53  ;;  %1915 = vmatprep.subr.bf16.mxu1 %v2934_v54  ;;  %v3013_v53 = vld [vmem:[%s4011_s1 + $0x7f0] ss:$8 sps:$4 sm:$0xff]  }
  0xc9   :  { %2127 = vmatprep.subr.bf16.mxu0 %v2937_v55  ;;  %v43_v54 = vld [vmem:[%s4012_s0 + $0x98] sm:$0xff] }
  0xca   :  { %1901 = vmatmul.mubr.bf16.gmra.mrb[4].mxu1 %v2306_v57  ;;  %v51_v55 = vld [vmem:[%s4012_s0 + $0xd8] sm:$0xff] }
  0xcb   :  { %2113 = vmatmul.mubr.bf16.gmra.mrb[4].mxu0 %v2314_v58  ;;  %1916 = vmatpush1.bf16.msra.mxu1 %v2932_v62  ;;  %v47_v57 = vld [vmem:[%s4012_s0 + $0xb8] sm:$0xff]  ;;  %v2292_v62 = vcombine.low %v3756_v56, %v3761_v59  ;;  %v3016_v56 = vmov 0.0  }
  0xcc   :  { %2128 = vmatpush1.bf16.msra.mxu0 %v2935_v63  ;;  %1917 = vmatprep.subr.bf16.mxu1 %v2940_v0  ;;  %v55_v58 = vld [vmem:[%s4012_s0 + $0xf8] sm:$0xff]  ;;  %v2300_v63 = vcombine.low %v3766_v60, %v3771_v61  ;;  %v2309_v0 = vcombine.high %v43_v54, %v51_v55 }
  0xcd   :  { %2129 = vmatprep.subr.bf16.mxu0 %v2943_v1  ;;  %1943 = vmatprep.mubr.bf16.mxu1 %v2293_v2  ;;  %v2317_v1 = vcombine.high %v47_v57, %v55_v58  ;;  %v2308_v2 = vcombine.low %v43_v54, %v51_v55 }
  0xce   :  { %2155 = vmatprep.mubr.bf16.mxu0 %v2301_v3  ;;  %v2316_v3 = vcombine.low %v47_v57, %v55_v58 }
  0xcf   :  { %1918 = vmatpush1.bf16.msra.mxu1 %v2938_v4  ;;  %v18_v4 = vlaneseq }
  0xd0   :  { %2130 = vmatpush1.bf16.msra.mxu0 %v2941_v5  ;;  %1919 = vmatprep.subr.bf16.mxu1 %v2946_v6 }
  0xd1   :  { %2131 = vmatprep.subr.bf16.mxu0 %v2949_v7  ;;  %vm3956_vm0 = vcmp.lt.s32.totalorder %v18_v4, 256 }
  0xd2   :  { %22 = vst.msk [vmem:[%s4013_s3] sm:$0x3] %vm3956_vm0, %v3016_v56  ;;  %23 = vst.msk [vmem:[%s4014_s4] sm:$0x3] %vm3956_vm0, %v3016_v56 }
  0xd3   :  { %1920 = vmatpush1.bf16.msra.mxu1 %v2944_v8 }
  0xd4   :  { %2132 = vmatpush1.bf16.msra.mxu0 %v2947_v9  ;;  %1921 = vmatprep.subr.bf16.mxu1 %v2952_v10 }
  0xd5   :  { %2133 = vmatprep.subr.bf16.mxu0 %v2955_v11 }
  0xd7   :  { %1922 = vmatpush1.bf16.msra.mxu1 %v2950_v12 }
  0xd8   :  { %2134 = vmatpush1.bf16.msra.mxu0 %v2953_v13  ;;  %1923 = vmatprep.subr.bf16.mxu1 %v2958_v14 }
  0xd9   :  { %2135 = vmatprep.subr.bf16.mxu0 %v2961_v15 }
  0xdb   :  { %1924 = vmatpush1.bf16.msra.mxu1 %v2956_v16 }
  0xdc   :  { %2136 = vmatpush1.bf16.msra.mxu0 %v2959_v17  ;;  %1925 = vmatprep.subr.bf16.mxu1 %v2964_v18 }
  0xdd   :  { %2137 = vmatprep.subr.bf16.mxu0 %v2967_v19 }
  0xdf   :  { %1926 = vmatpush1.bf16.msra.mxu1 %v2962_v20 }
  0xe0   :  { %2138 = vmatpush1.bf16.msra.mxu0 %v2965_v21  ;;  %1927 = vmatprep.subr.bf16.mxu1 %v2970_v22 }
  0xe1   :  { %2139 = vmatprep.subr.bf16.mxu0 %v2973_v23 }
  0xe3   :  { %1928 = vmatpush1.bf16.msra.mxu1 %v2968_v24 }
  0xe4   :  { %2140 = vmatpush1.bf16.msra.mxu0 %v2971_v25  ;;  %1929 = vmatprep.subr.bf16.mxu1 %v2976_v26 }
  0xe5   :  { %2141 = vmatprep.subr.bf16.mxu0 %v2979_v27 }
  0xe7   :  { %1930 = vmatpush1.bf16.msra.mxu1 %v2974_v28 }
  0xe8   :  { %2142 = vmatpush1.bf16.msra.mxu0 %v2977_v29  ;;  %1931 = vmatprep.subr.bf16.mxu1 %v2982_v30 }
  0xe9   :  { %2143 = vmatprep.subr.bf16.mxu0 %v2985_v31 }
  0xeb   :  { %1932 = vmatpush1.bf16.msra.mxu1 %v2980_v32 }
  0xec   :  { %2144 = vmatpush1.bf16.msra.mxu0 %v2983_v33  ;;  %1933 = vmatprep.subr.bf16.mxu1 %v2988_v34 }
  0xed   :  { %2145 = vmatprep.subr.bf16.mxu0 %v2991_v35 }
  0xef   :  { %1934 = vmatpush1.bf16.msra.mxu1 %v2986_v36 }
  0xf0   :  { %2146 = vmatpush1.bf16.msra.mxu0 %v2989_v37  ;;  %1935 = vmatprep.subr.bf16.mxu1 %v2994_v38 }
  0xf1   :  { %2147 = vmatprep.subr.bf16.mxu0 %v2997_v39 }
  0xf3   :  { %1936 = vmatpush1.bf16.msra.mxu1 %v2992_v40 }
  0xf4   :  { %2148 = vmatpush1.bf16.msra.mxu0 %v2995_v41  ;;  %1937 = vmatprep.subr.bf16.mxu1 %v3000_v43 }
  0xf5   :  { %2149 = vmatprep.subr.bf16.mxu0 %v3003_v44 }
  0xf7   :  { %1938 = vmatpush1.bf16.msra.mxu1 %v2998_v48 }
  0xf8   :  { %2150 = vmatpush1.bf16.msra.mxu0 %v3001_v49  ;;  %1939 = vmatprep.subr.bf16.mxu1 %v3006_v42 }
  0xf9   :  { %2151 = vmatprep.subr.bf16.mxu0 %v3009_v45 }
  0xfb   :  { %1940 = vmatpush1.bf16.msra.mxu1 %v3004_v46 }
  0xfc   :  { %2152 = vmatpush1.bf16.msra.mxu0 %v3007_v47  ;;  %1941 = vmatprep.subr.bf16.mxu1 %v3012_v50 }
  0xfd   :  { %2153 = vmatprep.subr.bf16.mxu0 %v3015_v51 }
  0xff   :  { %1942 = vmatpush1.bf16.msra.mxu1 %v3010_v52  ;;  %v3017_v52 = vmov 1966171168  }
 0x100   :  { %2154 = vmatpush1.bf16.msra.mxu0 %v3013_v53  ;;  %v2207_v53 = vunpack.c.l.s4 %v3017_v52 }
 0x102   :  { %1944 = vmatmul.mubr.bf16.vlgmr.msra.gmra.mrb[0].mxu1 %v2292_v62 }
 0x103   :  { %2156 = vmatmul.mubr.bf16.vlgmr.msra.gmra.mrb[0].mxu0 %v2300_v63  ;;  %1953 = vmatprep.mubr.bf16.mxu1 %v2309_v0 }
 0x104   :  { %2165 = vmatprep.mubr.bf16.mxu0 %v2317_v1 }
 0x10a   :  { %1954 = vmatmul.mubr.bf16.gmra.mrb[4].mxu1 %v2308_v2  ;;  %v2208_v2 = vunpack.c.0.s8 %v2207_v53 }
 0x10b   :  { %2166 = vmatmul.mubr.bf16.gmra.mrb[4].mxu0 %v2316_v3  ;;  %v2210_v3 = vshrl.u32 %v18_v4, 7 }
 0x1d5   :  { %v1945_v59 = vpop.f32.mrb[0].mxu1 }
 0x1d6   :  { %v2157_v60 = vpop.f32.mrb[0].mxu0  ;;  %v1947_v6 = vpop.f32.mrb[1].mxu1 }
 0x1d7   :  { %v2574_v61 = vadd.f32 %v2157_v60, %v1945_v59  ;;  %v2159_v7 = vpop.f32.mrb[1].mxu0  ;;  %v1949_v9 = vpop.f32.mrb[2].mxu1 }
 0x1d8   :  { %v2575_v8 = vadd.f32 %v2159_v7, %v1947_v6  ;;  %v2161_v10 = vpop.f32.mrb[2].mxu0  ;;  %v1951_v12 = vpop.f32.mrb[3].mxu1 }
 0x1d9   :  { %2176 = vst [vmem:[%s4015_s2] sm:$0xff] %v2574_v61  ;;  %v2576_v11 = vadd.f32 %v2161_v10, %v1949_v9  ;;  %v2163_v13 = vpop.f32.mrb[3].mxu0  ;;  %v2228_v15 = vmul.f32 %v2574_v61, %v2574_v61  ;;  %v2211_v10 = vsub.s32 %v2208_v2, %v2210_v3 }
 0x1da   :  { %2177 = vst [vmem:[%s4015_s2 + $0x8] sm:$0xff] %v2575_v8  ;;  %v2577_v14 = vadd.f32 %v2163_v13, %v1951_v12  ;;  %v2229_v18 = vmul.f32 %v2575_v8, %v2575_v8 }
 0x1db   :  { %2178 = vst [vmem:[%s4015_s2 + $0x10] sm:$0xff] %v2576_v11  ;;  %v2185_v16 = vadd.f32 %v2576_v11, %v2574_v61  ;;  %v2230_v17 = vmul.f32 %v2576_v11, %v2576_v11 }
 0x1dc   :  { %2179 = vst [vmem:[%s4015_s2 + $0x18] sm:$0xff] %v2577_v14  ;;  %v2194_v19 = vadd.f32 %v2577_v14, %v2575_v8  ;;  %v2231_v20 = vmul.f32 %v2577_v14, %v2577_v14 }
 0x1dd   :  { %v2236_v21 = vadd.f32 %v2230_v17, %v2228_v15  ;;  %v1955_v23 = vpop.f32.mrb[4].mxu1  ;;  %v2184_v17 = vld [vmem:[%s4013_s3] sm:$0x3] }
 0x1de   :  { %v2245_v22 = vadd.f32 %v2231_v20, %v2229_v18  ;;  %v2167_v24 = vpop.f32.mrb[4].mxu0  ;;  %v1957_v26 = vpop.f32.mrb[5].mxu1 }
 0x1df   :  { %v2578_v25 = vadd.f32 %v2167_v24, %v1955_v23  ;;  %v2169_v27 = vpop.f32.mrb[5].mxu0  ;;  %v1959_v29 = vpop.f32.mrb[6].mxu1 }
 0x1e0   :  { %v2579_v28 = vadd.f32 %v2169_v27, %v1957_v26  ;;  %v2171_v30 = vpop.f32.mrb[6].mxu0  ;;  %v1961_v34 = vpop.f32.mrb[7].mxu1 }
 0x1e1   :  { %2180 = vst [vmem:[%s4015_s2 + $0x20] sm:$0xff] %v2578_v25  ;;  %v2186_v31 = vadd.f32 %v2578_v25, %v2185_v16  ;;  %v2232_v32 = vmul.f32 %v2578_v25, %v2578_v25  ;;  %v2580_v33 = vadd.f32 %v2171_v30, %v1959_v29  ;;  %v2173_v35 = vpop.f32.mrb[7].mxu0 }
 0x1e2   :  { %2181 = vst [vmem:[%s4015_s2 + $0x28] sm:$0xff] %v2579_v28  ;;  %v2195_v36 = vadd.f32 %v2579_v28, %v2194_v19  ;;  %v2233_v37 = vmul.f32 %v2579_v28, %v2579_v28  ;;  %v2581_v38 = vadd.f32 %v2173_v35, %v1961_v34  ;;  %v2227_v19 = vld [vmem:[%s4014_s4] sm:$0x3] }
 0x1e3   :  { %v2237_v39 = vadd.f32 %v2236_v21, %v2232_v32  ;;  %2182 = vst [vmem:[%s4015_s2 + $0x30] sm:$0xff] %v2580_v33  ;;  %v2187_v40 = vadd.f32 %v2580_v33, %v2186_v31  ;;  %v2234_v41 = vmul.f32 %v2580_v33, %v2580_v33 }
 0x1e4   :  { %v2246_v43 = vadd.f32 %v2245_v22, %v2233_v37  ;;  %2183 = vst [vmem:[%s4015_s2 + $0x38] sm:$0xff] %v2581_v38  ;;  %v2196_v44 = vadd.f32 %v2581_v38, %v2195_v36  ;;  %v2235_v48 = vmul.f32 %v2581_v38, %v2581_v38 }
 0x1e5   :  { %v2188_v49 = vrot.slane %v2187_v40, 4  ;;  %v2238_v42 = vadd.f32 %v2237_v39, %v2234_v41 }
 0x1e6   :  { %v2197_v45 = vrot.slane %v2196_v44, 4  ;;  %v2247_v46 = vadd.f32 %v2246_v43, %v2235_v48 }
 0x1e7   :  { %v2189_v47 = vadd.f32 %v2188_v49, %v2187_v40  ;;  %v2239_v50 = vrot.slane %v2238_v42, 4 }
 0x1e8   :  { %v2198_v51 = vadd.f32 %v2197_v45, %v2196_v44  ;;  %v2248_v54 = vrot.slane %v2247_v46, 4 }
 0x1e9   :  { %v2190_v55 = vrot.slane %v2189_v47, 2  ;;  %v2240_v57 = vadd.f32 %v2239_v50, %v2238_v42 }
 0x1ea   :  { %v2199_v58 = vrot.slane %v2198_v51, 2  ;;  %v2249_v62 = vadd.f32 %v2248_v54, %v2247_v46 }
 0x1eb   :  { %v2191_v63 = vadd.f32 %v2190_v55, %v2189_v47  ;;  %v2241_v0 = vrot.slane %v2240_v57, 2 }
 0x1ec   :  { %v2200_v1 = vadd.f32 %v2199_v58, %v2198_v51  ;;  %v2250_v56 = vrot.slane %v2249_v62, 2 }
 0x1ed   :  { %v2192_v59 = vrot.slane %v2191_v63, 1  ;;  %v2242_v60 = vadd.f32 %v2241_v0, %v2240_v57 }
 0x1ee   :  { %v2201_v61 = vrot.slane %v2200_v1, 1  ;;  %v2251_v6 = vadd.f32 %v2250_v56, %v2249_v62 }
 0x1ef   :  { %v2193_v7 = vadd.f32 %v2192_v59, %v2191_v63  ;;  %v2243_v8 = vrot.slane %v2242_v60, 1 }
 0x1f0   :  { %v2202_v9 = vadd.f32 %v2201_v61, %v2200_v1  ;;  %v2252_v11 = vrot.slane %v2251_v6, 1 }
 0x1f1   :  { %v2244_v12 = vadd.f32 %v2243_v8, %v2242_v60 }
 0x1f2   :  { %v2205_v13 = vcombine.low %v2193_v7, %v2202_v9  ;;  %v2253_v14 = vadd.f32 %v2252_v11, %v2251_v6 }
 0x1f4   :  { %v2212_v15 = vrot.slane %v2205_v13, %v2211_v10  ;;  %v2256_v16 = vcombine.low %v2244_v12, %v2253_v14 }
 0x1f6   :  { %v2219_v4 = vrot.slane %v2212_v15, %v2211_v10  ;;  %v2263_v18 = vrot.slane %v2256_v16, %v2211_v10 }
 0x1f8   :  { %v2221_v20 = vadd.f32 %v2219_v4, %v2184_v17  ;;  %v2270_v21 = vrot.slane %v2263_v18, %v2211_v10 }
 0x1fa   :  { %2226 = vst.msk [vmem:[%s4013_s3] sm:$0x3] %vm3956_vm0, %v2221_v20  ;;  %v2272_v22 = vadd.f32 %v2270_v21, %v2227_v19 }
 0x1fc   :  { %2273 = vst.msk [vmem:[%s4014_s4] sm:$0x3] %vm3956_vm0, %v2272_v22 }

// kernel: nlayer_discriminator_forward.14
= control target key start
LH: loop header
LB: loop body
LE: loop exit
PB: predicated region body
PF: predicated region fallthrough
CT: control target
= control target key end

     0   :  { %v28_v0 = vlaneseq  ;;  %s283_s1 = inlined_call_operand.vmem [shape: f32[1,512], index: 1, kind: input, shape index: {}]   ;;  %s284_s2 = inlined_call_operand.vmem [shape: f32[1,512], index: 2, kind: input, shape index: {}]   ;;  %s285_s0 = inlined_call_operand.vmem [shape: f32[24,512], index: 0, kind: input, shape index: {}]   ;;  %s286_s3 = inlined_call_operand.vmem [shape: bf16[24,512], index: 3, kind: output, shape index: {}]  }
   0x1   :  { %v26_v2 = vld [vmem:[%s283_s1] sm:$0xf]  ;;  %v15_v5 = vld [vmem:[%s285_s0 + $0x8] sm:$0xff]  ;;  %v16_v10 = vld [vmem:[%s285_s0 + $0x10] sm:$0xff] }
   0x2   :  { %v29_v1 = vshrl.u32 %v28_v0, 7  ;;  %v60_v3 = vld [vmem:[%s284_s2] sm:$0xf]  ;;  %v19_v12 = vld [vmem:[%s285_s0 + $0x28] sm:$0xff]  ;;  %v17_v17 = vld [vmem:[%s285_s0 + $0x18] sm:$0xff] }
   0x3   :  { %v14_v4 = vld [vmem:[%s285_s0] sm:$0xff]  ;;  %v20_v18 = vld [vmem:[%s285_s0 + $0x30] sm:$0xff]  ;;  %v21_v19 = vld [vmem:[%s285_s0 + $0x38] sm:$0xff] }
   0x4   :  { %v30_v6 = vsub.s32 0, %v29_v1  ;;  %v34_v7 = vsub.s32 1, %v29_v1  ;;  %v38_v8 = vsub.s32 2, %v29_v1  ;;  %v42_v9 = vsub.s32 3, %v29_v1  ;;  %v18_v11 = vld [vmem:[%s285_s0 + $0x20] sm:$0xff]  ;;  %v23_v51 = vld [vmem:[%s285_s0 + $0x48] sm:$0xff] }
   0x5   :  { %v22_v46 = vld [vmem:[%s285_s0 + $0x40] sm:$0xff]  ;;  %v24_v52 = vld [vmem:[%s285_s0 + $0x50] sm:$0xff]  ;;  %v25_v53 = vld [vmem:[%s285_s0 + $0x58] sm:$0xff] }
   0x6   :  { %v31_v13 = vrot.slane %v26_v2, %v30_v6  ;;  %v35_v14 = vrot.slane %v26_v2, %v34_v7  ;;  %v233_v15 = vrot.slane %v60_v3, %v30_v6  ;;  %v235_v16 = vrot.slane %v60_v3, %v34_v7 }
   0x7   :  { %v39_v20 = vrot.slane %v26_v2, %v38_v8  ;;  %v43_v21 = vrot.slane %v26_v2, %v42_v9  ;;  %v73_v22 = vrot.slane %v60_v3, %v38_v8  ;;  %v77_v23 = vrot.slane %v60_v3, %v42_v9 }
   0x8   :  { %v48_v24 = vmul.f32 %v31_v13, %v14_v4  ;;  %v49_v25 = vmul.f32 %v35_v14, %v15_v5  ;;  %v52_v26 = vmul.f32 %v31_v13, %v18_v11  ;;  %v53_v27 = vmul.f32 %v35_v14, %v19_v12 }
   0x9   :  { %v50_v28 = vmul.f32 %v39_v20, %v16_v10  ;;  %v51_v29 = vmul.f32 %v43_v21, %v17_v17  ;;  %v54_v30 = vmul.f32 %v39_v20, %v20_v18  ;;  %v55_v31 = vmul.f32 %v43_v21, %v21_v19 }
   0xa   :  { %v82_v32 = vadd.f32 %v233_v15, %v48_v24  ;;  %v83_v33 = vadd.f32 %v235_v16, %v49_v25  ;;  %v86_v34 = vadd.f32 %v233_v15, %v52_v26  ;;  %v87_v35 = vadd.f32 %v235_v16, %v53_v27 }
   0xb   :  { %v84_v36 = vadd.f32 %v73_v22, %v50_v28  ;;  %v85_v37 = vadd.f32 %v77_v23, %v51_v29  ;;  %v88_v38 = vadd.f32 %v73_v22, %v54_v30  ;;  %v89_v39 = vadd.f32 %v77_v23, %v55_v31 }
   0xc   :  { %vm94_vm0 = vcmp.ge.f32.partialorder %v82_v32, 0.0  ;;  %vm95_vm1 = vcmp.ge.f32.partialorder %v83_v33, 0.0  ;;  %v106_v40 = vmul.f32 0.2, %v82_v32  ;;  %v107_v41 = vmul.f32 0.2, %v83_v33 }
   0xd   :  { %vm96_vm2 = vcmp.ge.f32.partialorder %v84_v36, 0.0  ;;  %vm97_vm3 = vcmp.ge.f32.partialorder %v85_v37, 0.0  ;;  %v108_v42 = vmul.f32 0.2, %v84_v36  ;;  %v109_v43 = vmul.f32 0.2, %v85_v37 }
   0xe   :  { %v118_v44 = vsel %vm94_vm0, %v82_v32, %v106_v40  ;;  %v119_v45 = vsel %vm95_vm1, %v83_v33, %v107_v41  ;;  %vm98_vm4 = vcmp.ge.f32.partialorder %v86_v34, 0.0  ;;  %vm99_vm5 = vcmp.ge.f32.partialorder %v87_v35, 0.0 }
   0xf   :  { %v186_v47 = vpack.c.bf16 %v119_v45, %v118_v44  ;;  %v120_v48 = vsel %vm96_vm2, %v84_v36, %v108_v42  ;;  %v121_v49 = vsel %vm97_vm3, %v85_v37, %v109_v43  ;;  %v110_v50 = vmul.f32 0.2, %v86_v34 }
  0x10   :  { %v187_v54 = vpack.c.bf16 %v121_v49, %v120_v48  ;;  %v111_v55 = vmul.f32 0.2, %v87_v35  ;;  %vm100_vm6 = vcmp.ge.f32.partialorder %v88_v38, 0.0  ;;  %vm101_vm7 = vcmp.ge.f32.partialorder %v89_v39, 0.0 }
  0x11   :  { %170 = vst [vmem:[%s286_s3] sm:$0xff] %v186_v47  ;;  %v122_v56 = vsel %vm98_vm4, %v86_v34, %v110_v50  ;;  %v112_v57 = vmul.f32 0.2, %v88_v38  ;;  %v113_v58 = vmul.f32 0.2, %v89_v39  ;;  %v56_v59 = vmul.f32 %v31_v13, %v22_v46 }
  0x12   :  { %171 = vst [vmem:[%s286_s3 + $0x8] sm:$0xff] %v187_v54  ;;  %v123_v60 = vsel %vm99_vm5, %v87_v35, %v111_v55  ;;  %v57_v61 = vmul.f32 %v35_v14, %v23_v51  ;;  %v58_v62 = vmul.f32 %v39_v20, %v24_v52  ;;  %v59_v63 = vmul.f32 %v43_v21, %v25_v53 }
  0x13   :  { %v188_v0 = vpack.c.bf16 %v123_v60, %v122_v56  ;;  %v124_v1 = vsel %vm100_vm6, %v88_v38, %v112_v57  ;;  %v125_v2 = vsel %vm101_vm7, %v89_v39, %v113_v58  ;;  %v90_v3 = vadd.f32 %v233_v15, %v56_v59 }
  0x14   :  { %v189_v4 = vpack.c.bf16 %v125_v2, %v124_v1  ;;  %v91_v5 = vadd.f32 %v235_v16, %v57_v61  ;;  %v92_v6 = vadd.f32 %v73_v22, %v58_v62  ;;  %v93_v7 = vadd.f32 %v77_v23, %v59_v63 }
  0x15   :  { %172 = vst [vmem:[%s286_s3 + $0x10] sm:$0xff] %v188_v0  ;;  %vm102_vm8 = vcmp.ge.f32.partialorder %v90_v3, 0.0  ;;  %v114_v8 = vmul.f32 0.2, %v90_v3 }
  0x16   :  { %173 = vst [vmem:[%s286_s3 + $0x18] sm:$0xff] %v189_v4  ;;  %vm103_vm9 = vcmp.ge.f32.partialorder %v91_v5, 0.0  ;;  %v115_v9 = vmul.f32 0.2, %v91_v5  ;;  %vm104_vm10 = vcmp.ge.f32.partialorder %v92_v6, 0.0  ;;  %vm105_vm11 = vcmp.ge.f32.partialorder %v93_v7, 0.0 }
  0x17   :  { %v126_v10 = vsel %vm102_vm8, %v90_v3, %v114_v8  ;;  %v116_v11 = vmul.f32 0.2, %v92_v6  ;;  %v117_v12 = vmul.f32 0.2, %v93_v7 }
  0x18   :  { %v127_v13 = vsel %vm103_vm9, %v91_v5, %v115_v9 }
  0x19   :  { %v190_v14 = vpack.c.bf16 %v127_v13, %v126_v10  ;;  %v128_v15 = vsel %vm104_vm10, %v92_v6, %v116_v11  ;;  %v129_v16 = vsel %vm105_vm11, %v93_v7, %v117_v12 }
  0x1a   :  { %v191_v17 = vpack.c.bf16 %v129_v16, %v128_v15 }
  0x1b   :  { %174 = vst [vmem:[%s286_s3 + $0x20] sm:$0xff] %v190_v14 }
  0x1c   :  { %175 = vst [vmem:[%s286_s3 + $0x28] sm:$0xff] %v191_v17 }

// kernel: nlayer_discriminator_forward.13
= control target key start
LH: loop header
LB: loop body
LE: loop exit
PB: predicated region body
PF: predicated region fallthrough
CT: control target
= control target key end

     0   :  { %s14623_s1 = inlined_call_operand.vmem [shape: bf16[4096,512], index: 1, kind: input, shape index: {}]   ;;  %s14624_s0 = inlined_call_operand.vmem [shape: bf16[24,4096], index: 0, kind: input, shape index: {}]   ;;  %s14625_s3 = inlined_call_operand.vmem [shape: f32[1,512], index: 3, kind: output, shape index: {1}]   ;;  %s14626_s4 = inlined_call_operand.vmem [shape: f32[1,512], index: 4, kind: output, shape index: {2}]   ;;  %s14627_s2 = inlined_call_operand.vmem [shape: f32[24,512], index: 2, kind: output, shape index: {0}]  }
   0x1   :  { %v9618_v0 = vld [vmem:[%s14623_s1 + $0x4] ss:$16 sps:$4 sm:$0xff]   ;;  %v9620_v1 = vld [vmem:[%s14623_s1 + $0xc] ss:$16 sps:$4 sm:$0xff]   ;;  %v9622_v2 = vld [vmem:[%s14623_s1] ss:$16 sps:$4 sm:$0xff]  }
   0x2   :  { %6488 = vmatprep.subr.bf16.mxu0 %v9618_v0  ;;  %v9623_v3 = vld [vmem:[%s14623_s1 + $0x8] ss:$16 sps:$4 sm:$0xff]   ;;  %7304 = vmatprep.subr.bf16.mxu1 %v9620_v1  ;;  %v9624_v4 = vld [vmem:[%s14623_s1 + $0x24] ss:$16 sps:$4 sm:$0xff]   ;;  %v9626_v5 = vld [vmem:[%s14623_s1 + $0x2c] ss:$16 sps:$4 sm:$0xff]  }
   0x3   :  { %6489 = vmatpush1.bf16.msra.mxu0 %v9622_v2  ;;  %7305 = vmatpush1.bf16.msra.mxu1 %v9623_v3  ;;  %v9628_v6 = vld [vmem:[%s14623_s1 + $0x20] ss:$16 sps:$4 sm:$0xff]   ;;  %v9629_v7 = vld [vmem:[%s14623_s1 + $0x28] ss:$16 sps:$4 sm:$0xff]   ;;  %v9630_v8 = vld [vmem:[%s14623_s1 + $0x44] ss:$16 sps:$4 sm:$0xff]  }
   0x4   :  { %6490 = vmatprep.subr.bf16.mxu0 %v9624_v4  ;;  %7306 = vmatprep.subr.bf16.mxu1 %v9626_v5  ;;  %v9632_v9 = vld [vmem:[%s14623_s1 + $0x4c] ss:$16 sps:$4 sm:$0xff]   ;;  %v9634_v10 = vld [vmem:[%s14623_s1 + $0x40] ss:$16 sps:$4 sm:$0xff]   ;;  %v9635_v11 = vld [vmem:[%s14623_s1 + $0x48] ss:$16 sps:$4 sm:$0xff]  }
   0x5   :  { %v9636_v12 = vld [vmem:[%s14623_s1 + $0x64] ss:$16 sps:$4 sm:$0xff]   ;;  %v9638_v13 = vld [vmem:[%s14623_s1 + $0x6c] ss:$16 sps:$4 sm:$0xff]   ;;  %v9640_v14 = vld [vmem:[%s14623_s1 + $0x60] ss:$16 sps:$4 sm:$0xff]  }
   0x6   :  { %v9641_v15 = vld [vmem:[%s14623_s1 + $0x68] ss:$16 sps:$4 sm:$0xff]   ;;  %v9642_v16 = vld [vmem:[%s14623_s1 + $0x84] ss:$16 sps:$4 sm:$0xff]   ;;  %v9644_v17 = vld [vmem:[%s14623_s1 + $0x8c] ss:$16 sps:$4 sm:$0xff]  }
   0x7   :  { %6491 = vmatpush1.bf16.msra.mxu0 %v9628_v6  ;;  %7307 = vmatpush1.bf16.msra.mxu1 %v9629_v7  ;;  %v9646_v18 = vld [vmem:[%s14623_s1 + $0x80] ss:$16 sps:$4 sm:$0xff]   ;;  %v9647_v19 = vld [vmem:[%s14623_s1 + $0x88] ss:$16 sps:$4 sm:$0xff]   ;;  %v9648_v20 = vld [vmem:[%s14623_s1 + $0xa4] ss:$16 sps:$4 sm:$0xff]  }
   0x8   :  { %6492 = vmatprep.subr.bf16.mxu0 %v9630_v8  ;;  %7308 = vmatprep.subr.bf16.mxu1 %v9632_v9  ;;  %v9650_v21 = vld [vmem:[%s14623_s1 + $0xac] ss:$16 sps:$4 sm:$0xff]   ;;  %v9652_v22 = vld [vmem:[%s14623_s1 + $0xa0] ss:$16 sps:$4 sm:$0xff]   ;;  %v9653_v23 = vld [vmem:[%s14623_s1 + $0xa8] ss:$16 sps:$4 sm:$0xff]  }
   0x9   :  { %v9654_v24 = vld [vmem:[%s14623_s1 + $0xc4] ss:$16 sps:$4 sm:$0xff]   ;;  %v9656_v25 = vld [vmem:[%s14623_s1 + $0xcc] ss:$16 sps:$4 sm:$0xff]   ;;  %v9658_v26 = vld [vmem:[%s14623_s1 + $0xc0] ss:$16 sps:$4 sm:$0xff]  }
   0xa   :  { %v9659_v27 = vld [vmem:[%s14623_s1 + $0xc8] ss:$16 sps:$4 sm:$0xff]   ;;  %v9660_v28 = vld [vmem:[%s14623_s1 + $0xe4] ss:$16 sps:$4 sm:$0xff]   ;;  %v9662_v29 = vld [vmem:[%s14623_s1 + $0xec] ss:$16 sps:$4 sm:$0xff]  }
   0xb   :  { %6493 = vmatpush1.bf16.msra.mxu0 %v9634_v10  ;;  %7309 = vmatpush1.bf16.msra.mxu1 %v9635_v11  ;;  %v9664_v30 = vld [vmem:[%s14623_s1 + $0xe0] ss:$16 sps:$4 sm:$0xff]   ;;  %v9665_v31 = vld [vmem:[%s14623_s1 + $0xe8] ss:$16 sps:$4 sm:$0xff]   ;;  %v9666_v32 = vld [vmem:[%s14623_s1 + $0x104] ss:$16 sps:$4 sm:$0xff]  }
   0xc   :  { %6494 = vmatprep.subr.bf16.mxu0 %v9636_v12  ;;  %7310 = vmatprep.subr.bf16.mxu1 %v9638_v13  ;;  %v9668_v33 = vld [vmem:[%s14623_s1 + $0x10c] ss:$16 sps:$4 sm:$0xff]   ;;  %v9670_v34 = vld [vmem:[%s14623_s1 + $0x100] ss:$16 sps:$4 sm:$0xff]   ;;  %v9671_v35 = vld [vmem:[%s14623_s1 + $0x108] ss:$16 sps:$4 sm:$0xff]  }
   0xd   :  { %v9672_v36 = vld [vmem:[%s14623_s1 + $0x124] ss:$16 sps:$4 sm:$0xff]   ;;  %v9674_v37 = vld [vmem:[%s14623_s1 + $0x12c] ss:$16 sps:$4 sm:$0xff]   ;;  %v9676_v38 = vld [vmem:[%s14623_s1 + $0x120] ss:$16 sps:$4 sm:$0xff]  }
   0xe   :  { %v9677_v39 = vld [vmem:[%s14623_s1 + $0x128] ss:$16 sps:$4 sm:$0xff]   ;;  %v9678_v40 = vld [vmem:[%s14623_s1 + $0x144] ss:$16 sps:$4 sm:$0xff]   ;;  %v9680_v41 = vld [vmem:[%s14623_s1 + $0x14c] ss:$16 sps:$4 sm:$0xff]  }
   0xf   :  { %6495 = vmatpush1.bf16.msra.mxu0 %v9640_v14  ;;  %7311 = vmatpush1.bf16.msra.mxu1 %v9641_v15  ;;  %v9682_v42 = vld [vmem:[%s14623_s1 + $0x140] ss:$16 sps:$4 sm:$0xff]   ;;  %v9683_v43 = vld [vmem:[%s14623_s1 + $0x148] ss:$16 sps:$4 sm:$0xff]   ;;  %v9684_v44 = vld [vmem:[%s14623_s1 + $0x164] ss:$16 sps:$4 sm:$0xff]  }
  0x10   :  { %6496 = vmatprep.subr.bf16.mxu0 %v9642_v16  ;;  %7312 = vmatprep.subr.bf16.mxu1 %v9644_v17  ;;  %v9686_v45 = vld [vmem:[%s14623_s1 + $0x16c] ss:$16 sps:$4 sm:$0xff]   ;;  %v24_v46 = vld [vmem:[%s14624_s0] sm:$0xff]  ;;  %v9689_v49 = vld [vmem:[%s14623_s1 + $0x168] ss:$16 sps:$4 sm:$0xff]  }
  0x11   :  { %v40_v47 = vld [vmem:[%s14624_s0 + $0x80] sm:$0xff]  ;;  %v9692_v52 = vld [vmem:[%s14623_s1 + $0x18c] ss:$16 sps:$4 sm:$0xff]   ;;  %v9695_v54 = vld [vmem:[%s14623_s1 + $0x188] ss:$16 sps:$4 sm:$0xff]  }
  0x12   :  { %v9688_v48 = vld [vmem:[%s14623_s1 + $0x160] ss:$16 sps:$4 sm:$0xff]   ;;  %v8289_v50 = vcombine.high %v24_v46, %v40_v47  ;;  %v9690_v51 = vld [vmem:[%s14623_s1 + $0x184] ss:$16 sps:$4 sm:$0xff]   ;;  %v9698_v56 = vld [vmem:[%s14623_s1 + $0x1ac] ss:$16 sps:$4 sm:$0xff]   ;;  %v8288_v5 = vcombine.low %v24_v46, %v40_v47 }
  0x13   :  { %6497 = vmatpush1.bf16.msra.mxu0 %v9646_v18  ;;  %7313 = vmatpush1.bf16.msra.mxu1 %v9647_v19  ;;  %v9694_v53 = vld [vmem:[%s14623_s1 + $0x180] ss:$16 sps:$4 sm:$0xff]   ;;  %v9696_v55 = vld [vmem:[%s14623_s1 + $0x1a4] ss:$16 sps:$4 sm:$0xff]   ;;  %v9701_v58 = vld [vmem:[%s14623_s1 + $0x1a8] ss:$16 sps:$4 sm:$0xff]  }
  0x14   :  { %6498 = vmatprep.subr.bf16.mxu0 %v9648_v20  ;;  %7314 = vmatprep.subr.bf16.mxu1 %v9650_v21  ;;  %v9700_v57 = vld [vmem:[%s14623_s1 + $0x1a0] ss:$16 sps:$4 sm:$0xff]   ;;  %v9702_v59 = vld [vmem:[%s14623_s1 + $0x1c4] ss:$16 sps:$4 sm:$0xff]   ;;  %v9704_v60 = vld [vmem:[%s14623_s1 + $0x1cc] ss:$16 sps:$4 sm:$0xff]  }
  0x15   :  { %6520 = vmatprep.mubr.bf16.mxu0 %v8289_v50  ;;  %7336 = vmatprep.mubr.bf16.mxu1 %v8289_v50  ;;  %v9706_v61 = vld [vmem:[%s14623_s1 + $0x1c0] ss:$16 sps:$4 sm:$0xff]   ;;  %v9707_v62 = vld [vmem:[%s14623_s1 + $0x1c8] ss:$16 sps:$4 sm:$0xff]   ;;  %v9708_v63 = vld [vmem:[%s14623_s1 + $0x1e4] ss:$16 sps:$4 sm:$0xff]  }
  0x16   :  { %v9710_v0 = vld [vmem:[%s14623_s1 + $0x1ec] ss:$16 sps:$4 sm:$0xff]   ;;  %v9712_v1 = vld [vmem:[%s14623_s1 + $0x1e0] ss:$16 sps:$4 sm:$0xff]   ;;  %v9713_v2 = vld [vmem:[%s14623_s1 + $0x1e8] ss:$16 sps:$4 sm:$0xff]  }
  0x17   :  { %6499 = vmatpush1.bf16.msra.mxu0 %v9652_v22  ;;  %7315 = vmatpush1.bf16.msra.mxu1 %v9653_v23  ;;  %v9716_v3 = vld [vmem:[%s14623_s1 + $0x204] ss:$16 sps:$4 sm:$0xff]   ;;  %v9719_v4 = vld [vmem:[%s14623_s1 + $0x20c] ss:$16 sps:$4 sm:$0xff]   ;;  %v9714_v6 = vld [vmem:[%s14623_s1 + $0x200] ss:$16 sps:$4 sm:$0xff]  }
  0x18   :  { %6500 = vmatprep.subr.bf16.mxu0 %v9654_v24  ;;  %7316 = vmatprep.subr.bf16.mxu1 %v9656_v25  ;;  %v9717_v7 = vld [vmem:[%s14623_s1 + $0x208] ss:$16 sps:$4 sm:$0xff]   ;;  %v9722_v8 = vld [vmem:[%s14623_s1 + $0x224] ss:$16 sps:$4 sm:$0xff]   ;;  %v9725_v9 = vld [vmem:[%s14623_s1 + $0x22c] ss:$16 sps:$4 sm:$0xff]  }
  0x19   :  { %v9720_v10 = vld [vmem:[%s14623_s1 + $0x220] ss:$16 sps:$4 sm:$0xff]   ;;  %v9723_v11 = vld [vmem:[%s14623_s1 + $0x228] ss:$16 sps:$4 sm:$0xff]   ;;  %v9728_v12 = vld [vmem:[%s14623_s1 + $0x244] ss:$16 sps:$4 sm:$0xff]  }
  0x1a   :  { %v9731_v13 = vld [vmem:[%s14623_s1 + $0x24c] ss:$16 sps:$4 sm:$0xff]   ;;  %v9726_v14 = vld [vmem:[%s14623_s1 + $0x240] ss:$16 sps:$4 sm:$0xff]   ;;  %v9729_v15 = vld [vmem:[%s14623_s1 + $0x248] ss:$16 sps:$4 sm:$0xff]  }
  0x1b   :  { %6501 = vmatpush1.bf16.msra.mxu0 %v9658_v26  ;;  %7317 = vmatpush1.bf16.msra.mxu1 %v9659_v27  ;;  %v9734_v16 = vld [vmem:[%s14623_s1 + $0x264] ss:$16 sps:$4 sm:$0xff]   ;;  %v9737_v17 = vld [vmem:[%s14623_s1 + $0x26c] ss:$16 sps:$4 sm:$0xff]   ;;  %v9732_v18 = vld [vmem:[%s14623_s1 + $0x260] ss:$16 sps:$4 sm:$0xff]  }
  0x1c   :  { %6502 = vmatprep.subr.bf16.mxu0 %v9660_v28  ;;  %7318 = vmatprep.subr.bf16.mxu1 %v9662_v29  ;;  %v9735_v19 = vld [vmem:[%s14623_s1 + $0x268] ss:$16 sps:$4 sm:$0xff]   ;;  %v9740_v20 = vld [vmem:[%s14623_s1 + $0x284] ss:$16 sps:$4 sm:$0xff]   ;;  %v9743_v21 = vld [vmem:[%s14623_s1 + $0x28c] ss:$16 sps:$4 sm:$0xff]  }
  0x1d   :  { %v9738_v22 = vld [vmem:[%s14623_s1 + $0x280] ss:$16 sps:$4 sm:$0xff]   ;;  %v9741_v23 = vld [vmem:[%s14623_s1 + $0x288] ss:$16 sps:$4 sm:$0xff]   ;;  %v9746_v24 = vld [vmem:[%s14623_s1 + $0x2a4] ss:$16 sps:$4 sm:$0xff]  }
  0x1e   :  { %v56_v25 = vld [vmem:[%s14624_s0 + $0x100] sm:$0xff]  ;;  %v9749_v26 = vld [vmem:[%s14623_s1 + $0x2ac] ss:$16 sps:$4 sm:$0xff]  }
  0x1f   :  { %6503 = vmatpush1.bf16.msra.mxu0 %v9664_v30  ;;  %7319 = vmatpush1.bf16.msra.mxu1 %v9665_v31  ;;  %v8321_v27 = vcombine.high %v56_v25, %v56_v25  ;;  %v8320_v28 = vcombine.low %v56_v25, %v56_v25  ;;  %v9744_v29 = vld [vmem:[%s14623_s1 + $0x2a0] ss:$16 sps:$4 sm:$0xff]   ;;  %v9747_v30 = vld [vmem:[%s14623_s1 + $0x2a8] ss:$16 sps:$4 sm:$0xff]   ;;  %v9752_v31 = vld [vmem:[%s14623_s1 + $0x2c4] ss:$16 sps:$4 sm:$0xff]  }
  0x20   :  { %6504 = vmatprep.subr.bf16.mxu0 %v9666_v32  ;;  %7320 = vmatprep.subr.bf16.mxu1 %v9668_v33  ;;  %v9755_v32 = vld [vmem:[%s14623_s1 + $0x2cc] ss:$16 sps:$4 sm:$0xff]   ;;  %v9770_v46 = vld [vmem:[%s14623_s1 + $0x324] ss:$16 sps:$4 sm:$0xff]  }
  0x21   :  { %v11495_v33 = vld [vmem:[%s14624_s0 + $0x8] sm:$0xff]  ;;  %v9776_v50 = vld [vmem:[%s14623_s1 + $0x344] ss:$16 sps:$4 sm:$0xff]  }
  0x22   :  { %v9773_v47 = vld [vmem:[%s14623_s1 + $0x32c] ss:$16 sps:$4 sm:$0xff]  }
  0x23   :  { %6505 = vmatpush1.bf16.msra.mxu0 %v9670_v34  ;;  %7321 = vmatpush1.bf16.msra.mxu1 %v9671_v35  ;;  %v11500_v34 = vld [vmem:[%s14624_s0 + $0x88] sm:$0xff]  ;;  %v9750_v35 = vld [vmem:[%s14623_s1 + $0x2c0] ss:$16 sps:$4 sm:$0xff]  }
  0x24   :  { %6506 = vmatprep.subr.bf16.mxu0 %v9672_v36  ;;  %7322 = vmatprep.subr.bf16.mxu1 %v9674_v37  ;;  %v8291_v36 = vcombine.high %v11495_v33, %v11500_v34  ;;  %v9753_v37 = vld [vmem:[%s14623_s1 + $0x2c8] ss:$16 sps:$4 sm:$0xff]  }
  0x27   :  { %6507 = vmatpush1.bf16.msra.mxu0 %v9676_v38  ;;  %7323 = vmatpush1.bf16.msra.mxu1 %v9677_v39  ;;  %v9758_v38 = vld [vmem:[%s14623_s1 + $0x2e4] ss:$16 sps:$4 sm:$0xff]   ;;  %v9761_v39 = vld [vmem:[%s14623_s1 + $0x2ec] ss:$16 sps:$4 sm:$0xff]  }
  0x28   :  { %6508 = vmatprep.subr.bf16.mxu0 %v9678_v40  ;;  %7324 = vmatprep.subr.bf16.mxu1 %v9680_v41  ;;  %v9756_v40 = vld [vmem:[%s14623_s1 + $0x2e0] ss:$16 sps:$4 sm:$0xff]   ;;  %v9759_v41 = vld [vmem:[%s14623_s1 + $0x2e8] ss:$16 sps:$4 sm:$0xff]  }
  0x2b   :  { %6509 = vmatpush1.bf16.msra.mxu0 %v9682_v42  ;;  %7325 = vmatpush1.bf16.msra.mxu1 %v9683_v43  ;;  %v9764_v42 = vld [vmem:[%s14623_s1 + $0x304] ss:$16 sps:$4 sm:$0xff]   ;;  %v9767_v43 = vld [vmem:[%s14623_s1 + $0x30c] ss:$16 sps:$4 sm:$0xff]  }
  0x2c   :  { %6510 = vmatprep.subr.bf16.mxu0 %v9684_v44  ;;  %7326 = vmatprep.subr.bf16.mxu1 %v9686_v45  ;;  %v9762_v44 = vld [vmem:[%s14623_s1 + $0x300] ss:$16 sps:$4 sm:$0xff]   ;;  %v9765_v45 = vld [vmem:[%s14623_s1 + $0x308] ss:$16 sps:$4 sm:$0xff]  }
  0x2f   :  { %6511 = vmatpush1.bf16.msra.mxu0 %v9688_v48  ;;  %7327 = vmatpush1.bf16.msra.mxu1 %v9689_v49  ;;  %v9768_v48 = vld [vmem:[%s14623_s1 + $0x320] ss:$16 sps:$4 sm:$0xff]   ;;  %v9771_v49 = vld [vmem:[%s14623_s1 + $0x328] ss:$16 sps:$4 sm:$0xff]  }
  0x30   :  { %6512 = vmatprep.subr.bf16.mxu0 %v9690_v51  ;;  %7328 = vmatprep.subr.bf16.mxu1 %v9692_v52  ;;  %v9779_v51 = vld [vmem:[%s14623_s1 + $0x34c] ss:$16 sps:$4 sm:$0xff]   ;;  %v9774_v52 = vld [vmem:[%s14623_s1 + $0x340] ss:$16 sps:$4 sm:$0xff]  }
  0x33   :  { %6513 = vmatpush1.bf16.msra.mxu0 %v9694_v53  ;;  %7329 = vmatpush1.bf16.msra.mxu1 %v9695_v54  ;;  %v9777_v53 = vld [vmem:[%s14623_s1 + $0x348] ss:$16 sps:$4 sm:$0xff]   ;;  %v9782_v54 = vld [vmem:[%s14623_s1 + $0x364] ss:$16 sps:$4 sm:$0xff]  }
  0x34   :  { %6514 = vmatprep.subr.bf16.mxu0 %v9696_v55  ;;  %7330 = vmatprep.subr.bf16.mxu1 %v9698_v56  ;;  %v9785_v55 = vld [vmem:[%s14623_s1 + $0x36c] ss:$16 sps:$4 sm:$0xff]   ;;  %v9780_v56 = vld [vmem:[%s14623_s1 + $0x360] ss:$16 sps:$4 sm:$0xff]  }
  0x37   :  { %6515 = vmatpush1.bf16.msra.mxu0 %v9700_v57  ;;  %7331 = vmatpush1.bf16.msra.mxu1 %v9701_v58  ;;  %v9783_v57 = vld [vmem:[%s14623_s1 + $0x368] ss:$16 sps:$4 sm:$0xff]   ;;  %v9788_v58 = vld [vmem:[%s14623_s1 + $0x384] ss:$16 sps:$4 sm:$0xff]  }
  0x38   :  { %6516 = vmatprep.subr.bf16.mxu0 %v9702_v59  ;;  %7332 = vmatprep.subr.bf16.mxu1 %v9704_v60  ;;  %v9791_v59 = vld [vmem:[%s14623_s1 + $0x38c] ss:$16 sps:$4 sm:$0xff]   ;;  %v9786_v60 = vld [vmem:[%s14623_s1 + $0x380] ss:$16 sps:$4 sm:$0xff]  }
  0x3b   :  { %6517 = vmatpush1.bf16.msra.mxu0 %v9706_v61  ;;  %7333 = vmatpush1.bf16.msra.mxu1 %v9707_v62  ;;  %v9789_v61 = vld [vmem:[%s14623_s1 + $0x388] ss:$16 sps:$4 sm:$0xff]   ;;  %v9794_v62 = vld [vmem:[%s14623_s1 + $0x3a4] ss:$16 sps:$4 sm:$0xff]  }
  0x3c   :  { %6518 = vmatprep.subr.bf16.mxu0 %v9708_v63  ;;  %7334 = vmatprep.subr.bf16.mxu1 %v9710_v0  ;;  %v9797_v63 = vld [vmem:[%s14623_s1 + $0x3ac] ss:$16 sps:$4 sm:$0xff]   ;;  %v9792_v0 = vld [vmem:[%s14623_s1 + $0x3a0] ss:$16 sps:$4 sm:$0xff]  }
  0x3f   :  { %6519 = vmatpush1.bf16.msra.mxu0 %v9712_v1  ;;  %7335 = vmatpush1.bf16.msra.mxu1 %v9713_v2  ;;  %v9795_v1 = vld [vmem:[%s14623_s1 + $0x3a8] ss:$16 sps:$4 sm:$0xff]   ;;  %v9801_v2 = vld [vmem:[%s14623_s1 + $0x3c4] ss:$16 sps:$4 sm:$0xff]  }
  0x40   :  { %6539 = vmatprep.subr.bf16.mxu0 %v9716_v3  ;;  %7355 = vmatprep.subr.bf16.mxu1 %v9719_v4  ;;  %v9804_v3 = vld [vmem:[%s14623_s1 + $0x3cc] ss:$16 sps:$4 sm:$0xff]   ;;  %v9799_v4 = vld [vmem:[%s14623_s1 + $0x3c0] ss:$16 sps:$4 sm:$0xff]  }
  0x42   :  { %6521 = vmatmul.mubr.bf16.vlgmr.msra.gmra.mrb[0].mxu0 %v8288_v5  ;;  %7337 = vmatmul.mubr.bf16.vlgmr.msra.gmra.mrb[0].mxu1 %v8288_v5  ;;  %v9802_v5 = vld [vmem:[%s14623_s1 + $0x3c8] ss:$16 sps:$4 sm:$0xff]  }
  0x43   :  { %6540 = vmatpush1.bf16.msra.mxu0 %v9714_v6  ;;  %7356 = vmatpush1.bf16.msra.mxu1 %v9717_v7  ;;  %v9808_v6 = vld [vmem:[%s14623_s1 + $0x3e4] ss:$16 sps:$4 sm:$0xff]   ;;  %v9811_v7 = vld [vmem:[%s14623_s1 + $0x3ec] ss:$16 sps:$4 sm:$0xff]  }
  0x44   :  { %6541 = vmatprep.subr.bf16.mxu0 %v9722_v8  ;;  %7357 = vmatprep.subr.bf16.mxu1 %v9725_v9  ;;  %v9806_v8 = vld [vmem:[%s14623_s1 + $0x3e0] ss:$16 sps:$4 sm:$0xff]   ;;  %v9809_v9 = vld [vmem:[%s14623_s1 + $0x3e8] ss:$16 sps:$4 sm:$0xff]  }
  0x45   :  { %6530 = vmatprep.mubr.bf16.mxu0 %v8321_v27  ;;  %7346 = vmatprep.mubr.bf16.mxu1 %v8321_v27  ;;  %v11667_v27 = vld [vmem:[%s14624_s0 + $0x90] sm:$0xff] }
  0x47   :  { %6542 = vmatpush1.bf16.msra.mxu0 %v9720_v10  ;;  %7358 = vmatpush1.bf16.msra.mxu1 %v9723_v11  ;;  %v9814_v10 = vld [vmem:[%s14623_s1 + $0x404] ss:$16 sps:$4 sm:$0xff]   ;;  %v9817_v11 = vld [vmem:[%s14623_s1 + $0x40c] ss:$16 sps:$4 sm:$0xff]  }
  0x48   :  { %6543 = vmatprep.subr.bf16.mxu0 %v9728_v12  ;;  %7359 = vmatprep.subr.bf16.mxu1 %v9731_v13  ;;  %v8290_v12 = vcombine.low %v11495_v33, %v11500_v34  ;;  %v57_v13 = vld [vmem:[%s14624_s0 + $0x108] sm:$0xff]  ;;  %v9838_v33 = vld [vmem:[%s14623_s1 + $0x484] ss:$16 sps:$4 sm:$0xff]  }
  0x49   :  { %v8322_v25 = vcombine.low %v57_v13, %v57_v13  ;;  %v9841_v34 = vld [vmem:[%s14623_s1 + $0x48c] ss:$16 sps:$4 sm:$0xff]  }
  0x4a   :  { %6531 = vmatmul.mubr.bf16.gmra.mrb[4].mxu0 %v8320_v28  ;;  %7347 = vmatmul.mubr.bf16.gmra.mrb[4].mxu1 %v8320_v28  ;;  %v9832_v28 = vld [vmem:[%s14623_s1 + $0x464] ss:$16 sps:$4 sm:$0xff]  }
  0x4b   :  { %6544 = vmatpush1.bf16.msra.mxu0 %v9726_v14  ;;  %7360 = vmatpush1.bf16.msra.mxu1 %v9729_v15  ;;  %v9812_v14 = vld [vmem:[%s14623_s1 + $0x400] ss:$16 sps:$4 sm:$0xff]   ;;  %v9815_v15 = vld [vmem:[%s14623_s1 + $0x408] ss:$16 sps:$4 sm:$0xff]  }
  0x4c   :  { %6545 = vmatprep.subr.bf16.mxu0 %v9734_v16  ;;  %7361 = vmatprep.subr.bf16.mxu1 %v9737_v17  ;;  %v9820_v16 = vld [vmem:[%s14623_s1 + $0x424] ss:$16 sps:$4 sm:$0xff]   ;;  %v9823_v17 = vld [vmem:[%s14623_s1 + $0x42c] ss:$16 sps:$4 sm:$0xff]  }
  0x4d   :  { %6571 = vmatprep.mubr.bf16.mxu0 %v8291_v36  ;;  %7387 = vmatprep.mubr.bf16.mxu1 %v8291_v36  ;;  %v9839_v36 = vld [vmem:[%s14623_s1 + $0x488] ss:$16 sps:$4 sm:$0xff]  }
  0x4f   :  { %6546 = vmatpush1.bf16.msra.mxu0 %v9732_v18  ;;  %7362 = vmatpush1.bf16.msra.mxu1 %v9735_v19  ;;  %v8323_v18 = vcombine.high %v57_v13, %v57_v13  ;;  %v9818_v19 = vld [vmem:[%s14623_s1 + $0x420] ss:$16 sps:$4 sm:$0xff]   ;;  %v9906_v13 = vld [vmem:[%s14623_s1 + $0x5e4] ss:$16 sps:$4 sm:$0xff]  }
  0x50   :  { %6547 = vmatprep.subr.bf16.mxu0 %v9740_v20  ;;  %7363 = vmatprep.subr.bf16.mxu1 %v9743_v21  ;;  %v9821_v20 = vld [vmem:[%s14623_s1 + $0x428] ss:$16 sps:$4 sm:$0xff]   ;;  %v9826_v21 = vld [vmem:[%s14623_s1 + $0x444] ss:$16 sps:$4 sm:$0xff]  }
  0x53   :  { %6548 = vmatpush1.bf16.msra.mxu0 %v9738_v22  ;;  %7364 = vmatpush1.bf16.msra.mxu1 %v9741_v23  ;;  %v9829_v22 = vld [vmem:[%s14623_s1 + $0x44c] ss:$16 sps:$4 sm:$0xff]   ;;  %v9824_v23 = vld [vmem:[%s14623_s1 + $0x440] ss:$16 sps:$4 sm:$0xff]  }
  0x54   :  { %6549 = vmatprep.subr.bf16.mxu0 %v9746_v24  ;;  %7365 = vmatprep.subr.bf16.mxu1 %v9749_v26  ;;  %v9827_v24 = vld [vmem:[%s14623_s1 + $0x448] ss:$16 sps:$4 sm:$0xff]   ;;  %v11662_v26 = vld [vmem:[%s14624_s0 + $0x10] sm:$0xff] }
  0x57   :  { %6550 = vmatpush1.bf16.msra.mxu0 %v9744_v29  ;;  %7366 = vmatpush1.bf16.msra.mxu1 %v9747_v30  ;;  %v9835_v29 = vld [vmem:[%s14623_s1 + $0x46c] ss:$16 sps:$4 sm:$0xff]   ;;  %v8293_v30 = vcombine.high %v11662_v26, %v11667_v27 }
  0x58   :  { %6551 = vmatprep.subr.bf16.mxu0 %v9752_v31  ;;  %7367 = vmatprep.subr.bf16.mxu1 %v9755_v32  ;;  %v9830_v31 = vld [vmem:[%s14623_s1 + $0x460] ss:$16 sps:$4 sm:$0xff]   ;;  %v9833_v32 = vld [vmem:[%s14623_s1 + $0x468] ss:$16 sps:$4 sm:$0xff]  }
  0x5b   :  { %6552 = vmatpush1.bf16.msra.mxu0 %v9750_v35  ;;  %7368 = vmatpush1.bf16.msra.mxu1 %v9753_v37  ;;  %v9836_v35 = vld [vmem:[%s14623_s1 + $0x480] ss:$16 sps:$4 sm:$0xff]   ;;  %v9844_v37 = vld [vmem:[%s14623_s1 + $0x4a4] ss:$16 sps:$4 sm:$0xff]  }
  0x5c   :  { %6553 = vmatprep.subr.bf16.mxu0 %v9758_v38  ;;  %7369 = vmatprep.subr.bf16.mxu1 %v9761_v39  ;;  %v9847_v38 = vld [vmem:[%s14623_s1 + $0x4ac] ss:$16 sps:$4 sm:$0xff]   ;;  %v9842_v39 = vld [vmem:[%s14623_s1 + $0x4a0] ss:$16 sps:$4 sm:$0xff]  }
  0x5f   :  { %6554 = vmatpush1.bf16.msra.mxu0 %v9756_v40  ;;  %7370 = vmatpush1.bf16.msra.mxu1 %v9759_v41  ;;  %v9845_v40 = vld [vmem:[%s14623_s1 + $0x4a8] ss:$16 sps:$4 sm:$0xff]   ;;  %v9850_v41 = vld [vmem:[%s14623_s1 + $0x4c4] ss:$16 sps:$4 sm:$0xff]  }
  0x60   :  { %6555 = vmatprep.subr.bf16.mxu0 %v9764_v42  ;;  %7371 = vmatprep.subr.bf16.mxu1 %v9767_v43  ;;  %v9853_v42 = vld [vmem:[%s14623_s1 + $0x4cc] ss:$16 sps:$4 sm:$0xff]   ;;  %v9848_v43 = vld [vmem:[%s14623_s1 + $0x4c0] ss:$16 sps:$4 sm:$0xff]  }
  0x63   :  { %6556 = vmatpush1.bf16.msra.mxu0 %v9762_v44  ;;  %7372 = vmatpush1.bf16.msra.mxu1 %v9765_v45  ;;  %v9851_v44 = vld [vmem:[%s14623_s1 + $0x4c8] ss:$16 sps:$4 sm:$0xff]   ;;  %v9856_v45 = vld [vmem:[%s14623_s1 + $0x4e4] ss:$16 sps:$4 sm:$0xff]  }
  0x64   :  { %6557 = vmatprep.subr.bf16.mxu0 %v9770_v46  ;;  %7373 = vmatprep.subr.bf16.mxu1 %v9773_v47  ;;  %v9859_v46 = vld [vmem:[%s14623_s1 + $0x4ec] ss:$16 sps:$4 sm:$0xff]   ;;  %v9854_v47 = vld [vmem:[%s14623_s1 + $0x4e0] ss:$16 sps:$4 sm:$0xff]  }
  0x67   :  { %6558 = vmatpush1.bf16.msra.mxu0 %v9768_v48  ;;  %7374 = vmatpush1.bf16.msra.mxu1 %v9771_v49  ;;  %v9857_v48 = vld [vmem:[%s14623_s1 + $0x4e8] ss:$16 sps:$4 sm:$0xff]   ;;  %v9862_v49 = vld [vmem:[%s14623_s1 + $0x504] ss:$16 sps:$4 sm:$0xff]  }
  0x68   :  { %6559 = vmatprep.subr.bf16.mxu0 %v9776_v50  ;;  %7375 = vmatprep.subr.bf16.mxu1 %v9779_v51  ;;  %v9865_v50 = vld [vmem:[%s14623_s1 + $0x50c] ss:$16 sps:$4 sm:$0xff]   ;;  %v9860_v51 = vld [vmem:[%s14623_s1 + $0x500] ss:$16 sps:$4 sm:$0xff]  }
  0x6b   :  { %6560 = vmatpush1.bf16.msra.mxu0 %v9774_v52  ;;  %7376 = vmatpush1.bf16.msra.mxu1 %v9777_v53  ;;  %v9863_v52 = vld [vmem:[%s14623_s1 + $0x508] ss:$16 sps:$4 sm:$0xff]   ;;  %v9868_v53 = vld [vmem:[%s14623_s1 + $0x524] ss:$16 sps:$4 sm:$0xff]  }
  0x6c   :  { %6561 = vmatprep.subr.bf16.mxu0 %v9782_v54  ;;  %7377 = vmatprep.subr.bf16.mxu1 %v9785_v55  ;;  %v9871_v54 = vld [vmem:[%s14623_s1 + $0x52c] ss:$16 sps:$4 sm:$0xff]   ;;  %v9866_v55 = vld [vmem:[%s14623_s1 + $0x520] ss:$16 sps:$4 sm:$0xff]  }
  0x6f   :  { %6562 = vmatpush1.bf16.msra.mxu0 %v9780_v56  ;;  %7378 = vmatpush1.bf16.msra.mxu1 %v9783_v57  ;;  %v9869_v56 = vld [vmem:[%s14623_s1 + $0x528] ss:$16 sps:$4 sm:$0xff]   ;;  %v9874_v57 = vld [vmem:[%s14623_s1 + $0x544] ss:$16 sps:$4 sm:$0xff]  }
  0x70   :  { %6563 = vmatprep.subr.bf16.mxu0 %v9788_v58  ;;  %7379 = vmatprep.subr.bf16.mxu1 %v9791_v59  ;;  %v9877_v58 = vld [vmem:[%s14623_s1 + $0x54c] ss:$16 sps:$4 sm:$0xff]   ;;  %v9872_v59 = vld [vmem:[%s14623_s1 + $0x540] ss:$16 sps:$4 sm:$0xff]  }
  0x73   :  { %6564 = vmatpush1.bf16.msra.mxu0 %v9786_v60  ;;  %7380 = vmatpush1.bf16.msra.mxu1 %v9789_v61  ;;  %v9875_v60 = vld [vmem:[%s14623_s1 + $0x548] ss:$16 sps:$4 sm:$0xff]   ;;  %v9880_v61 = vld [vmem:[%s14623_s1 + $0x564] ss:$16 sps:$4 sm:$0xff]  }
  0x74   :  { %6565 = vmatprep.subr.bf16.mxu0 %v9794_v62  ;;  %7381 = vmatprep.subr.bf16.mxu1 %v9797_v63  ;;  %v9883_v62 = vld [vmem:[%s14623_s1 + $0x56c] ss:$16 sps:$4 sm:$0xff]   ;;  %v9878_v63 = vld [vmem:[%s14623_s1 + $0x560] ss:$16 sps:$4 sm:$0xff]  }
  0x77   :  { %6566 = vmatpush1.bf16.msra.mxu0 %v9792_v0  ;;  %7382 = vmatpush1.bf16.msra.mxu1 %v9795_v1  ;;  %v9881_v0 = vld [vmem:[%s14623_s1 + $0x568] ss:$16 sps:$4 sm:$0xff]   ;;  %v9886_v1 = vld [vmem:[%s14623_s1 + $0x584] ss:$16 sps:$4 sm:$0xff]  }
  0x78   :  { %6567 = vmatprep.subr.bf16.mxu0 %v9801_v2  ;;  %7383 = vmatprep.subr.bf16.mxu1 %v9804_v3  ;;  %v9889_v2 = vld [vmem:[%s14623_s1 + $0x58c] ss:$16 sps:$4 sm:$0xff]   ;;  %v9884_v3 = vld [vmem:[%s14623_s1 + $0x580] ss:$16 sps:$4 sm:$0xff]  }
  0x7b   :  { %6568 = vmatpush1.bf16.msra.mxu0 %v9799_v4  ;;  %7384 = vmatpush1.bf16.msra.mxu1 %v9802_v5  ;;  %v9887_v4 = vld [vmem:[%s14623_s1 + $0x588] ss:$16 sps:$4 sm:$0xff]   ;;  %v9892_v5 = vld [vmem:[%s14623_s1 + $0x5a4] ss:$16 sps:$4 sm:$0xff]  }
  0x7c   :  { %6569 = vmatprep.subr.bf16.mxu0 %v9808_v6  ;;  %7385 = vmatprep.subr.bf16.mxu1 %v9811_v7  ;;  %v9895_v6 = vld [vmem:[%s14623_s1 + $0x5ac] ss:$16 sps:$4 sm:$0xff]   ;;  %v9890_v7 = vld [vmem:[%s14623_s1 + $0x5a0] ss:$16 sps:$4 sm:$0xff]  }
  0x7f   :  { %6570 = vmatpush1.bf16.msra.mxu0 %v9806_v8  ;;  %7386 = vmatpush1.bf16.msra.mxu1 %v9809_v9  ;;  %v9893_v8 = vld [vmem:[%s14623_s1 + $0x5a8] ss:$16 sps:$4 sm:$0xff]   ;;  %v9899_v9 = vld [vmem:[%s14623_s1 + $0x5c4] ss:$16 sps:$4 sm:$0xff]  }
  0x80   :  { %6590 = vmatprep.subr.bf16.mxu0 %v9814_v10  ;;  %7406 = vmatprep.subr.bf16.mxu1 %v9817_v11  ;;  %v9902_v10 = vld [vmem:[%s14623_s1 + $0x5cc] ss:$16 sps:$4 sm:$0xff]   ;;  %v9897_v11 = vld [vmem:[%s14623_s1 + $0x5c0] ss:$16 sps:$4 sm:$0xff]  }
  0x82   :  { %6572 = vmatmul.mubr.bf16.vlgmr.msra.gmra.mrb[0].mxu0 %v8290_v12  ;;  %7388 = vmatmul.mubr.bf16.vlgmr.msra.gmra.mrb[0].mxu1 %v8290_v12  ;;  %v9900_v12 = vld [vmem:[%s14623_s1 + $0x5c8] ss:$16 sps:$4 sm:$0xff]  }
  0x83   :  { %6591 = vmatpush1.bf16.msra.mxu0 %v9812_v14  ;;  %7407 = vmatpush1.bf16.msra.mxu1 %v9815_v15  ;;  %v9909_v14 = vld [vmem:[%s14623_s1 + $0x5ec] ss:$16 sps:$4 sm:$0xff]   ;;  %v9904_v15 = vld [vmem:[%s14623_s1 + $0x5e0] ss:$16 sps:$4 sm:$0xff]  }
  0x84   :  { %6592 = vmatprep.subr.bf16.mxu0 %v9820_v16  ;;  %7408 = vmatprep.subr.bf16.mxu1 %v9823_v17  ;;  %v9907_v16 = vld [vmem:[%s14623_s1 + $0x5e8] ss:$16 sps:$4 sm:$0xff]   ;;  %v9912_v17 = vld [vmem:[%s14623_s1 + $0x604] ss:$16 sps:$4 sm:$0xff]  }
  0x85   :  { %6581 = vmatprep.mubr.bf16.mxu0 %v8323_v18  ;;  %7397 = vmatprep.mubr.bf16.mxu1 %v8323_v18  ;;  %v9915_v18 = vld [vmem:[%s14623_s1 + $0x60c] ss:$16 sps:$4 sm:$0xff]  }
  0x87   :  { %6593 = vmatpush1.bf16.msra.mxu0 %v9818_v19  ;;  %7409 = vmatpush1.bf16.msra.mxu1 %v9821_v20  ;;  %v8292_v19 = vcombine.low %v11662_v26, %v11667_v27  ;;  %v9910_v20 = vld [vmem:[%s14623_s1 + $0x600] ss:$16 sps:$4 sm:$0xff]   ;;  %v9919_v27 = vld [vmem:[%s14623_s1 + $0x628] ss:$16 sps:$4 sm:$0xff]  }
  0x88   :  { %6594 = vmatprep.subr.bf16.mxu0 %v9826_v21  ;;  %7410 = vmatprep.subr.bf16.mxu1 %v9829_v22  ;;  %v58_v21 = vld [vmem:[%s14624_s0 + $0x110] sm:$0xff]  ;;  %v9913_v22 = vld [vmem:[%s14623_s1 + $0x608] ss:$16 sps:$4 sm:$0xff]  }
  0x89   :  { %v9916_v26 = vld [vmem:[%s14623_s1 + $0x620] ss:$16 sps:$4 sm:$0xff]  }
  0x8a   :  { %6582 = vmatmul.mubr.bf16.gmra.mrb[4].mxu0 %v8322_v25  ;;  %7398 = vmatmul.mubr.bf16.gmra.mrb[4].mxu1 %v8322_v25  ;;  %v8325_v25 = vcombine.high %v58_v21, %v58_v21 }
  0x8b   :  { %6595 = vmatpush1.bf16.msra.mxu0 %v9824_v23  ;;  %7411 = vmatpush1.bf16.msra.mxu1 %v9827_v24  ;;  %v9918_v23 = vld [vmem:[%s14623_s1 + $0x624] ss:$16 sps:$4 sm:$0xff]   ;;  %v9921_v24 = vld [vmem:[%s14623_s1 + $0x62c] ss:$16 sps:$4 sm:$0xff]  }
  0x8c   :  { %6596 = vmatprep.subr.bf16.mxu0 %v9832_v28  ;;  %7412 = vmatprep.subr.bf16.mxu1 %v9835_v29  ;;  %v9924_v28 = vld [vmem:[%s14623_s1 + $0x644] ss:$16 sps:$4 sm:$0xff]   ;;  %v9927_v29 = vld [vmem:[%s14623_s1 + $0x64c] ss:$16 sps:$4 sm:$0xff]  }
  0x8d   :  { %6622 = vmatprep.mubr.bf16.mxu0 %v8293_v30  ;;  %7438 = vmatprep.mubr.bf16.mxu1 %v8293_v30  ;;  %v9922_v30 = vld [vmem:[%s14623_s1 + $0x640] ss:$16 sps:$4 sm:$0xff]  }
  0x8f   :  { %6597 = vmatpush1.bf16.msra.mxu0 %v9830_v31  ;;  %7413 = vmatpush1.bf16.msra.mxu1 %v9833_v32  ;;  %v8324_v31 = vcombine.low %v58_v21, %v58_v21  ;;  %v11868_v32 = vld [vmem:[%s14624_s0 + $0x18] sm:$0xff] }
  0x90   :  { %6598 = vmatprep.subr.bf16.mxu0 %v9838_v33  ;;  %7414 = vmatprep.subr.bf16.mxu1 %v9841_v34  ;;  %v11873_v33 = vld [vmem:[%s14624_s0 + $0x98] sm:$0xff] }
  0x91   :  { %v9925_v34 = vld [vmem:[%s14623_s1 + $0x648] ss:$16 sps:$4 sm:$0xff]   ;;  %v10007_v21 = vld [vmem:[%s14623_s1 + $0x7ec] ss:$16 sps:$4 sm:$0xff]  }
  0x93   :  { %6599 = vmatpush1.bf16.msra.mxu0 %v9836_v35  ;;  %7415 = vmatpush1.bf16.msra.mxu1 %v9839_v36  ;;  %v9930_v35 = vld [vmem:[%s14623_s1 + $0x664] ss:$16 sps:$4 sm:$0xff]   ;;  %v9933_v36 = vld [vmem:[%s14623_s1 + $0x66c] ss:$16 sps:$4 sm:$0xff]  }
  0x94   :  { %6600 = vmatprep.subr.bf16.mxu0 %v9844_v37  ;;  %7416 = vmatprep.subr.bf16.mxu1 %v9847_v38  ;;  %v8295_v37 = vcombine.high %v11868_v32, %v11873_v33  ;;  %v9928_v38 = vld [vmem:[%s14623_s1 + $0x660] ss:$16 sps:$4 sm:$0xff]  }
  0x97   :  { %6601 = vmatpush1.bf16.msra.mxu0 %v9842_v39  ;;  %7417 = vmatpush1.bf16.msra.mxu1 %v9845_v40  ;;  %v9931_v39 = vld [vmem:[%s14623_s1 + $0x668] ss:$16 sps:$4 sm:$0xff]   ;;  %v9936_v40 = vld [vmem:[%s14623_s1 + $0x684] ss:$16 sps:$4 sm:$0xff]  }
  0x98   :  { %6602 = vmatprep.subr.bf16.mxu0 %v9850_v41  ;;  %7418 = vmatprep.subr.bf16.mxu1 %v9853_v42  ;;  %v9939_v41 = vld [vmem:[%s14623_s1 + $0x68c] ss:$16 sps:$4 sm:$0xff]   ;;  %v9934_v42 = vld [vmem:[%s14623_s1 + $0x680] ss:$16 sps:$4 sm:$0xff]  }
  0x9b   :  { %6603 = vmatpush1.bf16.msra.mxu0 %v9848_v43  ;;  %7419 = vmatpush1.bf16.msra.mxu1 %v9851_v44  ;;  %v9937_v43 = vld [vmem:[%s14623_s1 + $0x688] ss:$16 sps:$4 sm:$0xff]   ;;  %v9942_v44 = vld [vmem:[%s14623_s1 + $0x6a4] ss:$16 sps:$4 sm:$0xff]  }
  0x9c   :  { %6604 = vmatprep.subr.bf16.mxu0 %v9856_v45  ;;  %7420 = vmatprep.subr.bf16.mxu1 %v9859_v46  ;;  %v9945_v45 = vld [vmem:[%s14623_s1 + $0x6ac] ss:$16 sps:$4 sm:$0xff]   ;;  %v9940_v46 = vld [vmem:[%s14623_s1 + $0x6a0] ss:$16 sps:$4 sm:$0xff]  }
  0x9f   :  { %6605 = vmatpush1.bf16.msra.mxu0 %v9854_v47  ;;  %7421 = vmatpush1.bf16.msra.mxu1 %v9857_v48  ;;  %v9943_v47 = vld [vmem:[%s14623_s1 + $0x6a8] ss:$16 sps:$4 sm:$0xff]   ;;  %v9948_v48 = vld [vmem:[%s14623_s1 + $0x6c4] ss:$16 sps:$4 sm:$0xff]  }
  0xa0   :  { %6606 = vmatprep.subr.bf16.mxu0 %v9862_v49  ;;  %7422 = vmatprep.subr.bf16.mxu1 %v9865_v50  ;;  %v9951_v49 = vld [vmem:[%s14623_s1 + $0x6cc] ss:$16 sps:$4 sm:$0xff]   ;;  %v9946_v50 = vld [vmem:[%s14623_s1 + $0x6c0] ss:$16 sps:$4 sm:$0xff]  }
  0xa3   :  { %6607 = vmatpush1.bf16.msra.mxu0 %v9860_v51  ;;  %7423 = vmatpush1.bf16.msra.mxu1 %v9863_v52  ;;  %v9949_v51 = vld [vmem:[%s14623_s1 + $0x6c8] ss:$16 sps:$4 sm:$0xff]   ;;  %v9954_v52 = vld [vmem:[%s14623_s1 + $0x6e4] ss:$16 sps:$4 sm:$0xff]  }
  0xa4   :  { %6608 = vmatprep.subr.bf16.mxu0 %v9868_v53  ;;  %7424 = vmatprep.subr.bf16.mxu1 %v9871_v54  ;;  %v9957_v53 = vld [vmem:[%s14623_s1 + $0x6ec] ss:$16 sps:$4 sm:$0xff]   ;;  %v9952_v54 = vld [vmem:[%s14623_s1 + $0x6e0] ss:$16 sps:$4 sm:$0xff]  }
  0xa7   :  { %6609 = vmatpush1.bf16.msra.mxu0 %v9866_v55  ;;  %7425 = vmatpush1.bf16.msra.mxu1 %v9869_v56  ;;  %v9955_v55 = vld [vmem:[%s14623_s1 + $0x6e8] ss:$16 sps:$4 sm:$0xff]   ;;  %v9960_v56 = vld [vmem:[%s14623_s1 + $0x704] ss:$16 sps:$4 sm:$0xff]  }
  0xa8   :  { %6610 = vmatprep.subr.bf16.mxu0 %v9874_v57  ;;  %7426 = vmatprep.subr.bf16.mxu1 %v9877_v58  ;;  %v9963_v57 = vld [vmem:[%s14623_s1 + $0x70c] ss:$16 sps:$4 sm:$0xff]   ;;  %v9958_v58 = vld [vmem:[%s14623_s1 + $0x700] ss:$16 sps:$4 sm:$0xff]  }
  0xab   :  { %6611 = vmatpush1.bf16.msra.mxu0 %v9872_v59  ;;  %7427 = vmatpush1.bf16.msra.mxu1 %v9875_v60  ;;  %v9961_v59 = vld [vmem:[%s14623_s1 + $0x708] ss:$16 sps:$4 sm:$0xff]   ;;  %v9966_v60 = vld [vmem:[%s14623_s1 + $0x724] ss:$16 sps:$4 sm:$0xff]  }
  0xac   :  { %6612 = vmatprep.subr.bf16.mxu0 %v9880_v61  ;;  %7428 = vmatprep.subr.bf16.mxu1 %v9883_v62  ;;  %v9969_v61 = vld [vmem:[%s14623_s1 + $0x72c] ss:$16 sps:$4 sm:$0xff]   ;;  %v9964_v62 = vld [vmem:[%s14623_s1 + $0x720] ss:$16 sps:$4 sm:$0xff]  }
  0xaf   :  { %6613 = vmatpush1.bf16.msra.mxu0 %v9878_v63  ;;  %7429 = vmatpush1.bf16.msra.mxu1 %v9881_v0  ;;  %v9967_v63 = vld [vmem:[%s14623_s1 + $0x728] ss:$16 sps:$4 sm:$0xff]   ;;  %v9972_v0 = vld [vmem:[%s14623_s1 + $0x744] ss:$16 sps:$4 sm:$0xff]  }
  0xb0   :  { %6614 = vmatprep.subr.bf16.mxu0 %v9886_v1  ;;  %7430 = vmatprep.subr.bf16.mxu1 %v9889_v2  ;;  %v9975_v1 = vld [vmem:[%s14623_s1 + $0x74c] ss:$16 sps:$4 sm:$0xff]   ;;  %v9970_v2 = vld [vmem:[%s14623_s1 + $0x740] ss:$16 sps:$4 sm:$0xff]  }
  0xb3   :  { %6615 = vmatpush1.bf16.msra.mxu0 %v9884_v3  ;;  %7431 = vmatpush1.bf16.msra.mxu1 %v9887_v4  ;;  %v9973_v3 = vld [vmem:[%s14623_s1 + $0x748] ss:$16 sps:$4 sm:$0xff]   ;;  %v9978_v4 = vld [vmem:[%s14623_s1 + $0x764] ss:$16 sps:$4 sm:$0xff]  }
  0xb4   :  { %6616 = vmatprep.subr.bf16.mxu0 %v9892_v5  ;;  %7432 = vmatprep.subr.bf16.mxu1 %v9895_v6  ;;  %v9981_v5 = vld [vmem:[%s14623_s1 + $0x76c] ss:$16 sps:$4 sm:$0xff]   ;;  %v9976_v6 = vld [vmem:[%s14623_s1 + $0x760] ss:$16 sps:$4 sm:$0xff]  }
  0xb7   :  { %6617 = vmatpush1.bf16.msra.mxu0 %v9890_v7  ;;  %7433 = vmatpush1.bf16.msra.mxu1 %v9893_v8  ;;  %v9979_v7 = vld [vmem:[%s14623_s1 + $0x768] ss:$16 sps:$4 sm:$0xff]   ;;  %v9984_v8 = vld [vmem:[%s14623_s1 + $0x784] ss:$16 sps:$4 sm:$0xff]  }
  0xb8   :  { %6618 = vmatprep.subr.bf16.mxu0 %v9899_v9  ;;  %7434 = vmatprep.subr.bf16.mxu1 %v9902_v10  ;;  %v9987_v9 = vld [vmem:[%s14623_s1 + $0x78c] ss:$16 sps:$4 sm:$0xff]   ;;  %v9982_v10 = vld [vmem:[%s14623_s1 + $0x780] ss:$16 sps:$4 sm:$0xff]  }
  0xbb   :  { %6619 = vmatpush1.bf16.msra.mxu0 %v9897_v11  ;;  %7435 = vmatpush1.bf16.msra.mxu1 %v9900_v12  ;;  %v9985_v11 = vld [vmem:[%s14623_s1 + $0x788] ss:$16 sps:$4 sm:$0xff]   ;;  %v9990_v12 = vld [vmem:[%s14623_s1 + $0x7a4] ss:$16 sps:$4 sm:$0xff]  }
  0xbc   :  { %6620 = vmatprep.subr.bf16.mxu0 %v9906_v13  ;;  %7436 = vmatprep.subr.bf16.mxu1 %v9909_v14  ;;  %v9993_v13 = vld [vmem:[%s14623_s1 + $0x7ac] ss:$16 sps:$4 sm:$0xff]   ;;  %v9988_v14 = vld [vmem:[%s14623_s1 + $0x7a0] ss:$16 sps:$4 sm:$0xff]  }
  0xbf   :  { %6621 = vmatpush1.bf16.msra.mxu0 %v9904_v15  ;;  %7437 = vmatpush1.bf16.msra.mxu1 %v9907_v16  ;;  %v9991_v15 = vld [vmem:[%s14623_s1 + $0x7a8] ss:$16 sps:$4 sm:$0xff]   ;;  %v9997_v16 = vld [vmem:[%s14623_s1 + $0x7c4] ss:$16 sps:$4 sm:$0xff]  }
  0xc0   :  { %6641 = vmatprep.subr.bf16.mxu0 %v9912_v17  ;;  %7457 = vmatprep.subr.bf16.mxu1 %v9915_v18  ;;  %v10000_v17 = vld [vmem:[%s14623_s1 + $0x7cc] ss:$16 sps:$4 sm:$0xff]   ;;  %v9995_v18 = vld [vmem:[%s14623_s1 + $0x7c0] ss:$16 sps:$4 sm:$0xff]  }
  0xc2   :  { %6623 = vmatmul.mubr.bf16.vlgmr.msra.gmra.mrb[0].mxu0 %v8292_v19  ;;  %7439 = vmatmul.mubr.bf16.vlgmr.msra.gmra.mrb[0].mxu1 %v8292_v19  ;;  %v9998_v19 = vld [vmem:[%s14623_s1 + $0x7c8] ss:$16 sps:$4 sm:$0xff]  }
  0xc3   :  { %6642 = vmatpush1.bf16.msra.mxu0 %v9910_v20  ;;  %7458 = vmatpush1.bf16.msra.mxu1 %v9913_v22  ;;  %v10004_v20 = vld [vmem:[%s14623_s1 + $0x7e4] ss:$16 sps:$4 sm:$0xff]   ;;  %v10002_v22 = vld [vmem:[%s14623_s1 + $0x7e0] ss:$16 sps:$4 sm:$0xff]  }
  0xc4   :  { %6643 = vmatprep.subr.bf16.mxu0 %v9918_v23  ;;  %7459 = vmatprep.subr.bf16.mxu1 %v9921_v24  ;;  %v10005_v23 = vld [vmem:[%s14623_s1 + $0x7e8] ss:$16 sps:$4 sm:$0xff]   ;;  %v10010_v24 = vld [vmem:[%s14623_s1 + $0x804] ss:$16 sps:$4 sm:$0xff]  }
  0xc5   :  { %6632 = vmatprep.mubr.bf16.mxu0 %v8325_v25  ;;  %7448 = vmatprep.mubr.bf16.mxu1 %v8325_v25  ;;  %v10013_v25 = vld [vmem:[%s14623_s1 + $0x80c] ss:$16 sps:$4 sm:$0xff]  }
  0xc7   :  { %6644 = vmatpush1.bf16.msra.mxu0 %v9916_v26  ;;  %7460 = vmatpush1.bf16.msra.mxu1 %v9919_v27  ;;  %v8294_v26 = vcombine.low %v11868_v32, %v11873_v33  ;;  %v10008_v27 = vld [vmem:[%s14623_s1 + $0x800] ss:$16 sps:$4 sm:$0xff]  }
  0xc8   :  { %6645 = vmatprep.subr.bf16.mxu0 %v9924_v28  ;;  %7461 = vmatprep.subr.bf16.mxu1 %v9927_v29  ;;  %v59_v28 = vld [vmem:[%s14624_s0 + $0x118] sm:$0xff]  ;;  %v10014_v33 = vld [vmem:[%s14623_s1 + $0x820] ss:$16 sps:$4 sm:$0xff]  }
  0xc9   :  { %v10011_v29 = vld [vmem:[%s14623_s1 + $0x808] ss:$16 sps:$4 sm:$0xff]   ;;  %v8327_v32 = vcombine.high %v59_v28, %v59_v28 }
  0xca   :  { %6633 = vmatmul.mubr.bf16.gmra.mrb[4].mxu0 %v8324_v31  ;;  %7449 = vmatmul.mubr.bf16.gmra.mrb[4].mxu1 %v8324_v31  ;;  %v10019_v31 = vld [vmem:[%s14623_s1 + $0x82c] ss:$16 sps:$4 sm:$0xff]  }
  0xcb   :  { %6646 = vmatpush1.bf16.msra.mxu0 %v9922_v30  ;;  %7462 = vmatpush1.bf16.msra.mxu1 %v9925_v34  ;;  %v10016_v30 = vld [vmem:[%s14623_s1 + $0x824] ss:$16 sps:$4 sm:$0xff]   ;;  %v10017_v34 = vld [vmem:[%s14623_s1 + $0x828] ss:$16 sps:$4 sm:$0xff]  }
  0xcc   :  { %6647 = vmatprep.subr.bf16.mxu0 %v9930_v35  ;;  %7463 = vmatprep.subr.bf16.mxu1 %v9933_v36  ;;  %v10022_v35 = vld [vmem:[%s14623_s1 + $0x844] ss:$16 sps:$4 sm:$0xff]   ;;  %v10025_v36 = vld [vmem:[%s14623_s1 + $0x84c] ss:$16 sps:$4 sm:$0xff]  }
  0xcd   :  { %6673 = vmatprep.mubr.bf16.mxu0 %v8295_v37  ;;  %7489 = vmatprep.mubr.bf16.mxu1 %v8295_v37  ;;  %v10020_v37 = vld [vmem:[%s14623_s1 + $0x840] ss:$16 sps:$4 sm:$0xff]  }
  0xcf   :  { %6648 = vmatpush1.bf16.msra.mxu0 %v9928_v38  ;;  %7464 = vmatpush1.bf16.msra.mxu1 %v9931_v39  ;;  %v12077_v38 = vld [vmem:[%s14624_s0 + $0x20] sm:$0xff]  ;;  %v8326_v39 = vcombine.low %v59_v28, %v59_v28  ;;  %v10105_v28 = vld [vmem:[%s14623_s1 + $0x9ec] ss:$16 sps:$4 sm:$0xff]  }
  0xd0   :  { %6649 = vmatprep.subr.bf16.mxu0 %v9936_v40  ;;  %7465 = vmatprep.subr.bf16.mxu1 %v9939_v41  ;;  %v12082_v40 = vld [vmem:[%s14624_s0 + $0xa0] sm:$0xff]  ;;  %v10023_v41 = vld [vmem:[%s14623_s1 + $0x848] ss:$16 sps:$4 sm:$0xff]  }
  0xd3   :  { %6650 = vmatpush1.bf16.msra.mxu0 %v9934_v42  ;;  %7466 = vmatpush1.bf16.msra.mxu1 %v9937_v43  ;;  %v10028_v42 = vld [vmem:[%s14623_s1 + $0x864] ss:$16 sps:$4 sm:$0xff]   ;;  %v10031_v43 = vld [vmem:[%s14623_s1 + $0x86c] ss:$16 sps:$4 sm:$0xff]  }
  0xd4   :  { %6651 = vmatprep.subr.bf16.mxu0 %v9942_v44  ;;  %7467 = vmatprep.subr.bf16.mxu1 %v9945_v45  ;;  %v8297_v44 = vcombine.high %v12077_v38, %v12082_v40  ;;  %v10026_v45 = vld [vmem:[%s14623_s1 + $0x860] ss:$16 sps:$4 sm:$0xff]  }
  0xd7   :  { %6652 = vmatpush1.bf16.msra.mxu0 %v9940_v46  ;;  %7468 = vmatpush1.bf16.msra.mxu1 %v9943_v47  ;;  %v10029_v46 = vld [vmem:[%s14623_s1 + $0x868] ss:$16 sps:$4 sm:$0xff]   ;;  %v10034_v47 = vld [vmem:[%s14623_s1 + $0x884] ss:$16 sps:$4 sm:$0xff]  }
  0xd8   :  { %6653 = vmatprep.subr.bf16.mxu0 %v9948_v48  ;;  %7469 = vmatprep.subr.bf16.mxu1 %v9951_v49  ;;  %v10037_v48 = vld [vmem:[%s14623_s1 + $0x88c] ss:$16 sps:$4 sm:$0xff]   ;;  %v10032_v49 = vld [vmem:[%s14623_s1 + $0x880] ss:$16 sps:$4 sm:$0xff]  }
  0xdb   :  { %6654 = vmatpush1.bf16.msra.mxu0 %v9946_v50  ;;  %7470 = vmatpush1.bf16.msra.mxu1 %v9949_v51  ;;  %v10035_v50 = vld [vmem:[%s14623_s1 + $0x888] ss:$16 sps:$4 sm:$0xff]   ;;  %v10040_v51 = vld [vmem:[%s14623_s1 + $0x8a4] ss:$16 sps:$4 sm:$0xff]  }
  0xdc   :  { %6655 = vmatprep.subr.bf16.mxu0 %v9954_v52  ;;  %7471 = vmatprep.subr.bf16.mxu1 %v9957_v53  ;;  %v10043_v52 = vld [vmem:[%s14623_s1 + $0x8ac] ss:$16 sps:$4 sm:$0xff]   ;;  %v10038_v53 = vld [vmem:[%s14623_s1 + $0x8a0] ss:$16 sps:$4 sm:$0xff]  }
  0xdf   :  { %6656 = vmatpush1.bf16.msra.mxu0 %v9952_v54  ;;  %7472 = vmatpush1.bf16.msra.mxu1 %v9955_v55  ;;  %v10041_v54 = vld [vmem:[%s14623_s1 + $0x8a8] ss:$16 sps:$4 sm:$0xff]   ;;  %v10046_v55 = vld [vmem:[%s14623_s1 + $0x8c4] ss:$16 sps:$4 sm:$0xff]  }
  0xe0   :  { %6657 = vmatprep.subr.bf16.mxu0 %v9960_v56  ;;  %7473 = vmatprep.subr.bf16.mxu1 %v9963_v57  ;;  %v10049_v56 = vld [vmem:[%s14623_s1 + $0x8cc] ss:$16 sps:$4 sm:$0xff]   ;;  %v10044_v57 = vld [vmem:[%s14623_s1 + $0x8c0] ss:$16 sps:$4 sm:$0xff]  }
  0xe3   :  { %6658 = vmatpush1.bf16.msra.mxu0 %v9958_v58  ;;  %7474 = vmatpush1.bf16.msra.mxu1 %v9961_v59  ;;  %v10047_v58 = vld [vmem:[%s14623_s1 + $0x8c8] ss:$16 sps:$4 sm:$0xff]   ;;  %v10052_v59 = vld [vmem:[%s14623_s1 + $0x8e4] ss:$16 sps:$4 sm:$0xff]  }
  0xe4   :  { %6659 = vmatprep.subr.bf16.mxu0 %v9966_v60  ;;  %7475 = vmatprep.subr.bf16.mxu1 %v9969_v61  ;;  %v10055_v60 = vld [vmem:[%s14623_s1 + $0x8ec] ss:$16 sps:$4 sm:$0xff]   ;;  %v10050_v61 = vld [vmem:[%s14623_s1 + $0x8e0] ss:$16 sps:$4 sm:$0xff]  }
  0xe7   :  { %6660 = vmatpush1.bf16.msra.mxu0 %v9964_v62  ;;  %7476 = vmatpush1.bf16.msra.mxu1 %v9967_v63  ;;  %v10053_v62 = vld [vmem:[%s14623_s1 + $0x8e8] ss:$16 sps:$4 sm:$0xff]   ;;  %v10058_v63 = vld [vmem:[%s14623_s1 + $0x904] ss:$16 sps:$4 sm:$0xff]  }
  0xe8   :  { %6661 = vmatprep.subr.bf16.mxu0 %v9972_v0  ;;  %7477 = vmatprep.subr.bf16.mxu1 %v9975_v1  ;;  %v10061_v0 = vld [vmem:[%s14623_s1 + $0x90c] ss:$16 sps:$4 sm:$0xff]   ;;  %v10056_v1 = vld [vmem:[%s14623_s1 + $0x900] ss:$16 sps:$4 sm:$0xff]  }
  0xeb   :  { %6662 = vmatpush1.bf16.msra.mxu0 %v9970_v2  ;;  %7478 = vmatpush1.bf16.msra.mxu1 %v9973_v3  ;;  %v10059_v2 = vld [vmem:[%s14623_s1 + $0x908] ss:$16 sps:$4 sm:$0xff]   ;;  %v10064_v3 = vld [vmem:[%s14623_s1 + $0x924] ss:$16 sps:$4 sm:$0xff]  }
  0xec   :  { %6663 = vmatprep.subr.bf16.mxu0 %v9978_v4  ;;  %7479 = vmatprep.subr.bf16.mxu1 %v9981_v5  ;;  %v10067_v4 = vld [vmem:[%s14623_s1 + $0x92c] ss:$16 sps:$4 sm:$0xff]   ;;  %v10062_v5 = vld [vmem:[%s14623_s1 + $0x920] ss:$16 sps:$4 sm:$0xff]  }
  0xef   :  { %6664 = vmatpush1.bf16.msra.mxu0 %v9976_v6  ;;  %7480 = vmatpush1.bf16.msra.mxu1 %v9979_v7  ;;  %v10065_v6 = vld [vmem:[%s14623_s1 + $0x928] ss:$16 sps:$4 sm:$0xff]   ;;  %v10070_v7 = vld [vmem:[%s14623_s1 + $0x944] ss:$16 sps:$4 sm:$0xff]  }
  0xf0   :  { %6665 = vmatprep.subr.bf16.mxu0 %v9984_v8  ;;  %7481 = vmatprep.subr.bf16.mxu1 %v9987_v9  ;;  %v10073_v8 = vld [vmem:[%s14623_s1 + $0x94c] ss:$16 sps:$4 sm:$0xff]   ;;  %v10068_v9 = vld [vmem:[%s14623_s1 + $0x940] ss:$16 sps:$4 sm:$0xff]  }
  0xf3   :  { %6666 = vmatpush1.bf16.msra.mxu0 %v9982_v10  ;;  %7482 = vmatpush1.bf16.msra.mxu1 %v9985_v11  ;;  %v10071_v10 = vld [vmem:[%s14623_s1 + $0x948] ss:$16 sps:$4 sm:$0xff]   ;;  %v10076_v11 = vld [vmem:[%s14623_s1 + $0x964] ss:$16 sps:$4 sm:$0xff]  }
  0xf4   :  { %6667 = vmatprep.subr.bf16.mxu0 %v9990_v12  ;;  %7483 = vmatprep.subr.bf16.mxu1 %v9993_v13  ;;  %v10079_v12 = vld [vmem:[%s14623_s1 + $0x96c] ss:$16 sps:$4 sm:$0xff]   ;;  %v10074_v13 = vld [vmem:[%s14623_s1 + $0x960] ss:$16 sps:$4 sm:$0xff]  }
  0xf7   :  { %6668 = vmatpush1.bf16.msra.mxu0 %v9988_v14  ;;  %7484 = vmatpush1.bf16.msra.mxu1 %v9991_v15  ;;  %v10077_v14 = vld [vmem:[%s14623_s1 + $0x968] ss:$16 sps:$4 sm:$0xff]   ;;  %v10082_v15 = vld [vmem:[%s14623_s1 + $0x984] ss:$16 sps:$4 sm:$0xff]  }
  0xf8   :  { %6669 = vmatprep.subr.bf16.mxu0 %v9997_v16  ;;  %7485 = vmatprep.subr.bf16.mxu1 %v10000_v17  ;;  %v10085_v16 = vld [vmem:[%s14623_s1 + $0x98c] ss:$16 sps:$4 sm:$0xff]   ;;  %v10080_v17 = vld [vmem:[%s14623_s1 + $0x980] ss:$16 sps:$4 sm:$0xff]  }
  0xfb   :  { %6670 = vmatpush1.bf16.msra.mxu0 %v9995_v18  ;;  %7486 = vmatpush1.bf16.msra.mxu1 %v9998_v19  ;;  %v10083_v18 = vld [vmem:[%s14623_s1 + $0x988] ss:$16 sps:$4 sm:$0xff]   ;;  %v10088_v19 = vld [vmem:[%s14623_s1 + $0x9a4] ss:$16 sps:$4 sm:$0xff]  }
  0xfc   :  { %6671 = vmatprep.subr.bf16.mxu0 %v10004_v20  ;;  %7487 = vmatprep.subr.bf16.mxu1 %v10007_v21  ;;  %v10091_v20 = vld [vmem:[%s14623_s1 + $0x9ac] ss:$16 sps:$4 sm:$0xff]   ;;  %v10086_v21 = vld [vmem:[%s14623_s1 + $0x9a0] ss:$16 sps:$4 sm:$0xff]  }
  0xff   :  { %6672 = vmatpush1.bf16.msra.mxu0 %v10002_v22  ;;  %7488 = vmatpush1.bf16.msra.mxu1 %v10005_v23  ;;  %v10089_v22 = vld [vmem:[%s14623_s1 + $0x9a8] ss:$16 sps:$4 sm:$0xff]   ;;  %v10095_v23 = vld [vmem:[%s14623_s1 + $0x9c4] ss:$16 sps:$4 sm:$0xff]  }
 0x100   :  { %6692 = vmatprep.subr.bf16.mxu0 %v10010_v24  ;;  %7508 = vmatprep.subr.bf16.mxu1 %v10013_v25  ;;  %v10098_v24 = vld [vmem:[%s14623_s1 + $0x9cc] ss:$16 sps:$4 sm:$0xff]   ;;  %v10093_v25 = vld [vmem:[%s14623_s1 + $0x9c0] ss:$16 sps:$4 sm:$0xff]  }
 0x102   :  { %6674 = vmatmul.mubr.bf16.vlgmr.msra.gmra.mrb[0].mxu0 %v8294_v26  ;;  %7490 = vmatmul.mubr.bf16.vlgmr.msra.gmra.mrb[0].mxu1 %v8294_v26  ;;  %v10096_v26 = vld [vmem:[%s14623_s1 + $0x9c8] ss:$16 sps:$4 sm:$0xff]  }
 0x103   :  { %6693 = vmatpush1.bf16.msra.mxu0 %v10008_v27  ;;  %7509 = vmatpush1.bf16.msra.mxu1 %v10011_v29  ;;  %v10102_v27 = vld [vmem:[%s14623_s1 + $0x9e4] ss:$16 sps:$4 sm:$0xff]   ;;  %v10100_v29 = vld [vmem:[%s14623_s1 + $0x9e0] ss:$16 sps:$4 sm:$0xff]  }
 0x104   :  { %6694 = vmatprep.subr.bf16.mxu0 %v10016_v30  ;;  %7510 = vmatprep.subr.bf16.mxu1 %v10019_v31  ;;  %v10103_v30 = vld [vmem:[%s14623_s1 + $0x9e8] ss:$16 sps:$4 sm:$0xff]   ;;  %v10108_v31 = vld [vmem:[%s14623_s1 + $0xa04] ss:$16 sps:$4 sm:$0xff]  }
 0x105   :  { %6683 = vmatprep.mubr.bf16.mxu0 %v8327_v32  ;;  %7499 = vmatprep.mubr.bf16.mxu1 %v8327_v32  ;;  %v10111_v32 = vld [vmem:[%s14623_s1 + $0xa0c] ss:$16 sps:$4 sm:$0xff]  }
 0x107   :  { %6695 = vmatpush1.bf16.msra.mxu0 %v10014_v33  ;;  %7511 = vmatpush1.bf16.msra.mxu1 %v10017_v34  ;;  %v60_v33 = vld [vmem:[%s14624_s0 + $0x120] sm:$0xff]  ;;  %v8296_v34 = vcombine.low %v12077_v38, %v12082_v40  ;;  %v10117_v38 = vld [vmem:[%s14623_s1 + $0xa2c] ss:$16 sps:$4 sm:$0xff]   ;;  %v10115_v40 = vld [vmem:[%s14623_s1 + $0xa28] ss:$16 sps:$4 sm:$0xff]  }
 0x108   :  { %6696 = vmatprep.subr.bf16.mxu0 %v10022_v35  ;;  %7512 = vmatprep.subr.bf16.mxu1 %v10025_v36  ;;  %v10106_v35 = vld [vmem:[%s14623_s1 + $0xa00] ss:$16 sps:$4 sm:$0xff]   ;;  %v10109_v36 = vld [vmem:[%s14623_s1 + $0xa08] ss:$16 sps:$4 sm:$0xff]  }
 0x10a   :  { %6684 = vmatmul.mubr.bf16.gmra.mrb[4].mxu0 %v8326_v39  ;;  %7500 = vmatmul.mubr.bf16.gmra.mrb[4].mxu1 %v8326_v39  ;;  %v10112_v39 = vld [vmem:[%s14623_s1 + $0xa20] ss:$16 sps:$4 sm:$0xff]  }
 0x10b   :  { %6697 = vmatpush1.bf16.msra.mxu0 %v10020_v37  ;;  %7513 = vmatpush1.bf16.msra.mxu1 %v10023_v41  ;;  %v10114_v37 = vld [vmem:[%s14623_s1 + $0xa24] ss:$16 sps:$4 sm:$0xff]   ;;  %v8329_v41 = vcombine.high %v60_v33, %v60_v33 }
 0x10c   :  { %6698 = vmatprep.subr.bf16.mxu0 %v10028_v42  ;;  %7514 = vmatprep.subr.bf16.mxu1 %v10031_v43  ;;  %v10120_v42 = vld [vmem:[%s14623_s1 + $0xa44] ss:$16 sps:$4 sm:$0xff]   ;;  %v10123_v43 = vld [vmem:[%s14623_s1 + $0xa4c] ss:$16 sps:$4 sm:$0xff]  }
 0x10d   :  { %6724 = vmatprep.mubr.bf16.mxu0 %v8297_v44  ;;  %7540 = vmatprep.mubr.bf16.mxu1 %v8297_v44  ;;  %v12283_v44 = vld [vmem:[%s14624_s0 + $0x28] sm:$0xff] }
 0x10f   :  { %6699 = vmatpush1.bf16.msra.mxu0 %v10026_v45  ;;  %7515 = vmatpush1.bf16.msra.mxu1 %v10029_v46  ;;  %v12288_v45 = vld [vmem:[%s14624_s0 + $0xa8] sm:$0xff]  ;;  %v8328_v46 = vcombine.low %v60_v33, %v60_v33 }
 0x110   :  { %6700 = vmatprep.subr.bf16.mxu0 %v10034_v47  ;;  %7516 = vmatprep.subr.bf16.mxu1 %v10037_v48  ;;  %v10118_v47 = vld [vmem:[%s14623_s1 + $0xa40] ss:$16 sps:$4 sm:$0xff]   ;;  %v10121_v48 = vld [vmem:[%s14623_s1 + $0xa48] ss:$16 sps:$4 sm:$0xff]  }
 0x111   :  { %v10194_v33 = vld [vmem:[%s14623_s1 + $0xbc8] ss:$16 sps:$4 sm:$0xff]  }
 0x113   :  { %6701 = vmatpush1.bf16.msra.mxu0 %v10032_v49  ;;  %7517 = vmatpush1.bf16.msra.mxu1 %v10035_v50  ;;  %v10126_v49 = vld [vmem:[%s14623_s1 + $0xa64] ss:$16 sps:$4 sm:$0xff]   ;;  %v10129_v50 = vld [vmem:[%s14623_s1 + $0xa6c] ss:$16 sps:$4 sm:$0xff]  }
 0x114   :  { %6702 = vmatprep.subr.bf16.mxu0 %v10040_v51  ;;  %7518 = vmatprep.subr.bf16.mxu1 %v10043_v52  ;;  %v8299_v51 = vcombine.high %v12283_v44, %v12288_v45  ;;  %v10124_v52 = vld [vmem:[%s14623_s1 + $0xa60] ss:$16 sps:$4 sm:$0xff]  }
 0x117   :  { %6703 = vmatpush1.bf16.msra.mxu0 %v10038_v53  ;;  %7519 = vmatpush1.bf16.msra.mxu1 %v10041_v54  ;;  %v10127_v53 = vld [vmem:[%s14623_s1 + $0xa68] ss:$16 sps:$4 sm:$0xff]   ;;  %v10132_v54 = vld [vmem:[%s14623_s1 + $0xa84] ss:$16 sps:$4 sm:$0xff]  }
 0x118   :  { %6704 = vmatprep.subr.bf16.mxu0 %v10046_v55  ;;  %7520 = vmatprep.subr.bf16.mxu1 %v10049_v56  ;;  %v10135_v55 = vld [vmem:[%s14623_s1 + $0xa8c] ss:$16 sps:$4 sm:$0xff]   ;;  %v10130_v56 = vld [vmem:[%s14623_s1 + $0xa80] ss:$16 sps:$4 sm:$0xff]  }
 0x11b   :  { %6705 = vmatpush1.bf16.msra.mxu0 %v10044_v57  ;;  %7521 = vmatpush1.bf16.msra.mxu1 %v10047_v58  ;;  %v10133_v57 = vld [vmem:[%s14623_s1 + $0xa88] ss:$16 sps:$4 sm:$0xff]   ;;  %v10138_v58 = vld [vmem:[%s14623_s1 + $0xaa4] ss:$16 sps:$4 sm:$0xff]  }
 0x11c   :  { %6706 = vmatprep.subr.bf16.mxu0 %v10052_v59  ;;  %7522 = vmatprep.subr.bf16.mxu1 %v10055_v60  ;;  %v10141_v59 = vld [vmem:[%s14623_s1 + $0xaac] ss:$16 sps:$4 sm:$0xff]   ;;  %v10136_v60 = vld [vmem:[%s14623_s1 + $0xaa0] ss:$16 sps:$4 sm:$0xff]  }
 0x11f   :  { %6707 = vmatpush1.bf16.msra.mxu0 %v10050_v61  ;;  %7523 = vmatpush1.bf16.msra.mxu1 %v10053_v62  ;;  %v10139_v61 = vld [vmem:[%s14623_s1 + $0xaa8] ss:$16 sps:$4 sm:$0xff]   ;;  %v10144_v62 = vld [vmem:[%s14623_s1 + $0xac4] ss:$16 sps:$4 sm:$0xff]  }
 0x120   :  { %6708 = vmatprep.subr.bf16.mxu0 %v10058_v63  ;;  %7524 = vmatprep.subr.bf16.mxu1 %v10061_v0  ;;  %v10147_v63 = vld [vmem:[%s14623_s1 + $0xacc] ss:$16 sps:$4 sm:$0xff]   ;;  %v10142_v0 = vld [vmem:[%s14623_s1 + $0xac0] ss:$16 sps:$4 sm:$0xff]  }
 0x123   :  { %6709 = vmatpush1.bf16.msra.mxu0 %v10056_v1  ;;  %7525 = vmatpush1.bf16.msra.mxu1 %v10059_v2  ;;  %v10145_v1 = vld [vmem:[%s14623_s1 + $0xac8] ss:$16 sps:$4 sm:$0xff]   ;;  %v10150_v2 = vld [vmem:[%s14623_s1 + $0xae4] ss:$16 sps:$4 sm:$0xff]  }
 0x124   :  { %6710 = vmatprep.subr.bf16.mxu0 %v10064_v3  ;;  %7526 = vmatprep.subr.bf16.mxu1 %v10067_v4  ;;  %v10153_v3 = vld [vmem:[%s14623_s1 + $0xaec] ss:$16 sps:$4 sm:$0xff]   ;;  %v10148_v4 = vld [vmem:[%s14623_s1 + $0xae0] ss:$16 sps:$4 sm:$0xff]  }
 0x127   :  { %6711 = vmatpush1.bf16.msra.mxu0 %v10062_v5  ;;  %7527 = vmatpush1.bf16.msra.mxu1 %v10065_v6  ;;  %v10151_v5 = vld [vmem:[%s14623_s1 + $0xae8] ss:$16 sps:$4 sm:$0xff]   ;;  %v10156_v6 = vld [vmem:[%s14623_s1 + $0xb04] ss:$16 sps:$4 sm:$0xff]  }
 0x128   :  { %6712 = vmatprep.subr.bf16.mxu0 %v10070_v7  ;;  %7528 = vmatprep.subr.bf16.mxu1 %v10073_v8  ;;  %v10159_v7 = vld [vmem:[%s14623_s1 + $0xb0c] ss:$16 sps:$4 sm:$0xff]   ;;  %v10154_v8 = vld [vmem:[%s14623_s1 + $0xb00] ss:$16 sps:$4 sm:$0xff]  }
 0x12b   :  { %6713 = vmatpush1.bf16.msra.mxu0 %v10068_v9  ;;  %7529 = vmatpush1.bf16.msra.mxu1 %v10071_v10  ;;  %v10157_v9 = vld [vmem:[%s14623_s1 + $0xb08] ss:$16 sps:$4 sm:$0xff]   ;;  %v10162_v10 = vld [vmem:[%s14623_s1 + $0xb24] ss:$16 sps:$4 sm:$0xff]  }
 0x12c   :  { %6714 = vmatprep.subr.bf16.mxu0 %v10076_v11  ;;  %7530 = vmatprep.subr.bf16.mxu1 %v10079_v12  ;;  %v10165_v11 = vld [vmem:[%s14623_s1 + $0xb2c] ss:$16 sps:$4 sm:$0xff]   ;;  %v10160_v12 = vld [vmem:[%s14623_s1 + $0xb20] ss:$16 sps:$4 sm:$0xff]  }
 0x12f   :  { %6715 = vmatpush1.bf16.msra.mxu0 %v10074_v13  ;;  %7531 = vmatpush1.bf16.msra.mxu1 %v10077_v14  ;;  %v10163_v13 = vld [vmem:[%s14623_s1 + $0xb28] ss:$16 sps:$4 sm:$0xff]   ;;  %v10168_v14 = vld [vmem:[%s14623_s1 + $0xb44] ss:$16 sps:$4 sm:$0xff]  }
 0x130   :  { %6716 = vmatprep.subr.bf16.mxu0 %v10082_v15  ;;  %7532 = vmatprep.subr.bf16.mxu1 %v10085_v16  ;;  %v10171_v15 = vld [vmem:[%s14623_s1 + $0xb4c] ss:$16 sps:$4 sm:$0xff]   ;;  %v10166_v16 = vld [vmem:[%s14623_s1 + $0xb40] ss:$16 sps:$4 sm:$0xff]  }
 0x133   :  { %6717 = vmatpush1.bf16.msra.mxu0 %v10080_v17  ;;  %7533 = vmatpush1.bf16.msra.mxu1 %v10083_v18  ;;  %v10169_v17 = vld [vmem:[%s14623_s1 + $0xb48] ss:$16 sps:$4 sm:$0xff]   ;;  %v10174_v18 = vld [vmem:[%s14623_s1 + $0xb64] ss:$16 sps:$4 sm:$0xff]  }
 0x134   :  { %6718 = vmatprep.subr.bf16.mxu0 %v10088_v19  ;;  %7534 = vmatprep.subr.bf16.mxu1 %v10091_v20  ;;  %v10177_v19 = vld [vmem:[%s14623_s1 + $0xb6c] ss:$16 sps:$4 sm:$0xff]   ;;  %v10172_v20 = vld [vmem:[%s14623_s1 + $0xb60] ss:$16 sps:$4 sm:$0xff]  }
 0x137   :  { %6719 = vmatpush1.bf16.msra.mxu0 %v10086_v21  ;;  %7535 = vmatpush1.bf16.msra.mxu1 %v10089_v22  ;;  %v10175_v21 = vld [vmem:[%s14623_s1 + $0xb68] ss:$16 sps:$4 sm:$0xff]   ;;  %v10180_v22 = vld [vmem:[%s14623_s1 + $0xb84] ss:$16 sps:$4 sm:$0xff]  }
 0x138   :  { %6720 = vmatprep.subr.bf16.mxu0 %v10095_v23  ;;  %7536 = vmatprep.subr.bf16.mxu1 %v10098_v24  ;;  %v10183_v23 = vld [vmem:[%s14623_s1 + $0xb8c] ss:$16 sps:$4 sm:$0xff]   ;;  %v10178_v24 = vld [vmem:[%s14623_s1 + $0xb80] ss:$16 sps:$4 sm:$0xff]  }
 0x13b   :  { %6721 = vmatpush1.bf16.msra.mxu0 %v10093_v25  ;;  %7537 = vmatpush1.bf16.msra.mxu1 %v10096_v26  ;;  %v10181_v25 = vld [vmem:[%s14623_s1 + $0xb88] ss:$16 sps:$4 sm:$0xff]   ;;  %v10186_v26 = vld [vmem:[%s14623_s1 + $0xba4] ss:$16 sps:$4 sm:$0xff]  }
 0x13c   :  { %6722 = vmatprep.subr.bf16.mxu0 %v10102_v27  ;;  %7538 = vmatprep.subr.bf16.mxu1 %v10105_v28  ;;  %v10189_v27 = vld [vmem:[%s14623_s1 + $0xbac] ss:$16 sps:$4 sm:$0xff]   ;;  %v10184_v28 = vld [vmem:[%s14623_s1 + $0xba0] ss:$16 sps:$4 sm:$0xff]  }
 0x13f   :  { %6723 = vmatpush1.bf16.msra.mxu0 %v10100_v29  ;;  %7539 = vmatpush1.bf16.msra.mxu1 %v10103_v30  ;;  %v10187_v29 = vld [vmem:[%s14623_s1 + $0xba8] ss:$16 sps:$4 sm:$0xff]   ;;  %v10193_v30 = vld [vmem:[%s14623_s1 + $0xbc4] ss:$16 sps:$4 sm:$0xff]  }
 0x140   :  { %6743 = vmatprep.subr.bf16.mxu0 %v10108_v31  ;;  %7559 = vmatprep.subr.bf16.mxu1 %v10111_v32  ;;  %v10196_v31 = vld [vmem:[%s14623_s1 + $0xbcc] ss:$16 sps:$4 sm:$0xff]   ;;  %v10191_v32 = vld [vmem:[%s14623_s1 + $0xbc0] ss:$16 sps:$4 sm:$0xff]  }
 0x142   :  { %6725 = vmatmul.mubr.bf16.vlgmr.msra.gmra.mrb[0].mxu0 %v8296_v34  ;;  %7541 = vmatmul.mubr.bf16.vlgmr.msra.gmra.mrb[0].mxu1 %v8296_v34  ;;  %v10200_v34 = vld [vmem:[%s14623_s1 + $0xbe4] ss:$16 sps:$4 sm:$0xff]  }
 0x143   :  { %6744 = vmatpush1.bf16.msra.mxu0 %v10106_v35  ;;  %7560 = vmatpush1.bf16.msra.mxu1 %v10109_v36  ;;  %v10203_v35 = vld [vmem:[%s14623_s1 + $0xbec] ss:$16 sps:$4 sm:$0xff]   ;;  %v10198_v36 = vld [vmem:[%s14623_s1 + $0xbe0] ss:$16 sps:$4 sm:$0xff]  }
 0x144   :  { %6745 = vmatprep.subr.bf16.mxu0 %v10114_v37  ;;  %7561 = vmatprep.subr.bf16.mxu1 %v10117_v38  ;;  %v10201_v37 = vld [vmem:[%s14623_s1 + $0xbe8] ss:$16 sps:$4 sm:$0xff]   ;;  %v10206_v38 = vld [vmem:[%s14623_s1 + $0xc04] ss:$16 sps:$4 sm:$0xff]  }
 0x145   :  { %6734 = vmatprep.mubr.bf16.mxu0 %v8329_v41  ;;  %7550 = vmatprep.mubr.bf16.mxu1 %v8329_v41  ;;  %v8298_v41 = vcombine.low %v12283_v44, %v12288_v45  ;;  %v10215_v44 = vld [vmem:[%s14623_s1 + $0xc2c] ss:$16 sps:$4 sm:$0xff]   ;;  %v10210_v45 = vld [vmem:[%s14623_s1 + $0xc20] ss:$16 sps:$4 sm:$0xff]  }
 0x147   :  { %6746 = vmatpush1.bf16.msra.mxu0 %v10112_v39  ;;  %7562 = vmatpush1.bf16.msra.mxu1 %v10115_v40  ;;  %v10209_v39 = vld [vmem:[%s14623_s1 + $0xc0c] ss:$16 sps:$4 sm:$0xff]  }
 0x148   :  { %6747 = vmatprep.subr.bf16.mxu0 %v10120_v42  ;;  %7563 = vmatprep.subr.bf16.mxu1 %v10123_v43  ;;  %v61_v40 = vld [vmem:[%s14624_s0 + $0x128] sm:$0xff]  ;;  %v10204_v42 = vld [vmem:[%s14623_s1 + $0xc00] ss:$16 sps:$4 sm:$0xff]  }
 0x149   :  { %v10207_v43 = vld [vmem:[%s14623_s1 + $0xc08] ss:$16 sps:$4 sm:$0xff]  }
 0x14a   :  { %6735 = vmatmul.mubr.bf16.gmra.mrb[4].mxu0 %v8328_v46  ;;  %7551 = vmatmul.mubr.bf16.gmra.mrb[4].mxu1 %v8328_v46  ;;  %v10212_v46 = vld [vmem:[%s14623_s1 + $0xc24] ss:$16 sps:$4 sm:$0xff]  }
 0x14b   :  { %6748 = vmatpush1.bf16.msra.mxu0 %v10118_v47  ;;  %7564 = vmatpush1.bf16.msra.mxu1 %v10121_v48  ;;  %v10213_v47 = vld [vmem:[%s14623_s1 + $0xc28] ss:$16 sps:$4 sm:$0xff]   ;;  %v8331_v48 = vcombine.high %v61_v40, %v61_v40 }
 0x14c   :  { %6749 = vmatprep.subr.bf16.mxu0 %v10126_v49  ;;  %7565 = vmatprep.subr.bf16.mxu1 %v10129_v50  ;;  %v10218_v49 = vld [vmem:[%s14623_s1 + $0xc44] ss:$16 sps:$4 sm:$0xff]   ;;  %v10221_v50 = vld [vmem:[%s14623_s1 + $0xc4c] ss:$16 sps:$4 sm:$0xff]  }
 0x14d   :  { %6775 = vmatprep.mubr.bf16.mxu0 %v8299_v51  ;;  %7591 = vmatprep.mubr.bf16.mxu1 %v8299_v51  ;;  %v12492_v51 = vld [vmem:[%s14624_s0 + $0x30] sm:$0xff] }
 0x14f   :  { %6750 = vmatpush1.bf16.msra.mxu0 %v10124_v52  ;;  %7566 = vmatpush1.bf16.msra.mxu1 %v10127_v53  ;;  %v12497_v52 = vld [vmem:[%s14624_s0 + $0xb0] sm:$0xff]  ;;  %v8330_v53 = vcombine.low %v61_v40, %v61_v40  ;;  %v10292_v40 = vld [vmem:[%s14623_s1 + $0xdc8] ss:$16 sps:$4 sm:$0xff]  }
 0x150   :  { %6751 = vmatprep.subr.bf16.mxu0 %v10132_v54  ;;  %7567 = vmatprep.subr.bf16.mxu1 %v10135_v55  ;;  %v10216_v54 = vld [vmem:[%s14623_s1 + $0xc40] ss:$16 sps:$4 sm:$0xff]   ;;  %v10219_v55 = vld [vmem:[%s14623_s1 + $0xc48] ss:$16 sps:$4 sm:$0xff]  }
 0x153   :  { %6752 = vmatpush1.bf16.msra.mxu0 %v10130_v56  ;;  %7568 = vmatpush1.bf16.msra.mxu1 %v10133_v57  ;;  %v10224_v56 = vld [vmem:[%s14623_s1 + $0xc64] ss:$16 sps:$4 sm:$0xff]   ;;  %v10227_v57 = vld [vmem:[%s14623_s1 + $0xc6c] ss:$16 sps:$4 sm:$0xff]  }
 0x154   :  { %6753 = vmatprep.subr.bf16.mxu0 %v10138_v58  ;;  %7569 = vmatprep.subr.bf16.mxu1 %v10141_v59  ;;  %v8301_v58 = vcombine.high %v12492_v51, %v12497_v52  ;;  %v10222_v59 = vld [vmem:[%s14623_s1 + $0xc60] ss:$16 sps:$4 sm:$0xff]  }
 0x157   :  { %6754 = vmatpush1.bf16.msra.mxu0 %v10136_v60  ;;  %7570 = vmatpush1.bf16.msra.mxu1 %v10139_v61  ;;  %v10225_v60 = vld [vmem:[%s14623_s1 + $0xc68] ss:$16 sps:$4 sm:$0xff]   ;;  %v10230_v61 = vld [vmem:[%s14623_s1 + $0xc84] ss:$16 sps:$4 sm:$0xff]  }
 0x158   :  { %6755 = vmatprep.subr.bf16.mxu0 %v10144_v62  ;;  %7571 = vmatprep.subr.bf16.mxu1 %v10147_v63  ;;  %v10233_v62 = vld [vmem:[%s14623_s1 + $0xc8c] ss:$16 sps:$4 sm:$0xff]   ;;  %v10228_v63 = vld [vmem:[%s14623_s1 + $0xc80] ss:$16 sps:$4 sm:$0xff]  }
 0x15b   :  { %6756 = vmatpush1.bf16.msra.mxu0 %v10142_v0  ;;  %7572 = vmatpush1.bf16.msra.mxu1 %v10145_v1  ;;  %v10231_v0 = vld [vmem:[%s14623_s1 + $0xc88] ss:$16 sps:$4 sm:$0xff]   ;;  %v10236_v1 = vld [vmem:[%s14623_s1 + $0xca4] ss:$16 sps:$4 sm:$0xff]  }
 0x15c   :  { %6757 = vmatprep.subr.bf16.mxu0 %v10150_v2  ;;  %7573 = vmatprep.subr.bf16.mxu1 %v10153_v3  ;;  %v10239_v2 = vld [vmem:[%s14623_s1 + $0xcac] ss:$16 sps:$4 sm:$0xff]   ;;  %v10234_v3 = vld [vmem:[%s14623_s1 + $0xca0] ss:$16 sps:$4 sm:$0xff]  }
 0x15f   :  { %6758 = vmatpush1.bf16.msra.mxu0 %v10148_v4  ;;  %7574 = vmatpush1.bf16.msra.mxu1 %v10151_v5  ;;  %v10237_v4 = vld [vmem:[%s14623_s1 + $0xca8] ss:$16 sps:$4 sm:$0xff]   ;;  %v10242_v5 = vld [vmem:[%s14623_s1 + $0xcc4] ss:$16 sps:$4 sm:$0xff]  }
 0x160   :  { %6759 = vmatprep.subr.bf16.mxu0 %v10156_v6  ;;  %7575 = vmatprep.subr.bf16.mxu1 %v10159_v7  ;;  %v10245_v6 = vld [vmem:[%s14623_s1 + $0xccc] ss:$16 sps:$4 sm:$0xff]   ;;  %v10240_v7 = vld [vmem:[%s14623_s1 + $0xcc0] ss:$16 sps:$4 sm:$0xff]  }
 0x163   :  { %6760 = vmatpush1.bf16.msra.mxu0 %v10154_v8  ;;  %7576 = vmatpush1.bf16.msra.mxu1 %v10157_v9  ;;  %v10243_v8 = vld [vmem:[%s14623_s1 + $0xcc8] ss:$16 sps:$4 sm:$0xff]   ;;  %v10248_v9 = vld [vmem:[%s14623_s1 + $0xce4] ss:$16 sps:$4 sm:$0xff]  }
 0x164   :  { %6761 = vmatprep.subr.bf16.mxu0 %v10162_v10  ;;  %7577 = vmatprep.subr.bf16.mxu1 %v10165_v11  ;;  %v10251_v10 = vld [vmem:[%s14623_s1 + $0xcec] ss:$16 sps:$4 sm:$0xff]   ;;  %v10246_v11 = vld [vmem:[%s14623_s1 + $0xce0] ss:$16 sps:$4 sm:$0xff]  }
 0x167   :  { %6762 = vmatpush1.bf16.msra.mxu0 %v10160_v12  ;;  %7578 = vmatpush1.bf16.msra.mxu1 %v10163_v13  ;;  %v10249_v12 = vld [vmem:[%s14623_s1 + $0xce8] ss:$16 sps:$4 sm:$0xff]   ;;  %v10254_v13 = vld [vmem:[%s14623_s1 + $0xd04] ss:$16 sps:$4 sm:$0xff]  }
 0x168   :  { %6763 = vmatprep.subr.bf16.mxu0 %v10168_v14  ;;  %7579 = vmatprep.subr.bf16.mxu1 %v10171_v15  ;;  %v10257_v14 = vld [vmem:[%s14623_s1 + $0xd0c] ss:$16 sps:$4 sm:$0xff]   ;;  %v10252_v15 = vld [vmem:[%s14623_s1 + $0xd00] ss:$16 sps:$4 sm:$0xff]  }
 0x16b   :  { %6764 = vmatpush1.bf16.msra.mxu0 %v10166_v16  ;;  %7580 = vmatpush1.bf16.msra.mxu1 %v10169_v17  ;;  %v10255_v16 = vld [vmem:[%s14623_s1 + $0xd08] ss:$16 sps:$4 sm:$0xff]   ;;  %v10260_v17 = vld [vmem:[%s14623_s1 + $0xd24] ss:$16 sps:$4 sm:$0xff]  }
 0x16c   :  { %6765 = vmatprep.subr.bf16.mxu0 %v10174_v18  ;;  %7581 = vmatprep.subr.bf16.mxu1 %v10177_v19  ;;  %v10263_v18 = vld [vmem:[%s14623_s1 + $0xd2c] ss:$16 sps:$4 sm:$0xff]   ;;  %v10258_v19 = vld [vmem:[%s14623_s1 + $0xd20] ss:$16 sps:$4 sm:$0xff]  }
 0x16f   :  { %6766 = vmatpush1.bf16.msra.mxu0 %v10172_v20  ;;  %7582 = vmatpush1.bf16.msra.mxu1 %v10175_v21  ;;  %v10261_v20 = vld [vmem:[%s14623_s1 + $0xd28] ss:$16 sps:$4 sm:$0xff]   ;;  %v10266_v21 = vld [vmem:[%s14623_s1 + $0xd44] ss:$16 sps:$4 sm:$0xff]  }
 0x170   :  { %6767 = vmatprep.subr.bf16.mxu0 %v10180_v22  ;;  %7583 = vmatprep.subr.bf16.mxu1 %v10183_v23  ;;  %v10269_v22 = vld [vmem:[%s14623_s1 + $0xd4c] ss:$16 sps:$4 sm:$0xff]   ;;  %v10264_v23 = vld [vmem:[%s14623_s1 + $0xd40] ss:$16 sps:$4 sm:$0xff]  }
 0x173   :  { %6768 = vmatpush1.bf16.msra.mxu0 %v10178_v24  ;;  %7584 = vmatpush1.bf16.msra.mxu1 %v10181_v25  ;;  %v10267_v24 = vld [vmem:[%s14623_s1 + $0xd48] ss:$16 sps:$4 sm:$0xff]   ;;  %v10272_v25 = vld [vmem:[%s14623_s1 + $0xd64] ss:$16 sps:$4 sm:$0xff]  }
 0x174   :  { %6769 = vmatprep.subr.bf16.mxu0 %v10186_v26  ;;  %7585 = vmatprep.subr.bf16.mxu1 %v10189_v27  ;;  %v10275_v26 = vld [vmem:[%s14623_s1 + $0xd6c] ss:$16 sps:$4 sm:$0xff]   ;;  %v10270_v27 = vld [vmem:[%s14623_s1 + $0xd60] ss:$16 sps:$4 sm:$0xff]  }
 0x177   :  { %6770 = vmatpush1.bf16.msra.mxu0 %v10184_v28  ;;  %7586 = vmatpush1.bf16.msra.mxu1 %v10187_v29  ;;  %v10273_v28 = vld [vmem:[%s14623_s1 + $0xd68] ss:$16 sps:$4 sm:$0xff]   ;;  %v10278_v29 = vld [vmem:[%s14623_s1 + $0xd84] ss:$16 sps:$4 sm:$0xff]  }
 0x178   :  { %6771 = vmatprep.subr.bf16.mxu0 %v10193_v30  ;;  %7587 = vmatprep.subr.bf16.mxu1 %v10196_v31  ;;  %v10281_v30 = vld [vmem:[%s14623_s1 + $0xd8c] ss:$16 sps:$4 sm:$0xff]   ;;  %v10276_v31 = vld [vmem:[%s14623_s1 + $0xd80] ss:$16 sps:$4 sm:$0xff]  }
 0x17b   :  { %6772 = vmatpush1.bf16.msra.mxu0 %v10191_v32  ;;  %7588 = vmatpush1.bf16.msra.mxu1 %v10194_v33  ;;  %v10279_v32 = vld [vmem:[%s14623_s1 + $0xd88] ss:$16 sps:$4 sm:$0xff]   ;;  %v10284_v33 = vld [vmem:[%s14623_s1 + $0xda4] ss:$16 sps:$4 sm:$0xff]  }
 0x17c   :  { %6773 = vmatprep.subr.bf16.mxu0 %v10200_v34  ;;  %7589 = vmatprep.subr.bf16.mxu1 %v10203_v35  ;;  %v10287_v34 = vld [vmem:[%s14623_s1 + $0xdac] ss:$16 sps:$4 sm:$0xff]   ;;  %v10282_v35 = vld [vmem:[%s14623_s1 + $0xda0] ss:$16 sps:$4 sm:$0xff]  }
 0x17f   :  { %6774 = vmatpush1.bf16.msra.mxu0 %v10198_v36  ;;  %7590 = vmatpush1.bf16.msra.mxu1 %v10201_v37  ;;  %v10285_v36 = vld [vmem:[%s14623_s1 + $0xda8] ss:$16 sps:$4 sm:$0xff]   ;;  %v10291_v37 = vld [vmem:[%s14623_s1 + $0xdc4] ss:$16 sps:$4 sm:$0xff]  }
 0x180   :  { %6794 = vmatprep.subr.bf16.mxu0 %v10206_v38  ;;  %7610 = vmatprep.subr.bf16.mxu1 %v10209_v39  ;;  %v10294_v38 = vld [vmem:[%s14623_s1 + $0xdcc] ss:$16 sps:$4 sm:$0xff]   ;;  %v10289_v39 = vld [vmem:[%s14623_s1 + $0xdc0] ss:$16 sps:$4 sm:$0xff]  }
 0x182   :  { %6776 = vmatmul.mubr.bf16.vlgmr.msra.gmra.mrb[0].mxu0 %v8298_v41  ;;  %7592 = vmatmul.mubr.bf16.vlgmr.msra.gmra.mrb[0].mxu1 %v8298_v41  ;;  %v10298_v41 = vld [vmem:[%s14623_s1 + $0xde4] ss:$16 sps:$4 sm:$0xff]  }
 0x183   :  { %6795 = vmatpush1.bf16.msra.mxu0 %v10204_v42  ;;  %7611 = vmatpush1.bf16.msra.mxu1 %v10207_v43  ;;  %v10301_v42 = vld [vmem:[%s14623_s1 + $0xdec] ss:$16 sps:$4 sm:$0xff]   ;;  %v10296_v43 = vld [vmem:[%s14623_s1 + $0xde0] ss:$16 sps:$4 sm:$0xff]  }
 0x184   :  { %6796 = vmatprep.subr.bf16.mxu0 %v10212_v46  ;;  %7612 = vmatprep.subr.bf16.mxu1 %v10215_v44  ;;  %v10299_v46 = vld [vmem:[%s14623_s1 + $0xde8] ss:$16 sps:$4 sm:$0xff]   ;;  %v10304_v44 = vld [vmem:[%s14623_s1 + $0xe04] ss:$16 sps:$4 sm:$0xff]  }
 0x185   :  { %6785 = vmatprep.mubr.bf16.mxu0 %v8331_v48  ;;  %7601 = vmatprep.mubr.bf16.mxu1 %v8331_v48  ;;  %v8300_v48 = vcombine.low %v12492_v51, %v12497_v52  ;;  %v10313_v51 = vld [vmem:[%s14623_s1 + $0xe2c] ss:$16 sps:$4 sm:$0xff]   ;;  %v10308_v52 = vld [vmem:[%s14623_s1 + $0xe20] ss:$16 sps:$4 sm:$0xff]  }
 0x187   :  { %6797 = vmatpush1.bf16.msra.mxu0 %v10210_v45  ;;  %7613 = vmatpush1.bf16.msra.mxu1 %v10213_v47  ;;  %v10307_v45 = vld [vmem:[%s14623_s1 + $0xe0c] ss:$16 sps:$4 sm:$0xff]   ;;  %v62_v47 = vld [vmem:[%s14624_s0 + $0x130] sm:$0xff] }
 0x188   :  { %6798 = vmatprep.subr.bf16.mxu0 %v10218_v49  ;;  %7614 = vmatprep.subr.bf16.mxu1 %v10221_v50  ;;  %v10302_v49 = vld [vmem:[%s14623_s1 + $0xe00] ss:$16 sps:$4 sm:$0xff]   ;;  %v10305_v50 = vld [vmem:[%s14623_s1 + $0xe08] ss:$16 sps:$4 sm:$0xff]  }
 0x18a   :  { %6786 = vmatmul.mubr.bf16.gmra.mrb[4].mxu0 %v8330_v53  ;;  %7602 = vmatmul.mubr.bf16.gmra.mrb[4].mxu1 %v8330_v53  ;;  %v10310_v53 = vld [vmem:[%s14623_s1 + $0xe24] ss:$16 sps:$4 sm:$0xff]  }
 0x18b   :  { %6799 = vmatpush1.bf16.msra.mxu0 %v10216_v54  ;;  %7615 = vmatpush1.bf16.msra.mxu1 %v10219_v55  ;;  %v10311_v54 = vld [vmem:[%s14623_s1 + $0xe28] ss:$16 sps:$4 sm:$0xff]   ;;  %v8333_v55 = vcombine.high %v62_v47, %v62_v47 }
 0x18c   :  { %6800 = vmatprep.subr.bf16.mxu0 %v10224_v56  ;;  %7616 = vmatprep.subr.bf16.mxu1 %v10227_v57  ;;  %v10316_v56 = vld [vmem:[%s14623_s1 + $0xe44] ss:$16 sps:$4 sm:$0xff]   ;;  %v10319_v57 = vld [vmem:[%s14623_s1 + $0xe4c] ss:$16 sps:$4 sm:$0xff]  }
 0x18d   :  { %6826 = vmatprep.mubr.bf16.mxu0 %v8301_v58  ;;  %7642 = vmatprep.mubr.bf16.mxu1 %v8301_v58  ;;  %v12701_v58 = vld [vmem:[%s14624_s0 + $0x38] sm:$0xff] }
 0x18f   :  { %6801 = vmatpush1.bf16.msra.mxu0 %v10222_v59  ;;  %7617 = vmatpush1.bf16.msra.mxu1 %v10225_v60  ;;  %v12706_v59 = vld [vmem:[%s14624_s0 + $0xb8] sm:$0xff]  ;;  %v8332_v60 = vcombine.low %v62_v47, %v62_v47 }
 0x190   :  { %6802 = vmatprep.subr.bf16.mxu0 %v10230_v61  ;;  %7618 = vmatprep.subr.bf16.mxu1 %v10233_v62  ;;  %v10314_v61 = vld [vmem:[%s14623_s1 + $0xe40] ss:$16 sps:$4 sm:$0xff]   ;;  %v10317_v62 = vld [vmem:[%s14623_s1 + $0xe48] ss:$16 sps:$4 sm:$0xff]  }
 0x191   :  { %v10390_v47 = vld [vmem:[%s14623_s1 + $0xfc8] ss:$16 sps:$4 sm:$0xff]  }
 0x193   :  { %6803 = vmatpush1.bf16.msra.mxu0 %v10228_v63  ;;  %7619 = vmatpush1.bf16.msra.mxu1 %v10231_v0  ;;  %v10322_v63 = vld [vmem:[%s14623_s1 + $0xe64] ss:$16 sps:$4 sm:$0xff]   ;;  %v10325_v0 = vld [vmem:[%s14623_s1 + $0xe6c] ss:$16 sps:$4 sm:$0xff]  }
 0x194   :  { %6804 = vmatprep.subr.bf16.mxu0 %v10236_v1  ;;  %7620 = vmatprep.subr.bf16.mxu1 %v10239_v2  ;;  %v8303_v1 = vcombine.high %v12701_v58, %v12706_v59  ;;  %v10320_v2 = vld [vmem:[%s14623_s1 + $0xe60] ss:$16 sps:$4 sm:$0xff]  }
 0x197   :  { %6805 = vmatpush1.bf16.msra.mxu0 %v10234_v3  ;;  %7621 = vmatpush1.bf16.msra.mxu1 %v10237_v4  ;;  %v10323_v3 = vld [vmem:[%s14623_s1 + $0xe68] ss:$16 sps:$4 sm:$0xff]   ;;  %v10328_v4 = vld [vmem:[%s14623_s1 + $0xe84] ss:$16 sps:$4 sm:$0xff]  }
 0x198   :  { %6806 = vmatprep.subr.bf16.mxu0 %v10242_v5  ;;  %7622 = vmatprep.subr.bf16.mxu1 %v10245_v6  ;;  %v10331_v5 = vld [vmem:[%s14623_s1 + $0xe8c] ss:$16 sps:$4 sm:$0xff]   ;;  %v10326_v6 = vld [vmem:[%s14623_s1 + $0xe80] ss:$16 sps:$4 sm:$0xff]  }
 0x19b   :  { %6807 = vmatpush1.bf16.msra.mxu0 %v10240_v7  ;;  %7623 = vmatpush1.bf16.msra.mxu1 %v10243_v8  ;;  %v10329_v7 = vld [vmem:[%s14623_s1 + $0xe88] ss:$16 sps:$4 sm:$0xff]   ;;  %v10334_v8 = vld [vmem:[%s14623_s1 + $0xea4] ss:$16 sps:$4 sm:$0xff]  }
 0x19c   :  { %6808 = vmatprep.subr.bf16.mxu0 %v10248_v9  ;;  %7624 = vmatprep.subr.bf16.mxu1 %v10251_v10  ;;  %v10337_v9 = vld [vmem:[%s14623_s1 + $0xeac] ss:$16 sps:$4 sm:$0xff]   ;;  %v10332_v10 = vld [vmem:[%s14623_s1 + $0xea0] ss:$16 sps:$4 sm:$0xff]  }
 0x19f   :  { %6809 = vmatpush1.bf16.msra.mxu0 %v10246_v11  ;;  %7625 = vmatpush1.bf16.msra.mxu1 %v10249_v12  ;;  %v10335_v11 = vld [vmem:[%s14623_s1 + $0xea8] ss:$16 sps:$4 sm:$0xff]   ;;  %v10340_v12 = vld [vmem:[%s14623_s1 + $0xec4] ss:$16 sps:$4 sm:$0xff]  }
 0x1a0   :  { %6810 = vmatprep.subr.bf16.mxu0 %v10254_v13  ;;  %7626 = vmatprep.subr.bf16.mxu1 %v10257_v14  ;;  %v10343_v13 = vld [vmem:[%s14623_s1 + $0xecc] ss:$16 sps:$4 sm:$0xff]   ;;  %v10338_v14 = vld [vmem:[%s14623_s1 + $0xec0] ss:$16 sps:$4 sm:$0xff]  }
 0x1a3   :  { %6811 = vmatpush1.bf16.msra.mxu0 %v10252_v15  ;;  %7627 = vmatpush1.bf16.msra.mxu1 %v10255_v16  ;;  %v10341_v15 = vld [vmem:[%s14623_s1 + $0xec8] ss:$16 sps:$4 sm:$0xff]   ;;  %v10346_v16 = vld [vmem:[%s14623_s1 + $0xee4] ss:$16 sps:$4 sm:$0xff]  }
 0x1a4   :  { %6812 = vmatprep.subr.bf16.mxu0 %v10260_v17  ;;  %7628 = vmatprep.subr.bf16.mxu1 %v10263_v18  ;;  %v10349_v17 = vld [vmem:[%s14623_s1 + $0xeec] ss:$16 sps:$4 sm:$0xff]   ;;  %v10344_v18 = vld [vmem:[%s14623_s1 + $0xee0] ss:$16 sps:$4 sm:$0xff]  }
 0x1a7   :  { %6813 = vmatpush1.bf16.msra.mxu0 %v10258_v19  ;;  %7629 = vmatpush1.bf16.msra.mxu1 %v10261_v20  ;;  %v10347_v19 = vld [vmem:[%s14623_s1 + $0xee8] ss:$16 sps:$4 sm:$0xff]   ;;  %v10352_v20 = vld [vmem:[%s14623_s1 + $0xf04] ss:$16 sps:$4 sm:$0xff]  }
 0x1a8   :  { %6814 = vmatprep.subr.bf16.mxu0 %v10266_v21  ;;  %7630 = vmatprep.subr.bf16.mxu1 %v10269_v22  ;;  %v10355_v21 = vld [vmem:[%s14623_s1 + $0xf0c] ss:$16 sps:$4 sm:$0xff]   ;;  %v10350_v22 = vld [vmem:[%s14623_s1 + $0xf00] ss:$16 sps:$4 sm:$0xff]  }
 0x1ab   :  { %6815 = vmatpush1.bf16.msra.mxu0 %v10264_v23  ;;  %7631 = vmatpush1.bf16.msra.mxu1 %v10267_v24  ;;  %v10353_v23 = vld [vmem:[%s14623_s1 + $0xf08] ss:$16 sps:$4 sm:$0xff]   ;;  %v10358_v24 = vld [vmem:[%s14623_s1 + $0xf24] ss:$16 sps:$4 sm:$0xff]  }
 0x1ac   :  { %6816 = vmatprep.subr.bf16.mxu0 %v10272_v25  ;;  %7632 = vmatprep.subr.bf16.mxu1 %v10275_v26  ;;  %v10361_v25 = vld [vmem:[%s14623_s1 + $0xf2c] ss:$16 sps:$4 sm:$0xff]   ;;  %v10356_v26 = vld [vmem:[%s14623_s1 + $0xf20] ss:$16 sps:$4 sm:$0xff]  }
 0x1af   :  { %6817 = vmatpush1.bf16.msra.mxu0 %v10270_v27  ;;  %7633 = vmatpush1.bf16.msra.mxu1 %v10273_v28  ;;  %v10359_v27 = vld [vmem:[%s14623_s1 + $0xf28] ss:$16 sps:$4 sm:$0xff]   ;;  %v10364_v28 = vld [vmem:[%s14623_s1 + $0xf44] ss:$16 sps:$4 sm:$0xff]  }
 0x1b0   :  { %6818 = vmatprep.subr.bf16.mxu0 %v10278_v29  ;;  %7634 = vmatprep.subr.bf16.mxu1 %v10281_v30  ;;  %v10367_v29 = vld [vmem:[%s14623_s1 + $0xf4c] ss:$16 sps:$4 sm:$0xff]   ;;  %v10362_v30 = vld [vmem:[%s14623_s1 + $0xf40] ss:$16 sps:$4 sm:$0xff]  }
 0x1b3   :  { %6819 = vmatpush1.bf16.msra.mxu0 %v10276_v31  ;;  %7635 = vmatpush1.bf16.msra.mxu1 %v10279_v32  ;;  %v10365_v31 = vld [vmem:[%s14623_s1 + $0xf48] ss:$16 sps:$4 sm:$0xff]   ;;  %v10370_v32 = vld [vmem:[%s14623_s1 + $0xf64] ss:$16 sps:$4 sm:$0xff]  }
 0x1b4   :  { %6820 = vmatprep.subr.bf16.mxu0 %v10284_v33  ;;  %7636 = vmatprep.subr.bf16.mxu1 %v10287_v34  ;;  %v10373_v33 = vld [vmem:[%s14623_s1 + $0xf6c] ss:$16 sps:$4 sm:$0xff]   ;;  %v10368_v34 = vld [vmem:[%s14623_s1 + $0xf60] ss:$16 sps:$4 sm:$0xff]  }
 0x1b7   :  { %6821 = vmatpush1.bf16.msra.mxu0 %v10282_v35  ;;  %7637 = vmatpush1.bf16.msra.mxu1 %v10285_v36  ;;  %v10371_v35 = vld [vmem:[%s14623_s1 + $0xf68] ss:$16 sps:$4 sm:$0xff]   ;;  %v10376_v36 = vld [vmem:[%s14623_s1 + $0xf84] ss:$16 sps:$4 sm:$0xff]  }
 0x1b8   :  { %6822 = vmatprep.subr.bf16.mxu0 %v10291_v37  ;;  %7638 = vmatprep.subr.bf16.mxu1 %v10294_v38  ;;  %v10379_v37 = vld [vmem:[%s14623_s1 + $0xf8c] ss:$16 sps:$4 sm:$0xff]   ;;  %v10374_v38 = vld [vmem:[%s14623_s1 + $0xf80] ss:$16 sps:$4 sm:$0xff]  }
 0x1bb   :  { %6823 = vmatpush1.bf16.msra.mxu0 %v10289_v39  ;;  %7639 = vmatpush1.bf16.msra.mxu1 %v10292_v40  ;;  %v10377_v39 = vld [vmem:[%s14623_s1 + $0xf88] ss:$16 sps:$4 sm:$0xff]   ;;  %v10382_v40 = vld [vmem:[%s14623_s1 + $0xfa4] ss:$16 sps:$4 sm:$0xff]  }
 0x1bc   :  { %6824 = vmatprep.subr.bf16.mxu0 %v10298_v41  ;;  %7640 = vmatprep.subr.bf16.mxu1 %v10301_v42  ;;  %v10385_v41 = vld [vmem:[%s14623_s1 + $0xfac] ss:$16 sps:$4 sm:$0xff]   ;;  %v10380_v42 = vld [vmem:[%s14623_s1 + $0xfa0] ss:$16 sps:$4 sm:$0xff]  }
 0x1bf   :  { %6825 = vmatpush1.bf16.msra.mxu0 %v10296_v43  ;;  %7641 = vmatpush1.bf16.msra.mxu1 %v10299_v46  ;;  %v10383_v43 = vld [vmem:[%s14623_s1 + $0xfa8] ss:$16 sps:$4 sm:$0xff]   ;;  %v10389_v46 = vld [vmem:[%s14623_s1 + $0xfc4] ss:$16 sps:$4 sm:$0xff]  }
 0x1c0   :  { %6845 = vmatprep.subr.bf16.mxu0 %v10304_v44  ;;  %7661 = vmatprep.subr.bf16.mxu1 %v10307_v45  ;;  %v10392_v44 = vld [vmem:[%s14623_s1 + $0xfcc] ss:$16 sps:$4 sm:$0xff]   ;;  %v10387_v45 = vld [vmem:[%s14623_s1 + $0xfc0] ss:$16 sps:$4 sm:$0xff]  }
 0x1c2   :  { %6827 = vmatmul.mubr.bf16.vlgmr.msra.gmra.mrb[0].mxu0 %v8300_v48  ;;  %7643 = vmatmul.mubr.bf16.vlgmr.msra.gmra.mrb[0].mxu1 %v8300_v48  ;;  %v10396_v48 = vld [vmem:[%s14623_s1 + $0xfe4] ss:$16 sps:$4 sm:$0xff]  }
 0x1c3   :  { %6846 = vmatpush1.bf16.msra.mxu0 %v10302_v49  ;;  %7662 = vmatpush1.bf16.msra.mxu1 %v10305_v50  ;;  %v10399_v49 = vld [vmem:[%s14623_s1 + $0xfec] ss:$16 sps:$4 sm:$0xff]   ;;  %v10394_v50 = vld [vmem:[%s14623_s1 + $0xfe0] ss:$16 sps:$4 sm:$0xff]  }
 0x1c4   :  { %6847 = vmatprep.subr.bf16.mxu0 %v10310_v53  ;;  %7663 = vmatprep.subr.bf16.mxu1 %v10313_v51  ;;  %v10397_v53 = vld [vmem:[%s14623_s1 + $0xfe8] ss:$16 sps:$4 sm:$0xff]   ;;  %v10402_v51 = vld [vmem:[%s14623_s1 + $0x1004] ss:$16 sps:$4 sm:$0xff]  }
 0x1c5   :  { %6836 = vmatprep.mubr.bf16.mxu0 %v8333_v55  ;;  %7652 = vmatprep.mubr.bf16.mxu1 %v8333_v55  ;;  %v8302_v55 = vcombine.low %v12701_v58, %v12706_v59  ;;  %v10411_v58 = vld [vmem:[%s14623_s1 + $0x102c] ss:$16 sps:$4 sm:$0xff]   ;;  %v10406_v59 = vld [vmem:[%s14623_s1 + $0x1020] ss:$16 sps:$4 sm:$0xff]  }
 0x1c7   :  { %6848 = vmatpush1.bf16.msra.mxu0 %v10308_v52  ;;  %7664 = vmatpush1.bf16.msra.mxu1 %v10311_v54  ;;  %v10405_v52 = vld [vmem:[%s14623_s1 + $0x100c] ss:$16 sps:$4 sm:$0xff]  }
 0x1c8   :  { %6849 = vmatprep.subr.bf16.mxu0 %v10316_v56  ;;  %7665 = vmatprep.subr.bf16.mxu1 %v10319_v57  ;;  %v63_v54 = vld [vmem:[%s14624_s0 + $0x138] sm:$0xff]  ;;  %v10400_v56 = vld [vmem:[%s14623_s1 + $0x1000] ss:$16 sps:$4 sm:$0xff]  }
 0x1c9   :  { %v10403_v57 = vld [vmem:[%s14623_s1 + $0x1008] ss:$16 sps:$4 sm:$0xff]  }
 0x1ca   :  { %6837 = vmatmul.mubr.bf16.gmra.mrb[4].mxu0 %v8332_v60  ;;  %7653 = vmatmul.mubr.bf16.gmra.mrb[4].mxu1 %v8332_v60  ;;  %v10408_v60 = vld [vmem:[%s14623_s1 + $0x1024] ss:$16 sps:$4 sm:$0xff]  }
 0x1cb   :  { %6850 = vmatpush1.bf16.msra.mxu0 %v10314_v61  ;;  %7666 = vmatpush1.bf16.msra.mxu1 %v10317_v62  ;;  %v10409_v61 = vld [vmem:[%s14623_s1 + $0x1028] ss:$16 sps:$4 sm:$0xff]   ;;  %v8335_v62 = vcombine.high %v63_v54, %v63_v54 }
 0x1cc   :  { %6851 = vmatprep.subr.bf16.mxu0 %v10322_v63  ;;  %7667 = vmatprep.subr.bf16.mxu1 %v10325_v0  ;;  %v10414_v63 = vld [vmem:[%s14623_s1 + $0x1044] ss:$16 sps:$4 sm:$0xff]   ;;  %v10417_v0 = vld [vmem:[%s14623_s1 + $0x104c] ss:$16 sps:$4 sm:$0xff]  }
 0x1cd   :  { %6877 = vmatprep.mubr.bf16.mxu0 %v8303_v1  ;;  %7693 = vmatprep.mubr.bf16.mxu1 %v8303_v1  ;;  %v12910_v1 = vld [vmem:[%s14624_s0 + $0x40] sm:$0xff] }
 0x1cf   :  { %6852 = vmatpush1.bf16.msra.mxu0 %v10320_v2  ;;  %7668 = vmatpush1.bf16.msra.mxu1 %v10323_v3  ;;  %v12915_v2 = vld [vmem:[%s14624_s0 + $0xc0] sm:$0xff]  ;;  %v8334_v3 = vcombine.low %v63_v54, %v63_v54  ;;  %v10488_v54 = vld [vmem:[%s14623_s1 + $0x11c8] ss:$16 sps:$4 sm:$0xff]  }
 0x1d0   :  { %6853 = vmatprep.subr.bf16.mxu0 %v10328_v4  ;;  %7669 = vmatprep.subr.bf16.mxu1 %v10331_v5  ;;  %v10412_v4 = vld [vmem:[%s14623_s1 + $0x1040] ss:$16 sps:$4 sm:$0xff]   ;;  %v10415_v5 = vld [vmem:[%s14623_s1 + $0x1048] ss:$16 sps:$4 sm:$0xff]  }
 0x1d3   :  { %6854 = vmatpush1.bf16.msra.mxu0 %v10326_v6  ;;  %7670 = vmatpush1.bf16.msra.mxu1 %v10329_v7  ;;  %v10420_v6 = vld [vmem:[%s14623_s1 + $0x1064] ss:$16 sps:$4 sm:$0xff]   ;;  %v10423_v7 = vld [vmem:[%s14623_s1 + $0x106c] ss:$16 sps:$4 sm:$0xff]  }
 0x1d4   :  { %6855 = vmatprep.subr.bf16.mxu0 %v10334_v8  ;;  %7671 = vmatprep.subr.bf16.mxu1 %v10337_v9  ;;  %v8305_v8 = vcombine.high %v12910_v1, %v12915_v2  ;;  %v10418_v9 = vld [vmem:[%s14623_s1 + $0x1060] ss:$16 sps:$4 sm:$0xff]  }
 0x1d7   :  { %6856 = vmatpush1.bf16.msra.mxu0 %v10332_v10  ;;  %7672 = vmatpush1.bf16.msra.mxu1 %v10335_v11  ;;  %v10421_v10 = vld [vmem:[%s14623_s1 + $0x1068] ss:$16 sps:$4 sm:$0xff]   ;;  %v10426_v11 = vld [vmem:[%s14623_s1 + $0x1084] ss:$16 sps:$4 sm:$0xff]  }
 0x1d8   :  { %6857 = vmatprep.subr.bf16.mxu0 %v10340_v12  ;;  %7673 = vmatprep.subr.bf16.mxu1 %v10343_v13  ;;  %v10429_v12 = vld [vmem:[%s14623_s1 + $0x108c] ss:$16 sps:$4 sm:$0xff]   ;;  %v10424_v13 = vld [vmem:[%s14623_s1 + $0x1080] ss:$16 sps:$4 sm:$0xff]  }
 0x1db   :  { %6858 = vmatpush1.bf16.msra.mxu0 %v10338_v14  ;;  %7674 = vmatpush1.bf16.msra.mxu1 %v10341_v15  ;;  %v10427_v14 = vld [vmem:[%s14623_s1 + $0x1088] ss:$16 sps:$4 sm:$0xff]   ;;  %v10432_v15 = vld [vmem:[%s14623_s1 + $0x10a4] ss:$16 sps:$4 sm:$0xff]  }
 0x1dc   :  { %6859 = vmatprep.subr.bf16.mxu0 %v10346_v16  ;;  %7675 = vmatprep.subr.bf16.mxu1 %v10349_v17  ;;  %v10435_v16 = vld [vmem:[%s14623_s1 + $0x10ac] ss:$16 sps:$4 sm:$0xff]   ;;  %v10430_v17 = vld [vmem:[%s14623_s1 + $0x10a0] ss:$16 sps:$4 sm:$0xff]  }
 0x1df   :  { %6860 = vmatpush1.bf16.msra.mxu0 %v10344_v18  ;;  %7676 = vmatpush1.bf16.msra.mxu1 %v10347_v19  ;;  %v10433_v18 = vld [vmem:[%s14623_s1 + $0x10a8] ss:$16 sps:$4 sm:$0xff]   ;;  %v10438_v19 = vld [vmem:[%s14623_s1 + $0x10c4] ss:$16 sps:$4 sm:$0xff]  }
 0x1e0   :  { %6861 = vmatprep.subr.bf16.mxu0 %v10352_v20  ;;  %7677 = vmatprep.subr.bf16.mxu1 %v10355_v21  ;;  %v10441_v20 = vld [vmem:[%s14623_s1 + $0x10cc] ss:$16 sps:$4 sm:$0xff]   ;;  %v10436_v21 = vld [vmem:[%s14623_s1 + $0x10c0] ss:$16 sps:$4 sm:$0xff]  }
 0x1e3   :  { %6862 = vmatpush1.bf16.msra.mxu0 %v10350_v22  ;;  %7678 = vmatpush1.bf16.msra.mxu1 %v10353_v23  ;;  %v10439_v22 = vld [vmem:[%s14623_s1 + $0x10c8] ss:$16 sps:$4 sm:$0xff]   ;;  %v10444_v23 = vld [vmem:[%s14623_s1 + $0x10e4] ss:$16 sps:$4 sm:$0xff]  }
 0x1e4   :  { %6863 = vmatprep.subr.bf16.mxu0 %v10358_v24  ;;  %7679 = vmatprep.subr.bf16.mxu1 %v10361_v25  ;;  %v10447_v24 = vld [vmem:[%s14623_s1 + $0x10ec] ss:$16 sps:$4 sm:$0xff]   ;;  %v10442_v25 = vld [vmem:[%s14623_s1 + $0x10e0] ss:$16 sps:$4 sm:$0xff]  }
 0x1e7   :  { %6864 = vmatpush1.bf16.msra.mxu0 %v10356_v26  ;;  %7680 = vmatpush1.bf16.msra.mxu1 %v10359_v27  ;;  %v10445_v26 = vld [vmem:[%s14623_s1 + $0x10e8] ss:$16 sps:$4 sm:$0xff]   ;;  %v10450_v27 = vld [vmem:[%s14623_s1 + $0x1104] ss:$16 sps:$4 sm:$0xff]  }
 0x1e8   :  { %6865 = vmatprep.subr.bf16.mxu0 %v10364_v28  ;;  %7681 = vmatprep.subr.bf16.mxu1 %v10367_v29  ;;  %v10453_v28 = vld [vmem:[%s14623_s1 + $0x110c] ss:$16 sps:$4 sm:$0xff]   ;;  %v10448_v29 = vld [vmem:[%s14623_s1 + $0x1100] ss:$16 sps:$4 sm:$0xff]  }
 0x1eb   :  { %6866 = vmatpush1.bf16.msra.mxu0 %v10362_v30  ;;  %7682 = vmatpush1.bf16.msra.mxu1 %v10365_v31  ;;  %v10451_v30 = vld [vmem:[%s14623_s1 + $0x1108] ss:$16 sps:$4 sm:$0xff]   ;;  %v10456_v31 = vld [vmem:[%s14623_s1 + $0x1124] ss:$16 sps:$4 sm:$0xff]  }
 0x1ec   :  { %6867 = vmatprep.subr.bf16.mxu0 %v10370_v32  ;;  %7683 = vmatprep.subr.bf16.mxu1 %v10373_v33  ;;  %v10459_v32 = vld [vmem:[%s14623_s1 + $0x112c] ss:$16 sps:$4 sm:$0xff]   ;;  %v10454_v33 = vld [vmem:[%s14623_s1 + $0x1120] ss:$16 sps:$4 sm:$0xff]  }
 0x1ef   :  { %6868 = vmatpush1.bf16.msra.mxu0 %v10368_v34  ;;  %7684 = vmatpush1.bf16.msra.mxu1 %v10371_v35  ;;  %v10457_v34 = vld [vmem:[%s14623_s1 + $0x1128] ss:$16 sps:$4 sm:$0xff]   ;;  %v10462_v35 = vld [vmem:[%s14623_s1 + $0x1144] ss:$16 sps:$4 sm:$0xff]  }
 0x1f0   :  { %6869 = vmatprep.subr.bf16.mxu0 %v10376_v36  ;;  %7685 = vmatprep.subr.bf16.mxu1 %v10379_v37  ;;  %v10465_v36 = vld [vmem:[%s14623_s1 + $0x114c] ss:$16 sps:$4 sm:$0xff]   ;;  %v10460_v37 = vld [vmem:[%s14623_s1 + $0x1140] ss:$16 sps:$4 sm:$0xff]  }
 0x1f3   :  { %6870 = vmatpush1.bf16.msra.mxu0 %v10374_v38  ;;  %7686 = vmatpush1.bf16.msra.mxu1 %v10377_v39  ;;  %v10463_v38 = vld [vmem:[%s14623_s1 + $0x1148] ss:$16 sps:$4 sm:$0xff]   ;;  %v10468_v39 = vld [vmem:[%s14623_s1 + $0x1164] ss:$16 sps:$4 sm:$0xff]  }
 0x1f4   :  { %6871 = vmatprep.subr.bf16.mxu0 %v10382_v40  ;;  %7687 = vmatprep.subr.bf16.mxu1 %v10385_v41  ;;  %v10471_v40 = vld [vmem:[%s14623_s1 + $0x116c] ss:$16 sps:$4 sm:$0xff]   ;;  %v10466_v41 = vld [vmem:[%s14623_s1 + $0x1160] ss:$16 sps:$4 sm:$0xff]  }
 0x1f7   :  { %6872 = vmatpush1.bf16.msra.mxu0 %v10380_v42  ;;  %7688 = vmatpush1.bf16.msra.mxu1 %v10383_v43  ;;  %v10469_v42 = vld [vmem:[%s14623_s1 + $0x1168] ss:$16 sps:$4 sm:$0xff]   ;;  %v10474_v43 = vld [vmem:[%s14623_s1 + $0x1184] ss:$16 sps:$4 sm:$0xff]  }
 0x1f8   :  { %6873 = vmatprep.subr.bf16.mxu0 %v10389_v46  ;;  %7689 = vmatprep.subr.bf16.mxu1 %v10392_v44  ;;  %v10477_v46 = vld [vmem:[%s14623_s1 + $0x118c] ss:$16 sps:$4 sm:$0xff]   ;;  %v10472_v44 = vld [vmem:[%s14623_s1 + $0x1180] ss:$16 sps:$4 sm:$0xff]  }
 0x1fb   :  { %6874 = vmatpush1.bf16.msra.mxu0 %v10387_v45  ;;  %7690 = vmatpush1.bf16.msra.mxu1 %v10390_v47  ;;  %v10475_v45 = vld [vmem:[%s14623_s1 + $0x1188] ss:$16 sps:$4 sm:$0xff]   ;;  %v10480_v47 = vld [vmem:[%s14623_s1 + $0x11a4] ss:$16 sps:$4 sm:$0xff]  }
 0x1fc   :  { %6875 = vmatprep.subr.bf16.mxu0 %v10396_v48  ;;  %7691 = vmatprep.subr.bf16.mxu1 %v10399_v49  ;;  %v10483_v48 = vld [vmem:[%s14623_s1 + $0x11ac] ss:$16 sps:$4 sm:$0xff]   ;;  %v10478_v49 = vld [vmem:[%s14623_s1 + $0x11a0] ss:$16 sps:$4 sm:$0xff]  }
 0x1ff   :  { %6876 = vmatpush1.bf16.msra.mxu0 %v10394_v50  ;;  %7692 = vmatpush1.bf16.msra.mxu1 %v10397_v53  ;;  %v10481_v50 = vld [vmem:[%s14623_s1 + $0x11a8] ss:$16 sps:$4 sm:$0xff]   ;;  %v10487_v53 = vld [vmem:[%s14623_s1 + $0x11c4] ss:$16 sps:$4 sm:$0xff]  }
 0x200   :  { %6896 = vmatprep.subr.bf16.mxu0 %v10402_v51  ;;  %7712 = vmatprep.subr.bf16.mxu1 %v10405_v52  ;;  %v10490_v51 = vld [vmem:[%s14623_s1 + $0x11cc] ss:$16 sps:$4 sm:$0xff]   ;;  %v10485_v52 = vld [vmem:[%s14623_s1 + $0x11c0] ss:$16 sps:$4 sm:$0xff]  }
 0x202   :  { %6878 = vmatmul.mubr.bf16.vlgmr.msra.gmra.mrb[0].mxu0 %v8302_v55  ;;  %7694 = vmatmul.mubr.bf16.vlgmr.msra.gmra.mrb[0].mxu1 %v8302_v55  ;;  %v10494_v55 = vld [vmem:[%s14623_s1 + $0x11e4] ss:$16 sps:$4 sm:$0xff]  }
 0x203   :  { %6897 = vmatpush1.bf16.msra.mxu0 %v10400_v56  ;;  %7713 = vmatpush1.bf16.msra.mxu1 %v10403_v57  ;;  %v10497_v56 = vld [vmem:[%s14623_s1 + $0x11ec] ss:$16 sps:$4 sm:$0xff]   ;;  %v10492_v57 = vld [vmem:[%s14623_s1 + $0x11e0] ss:$16 sps:$4 sm:$0xff]  }
 0x204   :  { %6898 = vmatprep.subr.bf16.mxu0 %v10408_v60  ;;  %7714 = vmatprep.subr.bf16.mxu1 %v10411_v58  ;;  %v10495_v60 = vld [vmem:[%s14623_s1 + $0x11e8] ss:$16 sps:$4 sm:$0xff]   ;;  %v10500_v58 = vld [vmem:[%s14623_s1 + $0x1204] ss:$16 sps:$4 sm:$0xff]  }
 0x205   :  { %6887 = vmatprep.mubr.bf16.mxu0 %v8335_v62  ;;  %7703 = vmatprep.mubr.bf16.mxu1 %v8335_v62  ;;  %v8304_v62 = vcombine.low %v12910_v1, %v12915_v2  ;;  %v10509_v1 = vld [vmem:[%s14623_s1 + $0x122c] ss:$16 sps:$4 sm:$0xff]   ;;  %v10504_v2 = vld [vmem:[%s14623_s1 + $0x1220] ss:$16 sps:$4 sm:$0xff]  }
 0x207   :  { %6899 = vmatpush1.bf16.msra.mxu0 %v10406_v59  ;;  %7715 = vmatpush1.bf16.msra.mxu1 %v10409_v61  ;;  %v10503_v59 = vld [vmem:[%s14623_s1 + $0x120c] ss:$16 sps:$4 sm:$0xff]   ;;  %v64_v61 = vld [vmem:[%s14624_s0 + $0x140] sm:$0xff] }
 0x208   :  { %6900 = vmatprep.subr.bf16.mxu0 %v10414_v63  ;;  %7716 = vmatprep.subr.bf16.mxu1 %v10417_v0  ;;  %v10498_v63 = vld [vmem:[%s14623_s1 + $0x1200] ss:$16 sps:$4 sm:$0xff]   ;;  %v10501_v0 = vld [vmem:[%s14623_s1 + $0x1208] ss:$16 sps:$4 sm:$0xff]  }
 0x20a   :  { %6888 = vmatmul.mubr.bf16.gmra.mrb[4].mxu0 %v8334_v3  ;;  %7704 = vmatmul.mubr.bf16.gmra.mrb[4].mxu1 %v8334_v3  ;;  %v10506_v3 = vld [vmem:[%s14623_s1 + $0x1224] ss:$16 sps:$4 sm:$0xff]  }
 0x20b   :  { %6901 = vmatpush1.bf16.msra.mxu0 %v10412_v4  ;;  %7717 = vmatpush1.bf16.msra.mxu1 %v10415_v5  ;;  %v10507_v4 = vld [vmem:[%s14623_s1 + $0x1228] ss:$16 sps:$4 sm:$0xff]   ;;  %v8337_v5 = vcombine.high %v64_v61, %v64_v61 }
 0x20c   :  { %6902 = vmatprep.subr.bf16.mxu0 %v10420_v6  ;;  %7718 = vmatprep.subr.bf16.mxu1 %v10423_v7  ;;  %v10512_v6 = vld [vmem:[%s14623_s1 + $0x1244] ss:$16 sps:$4 sm:$0xff]   ;;  %v10515_v7 = vld [vmem:[%s14623_s1 + $0x124c] ss:$16 sps:$4 sm:$0xff]  }
 0x20d   :  { %6928 = vmatprep.mubr.bf16.mxu0 %v8305_v8  ;;  %7744 = vmatprep.mubr.bf16.mxu1 %v8305_v8  ;;  %v13119_v8 = vld [vmem:[%s14624_s0 + $0x48] sm:$0xff] }
 0x20f   :  { %6903 = vmatpush1.bf16.msra.mxu0 %v10418_v9  ;;  %7719 = vmatpush1.bf16.msra.mxu1 %v10421_v10  ;;  %v13124_v9 = vld [vmem:[%s14624_s0 + $0xc8] sm:$0xff]  ;;  %v8336_v10 = vcombine.low %v64_v61, %v64_v61 }
 0x210   :  { %6904 = vmatprep.subr.bf16.mxu0 %v10426_v11  ;;  %7720 = vmatprep.subr.bf16.mxu1 %v10429_v12  ;;  %v10510_v11 = vld [vmem:[%s14623_s1 + $0x1240] ss:$16 sps:$4 sm:$0xff]   ;;  %v10513_v12 = vld [vmem:[%s14623_s1 + $0x1248] ss:$16 sps:$4 sm:$0xff]  }
 0x211   :  { %v10586_v61 = vld [vmem:[%s14623_s1 + $0x13c8] ss:$16 sps:$4 sm:$0xff]  }
 0x213   :  { %6905 = vmatpush1.bf16.msra.mxu0 %v10424_v13  ;;  %7721 = vmatpush1.bf16.msra.mxu1 %v10427_v14  ;;  %v10518_v13 = vld [vmem:[%s14623_s1 + $0x1264] ss:$16 sps:$4 sm:$0xff]   ;;  %v10521_v14 = vld [vmem:[%s14623_s1 + $0x126c] ss:$16 sps:$4 sm:$0xff]  }
 0x214   :  { %6906 = vmatprep.subr.bf16.mxu0 %v10432_v15  ;;  %7722 = vmatprep.subr.bf16.mxu1 %v10435_v16  ;;  %v8307_v15 = vcombine.high %v13119_v8, %v13124_v9  ;;  %v10516_v16 = vld [vmem:[%s14623_s1 + $0x1260] ss:$16 sps:$4 sm:$0xff]  }
 0x217   :  { %6907 = vmatpush1.bf16.msra.mxu0 %v10430_v17  ;;  %7723 = vmatpush1.bf16.msra.mxu1 %v10433_v18  ;;  %v10519_v17 = vld [vmem:[%s14623_s1 + $0x1268] ss:$16 sps:$4 sm:$0xff]   ;;  %v10524_v18 = vld [vmem:[%s14623_s1 + $0x1284] ss:$16 sps:$4 sm:$0xff]  }
 0x218   :  { %6908 = vmatprep.subr.bf16.mxu0 %v10438_v19  ;;  %7724 = vmatprep.subr.bf16.mxu1 %v10441_v20  ;;  %v10527_v19 = vld [vmem:[%s14623_s1 + $0x128c] ss:$16 sps:$4 sm:$0xff]   ;;  %v10522_v20 = vld [vmem:[%s14623_s1 + $0x1280] ss:$16 sps:$4 sm:$0xff]  }
 0x21b   :  { %6909 = vmatpush1.bf16.msra.mxu0 %v10436_v21  ;;  %7725 = vmatpush1.bf16.msra.mxu1 %v10439_v22  ;;  %v10525_v21 = vld [vmem:[%s14623_s1 + $0x1288] ss:$16 sps:$4 sm:$0xff]   ;;  %v10530_v22 = vld [vmem:[%s14623_s1 + $0x12a4] ss:$16 sps:$4 sm:$0xff]  }
 0x21c   :  { %6910 = vmatprep.subr.bf16.mxu0 %v10444_v23  ;;  %7726 = vmatprep.subr.bf16.mxu1 %v10447_v24  ;;  %v10533_v23 = vld [vmem:[%s14623_s1 + $0x12ac] ss:$16 sps:$4 sm:$0xff]   ;;  %v10528_v24 = vld [vmem:[%s14623_s1 + $0x12a0] ss:$16 sps:$4 sm:$0xff]  }
 0x21f   :  { %6911 = vmatpush1.bf16.msra.mxu0 %v10442_v25  ;;  %7727 = vmatpush1.bf16.msra.mxu1 %v10445_v26  ;;  %v10531_v25 = vld [vmem:[%s14623_s1 + $0x12a8] ss:$16 sps:$4 sm:$0xff]   ;;  %v10536_v26 = vld [vmem:[%s14623_s1 + $0x12c4] ss:$16 sps:$4 sm:$0xff]  }
 0x220   :  { %6912 = vmatprep.subr.bf16.mxu0 %v10450_v27  ;;  %7728 = vmatprep.subr.bf16.mxu1 %v10453_v28  ;;  %v10539_v27 = vld [vmem:[%s14623_s1 + $0x12cc] ss:$16 sps:$4 sm:$0xff]   ;;  %v10534_v28 = vld [vmem:[%s14623_s1 + $0x12c0] ss:$16 sps:$4 sm:$0xff]  }
 0x223   :  { %6913 = vmatpush1.bf16.msra.mxu0 %v10448_v29  ;;  %7729 = vmatpush1.bf16.msra.mxu1 %v10451_v30  ;;  %v10537_v29 = vld [vmem:[%s14623_s1 + $0x12c8] ss:$16 sps:$4 sm:$0xff]   ;;  %v10542_v30 = vld [vmem:[%s14623_s1 + $0x12e4] ss:$16 sps:$4 sm:$0xff]  }
 0x224   :  { %6914 = vmatprep.subr.bf16.mxu0 %v10456_v31  ;;  %7730 = vmatprep.subr.bf16.mxu1 %v10459_v32  ;;  %v10545_v31 = vld [vmem:[%s14623_s1 + $0x12ec] ss:$16 sps:$4 sm:$0xff]   ;;  %v10540_v32 = vld [vmem:[%s14623_s1 + $0x12e0] ss:$16 sps:$4 sm:$0xff]  }
 0x227   :  { %6915 = vmatpush1.bf16.msra.mxu0 %v10454_v33  ;;  %7731 = vmatpush1.bf16.msra.mxu1 %v10457_v34  ;;  %v10543_v33 = vld [vmem:[%s14623_s1 + $0x12e8] ss:$16 sps:$4 sm:$0xff]   ;;  %v10548_v34 = vld [vmem:[%s14623_s1 + $0x1304] ss:$16 sps:$4 sm:$0xff]  }
 0x228   :  { %6916 = vmatprep.subr.bf16.mxu0 %v10462_v35  ;;  %7732 = vmatprep.subr.bf16.mxu1 %v10465_v36  ;;  %v10551_v35 = vld [vmem:[%s14623_s1 + $0x130c] ss:$16 sps:$4 sm:$0xff]   ;;  %v10546_v36 = vld [vmem:[%s14623_s1 + $0x1300] ss:$16 sps:$4 sm:$0xff]  }
 0x22b   :  { %6917 = vmatpush1.bf16.msra.mxu0 %v10460_v37  ;;  %7733 = vmatpush1.bf16.msra.mxu1 %v10463_v38  ;;  %v10549_v37 = vld [vmem:[%s14623_s1 + $0x1308] ss:$16 sps:$4 sm:$0xff]   ;;  %v10554_v38 = vld [vmem:[%s14623_s1 + $0x1324] ss:$16 sps:$4 sm:$0xff]  }
 0x22c   :  { %6918 = vmatprep.subr.bf16.mxu0 %v10468_v39  ;;  %7734 = vmatprep.subr.bf16.mxu1 %v10471_v40  ;;  %v10557_v39 = vld [vmem:[%s14623_s1 + $0x132c] ss:$16 sps:$4 sm:$0xff]   ;;  %v10552_v40 = vld [vmem:[%s14623_s1 + $0x1320] ss:$16 sps:$4 sm:$0xff]  }
 0x22f   :  { %6919 = vmatpush1.bf16.msra.mxu0 %v10466_v41  ;;  %7735 = vmatpush1.bf16.msra.mxu1 %v10469_v42  ;;  %v10555_v41 = vld [vmem:[%s14623_s1 + $0x1328] ss:$16 sps:$4 sm:$0xff]   ;;  %v10560_v42 = vld [vmem:[%s14623_s1 + $0x1344] ss:$16 sps:$4 sm:$0xff]  }
 0x230   :  { %6920 = vmatprep.subr.bf16.mxu0 %v10474_v43  ;;  %7736 = vmatprep.subr.bf16.mxu1 %v10477_v46  ;;  %v10563_v43 = vld [vmem:[%s14623_s1 + $0x134c] ss:$16 sps:$4 sm:$0xff]   ;;  %v10558_v46 = vld [vmem:[%s14623_s1 + $0x1340] ss:$16 sps:$4 sm:$0xff]  }
 0x233   :  { %6921 = vmatpush1.bf16.msra.mxu0 %v10472_v44  ;;  %7737 = vmatpush1.bf16.msra.mxu1 %v10475_v45  ;;  %v10561_v44 = vld [vmem:[%s14623_s1 + $0x1348] ss:$16 sps:$4 sm:$0xff]   ;;  %v10566_v45 = vld [vmem:[%s14623_s1 + $0x1364] ss:$16 sps:$4 sm:$0xff]  }
 0x234   :  { %6922 = vmatprep.subr.bf16.mxu0 %v10480_v47  ;;  %7738 = vmatprep.subr.bf16.mxu1 %v10483_v48  ;;  %v10569_v47 = vld [vmem:[%s14623_s1 + $0x136c] ss:$16 sps:$4 sm:$0xff]   ;;  %v10564_v48 = vld [vmem:[%s14623_s1 + $0x1360] ss:$16 sps:$4 sm:$0xff]  }
 0x237   :  { %6923 = vmatpush1.bf16.msra.mxu0 %v10478_v49  ;;  %7739 = vmatpush1.bf16.msra.mxu1 %v10481_v50  ;;  %v10567_v49 = vld [vmem:[%s14623_s1 + $0x1368] ss:$16 sps:$4 sm:$0xff]   ;;  %v10572_v50 = vld [vmem:[%s14623_s1 + $0x1384] ss:$16 sps:$4 sm:$0xff]  }
 0x238   :  { %6924 = vmatprep.subr.bf16.mxu0 %v10487_v53  ;;  %7740 = vmatprep.subr.bf16.mxu1 %v10490_v51  ;;  %v10575_v53 = vld [vmem:[%s14623_s1 + $0x138c] ss:$16 sps:$4 sm:$0xff]   ;;  %v10570_v51 = vld [vmem:[%s14623_s1 + $0x1380] ss:$16 sps:$4 sm:$0xff]  }
 0x23b   :  { %6925 = vmatpush1.bf16.msra.mxu0 %v10485_v52  ;;  %7741 = vmatpush1.bf16.msra.mxu1 %v10488_v54  ;;  %v10573_v52 = vld [vmem:[%s14623_s1 + $0x1388] ss:$16 sps:$4 sm:$0xff]   ;;  %v10578_v54 = vld [vmem:[%s14623_s1 + $0x13a4] ss:$16 sps:$4 sm:$0xff]  }
 0x23c   :  { %6926 = vmatprep.subr.bf16.mxu0 %v10494_v55  ;;  %7742 = vmatprep.subr.bf16.mxu1 %v10497_v56  ;;  %v10581_v55 = vld [vmem:[%s14623_s1 + $0x13ac] ss:$16 sps:$4 sm:$0xff]   ;;  %v10576_v56 = vld [vmem:[%s14623_s1 + $0x13a0] ss:$16 sps:$4 sm:$0xff]  }
 0x23f   :  { %6927 = vmatpush1.bf16.msra.mxu0 %v10492_v57  ;;  %7743 = vmatpush1.bf16.msra.mxu1 %v10495_v60  ;;  %v10579_v57 = vld [vmem:[%s14623_s1 + $0x13a8] ss:$16 sps:$4 sm:$0xff]   ;;  %v10585_v60 = vld [vmem:[%s14623_s1 + $0x13c4] ss:$16 sps:$4 sm:$0xff]  }
 0x240   :  { %6947 = vmatprep.subr.bf16.mxu0 %v10500_v58  ;;  %7763 = vmatprep.subr.bf16.mxu1 %v10503_v59  ;;  %v10588_v58 = vld [vmem:[%s14623_s1 + $0x13cc] ss:$16 sps:$4 sm:$0xff]   ;;  %v10583_v59 = vld [vmem:[%s14623_s1 + $0x13c0] ss:$16 sps:$4 sm:$0xff]  }
 0x242   :  { %6929 = vmatmul.mubr.bf16.vlgmr.msra.gmra.mrb[0].mxu0 %v8304_v62  ;;  %7745 = vmatmul.mubr.bf16.vlgmr.msra.gmra.mrb[0].mxu1 %v8304_v62  ;;  %v10592_v62 = vld [vmem:[%s14623_s1 + $0x13e4] ss:$16 sps:$4 sm:$0xff]  }
 0x243   :  { %6948 = vmatpush1.bf16.msra.mxu0 %v10498_v63  ;;  %7764 = vmatpush1.bf16.msra.mxu1 %v10501_v0  ;;  %v10595_v63 = vld [vmem:[%s14623_s1 + $0x13ec] ss:$16 sps:$4 sm:$0xff]   ;;  %v10590_v0 = vld [vmem:[%s14623_s1 + $0x13e0] ss:$16 sps:$4 sm:$0xff]  }
 0x244   :  { %6949 = vmatprep.subr.bf16.mxu0 %v10506_v3  ;;  %7765 = vmatprep.subr.bf16.mxu1 %v10509_v1  ;;  %v10593_v3 = vld [vmem:[%s14623_s1 + $0x13e8] ss:$16 sps:$4 sm:$0xff]   ;;  %v10598_v1 = vld [vmem:[%s14623_s1 + $0x1404] ss:$16 sps:$4 sm:$0xff]  }
 0x245   :  { %6938 = vmatprep.mubr.bf16.mxu0 %v8337_v5  ;;  %7754 = vmatprep.mubr.bf16.mxu1 %v8337_v5  ;;  %v65_v5 = vld [vmem:[%s14624_s0 + $0x148] sm:$0xff] }
 0x247   :  { %6950 = vmatpush1.bf16.msra.mxu0 %v10504_v2  ;;  %7766 = vmatpush1.bf16.msra.mxu1 %v10507_v4  ;;  %v10601_v2 = vld [vmem:[%s14623_s1 + $0x140c] ss:$16 sps:$4 sm:$0xff]   ;;  %v8306_v4 = vcombine.low %v13119_v8, %v13124_v9  ;;  %v10604_v8 = vld [vmem:[%s14623_s1 + $0x1424] ss:$16 sps:$4 sm:$0xff]  }
 0x248   :  { %6951 = vmatprep.subr.bf16.mxu0 %v10512_v6  ;;  %7767 = vmatprep.subr.bf16.mxu1 %v10515_v7  ;;  %v10596_v6 = vld [vmem:[%s14623_s1 + $0x1400] ss:$16 sps:$4 sm:$0xff]   ;;  %v10599_v7 = vld [vmem:[%s14623_s1 + $0x1408] ss:$16 sps:$4 sm:$0xff]   ;;  %v10607_v9 = vld [vmem:[%s14623_s1 + $0x142c] ss:$16 sps:$4 sm:$0xff]  }
 0x24a   :  { %6939 = vmatmul.mubr.bf16.gmra.mrb[4].mxu0 %v8336_v10  ;;  %7755 = vmatmul.mubr.bf16.gmra.mrb[4].mxu1 %v8336_v10  ;;  %v8339_v10 = vcombine.high %v65_v5, %v65_v5 }
 0x24b   :  { %6952 = vmatpush1.bf16.msra.mxu0 %v10510_v11  ;;  %7768 = vmatpush1.bf16.msra.mxu1 %v10513_v12  ;;  %v10602_v11 = vld [vmem:[%s14623_s1 + $0x1420] ss:$16 sps:$4 sm:$0xff]   ;;  %v10605_v12 = vld [vmem:[%s14623_s1 + $0x1428] ss:$16 sps:$4 sm:$0xff]  }
 0x24c   :  { %6953 = vmatprep.subr.bf16.mxu0 %v10518_v13  ;;  %7769 = vmatprep.subr.bf16.mxu1 %v10521_v14  ;;  %v10610_v13 = vld [vmem:[%s14623_s1 + $0x1444] ss:$16 sps:$4 sm:$0xff]   ;;  %v10613_v14 = vld [vmem:[%s14623_s1 + $0x144c] ss:$16 sps:$4 sm:$0xff]  }
 0x24d   :  { %6979 = vmatprep.mubr.bf16.mxu0 %v8307_v15  ;;  %7795 = vmatprep.mubr.bf16.mxu1 %v8307_v15  ;;  %v8338_v15 = vcombine.low %v65_v5, %v65_v5  ;;  %v10690_v5 = vld [vmem:[%s14623_s1 + $0x15e4] ss:$16 sps:$4 sm:$0xff]  }
 0x24f   :  { %6954 = vmatpush1.bf16.msra.mxu0 %v10516_v16  ;;  %7770 = vmatpush1.bf16.msra.mxu1 %v10519_v17  ;;  %v13328_v16 = vld [vmem:[%s14624_s0 + $0x50] sm:$0xff] }
 0x250   :  { %6955 = vmatprep.subr.bf16.mxu0 %v10524_v18  ;;  %7771 = vmatprep.subr.bf16.mxu1 %v10527_v19  ;;  %v13333_v17 = vld [vmem:[%s14624_s0 + $0xd0] sm:$0xff]  ;;  %v10611_v19 = vld [vmem:[%s14623_s1 + $0x1448] ss:$16 sps:$4 sm:$0xff]  }
 0x251   :  { %v10608_v18 = vld [vmem:[%s14623_s1 + $0x1440] ss:$16 sps:$4 sm:$0xff]  }
 0x253   :  { %6956 = vmatpush1.bf16.msra.mxu0 %v10522_v20  ;;  %7772 = vmatpush1.bf16.msra.mxu1 %v10525_v21  ;;  %v10616_v20 = vld [vmem:[%s14623_s1 + $0x1464] ss:$16 sps:$4 sm:$0xff]   ;;  %v10619_v21 = vld [vmem:[%s14623_s1 + $0x146c] ss:$16 sps:$4 sm:$0xff]  }
 0x254   :  { %6957 = vmatprep.subr.bf16.mxu0 %v10530_v22  ;;  %7773 = vmatprep.subr.bf16.mxu1 %v10533_v23  ;;  %v8309_v22 = vcombine.high %v13328_v16, %v13333_v17  ;;  %v10614_v23 = vld [vmem:[%s14623_s1 + $0x1460] ss:$16 sps:$4 sm:$0xff]  }
 0x257   :  { %6958 = vmatpush1.bf16.msra.mxu0 %v10528_v24  ;;  %7774 = vmatpush1.bf16.msra.mxu1 %v10531_v25  ;;  %v10617_v24 = vld [vmem:[%s14623_s1 + $0x1468] ss:$16 sps:$4 sm:$0xff]   ;;  %v10622_v25 = vld [vmem:[%s14623_s1 + $0x1484] ss:$16 sps:$4 sm:$0xff]  }
 0x258   :  { %6959 = vmatprep.subr.bf16.mxu0 %v10536_v26  ;;  %7775 = vmatprep.subr.bf16.mxu1 %v10539_v27  ;;  %v10625_v26 = vld [vmem:[%s14623_s1 + $0x148c] ss:$16 sps:$4 sm:$0xff]   ;;  %v10620_v27 = vld [vmem:[%s14623_s1 + $0x1480] ss:$16 sps:$4 sm:$0xff]  }
 0x25b   :  { %6960 = vmatpush1.bf16.msra.mxu0 %v10534_v28  ;;  %7776 = vmatpush1.bf16.msra.mxu1 %v10537_v29  ;;  %v10623_v28 = vld [vmem:[%s14623_s1 + $0x1488] ss:$16 sps:$4 sm:$0xff]   ;;  %v10628_v29 = vld [vmem:[%s14623_s1 + $0x14a4] ss:$16 sps:$4 sm:$0xff]  }
 0x25c   :  { %6961 = vmatprep.subr.bf16.mxu0 %v10542_v30  ;;  %7777 = vmatprep.subr.bf16.mxu1 %v10545_v31  ;;  %v10631_v30 = vld [vmem:[%s14623_s1 + $0x14ac] ss:$16 sps:$4 sm:$0xff]   ;;  %v10626_v31 = vld [vmem:[%s14623_s1 + $0x14a0] ss:$16 sps:$4 sm:$0xff]  }
 0x25f   :  { %6962 = vmatpush1.bf16.msra.mxu0 %v10540_v32  ;;  %7778 = vmatpush1.bf16.msra.mxu1 %v10543_v33  ;;  %v10629_v32 = vld [vmem:[%s14623_s1 + $0x14a8] ss:$16 sps:$4 sm:$0xff]   ;;  %v10634_v33 = vld [vmem:[%s14623_s1 + $0x14c4] ss:$16 sps:$4 sm:$0xff]  }
 0x260   :  { %6963 = vmatprep.subr.bf16.mxu0 %v10548_v34  ;;  %7779 = vmatprep.subr.bf16.mxu1 %v10551_v35  ;;  %v10637_v34 = vld [vmem:[%s14623_s1 + $0x14cc] ss:$16 sps:$4 sm:$0xff]   ;;  %v10632_v35 = vld [vmem:[%s14623_s1 + $0x14c0] ss:$16 sps:$4 sm:$0xff]  }
 0x263   :  { %6964 = vmatpush1.bf16.msra.mxu0 %v10546_v36  ;;  %7780 = vmatpush1.bf16.msra.mxu1 %v10549_v37  ;;  %v10635_v36 = vld [vmem:[%s14623_s1 + $0x14c8] ss:$16 sps:$4 sm:$0xff]   ;;  %v10640_v37 = vld [vmem:[%s14623_s1 + $0x14e4] ss:$16 sps:$4 sm:$0xff]  }
 0x264   :  { %6965 = vmatprep.subr.bf16.mxu0 %v10554_v38  ;;  %7781 = vmatprep.subr.bf16.mxu1 %v10557_v39  ;;  %v10643_v38 = vld [vmem:[%s14623_s1 + $0x14ec] ss:$16 sps:$4 sm:$0xff]   ;;  %v10638_v39 = vld [vmem:[%s14623_s1 + $0x14e0] ss:$16 sps:$4 sm:$0xff]  }
 0x267   :  { %6966 = vmatpush1.bf16.msra.mxu0 %v10552_v40  ;;  %7782 = vmatpush1.bf16.msra.mxu1 %v10555_v41  ;;  %v10641_v40 = vld [vmem:[%s14623_s1 + $0x14e8] ss:$16 sps:$4 sm:$0xff]   ;;  %v10646_v41 = vld [vmem:[%s14623_s1 + $0x1504] ss:$16 sps:$4 sm:$0xff]  }
 0x268   :  { %6967 = vmatprep.subr.bf16.mxu0 %v10560_v42  ;;  %7783 = vmatprep.subr.bf16.mxu1 %v10563_v43  ;;  %v10649_v42 = vld [vmem:[%s14623_s1 + $0x150c] ss:$16 sps:$4 sm:$0xff]   ;;  %v10644_v43 = vld [vmem:[%s14623_s1 + $0x1500] ss:$16 sps:$4 sm:$0xff]  }
 0x26b   :  { %6968 = vmatpush1.bf16.msra.mxu0 %v10558_v46  ;;  %7784 = vmatpush1.bf16.msra.mxu1 %v10561_v44  ;;  %v10647_v46 = vld [vmem:[%s14623_s1 + $0x1508] ss:$16 sps:$4 sm:$0xff]   ;;  %v10652_v44 = vld [vmem:[%s14623_s1 + $0x1524] ss:$16 sps:$4 sm:$0xff]  }
 0x26c   :  { %6969 = vmatprep.subr.bf16.mxu0 %v10566_v45  ;;  %7785 = vmatprep.subr.bf16.mxu1 %v10569_v47  ;;  %v10655_v45 = vld [vmem:[%s14623_s1 + $0x152c] ss:$16 sps:$4 sm:$0xff]   ;;  %v10650_v47 = vld [vmem:[%s14623_s1 + $0x1520] ss:$16 sps:$4 sm:$0xff]  }
 0x26f   :  { %6970 = vmatpush1.bf16.msra.mxu0 %v10564_v48  ;;  %7786 = vmatpush1.bf16.msra.mxu1 %v10567_v49  ;;  %v10653_v48 = vld [vmem:[%s14623_s1 + $0x1528] ss:$16 sps:$4 sm:$0xff]   ;;  %v10658_v49 = vld [vmem:[%s14623_s1 + $0x1544] ss:$16 sps:$4 sm:$0xff]  }
 0x270   :  { %6971 = vmatprep.subr.bf16.mxu0 %v10572_v50  ;;  %7787 = vmatprep.subr.bf16.mxu1 %v10575_v53  ;;  %v10661_v50 = vld [vmem:[%s14623_s1 + $0x154c] ss:$16 sps:$4 sm:$0xff]   ;;  %v10656_v53 = vld [vmem:[%s14623_s1 + $0x1540] ss:$16 sps:$4 sm:$0xff]  }
 0x273   :  { %6972 = vmatpush1.bf16.msra.mxu0 %v10570_v51  ;;  %7788 = vmatpush1.bf16.msra.mxu1 %v10573_v52  ;;  %v10659_v51 = vld [vmem:[%s14623_s1 + $0x1548] ss:$16 sps:$4 sm:$0xff]   ;;  %v10664_v52 = vld [vmem:[%s14623_s1 + $0x1564] ss:$16 sps:$4 sm:$0xff]  }
 0x274   :  { %6973 = vmatprep.subr.bf16.mxu0 %v10578_v54  ;;  %7789 = vmatprep.subr.bf16.mxu1 %v10581_v55  ;;  %v10667_v54 = vld [vmem:[%s14623_s1 + $0x156c] ss:$16 sps:$4 sm:$0xff]   ;;  %v10662_v55 = vld [vmem:[%s14623_s1 + $0x1560] ss:$16 sps:$4 sm:$0xff]  }
 0x277   :  { %6974 = vmatpush1.bf16.msra.mxu0 %v10576_v56  ;;  %7790 = vmatpush1.bf16.msra.mxu1 %v10579_v57  ;;  %v10665_v56 = vld [vmem:[%s14623_s1 + $0x1568] ss:$16 sps:$4 sm:$0xff]   ;;  %v10670_v57 = vld [vmem:[%s14623_s1 + $0x1584] ss:$16 sps:$4 sm:$0xff]  }
 0x278   :  { %6975 = vmatprep.subr.bf16.mxu0 %v10585_v60  ;;  %7791 = vmatprep.subr.bf16.mxu1 %v10588_v58  ;;  %v10673_v60 = vld [vmem:[%s14623_s1 + $0x158c] ss:$16 sps:$4 sm:$0xff]   ;;  %v10668_v58 = vld [vmem:[%s14623_s1 + $0x1580] ss:$16 sps:$4 sm:$0xff]  }
 0x27b   :  { %6976 = vmatpush1.bf16.msra.mxu0 %v10583_v59  ;;  %7792 = vmatpush1.bf16.msra.mxu1 %v10586_v61  ;;  %v10671_v59 = vld [vmem:[%s14623_s1 + $0x1588] ss:$16 sps:$4 sm:$0xff]   ;;  %v10676_v61 = vld [vmem:[%s14623_s1 + $0x15a4] ss:$16 sps:$4 sm:$0xff]  }
 0x27c   :  { %6977 = vmatprep.subr.bf16.mxu0 %v10592_v62  ;;  %7793 = vmatprep.subr.bf16.mxu1 %v10595_v63  ;;  %v10679_v62 = vld [vmem:[%s14623_s1 + $0x15ac] ss:$16 sps:$4 sm:$0xff]   ;;  %v10674_v63 = vld [vmem:[%s14623_s1 + $0x15a0] ss:$16 sps:$4 sm:$0xff]  }
 0x27f   :  { %6978 = vmatpush1.bf16.msra.mxu0 %v10590_v0  ;;  %7794 = vmatpush1.bf16.msra.mxu1 %v10593_v3  ;;  %v10677_v0 = vld [vmem:[%s14623_s1 + $0x15a8] ss:$16 sps:$4 sm:$0xff]   ;;  %v10683_v3 = vld [vmem:[%s14623_s1 + $0x15c4] ss:$16 sps:$4 sm:$0xff]  }
 0x280   :  { %6998 = vmatprep.subr.bf16.mxu0 %v10598_v1  ;;  %7814 = vmatprep.subr.bf16.mxu1 %v10601_v2  ;;  %v10686_v1 = vld [vmem:[%s14623_s1 + $0x15cc] ss:$16 sps:$4 sm:$0xff]   ;;  %v10681_v2 = vld [vmem:[%s14623_s1 + $0x15c0] ss:$16 sps:$4 sm:$0xff]  }
 0x282   :  { %6980 = vmatmul.mubr.bf16.vlgmr.msra.gmra.mrb[0].mxu0 %v8306_v4  ;;  %7796 = vmatmul.mubr.bf16.vlgmr.msra.gmra.mrb[0].mxu1 %v8306_v4  ;;  %v10684_v4 = vld [vmem:[%s14623_s1 + $0x15c8] ss:$16 sps:$4 sm:$0xff]  }
 0x283   :  { %6999 = vmatpush1.bf16.msra.mxu0 %v10596_v6  ;;  %7815 = vmatpush1.bf16.msra.mxu1 %v10599_v7  ;;  %v10693_v6 = vld [vmem:[%s14623_s1 + $0x15ec] ss:$16 sps:$4 sm:$0xff]   ;;  %v10688_v7 = vld [vmem:[%s14623_s1 + $0x15e0] ss:$16 sps:$4 sm:$0xff]  }
 0x284   :  { %7000 = vmatprep.subr.bf16.mxu0 %v10604_v8  ;;  %7816 = vmatprep.subr.bf16.mxu1 %v10607_v9  ;;  %v10691_v8 = vld [vmem:[%s14623_s1 + $0x15e8] ss:$16 sps:$4 sm:$0xff]   ;;  %v10696_v9 = vld [vmem:[%s14623_s1 + $0x1604] ss:$16 sps:$4 sm:$0xff]  }
 0x285   :  { %6989 = vmatprep.mubr.bf16.mxu0 %v8339_v10  ;;  %7805 = vmatprep.mubr.bf16.mxu1 %v8339_v10  ;;  %v10699_v10 = vld [vmem:[%s14623_s1 + $0x160c] ss:$16 sps:$4 sm:$0xff]  }
 0x287   :  { %7001 = vmatpush1.bf16.msra.mxu0 %v10602_v11  ;;  %7817 = vmatpush1.bf16.msra.mxu1 %v10605_v12  ;;  %v8308_v11 = vcombine.low %v13328_v16, %v13333_v17  ;;  %v66_v12 = vld [vmem:[%s14624_s0 + $0x150] sm:$0xff]  ;;  %v10705_v16 = vld [vmem:[%s14623_s1 + $0x162c] ss:$16 sps:$4 sm:$0xff]  }
 0x288   :  { %7002 = vmatprep.subr.bf16.mxu0 %v10610_v13  ;;  %7818 = vmatprep.subr.bf16.mxu1 %v10613_v14  ;;  %v10694_v13 = vld [vmem:[%s14623_s1 + $0x1600] ss:$16 sps:$4 sm:$0xff]   ;;  %v10697_v14 = vld [vmem:[%s14623_s1 + $0x1608] ss:$16 sps:$4 sm:$0xff]   ;;  %v8341_v17 = vcombine.high %v66_v12, %v66_v12 }
 0x28a   :  { %6990 = vmatmul.mubr.bf16.gmra.mrb[4].mxu0 %v8338_v15  ;;  %7806 = vmatmul.mubr.bf16.gmra.mrb[4].mxu1 %v8338_v15  ;;  %v10702_v15 = vld [vmem:[%s14623_s1 + $0x1624] ss:$16 sps:$4 sm:$0xff]  }
 0x28b   :  { %7003 = vmatpush1.bf16.msra.mxu0 %v10608_v18  ;;  %7819 = vmatpush1.bf16.msra.mxu1 %v10611_v19  ;;  %v10700_v18 = vld [vmem:[%s14623_s1 + $0x1620] ss:$16 sps:$4 sm:$0xff]   ;;  %v10703_v19 = vld [vmem:[%s14623_s1 + $0x1628] ss:$16 sps:$4 sm:$0xff]  }
 0x28c   :  { %7004 = vmatprep.subr.bf16.mxu0 %v10616_v20  ;;  %7820 = vmatprep.subr.bf16.mxu1 %v10619_v21  ;;  %v10708_v20 = vld [vmem:[%s14623_s1 + $0x1644] ss:$16 sps:$4 sm:$0xff]   ;;  %v10711_v21 = vld [vmem:[%s14623_s1 + $0x164c] ss:$16 sps:$4 sm:$0xff]  }
 0x28d   :  { %7030 = vmatprep.mubr.bf16.mxu0 %v8309_v22  ;;  %7846 = vmatprep.mubr.bf16.mxu1 %v8309_v22  ;;  %v8340_v22 = vcombine.low %v66_v12, %v66_v12  ;;  %v10788_v12 = vld [vmem:[%s14623_s1 + $0x17e4] ss:$16 sps:$4 sm:$0xff]  }
 0x28f   :  { %7005 = vmatpush1.bf16.msra.mxu0 %v10614_v23  ;;  %7821 = vmatpush1.bf16.msra.mxu1 %v10617_v24  ;;  %v13537_v23 = vld [vmem:[%s14624_s0 + $0x58] sm:$0xff] }
 0x290   :  { %7006 = vmatprep.subr.bf16.mxu0 %v10622_v25  ;;  %7822 = vmatprep.subr.bf16.mxu1 %v10625_v26  ;;  %v13542_v24 = vld [vmem:[%s14624_s0 + $0xd8] sm:$0xff]  ;;  %v10706_v25 = vld [vmem:[%s14623_s1 + $0x1640] ss:$16 sps:$4 sm:$0xff]  }
 0x291   :  { %v10709_v26 = vld [vmem:[%s14623_s1 + $0x1648] ss:$16 sps:$4 sm:$0xff]  }
 0x293   :  { %7007 = vmatpush1.bf16.msra.mxu0 %v10620_v27  ;;  %7823 = vmatpush1.bf16.msra.mxu1 %v10623_v28  ;;  %v10714_v27 = vld [vmem:[%s14623_s1 + $0x1664] ss:$16 sps:$4 sm:$0xff]   ;;  %v10717_v28 = vld [vmem:[%s14623_s1 + $0x166c] ss:$16 sps:$4 sm:$0xff]  }
 0x294   :  { %7008 = vmatprep.subr.bf16.mxu0 %v10628_v29  ;;  %7824 = vmatprep.subr.bf16.mxu1 %v10631_v30  ;;  %v8311_v29 = vcombine.high %v13537_v23, %v13542_v24  ;;  %v10712_v30 = vld [vmem:[%s14623_s1 + $0x1660] ss:$16 sps:$4 sm:$0xff]  }
 0x297   :  { %7009 = vmatpush1.bf16.msra.mxu0 %v10626_v31  ;;  %7825 = vmatpush1.bf16.msra.mxu1 %v10629_v32  ;;  %v10715_v31 = vld [vmem:[%s14623_s1 + $0x1668] ss:$16 sps:$4 sm:$0xff]   ;;  %v10720_v32 = vld [vmem:[%s14623_s1 + $0x1684] ss:$16 sps:$4 sm:$0xff]  }
 0x298   :  { %7010 = vmatprep.subr.bf16.mxu0 %v10634_v33  ;;  %7826 = vmatprep.subr.bf16.mxu1 %v10637_v34  ;;  %v10723_v33 = vld [vmem:[%s14623_s1 + $0x168c] ss:$16 sps:$4 sm:$0xff]   ;;  %v10718_v34 = vld [vmem:[%s14623_s1 + $0x1680] ss:$16 sps:$4 sm:$0xff]  }
 0x29b   :  { %7011 = vmatpush1.bf16.msra.mxu0 %v10632_v35  ;;  %7827 = vmatpush1.bf16.msra.mxu1 %v10635_v36  ;;  %v10721_v35 = vld [vmem:[%s14623_s1 + $0x1688] ss:$16 sps:$4 sm:$0xff]   ;;  %v10726_v36 = vld [vmem:[%s14623_s1 + $0x16a4] ss:$16 sps:$4 sm:$0xff]  }
 0x29c   :  { %7012 = vmatprep.subr.bf16.mxu0 %v10640_v37  ;;  %7828 = vmatprep.subr.bf16.mxu1 %v10643_v38  ;;  %v10729_v37 = vld [vmem:[%s14623_s1 + $0x16ac] ss:$16 sps:$4 sm:$0xff]   ;;  %v10724_v38 = vld [vmem:[%s14623_s1 + $0x16a0] ss:$16 sps:$4 sm:$0xff]  }
 0x29f   :  { %7013 = vmatpush1.bf16.msra.mxu0 %v10638_v39  ;;  %7829 = vmatpush1.bf16.msra.mxu1 %v10641_v40  ;;  %v10727_v39 = vld [vmem:[%s14623_s1 + $0x16a8] ss:$16 sps:$4 sm:$0xff]   ;;  %v10732_v40 = vld [vmem:[%s14623_s1 + $0x16c4] ss:$16 sps:$4 sm:$0xff]  }
 0x2a0   :  { %7014 = vmatprep.subr.bf16.mxu0 %v10646_v41  ;;  %7830 = vmatprep.subr.bf16.mxu1 %v10649_v42  ;;  %v10735_v41 = vld [vmem:[%s14623_s1 + $0x16cc] ss:$16 sps:$4 sm:$0xff]   ;;  %v10730_v42 = vld [vmem:[%s14623_s1 + $0x16c0] ss:$16 sps:$4 sm:$0xff]  }
 0x2a3   :  { %7015 = vmatpush1.bf16.msra.mxu0 %v10644_v43  ;;  %7831 = vmatpush1.bf16.msra.mxu1 %v10647_v46  ;;  %v10733_v43 = vld [vmem:[%s14623_s1 + $0x16c8] ss:$16 sps:$4 sm:$0xff]   ;;  %v10738_v46 = vld [vmem:[%s14623_s1 + $0x16e4] ss:$16 sps:$4 sm:$0xff]  }
 0x2a4   :  { %7016 = vmatprep.subr.bf16.mxu0 %v10652_v44  ;;  %7832 = vmatprep.subr.bf16.mxu1 %v10655_v45  ;;  %v10741_v44 = vld [vmem:[%s14623_s1 + $0x16ec] ss:$16 sps:$4 sm:$0xff]   ;;  %v10736_v45 = vld [vmem:[%s14623_s1 + $0x16e0] ss:$16 sps:$4 sm:$0xff]  }
 0x2a7   :  { %7017 = vmatpush1.bf16.msra.mxu0 %v10650_v47  ;;  %7833 = vmatpush1.bf16.msra.mxu1 %v10653_v48  ;;  %v10739_v47 = vld [vmem:[%s14623_s1 + $0x16e8] ss:$16 sps:$4 sm:$0xff]   ;;  %v10744_v48 = vld [vmem:[%s14623_s1 + $0x1704] ss:$16 sps:$4 sm:$0xff]  }
 0x2a8   :  { %7018 = vmatprep.subr.bf16.mxu0 %v10658_v49  ;;  %7834 = vmatprep.subr.bf16.mxu1 %v10661_v50  ;;  %v10747_v49 = vld [vmem:[%s14623_s1 + $0x170c] ss:$16 sps:$4 sm:$0xff]   ;;  %v10742_v50 = vld [vmem:[%s14623_s1 + $0x1700] ss:$16 sps:$4 sm:$0xff]  }
 0x2ab   :  { %7019 = vmatpush1.bf16.msra.mxu0 %v10656_v53  ;;  %7835 = vmatpush1.bf16.msra.mxu1 %v10659_v51  ;;  %v10745_v53 = vld [vmem:[%s14623_s1 + $0x1708] ss:$16 sps:$4 sm:$0xff]   ;;  %v10750_v51 = vld [vmem:[%s14623_s1 + $0x1724] ss:$16 sps:$4 sm:$0xff]  }
 0x2ac   :  { %7020 = vmatprep.subr.bf16.mxu0 %v10664_v52  ;;  %7836 = vmatprep.subr.bf16.mxu1 %v10667_v54  ;;  %v10753_v52 = vld [vmem:[%s14623_s1 + $0x172c] ss:$16 sps:$4 sm:$0xff]   ;;  %v10748_v54 = vld [vmem:[%s14623_s1 + $0x1720] ss:$16 sps:$4 sm:$0xff]  }
 0x2af   :  { %7021 = vmatpush1.bf16.msra.mxu0 %v10662_v55  ;;  %7837 = vmatpush1.bf16.msra.mxu1 %v10665_v56  ;;  %v10751_v55 = vld [vmem:[%s14623_s1 + $0x1728] ss:$16 sps:$4 sm:$0xff]   ;;  %v10756_v56 = vld [vmem:[%s14623_s1 + $0x1744] ss:$16 sps:$4 sm:$0xff]  }
 0x2b0   :  { %7022 = vmatprep.subr.bf16.mxu0 %v10670_v57  ;;  %7838 = vmatprep.subr.bf16.mxu1 %v10673_v60  ;;  %v10759_v57 = vld [vmem:[%s14623_s1 + $0x174c] ss:$16 sps:$4 sm:$0xff]   ;;  %v10754_v60 = vld [vmem:[%s14623_s1 + $0x1740] ss:$16 sps:$4 sm:$0xff]  }
 0x2b3   :  { %7023 = vmatpush1.bf16.msra.mxu0 %v10668_v58  ;;  %7839 = vmatpush1.bf16.msra.mxu1 %v10671_v59  ;;  %v10757_v58 = vld [vmem:[%s14623_s1 + $0x1748] ss:$16 sps:$4 sm:$0xff]   ;;  %v10762_v59 = vld [vmem:[%s14623_s1 + $0x1764] ss:$16 sps:$4 sm:$0xff]  }
 0x2b4   :  { %7024 = vmatprep.subr.bf16.mxu0 %v10676_v61  ;;  %7840 = vmatprep.subr.bf16.mxu1 %v10679_v62  ;;  %v10765_v61 = vld [vmem:[%s14623_s1 + $0x176c] ss:$16 sps:$4 sm:$0xff]   ;;  %v10760_v62 = vld [vmem:[%s14623_s1 + $0x1760] ss:$16 sps:$4 sm:$0xff]  }
 0x2b7   :  { %7025 = vmatpush1.bf16.msra.mxu0 %v10674_v63  ;;  %7841 = vmatpush1.bf16.msra.mxu1 %v10677_v0  ;;  %v10763_v63 = vld [vmem:[%s14623_s1 + $0x1768] ss:$16 sps:$4 sm:$0xff]   ;;  %v10768_v0 = vld [vmem:[%s14623_s1 + $0x1784] ss:$16 sps:$4 sm:$0xff]  }
 0x2b8   :  { %7026 = vmatprep.subr.bf16.mxu0 %v10683_v3  ;;  %7842 = vmatprep.subr.bf16.mxu1 %v10686_v1  ;;  %v10771_v3 = vld [vmem:[%s14623_s1 + $0x178c] ss:$16 sps:$4 sm:$0xff]   ;;  %v10766_v1 = vld [vmem:[%s14623_s1 + $0x1780] ss:$16 sps:$4 sm:$0xff]  }
 0x2bb   :  { %7027 = vmatpush1.bf16.msra.mxu0 %v10681_v2  ;;  %7843 = vmatpush1.bf16.msra.mxu1 %v10684_v4  ;;  %v10769_v2 = vld [vmem:[%s14623_s1 + $0x1788] ss:$16 sps:$4 sm:$0xff]   ;;  %v10774_v4 = vld [vmem:[%s14623_s1 + $0x17a4] ss:$16 sps:$4 sm:$0xff]  }
 0x2bc   :  { %7028 = vmatprep.subr.bf16.mxu0 %v10690_v5  ;;  %7844 = vmatprep.subr.bf16.mxu1 %v10693_v6  ;;  %v10777_v5 = vld [vmem:[%s14623_s1 + $0x17ac] ss:$16 sps:$4 sm:$0xff]   ;;  %v10772_v6 = vld [vmem:[%s14623_s1 + $0x17a0] ss:$16 sps:$4 sm:$0xff]  }
 0x2bf   :  { %7029 = vmatpush1.bf16.msra.mxu0 %v10688_v7  ;;  %7845 = vmatpush1.bf16.msra.mxu1 %v10691_v8  ;;  %v10775_v7 = vld [vmem:[%s14623_s1 + $0x17a8] ss:$16 sps:$4 sm:$0xff]   ;;  %v10781_v8 = vld [vmem:[%s14623_s1 + $0x17c4] ss:$16 sps:$4 sm:$0xff]  }
 0x2c0   :  { %7049 = vmatprep.subr.bf16.mxu0 %v10696_v9  ;;  %7865 = vmatprep.subr.bf16.mxu1 %v10699_v10  ;;  %v10784_v9 = vld [vmem:[%s14623_s1 + $0x17cc] ss:$16 sps:$4 sm:$0xff]   ;;  %v10779_v10 = vld [vmem:[%s14623_s1 + $0x17c0] ss:$16 sps:$4 sm:$0xff]  }
 0x2c2   :  { %7031 = vmatmul.mubr.bf16.vlgmr.msra.gmra.mrb[0].mxu0 %v8308_v11  ;;  %7847 = vmatmul.mubr.bf16.vlgmr.msra.gmra.mrb[0].mxu1 %v8308_v11  ;;  %v10782_v11 = vld [vmem:[%s14623_s1 + $0x17c8] ss:$16 sps:$4 sm:$0xff]  }
 0x2c3   :  { %7050 = vmatpush1.bf16.msra.mxu0 %v10694_v13  ;;  %7866 = vmatpush1.bf16.msra.mxu1 %v10697_v14  ;;  %v10791_v13 = vld [vmem:[%s14623_s1 + $0x17ec] ss:$16 sps:$4 sm:$0xff]   ;;  %v10786_v14 = vld [vmem:[%s14623_s1 + $0x17e0] ss:$16 sps:$4 sm:$0xff]  }
 0x2c4   :  { %7051 = vmatprep.subr.bf16.mxu0 %v10702_v15  ;;  %7867 = vmatprep.subr.bf16.mxu1 %v10705_v16  ;;  %v10789_v15 = vld [vmem:[%s14623_s1 + $0x17e8] ss:$16 sps:$4 sm:$0xff]   ;;  %v10794_v16 = vld [vmem:[%s14623_s1 + $0x1804] ss:$16 sps:$4 sm:$0xff]  }
 0x2c5   :  { %7040 = vmatprep.mubr.bf16.mxu0 %v8341_v17  ;;  %7856 = vmatprep.mubr.bf16.mxu1 %v8341_v17  ;;  %v10797_v17 = vld [vmem:[%s14623_s1 + $0x180c] ss:$16 sps:$4 sm:$0xff]  }
 0x2c7   :  { %7052 = vmatpush1.bf16.msra.mxu0 %v10700_v18  ;;  %7868 = vmatpush1.bf16.msra.mxu1 %v10703_v19  ;;  %v8310_v18 = vcombine.low %v13537_v23, %v13542_v24  ;;  %v67_v19 = vld [vmem:[%s14624_s0 + $0x158] sm:$0xff] }
 0x2c8   :  { %7053 = vmatprep.subr.bf16.mxu0 %v10708_v20  ;;  %7869 = vmatprep.subr.bf16.mxu1 %v10711_v21  ;;  %v10792_v20 = vld [vmem:[%s14623_s1 + $0x1800] ss:$16 sps:$4 sm:$0xff]   ;;  %v10795_v21 = vld [vmem:[%s14623_s1 + $0x1808] ss:$16 sps:$4 sm:$0xff]   ;;  %v10803_v23 = vld [vmem:[%s14623_s1 + $0x182c] ss:$16 sps:$4 sm:$0xff]   ;;  %v8343_v24 = vcombine.high %v67_v19, %v67_v19 }
 0x2ca   :  { %7041 = vmatmul.mubr.bf16.gmra.mrb[4].mxu0 %v8340_v22  ;;  %7857 = vmatmul.mubr.bf16.gmra.mrb[4].mxu1 %v8340_v22  ;;  %v10800_v22 = vld [vmem:[%s14623_s1 + $0x1824] ss:$16 sps:$4 sm:$0xff]  }
 0x2cb   :  { %7054 = vmatpush1.bf16.msra.mxu0 %v10706_v25  ;;  %7870 = vmatpush1.bf16.msra.mxu1 %v10709_v26  ;;  %v10798_v25 = vld [vmem:[%s14623_s1 + $0x1820] ss:$16 sps:$4 sm:$0xff]   ;;  %v10801_v26 = vld [vmem:[%s14623_s1 + $0x1828] ss:$16 sps:$4 sm:$0xff]  }
 0x2cc   :  { %7055 = vmatprep.subr.bf16.mxu0 %v10714_v27  ;;  %7871 = vmatprep.subr.bf16.mxu1 %v10717_v28  ;;  %v10806_v27 = vld [vmem:[%s14623_s1 + $0x1844] ss:$16 sps:$4 sm:$0xff]   ;;  %v10809_v28 = vld [vmem:[%s14623_s1 + $0x184c] ss:$16 sps:$4 sm:$0xff]  }
 0x2cd   :  { %7081 = vmatprep.mubr.bf16.mxu0 %v8311_v29  ;;  %7897 = vmatprep.mubr.bf16.mxu1 %v8311_v29  ;;  %v8342_v29 = vcombine.low %v67_v19, %v67_v19  ;;  %v10886_v19 = vld [vmem:[%s14623_s1 + $0x19e4] ss:$16 sps:$4 sm:$0xff]  }
 0x2cf   :  { %7056 = vmatpush1.bf16.msra.mxu0 %v10712_v30  ;;  %7872 = vmatpush1.bf16.msra.mxu1 %v10715_v31  ;;  %v13746_v30 = vld [vmem:[%s14624_s0 + $0x60] sm:$0xff] }
 0x2d0   :  { %7057 = vmatprep.subr.bf16.mxu0 %v10720_v32  ;;  %7873 = vmatprep.subr.bf16.mxu1 %v10723_v33  ;;  %v13751_v31 = vld [vmem:[%s14624_s0 + $0xe0] sm:$0xff]  ;;  %v10807_v33 = vld [vmem:[%s14623_s1 + $0x1848] ss:$16 sps:$4 sm:$0xff]  }
 0x2d1   :  { %v10804_v32 = vld [vmem:[%s14623_s1 + $0x1840] ss:$16 sps:$4 sm:$0xff]  }
 0x2d3   :  { %7058 = vmatpush1.bf16.msra.mxu0 %v10718_v34  ;;  %7874 = vmatpush1.bf16.msra.mxu1 %v10721_v35  ;;  %v10812_v34 = vld [vmem:[%s14623_s1 + $0x1864] ss:$16 sps:$4 sm:$0xff]   ;;  %v10815_v35 = vld [vmem:[%s14623_s1 + $0x186c] ss:$16 sps:$4 sm:$0xff]  }
 0x2d4   :  { %7059 = vmatprep.subr.bf16.mxu0 %v10726_v36  ;;  %7875 = vmatprep.subr.bf16.mxu1 %v10729_v37  ;;  %v8313_v36 = vcombine.high %v13746_v30, %v13751_v31  ;;  %v10810_v37 = vld [vmem:[%s14623_s1 + $0x1860] ss:$16 sps:$4 sm:$0xff]  }
 0x2d7   :  { %7060 = vmatpush1.bf16.msra.mxu0 %v10724_v38  ;;  %7876 = vmatpush1.bf16.msra.mxu1 %v10727_v39  ;;  %v10813_v38 = vld [vmem:[%s14623_s1 + $0x1868] ss:$16 sps:$4 sm:$0xff]   ;;  %v10818_v39 = vld [vmem:[%s14623_s1 + $0x1884] ss:$16 sps:$4 sm:$0xff]  }
 0x2d8   :  { %7061 = vmatprep.subr.bf16.mxu0 %v10732_v40  ;;  %7877 = vmatprep.subr.bf16.mxu1 %v10735_v41  ;;  %v10821_v40 = vld [vmem:[%s14623_s1 + $0x188c] ss:$16 sps:$4 sm:$0xff]   ;;  %v10816_v41 = vld [vmem:[%s14623_s1 + $0x1880] ss:$16 sps:$4 sm:$0xff]  }
 0x2db   :  { %7062 = vmatpush1.bf16.msra.mxu0 %v10730_v42  ;;  %7878 = vmatpush1.bf16.msra.mxu1 %v10733_v43  ;;  %v10819_v42 = vld [vmem:[%s14623_s1 + $0x1888] ss:$16 sps:$4 sm:$0xff]   ;;  %v10824_v43 = vld [vmem:[%s14623_s1 + $0x18a4] ss:$16 sps:$4 sm:$0xff]  }
 0x2dc   :  { %7063 = vmatprep.subr.bf16.mxu0 %v10738_v46  ;;  %7879 = vmatprep.subr.bf16.mxu1 %v10741_v44  ;;  %v10827_v46 = vld [vmem:[%s14623_s1 + $0x18ac] ss:$16 sps:$4 sm:$0xff]   ;;  %v10822_v44 = vld [vmem:[%s14623_s1 + $0x18a0] ss:$16 sps:$4 sm:$0xff]  }
 0x2df   :  { %7064 = vmatpush1.bf16.msra.mxu0 %v10736_v45  ;;  %7880 = vmatpush1.bf16.msra.mxu1 %v10739_v47  ;;  %v10825_v45 = vld [vmem:[%s14623_s1 + $0x18a8] ss:$16 sps:$4 sm:$0xff]   ;;  %v10830_v47 = vld [vmem:[%s14623_s1 + $0x18c4] ss:$16 sps:$4 sm:$0xff]  }
 0x2e0   :  { %7065 = vmatprep.subr.bf16.mxu0 %v10744_v48  ;;  %7881 = vmatprep.subr.bf16.mxu1 %v10747_v49  ;;  %v10833_v48 = vld [vmem:[%s14623_s1 + $0x18cc] ss:$16 sps:$4 sm:$0xff]   ;;  %v10828_v49 = vld [vmem:[%s14623_s1 + $0x18c0] ss:$16 sps:$4 sm:$0xff]  }
 0x2e3   :  { %7066 = vmatpush1.bf16.msra.mxu0 %v10742_v50  ;;  %7882 = vmatpush1.bf16.msra.mxu1 %v10745_v53  ;;  %v10831_v50 = vld [vmem:[%s14623_s1 + $0x18c8] ss:$16 sps:$4 sm:$0xff]   ;;  %v10836_v53 = vld [vmem:[%s14623_s1 + $0x18e4] ss:$16 sps:$4 sm:$0xff]  }
 0x2e4   :  { %7067 = vmatprep.subr.bf16.mxu0 %v10750_v51  ;;  %7883 = vmatprep.subr.bf16.mxu1 %v10753_v52  ;;  %v10839_v51 = vld [vmem:[%s14623_s1 + $0x18ec] ss:$16 sps:$4 sm:$0xff]   ;;  %v10834_v52 = vld [vmem:[%s14623_s1 + $0x18e0] ss:$16 sps:$4 sm:$0xff]  }
 0x2e7   :  { %7068 = vmatpush1.bf16.msra.mxu0 %v10748_v54  ;;  %7884 = vmatpush1.bf16.msra.mxu1 %v10751_v55  ;;  %v10837_v54 = vld [vmem:[%s14623_s1 + $0x18e8] ss:$16 sps:$4 sm:$0xff]   ;;  %v10842_v55 = vld [vmem:[%s14623_s1 + $0x1904] ss:$16 sps:$4 sm:$0xff]  }
 0x2e8   :  { %7069 = vmatprep.subr.bf16.mxu0 %v10756_v56  ;;  %7885 = vmatprep.subr.bf16.mxu1 %v10759_v57  ;;  %v10845_v56 = vld [vmem:[%s14623_s1 + $0x190c] ss:$16 sps:$4 sm:$0xff]   ;;  %v10840_v57 = vld [vmem:[%s14623_s1 + $0x1900] ss:$16 sps:$4 sm:$0xff]  }
 0x2eb   :  { %7070 = vmatpush1.bf16.msra.mxu0 %v10754_v60  ;;  %7886 = vmatpush1.bf16.msra.mxu1 %v10757_v58  ;;  %v10843_v60 = vld [vmem:[%s14623_s1 + $0x1908] ss:$16 sps:$4 sm:$0xff]   ;;  %v10848_v58 = vld [vmem:[%s14623_s1 + $0x1924] ss:$16 sps:$4 sm:$0xff]  }
 0x2ec   :  { %7071 = vmatprep.subr.bf16.mxu0 %v10762_v59  ;;  %7887 = vmatprep.subr.bf16.mxu1 %v10765_v61  ;;  %v10851_v59 = vld [vmem:[%s14623_s1 + $0x192c] ss:$16 sps:$4 sm:$0xff]   ;;  %v10846_v61 = vld [vmem:[%s14623_s1 + $0x1920] ss:$16 sps:$4 sm:$0xff]  }
 0x2ef   :  { %7072 = vmatpush1.bf16.msra.mxu0 %v10760_v62  ;;  %7888 = vmatpush1.bf16.msra.mxu1 %v10763_v63  ;;  %v10849_v62 = vld [vmem:[%s14623_s1 + $0x1928] ss:$16 sps:$4 sm:$0xff]   ;;  %v10854_v63 = vld [vmem:[%s14623_s1 + $0x1944] ss:$16 sps:$4 sm:$0xff]  }
 0x2f0   :  { %7073 = vmatprep.subr.bf16.mxu0 %v10768_v0  ;;  %7889 = vmatprep.subr.bf16.mxu1 %v10771_v3  ;;  %v10857_v0 = vld [vmem:[%s14623_s1 + $0x194c] ss:$16 sps:$4 sm:$0xff]   ;;  %v10852_v3 = vld [vmem:[%s14623_s1 + $0x1940] ss:$16 sps:$4 sm:$0xff]  }
 0x2f3   :  { %7074 = vmatpush1.bf16.msra.mxu0 %v10766_v1  ;;  %7890 = vmatpush1.bf16.msra.mxu1 %v10769_v2  ;;  %v10855_v1 = vld [vmem:[%s14623_s1 + $0x1948] ss:$16 sps:$4 sm:$0xff]   ;;  %v10860_v2 = vld [vmem:[%s14623_s1 + $0x1964] ss:$16 sps:$4 sm:$0xff]  }
 0x2f4   :  { %7075 = vmatprep.subr.bf16.mxu0 %v10774_v4  ;;  %7891 = vmatprep.subr.bf16.mxu1 %v10777_v5  ;;  %v10863_v4 = vld [vmem:[%s14623_s1 + $0x196c] ss:$16 sps:$4 sm:$0xff]   ;;  %v10858_v5 = vld [vmem:[%s14623_s1 + $0x1960] ss:$16 sps:$4 sm:$0xff]  }
 0x2f7   :  { %7076 = vmatpush1.bf16.msra.mxu0 %v10772_v6  ;;  %7892 = vmatpush1.bf16.msra.mxu1 %v10775_v7  ;;  %v10861_v6 = vld [vmem:[%s14623_s1 + $0x1968] ss:$16 sps:$4 sm:$0xff]   ;;  %v10866_v7 = vld [vmem:[%s14623_s1 + $0x1984] ss:$16 sps:$4 sm:$0xff]  }
 0x2f8   :  { %7077 = vmatprep.subr.bf16.mxu0 %v10781_v8  ;;  %7893 = vmatprep.subr.bf16.mxu1 %v10784_v9  ;;  %v10869_v8 = vld [vmem:[%s14623_s1 + $0x198c] ss:$16 sps:$4 sm:$0xff]   ;;  %v10864_v9 = vld [vmem:[%s14623_s1 + $0x1980] ss:$16 sps:$4 sm:$0xff]  }
 0x2fb   :  { %7078 = vmatpush1.bf16.msra.mxu0 %v10779_v10  ;;  %7894 = vmatpush1.bf16.msra.mxu1 %v10782_v11  ;;  %v10867_v10 = vld [vmem:[%s14623_s1 + $0x1988] ss:$16 sps:$4 sm:$0xff]   ;;  %v10872_v11 = vld [vmem:[%s14623_s1 + $0x19a4] ss:$16 sps:$4 sm:$0xff]  }
 0x2fc   :  { %7079 = vmatprep.subr.bf16.mxu0 %v10788_v12  ;;  %7895 = vmatprep.subr.bf16.mxu1 %v10791_v13  ;;  %v10875_v12 = vld [vmem:[%s14623_s1 + $0x19ac] ss:$16 sps:$4 sm:$0xff]   ;;  %v10870_v13 = vld [vmem:[%s14623_s1 + $0x19a0] ss:$16 sps:$4 sm:$0xff]  }
 0x2ff   :  { %7080 = vmatpush1.bf16.msra.mxu0 %v10786_v14  ;;  %7896 = vmatpush1.bf16.msra.mxu1 %v10789_v15  ;;  %v10873_v14 = vld [vmem:[%s14623_s1 + $0x19a8] ss:$16 sps:$4 sm:$0xff]   ;;  %v10879_v15 = vld [vmem:[%s14623_s1 + $0x19c4] ss:$16 sps:$4 sm:$0xff]  }
 0x300   :  { %7100 = vmatprep.subr.bf16.mxu0 %v10794_v16  ;;  %7916 = vmatprep.subr.bf16.mxu1 %v10797_v17  ;;  %v10882_v16 = vld [vmem:[%s14623_s1 + $0x19cc] ss:$16 sps:$4 sm:$0xff]   ;;  %v10877_v17 = vld [vmem:[%s14623_s1 + $0x19c0] ss:$16 sps:$4 sm:$0xff]  }
 0x302   :  { %7082 = vmatmul.mubr.bf16.vlgmr.msra.gmra.mrb[0].mxu0 %v8310_v18  ;;  %7898 = vmatmul.mubr.bf16.vlgmr.msra.gmra.mrb[0].mxu1 %v8310_v18  ;;  %v10880_v18 = vld [vmem:[%s14623_s1 + $0x19c8] ss:$16 sps:$4 sm:$0xff]  }
 0x303   :  { %7101 = vmatpush1.bf16.msra.mxu0 %v10792_v20  ;;  %7917 = vmatpush1.bf16.msra.mxu1 %v10795_v21  ;;  %v10889_v20 = vld [vmem:[%s14623_s1 + $0x19ec] ss:$16 sps:$4 sm:$0xff]   ;;  %v10884_v21 = vld [vmem:[%s14623_s1 + $0x19e0] ss:$16 sps:$4 sm:$0xff]  }
 0x304   :  { %7102 = vmatprep.subr.bf16.mxu0 %v10800_v22  ;;  %7918 = vmatprep.subr.bf16.mxu1 %v10803_v23  ;;  %v10887_v22 = vld [vmem:[%s14623_s1 + $0x19e8] ss:$16 sps:$4 sm:$0xff]   ;;  %v10892_v23 = vld [vmem:[%s14623_s1 + $0x1a04] ss:$16 sps:$4 sm:$0xff]  }
 0x305   :  { %7091 = vmatprep.mubr.bf16.mxu0 %v8343_v24  ;;  %7907 = vmatprep.mubr.bf16.mxu1 %v8343_v24  ;;  %v10895_v24 = vld [vmem:[%s14623_s1 + $0x1a0c] ss:$16 sps:$4 sm:$0xff]  }
 0x307   :  { %7103 = vmatpush1.bf16.msra.mxu0 %v10798_v25  ;;  %7919 = vmatpush1.bf16.msra.mxu1 %v10801_v26  ;;  %v8312_v25 = vcombine.low %v13746_v30, %v13751_v31  ;;  %v68_v26 = vld [vmem:[%s14624_s0 + $0x160] sm:$0xff]  ;;  %v10901_v30 = vld [vmem:[%s14623_s1 + $0x1a2c] ss:$16 sps:$4 sm:$0xff]  }
 0x308   :  { %7104 = vmatprep.subr.bf16.mxu0 %v10806_v27  ;;  %7920 = vmatprep.subr.bf16.mxu1 %v10809_v28  ;;  %v10890_v27 = vld [vmem:[%s14623_s1 + $0x1a00] ss:$16 sps:$4 sm:$0xff]   ;;  %v10893_v28 = vld [vmem:[%s14623_s1 + $0x1a08] ss:$16 sps:$4 sm:$0xff]   ;;  %v8345_v31 = vcombine.high %v68_v26, %v68_v26 }
 0x30a   :  { %7092 = vmatmul.mubr.bf16.gmra.mrb[4].mxu0 %v8342_v29  ;;  %7908 = vmatmul.mubr.bf16.gmra.mrb[4].mxu1 %v8342_v29  ;;  %v10898_v29 = vld [vmem:[%s14623_s1 + $0x1a24] ss:$16 sps:$4 sm:$0xff]  }
 0x30b   :  { %7105 = vmatpush1.bf16.msra.mxu0 %v10804_v32  ;;  %7921 = vmatpush1.bf16.msra.mxu1 %v10807_v33  ;;  %v10896_v32 = vld [vmem:[%s14623_s1 + $0x1a20] ss:$16 sps:$4 sm:$0xff]   ;;  %v10899_v33 = vld [vmem:[%s14623_s1 + $0x1a28] ss:$16 sps:$4 sm:$0xff]  }
 0x30c   :  { %7106 = vmatprep.subr.bf16.mxu0 %v10812_v34  ;;  %7922 = vmatprep.subr.bf16.mxu1 %v10815_v35  ;;  %v10904_v34 = vld [vmem:[%s14623_s1 + $0x1a44] ss:$16 sps:$4 sm:$0xff]   ;;  %v10907_v35 = vld [vmem:[%s14623_s1 + $0x1a4c] ss:$16 sps:$4 sm:$0xff]  }
 0x30d   :  { %7132 = vmatprep.mubr.bf16.mxu0 %v8313_v36  ;;  %7948 = vmatprep.mubr.bf16.mxu1 %v8313_v36  ;;  %v8344_v36 = vcombine.low %v68_v26, %v68_v26  ;;  %v10984_v26 = vld [vmem:[%s14623_s1 + $0x1be4] ss:$16 sps:$4 sm:$0xff]  }
 0x30f   :  { %7107 = vmatpush1.bf16.msra.mxu0 %v10810_v37  ;;  %7923 = vmatpush1.bf16.msra.mxu1 %v10813_v38  ;;  %v13955_v37 = vld [vmem:[%s14624_s0 + $0x68] sm:$0xff] }
 0x310   :  { %7108 = vmatprep.subr.bf16.mxu0 %v10818_v39  ;;  %7924 = vmatprep.subr.bf16.mxu1 %v10821_v40  ;;  %v13960_v38 = vld [vmem:[%s14624_s0 + $0xe8] sm:$0xff]  ;;  %v10902_v39 = vld [vmem:[%s14623_s1 + $0x1a40] ss:$16 sps:$4 sm:$0xff]  }
 0x311   :  { %v10905_v40 = vld [vmem:[%s14623_s1 + $0x1a48] ss:$16 sps:$4 sm:$0xff]  }
 0x313   :  { %7109 = vmatpush1.bf16.msra.mxu0 %v10816_v41  ;;  %7925 = vmatpush1.bf16.msra.mxu1 %v10819_v42  ;;  %v10910_v41 = vld [vmem:[%s14623_s1 + $0x1a64] ss:$16 sps:$4 sm:$0xff]   ;;  %v10913_v42 = vld [vmem:[%s14623_s1 + $0x1a6c] ss:$16 sps:$4 sm:$0xff]  }
 0x314   :  { %7110 = vmatprep.subr.bf16.mxu0 %v10824_v43  ;;  %7926 = vmatprep.subr.bf16.mxu1 %v10827_v46  ;;  %v8315_v43 = vcombine.high %v13955_v37, %v13960_v38  ;;  %v10908_v46 = vld [vmem:[%s14623_s1 + $0x1a60] ss:$16 sps:$4 sm:$0xff]  }
 0x317   :  { %7111 = vmatpush1.bf16.msra.mxu0 %v10822_v44  ;;  %7927 = vmatpush1.bf16.msra.mxu1 %v10825_v45  ;;  %v10911_v44 = vld [vmem:[%s14623_s1 + $0x1a68] ss:$16 sps:$4 sm:$0xff]   ;;  %v10916_v45 = vld [vmem:[%s14623_s1 + $0x1a84] ss:$16 sps:$4 sm:$0xff]  }
 0x318   :  { %7112 = vmatprep.subr.bf16.mxu0 %v10830_v47  ;;  %7928 = vmatprep.subr.bf16.mxu1 %v10833_v48  ;;  %v10919_v47 = vld [vmem:[%s14623_s1 + $0x1a8c] ss:$16 sps:$4 sm:$0xff]   ;;  %v10914_v48 = vld [vmem:[%s14623_s1 + $0x1a80] ss:$16 sps:$4 sm:$0xff]  }
 0x31b   :  { %7113 = vmatpush1.bf16.msra.mxu0 %v10828_v49  ;;  %7929 = vmatpush1.bf16.msra.mxu1 %v10831_v50  ;;  %v10917_v49 = vld [vmem:[%s14623_s1 + $0x1a88] ss:$16 sps:$4 sm:$0xff]   ;;  %v10922_v50 = vld [vmem:[%s14623_s1 + $0x1aa4] ss:$16 sps:$4 sm:$0xff]  }
 0x31c   :  { %7114 = vmatprep.subr.bf16.mxu0 %v10836_v53  ;;  %7930 = vmatprep.subr.bf16.mxu1 %v10839_v51  ;;  %v10925_v53 = vld [vmem:[%s14623_s1 + $0x1aac] ss:$16 sps:$4 sm:$0xff]   ;;  %v10920_v51 = vld [vmem:[%s14623_s1 + $0x1aa0] ss:$16 sps:$4 sm:$0xff]  }
 0x31f   :  { %7115 = vmatpush1.bf16.msra.mxu0 %v10834_v52  ;;  %7931 = vmatpush1.bf16.msra.mxu1 %v10837_v54  ;;  %v10923_v52 = vld [vmem:[%s14623_s1 + $0x1aa8] ss:$16 sps:$4 sm:$0xff]   ;;  %v10928_v54 = vld [vmem:[%s14623_s1 + $0x1ac4] ss:$16 sps:$4 sm:$0xff]  }
 0x320   :  { %7116 = vmatprep.subr.bf16.mxu0 %v10842_v55  ;;  %7932 = vmatprep.subr.bf16.mxu1 %v10845_v56  ;;  %v10931_v55 = vld [vmem:[%s14623_s1 + $0x1acc] ss:$16 sps:$4 sm:$0xff]   ;;  %v10926_v56 = vld [vmem:[%s14623_s1 + $0x1ac0] ss:$16 sps:$4 sm:$0xff]  }
 0x323   :  { %7117 = vmatpush1.bf16.msra.mxu0 %v10840_v57  ;;  %7933 = vmatpush1.bf16.msra.mxu1 %v10843_v60  ;;  %v10929_v57 = vld [vmem:[%s14623_s1 + $0x1ac8] ss:$16 sps:$4 sm:$0xff]   ;;  %v10934_v60 = vld [vmem:[%s14623_s1 + $0x1ae4] ss:$16 sps:$4 sm:$0xff]  }
 0x324   :  { %7118 = vmatprep.subr.bf16.mxu0 %v10848_v58  ;;  %7934 = vmatprep.subr.bf16.mxu1 %v10851_v59  ;;  %v10937_v58 = vld [vmem:[%s14623_s1 + $0x1aec] ss:$16 sps:$4 sm:$0xff]   ;;  %v10932_v59 = vld [vmem:[%s14623_s1 + $0x1ae0] ss:$16 sps:$4 sm:$0xff]  }
 0x327   :  { %7119 = vmatpush1.bf16.msra.mxu0 %v10846_v61  ;;  %7935 = vmatpush1.bf16.msra.mxu1 %v10849_v62  ;;  %v10935_v61 = vld [vmem:[%s14623_s1 + $0x1ae8] ss:$16 sps:$4 sm:$0xff]   ;;  %v10940_v62 = vld [vmem:[%s14623_s1 + $0x1b04] ss:$16 sps:$4 sm:$0xff]  }
 0x328   :  { %7120 = vmatprep.subr.bf16.mxu0 %v10854_v63  ;;  %7936 = vmatprep.subr.bf16.mxu1 %v10857_v0  ;;  %v10943_v63 = vld [vmem:[%s14623_s1 + $0x1b0c] ss:$16 sps:$4 sm:$0xff]   ;;  %v10938_v0 = vld [vmem:[%s14623_s1 + $0x1b00] ss:$16 sps:$4 sm:$0xff]  }
 0x32b   :  { %7121 = vmatpush1.bf16.msra.mxu0 %v10852_v3  ;;  %7937 = vmatpush1.bf16.msra.mxu1 %v10855_v1  ;;  %v10941_v3 = vld [vmem:[%s14623_s1 + $0x1b08] ss:$16 sps:$4 sm:$0xff]   ;;  %v10946_v1 = vld [vmem:[%s14623_s1 + $0x1b24] ss:$16 sps:$4 sm:$0xff]  }
 0x32c   :  { %7122 = vmatprep.subr.bf16.mxu0 %v10860_v2  ;;  %7938 = vmatprep.subr.bf16.mxu1 %v10863_v4  ;;  %v10949_v2 = vld [vmem:[%s14623_s1 + $0x1b2c] ss:$16 sps:$4 sm:$0xff]   ;;  %v10944_v4 = vld [vmem:[%s14623_s1 + $0x1b20] ss:$16 sps:$4 sm:$0xff]  }
 0x32f   :  { %7123 = vmatpush1.bf16.msra.mxu0 %v10858_v5  ;;  %7939 = vmatpush1.bf16.msra.mxu1 %v10861_v6  ;;  %v10947_v5 = vld [vmem:[%s14623_s1 + $0x1b28] ss:$16 sps:$4 sm:$0xff]   ;;  %v10952_v6 = vld [vmem:[%s14623_s1 + $0x1b44] ss:$16 sps:$4 sm:$0xff]  }
 0x330   :  { %7124 = vmatprep.subr.bf16.mxu0 %v10866_v7  ;;  %7940 = vmatprep.subr.bf16.mxu1 %v10869_v8  ;;  %v10955_v7 = vld [vmem:[%s14623_s1 + $0x1b4c] ss:$16 sps:$4 sm:$0xff]   ;;  %v10950_v8 = vld [vmem:[%s14623_s1 + $0x1b40] ss:$16 sps:$4 sm:$0xff]  }
 0x333   :  { %7125 = vmatpush1.bf16.msra.mxu0 %v10864_v9  ;;  %7941 = vmatpush1.bf16.msra.mxu1 %v10867_v10  ;;  %v10953_v9 = vld [vmem:[%s14623_s1 + $0x1b48] ss:$16 sps:$4 sm:$0xff]   ;;  %v10958_v10 = vld [vmem:[%s14623_s1 + $0x1b64] ss:$16 sps:$4 sm:$0xff]  }
 0x334   :  { %7126 = vmatprep.subr.bf16.mxu0 %v10872_v11  ;;  %7942 = vmatprep.subr.bf16.mxu1 %v10875_v12  ;;  %v10961_v11 = vld [vmem:[%s14623_s1 + $0x1b6c] ss:$16 sps:$4 sm:$0xff]   ;;  %v10956_v12 = vld [vmem:[%s14623_s1 + $0x1b60] ss:$16 sps:$4 sm:$0xff]  }
 0x337   :  { %7127 = vmatpush1.bf16.msra.mxu0 %v10870_v13  ;;  %7943 = vmatpush1.bf16.msra.mxu1 %v10873_v14  ;;  %v10959_v13 = vld [vmem:[%s14623_s1 + $0x1b68] ss:$16 sps:$4 sm:$0xff]   ;;  %v10964_v14 = vld [vmem:[%s14623_s1 + $0x1b84] ss:$16 sps:$4 sm:$0xff]  }
 0x338   :  { %7128 = vmatprep.subr.bf16.mxu0 %v10879_v15  ;;  %7944 = vmatprep.subr.bf16.mxu1 %v10882_v16  ;;  %v10967_v15 = vld [vmem:[%s14623_s1 + $0x1b8c] ss:$16 sps:$4 sm:$0xff]   ;;  %v10962_v16 = vld [vmem:[%s14623_s1 + $0x1b80] ss:$16 sps:$4 sm:$0xff]  }
 0x33b   :  { %7129 = vmatpush1.bf16.msra.mxu0 %v10877_v17  ;;  %7945 = vmatpush1.bf16.msra.mxu1 %v10880_v18  ;;  %v10965_v17 = vld [vmem:[%s14623_s1 + $0x1b88] ss:$16 sps:$4 sm:$0xff]   ;;  %v10970_v18 = vld [vmem:[%s14623_s1 + $0x1ba4] ss:$16 sps:$4 sm:$0xff]  }
 0x33c   :  { %7130 = vmatprep.subr.bf16.mxu0 %v10886_v19  ;;  %7946 = vmatprep.subr.bf16.mxu1 %v10889_v20  ;;  %v10973_v19 = vld [vmem:[%s14623_s1 + $0x1bac] ss:$16 sps:$4 sm:$0xff]   ;;  %v10968_v20 = vld [vmem:[%s14623_s1 + $0x1ba0] ss:$16 sps:$4 sm:$0xff]  }
 0x33f   :  { %7131 = vmatpush1.bf16.msra.mxu0 %v10884_v21  ;;  %7947 = vmatpush1.bf16.msra.mxu1 %v10887_v22  ;;  %v10971_v21 = vld [vmem:[%s14623_s1 + $0x1ba8] ss:$16 sps:$4 sm:$0xff]   ;;  %v10977_v22 = vld [vmem:[%s14623_s1 + $0x1bc4] ss:$16 sps:$4 sm:$0xff]  }
 0x340   :  { %7151 = vmatprep.subr.bf16.mxu0 %v10892_v23  ;;  %7967 = vmatprep.subr.bf16.mxu1 %v10895_v24  ;;  %v10980_v23 = vld [vmem:[%s14623_s1 + $0x1bcc] ss:$16 sps:$4 sm:$0xff]   ;;  %v10975_v24 = vld [vmem:[%s14623_s1 + $0x1bc0] ss:$16 sps:$4 sm:$0xff]  }
 0x342   :  { %7133 = vmatmul.mubr.bf16.vlgmr.msra.gmra.mrb[0].mxu0 %v8312_v25  ;;  %7949 = vmatmul.mubr.bf16.vlgmr.msra.gmra.mrb[0].mxu1 %v8312_v25  ;;  %v10978_v25 = vld [vmem:[%s14623_s1 + $0x1bc8] ss:$16 sps:$4 sm:$0xff]  }
 0x343   :  { %7152 = vmatpush1.bf16.msra.mxu0 %v10890_v27  ;;  %7968 = vmatpush1.bf16.msra.mxu1 %v10893_v28  ;;  %v10987_v27 = vld [vmem:[%s14623_s1 + $0x1bec] ss:$16 sps:$4 sm:$0xff]   ;;  %v10982_v28 = vld [vmem:[%s14623_s1 + $0x1be0] ss:$16 sps:$4 sm:$0xff]  }
 0x344   :  { %7153 = vmatprep.subr.bf16.mxu0 %v10898_v29  ;;  %7969 = vmatprep.subr.bf16.mxu1 %v10901_v30  ;;  %v10985_v29 = vld [vmem:[%s14623_s1 + $0x1be8] ss:$16 sps:$4 sm:$0xff]   ;;  %v10990_v30 = vld [vmem:[%s14623_s1 + $0x1c04] ss:$16 sps:$4 sm:$0xff]  }
 0x345   :  { %7142 = vmatprep.mubr.bf16.mxu0 %v8345_v31  ;;  %7958 = vmatprep.mubr.bf16.mxu1 %v8345_v31  ;;  %v10993_v31 = vld [vmem:[%s14623_s1 + $0x1c0c] ss:$16 sps:$4 sm:$0xff]  }
 0x347   :  { %7154 = vmatpush1.bf16.msra.mxu0 %v10896_v32  ;;  %7970 = vmatpush1.bf16.msra.mxu1 %v10899_v33  ;;  %v8314_v32 = vcombine.low %v13955_v37, %v13960_v38  ;;  %v69_v33 = vld [vmem:[%s14624_s0 + $0x168] sm:$0xff] }
 0x348   :  { %7155 = vmatprep.subr.bf16.mxu0 %v10904_v34  ;;  %7971 = vmatprep.subr.bf16.mxu1 %v10907_v35  ;;  %v10988_v34 = vld [vmem:[%s14623_s1 + $0x1c00] ss:$16 sps:$4 sm:$0xff]   ;;  %v10991_v35 = vld [vmem:[%s14623_s1 + $0x1c08] ss:$16 sps:$4 sm:$0xff]   ;;  %v10999_v37 = vld [vmem:[%s14623_s1 + $0x1c2c] ss:$16 sps:$4 sm:$0xff]   ;;  %v8347_v38 = vcombine.high %v69_v33, %v69_v33 }
 0x34a   :  { %7143 = vmatmul.mubr.bf16.gmra.mrb[4].mxu0 %v8344_v36  ;;  %7959 = vmatmul.mubr.bf16.gmra.mrb[4].mxu1 %v8344_v36  ;;  %v10996_v36 = vld [vmem:[%s14623_s1 + $0x1c24] ss:$16 sps:$4 sm:$0xff]  }
 0x34b   :  { %7156 = vmatpush1.bf16.msra.mxu0 %v10902_v39  ;;  %7972 = vmatpush1.bf16.msra.mxu1 %v10905_v40  ;;  %v10994_v39 = vld [vmem:[%s14623_s1 + $0x1c20] ss:$16 sps:$4 sm:$0xff]   ;;  %v10997_v40 = vld [vmem:[%s14623_s1 + $0x1c28] ss:$16 sps:$4 sm:$0xff]  }
 0x34c   :  { %7157 = vmatprep.subr.bf16.mxu0 %v10910_v41  ;;  %7973 = vmatprep.subr.bf16.mxu1 %v10913_v42  ;;  %v11002_v41 = vld [vmem:[%s14623_s1 + $0x1c44] ss:$16 sps:$4 sm:$0xff]   ;;  %v11005_v42 = vld [vmem:[%s14623_s1 + $0x1c4c] ss:$16 sps:$4 sm:$0xff]  }
 0x34d   :  { %7183 = vmatprep.mubr.bf16.mxu0 %v8315_v43  ;;  %7999 = vmatprep.mubr.bf16.mxu1 %v8315_v43  ;;  %v8346_v43 = vcombine.low %v69_v33, %v69_v33  ;;  %v11082_v33 = vld [vmem:[%s14623_s1 + $0x1de4] ss:$16 sps:$4 sm:$0xff]  }
 0x34f   :  { %7158 = vmatpush1.bf16.msra.mxu0 %v10908_v46  ;;  %7974 = vmatpush1.bf16.msra.mxu1 %v10911_v44  ;;  %v14164_v46 = vld [vmem:[%s14624_s0 + $0x70] sm:$0xff] }
 0x350   :  { %7159 = vmatprep.subr.bf16.mxu0 %v10916_v45  ;;  %7975 = vmatprep.subr.bf16.mxu1 %v10919_v47  ;;  %v14169_v44 = vld [vmem:[%s14624_s0 + $0xf0] sm:$0xff]  ;;  %v11003_v47 = vld [vmem:[%s14623_s1 + $0x1c48] ss:$16 sps:$4 sm:$0xff]  }
 0x351   :  { %v11000_v45 = vld [vmem:[%s14623_s1 + $0x1c40] ss:$16 sps:$4 sm:$0xff]  }
 0x353   :  { %7160 = vmatpush1.bf16.msra.mxu0 %v10914_v48  ;;  %7976 = vmatpush1.bf16.msra.mxu1 %v10917_v49  ;;  %v11008_v48 = vld [vmem:[%s14623_s1 + $0x1c64] ss:$16 sps:$4 sm:$0xff]   ;;  %v11011_v49 = vld [vmem:[%s14623_s1 + $0x1c6c] ss:$16 sps:$4 sm:$0xff]  }
 0x354   :  { %7161 = vmatprep.subr.bf16.mxu0 %v10922_v50  ;;  %7977 = vmatprep.subr.bf16.mxu1 %v10925_v53  ;;  %v8317_v50 = vcombine.high %v14164_v46, %v14169_v44  ;;  %v11006_v53 = vld [vmem:[%s14623_s1 + $0x1c60] ss:$16 sps:$4 sm:$0xff]  }
 0x357   :  { %7162 = vmatpush1.bf16.msra.mxu0 %v10920_v51  ;;  %7978 = vmatpush1.bf16.msra.mxu1 %v10923_v52  ;;  %v11009_v51 = vld [vmem:[%s14623_s1 + $0x1c68] ss:$16 sps:$4 sm:$0xff]   ;;  %v11014_v52 = vld [vmem:[%s14623_s1 + $0x1c84] ss:$16 sps:$4 sm:$0xff]  }
 0x358   :  { %7163 = vmatprep.subr.bf16.mxu0 %v10928_v54  ;;  %7979 = vmatprep.subr.bf16.mxu1 %v10931_v55  ;;  %v11017_v54 = vld [vmem:[%s14623_s1 + $0x1c8c] ss:$16 sps:$4 sm:$0xff]   ;;  %v11012_v55 = vld [vmem:[%s14623_s1 + $0x1c80] ss:$16 sps:$4 sm:$0xff]  }
 0x35b   :  { %7164 = vmatpush1.bf16.msra.mxu0 %v10926_v56  ;;  %7980 = vmatpush1.bf16.msra.mxu1 %v10929_v57  ;;  %v11015_v56 = vld [vmem:[%s14623_s1 + $0x1c88] ss:$16 sps:$4 sm:$0xff]   ;;  %v11020_v57 = vld [vmem:[%s14623_s1 + $0x1ca4] ss:$16 sps:$4 sm:$0xff]  }
 0x35c   :  { %7165 = vmatprep.subr.bf16.mxu0 %v10934_v60  ;;  %7981 = vmatprep.subr.bf16.mxu1 %v10937_v58  ;;  %v11023_v60 = vld [vmem:[%s14623_s1 + $0x1cac] ss:$16 sps:$4 sm:$0xff]   ;;  %v11018_v58 = vld [vmem:[%s14623_s1 + $0x1ca0] ss:$16 sps:$4 sm:$0xff]  }
 0x35f   :  { %7166 = vmatpush1.bf16.msra.mxu0 %v10932_v59  ;;  %7982 = vmatpush1.bf16.msra.mxu1 %v10935_v61  ;;  %v11021_v59 = vld [vmem:[%s14623_s1 + $0x1ca8] ss:$16 sps:$4 sm:$0xff]   ;;  %v11026_v61 = vld [vmem:[%s14623_s1 + $0x1cc4] ss:$16 sps:$4 sm:$0xff]  }
 0x360   :  { %7167 = vmatprep.subr.bf16.mxu0 %v10940_v62  ;;  %7983 = vmatprep.subr.bf16.mxu1 %v10943_v63  ;;  %v11029_v62 = vld [vmem:[%s14623_s1 + $0x1ccc] ss:$16 sps:$4 sm:$0xff]   ;;  %v11024_v63 = vld [vmem:[%s14623_s1 + $0x1cc0] ss:$16 sps:$4 sm:$0xff]  }
 0x363   :  { %7168 = vmatpush1.bf16.msra.mxu0 %v10938_v0  ;;  %7984 = vmatpush1.bf16.msra.mxu1 %v10941_v3  ;;  %v11027_v0 = vld [vmem:[%s14623_s1 + $0x1cc8] ss:$16 sps:$4 sm:$0xff]   ;;  %v11032_v3 = vld [vmem:[%s14623_s1 + $0x1ce4] ss:$16 sps:$4 sm:$0xff]  }
 0x364   :  { %7169 = vmatprep.subr.bf16.mxu0 %v10946_v1  ;;  %7985 = vmatprep.subr.bf16.mxu1 %v10949_v2  ;;  %v11035_v1 = vld [vmem:[%s14623_s1 + $0x1cec] ss:$16 sps:$4 sm:$0xff]   ;;  %v11030_v2 = vld [vmem:[%s14623_s1 + $0x1ce0] ss:$16 sps:$4 sm:$0xff]  }
 0x367   :  { %7170 = vmatpush1.bf16.msra.mxu0 %v10944_v4  ;;  %7986 = vmatpush1.bf16.msra.mxu1 %v10947_v5  ;;  %v11033_v4 = vld [vmem:[%s14623_s1 + $0x1ce8] ss:$16 sps:$4 sm:$0xff]   ;;  %v11038_v5 = vld [vmem:[%s14623_s1 + $0x1d04] ss:$16 sps:$4 sm:$0xff]  }
 0x368   :  { %7171 = vmatprep.subr.bf16.mxu0 %v10952_v6  ;;  %7987 = vmatprep.subr.bf16.mxu1 %v10955_v7  ;;  %v11041_v6 = vld [vmem:[%s14623_s1 + $0x1d0c] ss:$16 sps:$4 sm:$0xff]   ;;  %v11036_v7 = vld [vmem:[%s14623_s1 + $0x1d00] ss:$16 sps:$4 sm:$0xff]  }
 0x36b   :  { %7172 = vmatpush1.bf16.msra.mxu0 %v10950_v8  ;;  %7988 = vmatpush1.bf16.msra.mxu1 %v10953_v9  ;;  %v11039_v8 = vld [vmem:[%s14623_s1 + $0x1d08] ss:$16 sps:$4 sm:$0xff]   ;;  %v11044_v9 = vld [vmem:[%s14623_s1 + $0x1d24] ss:$16 sps:$4 sm:$0xff]  }
 0x36c   :  { %7173 = vmatprep.subr.bf16.mxu0 %v10958_v10  ;;  %7989 = vmatprep.subr.bf16.mxu1 %v10961_v11  ;;  %v11047_v10 = vld [vmem:[%s14623_s1 + $0x1d2c] ss:$16 sps:$4 sm:$0xff]   ;;  %v11042_v11 = vld [vmem:[%s14623_s1 + $0x1d20] ss:$16 sps:$4 sm:$0xff]  }
 0x36f   :  { %7174 = vmatpush1.bf16.msra.mxu0 %v10956_v12  ;;  %7990 = vmatpush1.bf16.msra.mxu1 %v10959_v13  ;;  %v11045_v12 = vld [vmem:[%s14623_s1 + $0x1d28] ss:$16 sps:$4 sm:$0xff]   ;;  %v11050_v13 = vld [vmem:[%s14623_s1 + $0x1d44] ss:$16 sps:$4 sm:$0xff]  }
 0x370   :  { %7175 = vmatprep.subr.bf16.mxu0 %v10964_v14  ;;  %7991 = vmatprep.subr.bf16.mxu1 %v10967_v15  ;;  %v11053_v14 = vld [vmem:[%s14623_s1 + $0x1d4c] ss:$16 sps:$4 sm:$0xff]   ;;  %v11048_v15 = vld [vmem:[%s14623_s1 + $0x1d40] ss:$16 sps:$4 sm:$0xff]  }
 0x373   :  { %7176 = vmatpush1.bf16.msra.mxu0 %v10962_v16  ;;  %7992 = vmatpush1.bf16.msra.mxu1 %v10965_v17  ;;  %v11051_v16 = vld [vmem:[%s14623_s1 + $0x1d48] ss:$16 sps:$4 sm:$0xff]   ;;  %v11056_v17 = vld [vmem:[%s14623_s1 + $0x1d64] ss:$16 sps:$4 sm:$0xff]  }
 0x374   :  { %7177 = vmatprep.subr.bf16.mxu0 %v10970_v18  ;;  %7993 = vmatprep.subr.bf16.mxu1 %v10973_v19  ;;  %v11059_v18 = vld [vmem:[%s14623_s1 + $0x1d6c] ss:$16 sps:$4 sm:$0xff]   ;;  %v11054_v19 = vld [vmem:[%s14623_s1 + $0x1d60] ss:$16 sps:$4 sm:$0xff]  }
 0x377   :  { %7178 = vmatpush1.bf16.msra.mxu0 %v10968_v20  ;;  %7994 = vmatpush1.bf16.msra.mxu1 %v10971_v21  ;;  %v11057_v20 = vld [vmem:[%s14623_s1 + $0x1d68] ss:$16 sps:$4 sm:$0xff]   ;;  %v11062_v21 = vld [vmem:[%s14623_s1 + $0x1d84] ss:$16 sps:$4 sm:$0xff]  }
 0x378   :  { %7179 = vmatprep.subr.bf16.mxu0 %v10977_v22  ;;  %7995 = vmatprep.subr.bf16.mxu1 %v10980_v23  ;;  %v11065_v22 = vld [vmem:[%s14623_s1 + $0x1d8c] ss:$16 sps:$4 sm:$0xff]   ;;  %v11060_v23 = vld [vmem:[%s14623_s1 + $0x1d80] ss:$16 sps:$4 sm:$0xff]  }
 0x37b   :  { %7180 = vmatpush1.bf16.msra.mxu0 %v10975_v24  ;;  %7996 = vmatpush1.bf16.msra.mxu1 %v10978_v25  ;;  %v11063_v24 = vld [vmem:[%s14623_s1 + $0x1d88] ss:$16 sps:$4 sm:$0xff]   ;;  %v11068_v25 = vld [vmem:[%s14623_s1 + $0x1da4] ss:$16 sps:$4 sm:$0xff]  }
 0x37c   :  { %7181 = vmatprep.subr.bf16.mxu0 %v10984_v26  ;;  %7997 = vmatprep.subr.bf16.mxu1 %v10987_v27  ;;  %v11071_v26 = vld [vmem:[%s14623_s1 + $0x1dac] ss:$16 sps:$4 sm:$0xff]   ;;  %v11066_v27 = vld [vmem:[%s14623_s1 + $0x1da0] ss:$16 sps:$4 sm:$0xff]  }
 0x37f   :  { %7182 = vmatpush1.bf16.msra.mxu0 %v10982_v28  ;;  %7998 = vmatpush1.bf16.msra.mxu1 %v10985_v29  ;;  %v11069_v28 = vld [vmem:[%s14623_s1 + $0x1da8] ss:$16 sps:$4 sm:$0xff]   ;;  %v11075_v29 = vld [vmem:[%s14623_s1 + $0x1dc4] ss:$16 sps:$4 sm:$0xff]  }
 0x380   :  { %7202 = vmatprep.subr.bf16.mxu0 %v10990_v30  ;;  %8018 = vmatprep.subr.bf16.mxu1 %v10993_v31  ;;  %v11078_v30 = vld [vmem:[%s14623_s1 + $0x1dcc] ss:$16 sps:$4 sm:$0xff]   ;;  %v11073_v31 = vld [vmem:[%s14623_s1 + $0x1dc0] ss:$16 sps:$4 sm:$0xff]  }
 0x382   :  { %7184 = vmatmul.mubr.bf16.vlgmr.msra.gmra.mrb[0].mxu0 %v8314_v32  ;;  %8000 = vmatmul.mubr.bf16.vlgmr.msra.gmra.mrb[0].mxu1 %v8314_v32  ;;  %v11076_v32 = vld [vmem:[%s14623_s1 + $0x1dc8] ss:$16 sps:$4 sm:$0xff]  }
 0x383   :  { %7203 = vmatpush1.bf16.msra.mxu0 %v10988_v34  ;;  %8019 = vmatpush1.bf16.msra.mxu1 %v10991_v35  ;;  %v11085_v34 = vld [vmem:[%s14623_s1 + $0x1dec] ss:$16 sps:$4 sm:$0xff]   ;;  %v11080_v35 = vld [vmem:[%s14623_s1 + $0x1de0] ss:$16 sps:$4 sm:$0xff]  }
 0x384   :  { %7204 = vmatprep.subr.bf16.mxu0 %v10996_v36  ;;  %8020 = vmatprep.subr.bf16.mxu1 %v10999_v37  ;;  %v11083_v36 = vld [vmem:[%s14623_s1 + $0x1de8] ss:$16 sps:$4 sm:$0xff]   ;;  %v11088_v37 = vld [vmem:[%s14623_s1 + $0x1e04] ss:$16 sps:$4 sm:$0xff]  }
 0x385   :  { %7193 = vmatprep.mubr.bf16.mxu0 %v8347_v38  ;;  %8009 = vmatprep.mubr.bf16.mxu1 %v8347_v38  ;;  %v11091_v38 = vld [vmem:[%s14623_s1 + $0x1e0c] ss:$16 sps:$4 sm:$0xff]  }
 0x387   :  { %7205 = vmatpush1.bf16.msra.mxu0 %v10994_v39  ;;  %8021 = vmatpush1.bf16.msra.mxu1 %v10997_v40  ;;  %v8316_v39 = vcombine.low %v14164_v46, %v14169_v44  ;;  %v70_v40 = vld [vmem:[%s14624_s0 + $0x170] sm:$0xff]  ;;  %v11097_v46 = vld [vmem:[%s14623_s1 + $0x1e2c] ss:$16 sps:$4 sm:$0xff]  }
 0x388   :  { %7206 = vmatprep.subr.bf16.mxu0 %v11002_v41  ;;  %8022 = vmatprep.subr.bf16.mxu1 %v11005_v42  ;;  %v11086_v41 = vld [vmem:[%s14623_s1 + $0x1e00] ss:$16 sps:$4 sm:$0xff]   ;;  %v11089_v42 = vld [vmem:[%s14623_s1 + $0x1e08] ss:$16 sps:$4 sm:$0xff]   ;;  %v8349_v44 = vcombine.high %v70_v40, %v70_v40 }
 0x38a   :  { %7194 = vmatmul.mubr.bf16.gmra.mrb[4].mxu0 %v8346_v43  ;;  %8010 = vmatmul.mubr.bf16.gmra.mrb[4].mxu1 %v8346_v43  ;;  %v11094_v43 = vld [vmem:[%s14623_s1 + $0x1e24] ss:$16 sps:$4 sm:$0xff]  }
 0x38b   :  { %7207 = vmatpush1.bf16.msra.mxu0 %v11000_v45  ;;  %8023 = vmatpush1.bf16.msra.mxu1 %v11003_v47  ;;  %v11092_v45 = vld [vmem:[%s14623_s1 + $0x1e20] ss:$16 sps:$4 sm:$0xff]   ;;  %v11095_v47 = vld [vmem:[%s14623_s1 + $0x1e28] ss:$16 sps:$4 sm:$0xff]  }
 0x38c   :  { %7208 = vmatprep.subr.bf16.mxu0 %v11008_v48  ;;  %8024 = vmatprep.subr.bf16.mxu1 %v11011_v49  ;;  %v11100_v48 = vld [vmem:[%s14623_s1 + $0x1e44] ss:$16 sps:$4 sm:$0xff]   ;;  %v11103_v49 = vld [vmem:[%s14623_s1 + $0x1e4c] ss:$16 sps:$4 sm:$0xff]  }
 0x38d   :  { %7234 = vmatprep.mubr.bf16.mxu0 %v8317_v50  ;;  %8050 = vmatprep.mubr.bf16.mxu1 %v8317_v50  ;;  %v8348_v50 = vcombine.low %v70_v40, %v70_v40  ;;  %v11180_v40 = vld [vmem:[%s14623_s1 + $0x1fe4] ss:$16 sps:$4 sm:$0xff]  }
 0x38f   :  { %7209 = vmatpush1.bf16.msra.mxu0 %v11006_v53  ;;  %8025 = vmatpush1.bf16.msra.mxu1 %v11009_v51  ;;  %v14373_v53 = vld [vmem:[%s14624_s0 + $0x78] sm:$0xff] }
 0x390   :  { %7210 = vmatprep.subr.bf16.mxu0 %v11014_v52  ;;  %8026 = vmatprep.subr.bf16.mxu1 %v11017_v54  ;;  %v14378_v51 = vld [vmem:[%s14624_s0 + $0xf8] sm:$0xff]  ;;  %v11098_v52 = vld [vmem:[%s14623_s1 + $0x1e40] ss:$16 sps:$4 sm:$0xff]  }
 0x391   :  { %v11101_v54 = vld [vmem:[%s14623_s1 + $0x1e48] ss:$16 sps:$4 sm:$0xff]  }
 0x393   :  { %7211 = vmatpush1.bf16.msra.mxu0 %v11012_v55  ;;  %8027 = vmatpush1.bf16.msra.mxu1 %v11015_v56  ;;  %v11106_v55 = vld [vmem:[%s14623_s1 + $0x1e64] ss:$16 sps:$4 sm:$0xff]   ;;  %v11109_v56 = vld [vmem:[%s14623_s1 + $0x1e6c] ss:$16 sps:$4 sm:$0xff]  }
 0x394   :  { %7212 = vmatprep.subr.bf16.mxu0 %v11020_v57  ;;  %8028 = vmatprep.subr.bf16.mxu1 %v11023_v60  ;;  %v8319_v57 = vcombine.high %v14373_v53, %v14378_v51  ;;  %v11104_v60 = vld [vmem:[%s14623_s1 + $0x1e60] ss:$16 sps:$4 sm:$0xff]  }
 0x397   :  { %7213 = vmatpush1.bf16.msra.mxu0 %v11018_v58  ;;  %8029 = vmatpush1.bf16.msra.mxu1 %v11021_v59  ;;  %v11107_v58 = vld [vmem:[%s14623_s1 + $0x1e68] ss:$16 sps:$4 sm:$0xff]   ;;  %v11112_v59 = vld [vmem:[%s14623_s1 + $0x1e84] ss:$16 sps:$4 sm:$0xff]  }
 0x398   :  { %7214 = vmatprep.subr.bf16.mxu0 %v11026_v61  ;;  %8030 = vmatprep.subr.bf16.mxu1 %v11029_v62  ;;  %v11115_v61 = vld [vmem:[%s14623_s1 + $0x1e8c] ss:$16 sps:$4 sm:$0xff]   ;;  %v11110_v62 = vld [vmem:[%s14623_s1 + $0x1e80] ss:$16 sps:$4 sm:$0xff]  }
 0x39b   :  { %7215 = vmatpush1.bf16.msra.mxu0 %v11024_v63  ;;  %8031 = vmatpush1.bf16.msra.mxu1 %v11027_v0  ;;  %v11113_v63 = vld [vmem:[%s14623_s1 + $0x1e88] ss:$16 sps:$4 sm:$0xff]   ;;  %v11118_v0 = vld [vmem:[%s14623_s1 + $0x1ea4] ss:$16 sps:$4 sm:$0xff]  }
 0x39c   :  { %7216 = vmatprep.subr.bf16.mxu0 %v11032_v3  ;;  %8032 = vmatprep.subr.bf16.mxu1 %v11035_v1  ;;  %v11121_v3 = vld [vmem:[%s14623_s1 + $0x1eac] ss:$16 sps:$4 sm:$0xff]   ;;  %v11116_v1 = vld [vmem:[%s14623_s1 + $0x1ea0] ss:$16 sps:$4 sm:$0xff]  }
 0x39f   :  { %7217 = vmatpush1.bf16.msra.mxu0 %v11030_v2  ;;  %8033 = vmatpush1.bf16.msra.mxu1 %v11033_v4  ;;  %v11119_v2 = vld [vmem:[%s14623_s1 + $0x1ea8] ss:$16 sps:$4 sm:$0xff]   ;;  %v11124_v4 = vld [vmem:[%s14623_s1 + $0x1ec4] ss:$16 sps:$4 sm:$0xff]  }
 0x3a0   :  { %7218 = vmatprep.subr.bf16.mxu0 %v11038_v5  ;;  %8034 = vmatprep.subr.bf16.mxu1 %v11041_v6  ;;  %v11127_v5 = vld [vmem:[%s14623_s1 + $0x1ecc] ss:$16 sps:$4 sm:$0xff]   ;;  %v11122_v6 = vld [vmem:[%s14623_s1 + $0x1ec0] ss:$16 sps:$4 sm:$0xff]  }
 0x3a3   :  { %7219 = vmatpush1.bf16.msra.mxu0 %v11036_v7  ;;  %8035 = vmatpush1.bf16.msra.mxu1 %v11039_v8  ;;  %v11125_v7 = vld [vmem:[%s14623_s1 + $0x1ec8] ss:$16 sps:$4 sm:$0xff]   ;;  %v11130_v8 = vld [vmem:[%s14623_s1 + $0x1ee4] ss:$16 sps:$4 sm:$0xff]  }
 0x3a4   :  { %7220 = vmatprep.subr.bf16.mxu0 %v11044_v9  ;;  %8036 = vmatprep.subr.bf16.mxu1 %v11047_v10  ;;  %v11133_v9 = vld [vmem:[%s14623_s1 + $0x1eec] ss:$16 sps:$4 sm:$0xff]   ;;  %v11128_v10 = vld [vmem:[%s14623_s1 + $0x1ee0] ss:$16 sps:$4 sm:$0xff]  }
 0x3a7   :  { %7221 = vmatpush1.bf16.msra.mxu0 %v11042_v11  ;;  %8037 = vmatpush1.bf16.msra.mxu1 %v11045_v12  ;;  %v11131_v11 = vld [vmem:[%s14623_s1 + $0x1ee8] ss:$16 sps:$4 sm:$0xff]   ;;  %v11136_v12 = vld [vmem:[%s14623_s1 + $0x1f04] ss:$16 sps:$4 sm:$0xff]  }
 0x3a8   :  { %7222 = vmatprep.subr.bf16.mxu0 %v11050_v13  ;;  %8038 = vmatprep.subr.bf16.mxu1 %v11053_v14  ;;  %v11139_v13 = vld [vmem:[%s14623_s1 + $0x1f0c] ss:$16 sps:$4 sm:$0xff]   ;;  %v11134_v14 = vld [vmem:[%s14623_s1 + $0x1f00] ss:$16 sps:$4 sm:$0xff]  }
 0x3ab   :  { %7223 = vmatpush1.bf16.msra.mxu0 %v11048_v15  ;;  %8039 = vmatpush1.bf16.msra.mxu1 %v11051_v16  ;;  %v11137_v15 = vld [vmem:[%s14623_s1 + $0x1f08] ss:$16 sps:$4 sm:$0xff]   ;;  %v11142_v16 = vld [vmem:[%s14623_s1 + $0x1f24] ss:$16 sps:$4 sm:$0xff]  }
 0x3ac   :  { %7224 = vmatprep.subr.bf16.mxu0 %v11056_v17  ;;  %8040 = vmatprep.subr.bf16.mxu1 %v11059_v18  ;;  %v11145_v17 = vld [vmem:[%s14623_s1 + $0x1f2c] ss:$16 sps:$4 sm:$0xff]   ;;  %v11140_v18 = vld [vmem:[%s14623_s1 + $0x1f20] ss:$16 sps:$4 sm:$0xff]  }
 0x3af   :  { %7225 = vmatpush1.bf16.msra.mxu0 %v11054_v19  ;;  %8041 = vmatpush1.bf16.msra.mxu1 %v11057_v20  ;;  %v11143_v19 = vld [vmem:[%s14623_s1 + $0x1f28] ss:$16 sps:$4 sm:$0xff]   ;;  %v11148_v20 = vld [vmem:[%s14623_s1 + $0x1f44] ss:$16 sps:$4 sm:$0xff]  }
 0x3b0   :  { %7226 = vmatprep.subr.bf16.mxu0 %v11062_v21  ;;  %8042 = vmatprep.subr.bf16.mxu1 %v11065_v22  ;;  %v11151_v21 = vld [vmem:[%s14623_s1 + $0x1f4c] ss:$16 sps:$4 sm:$0xff]   ;;  %v11146_v22 = vld [vmem:[%s14623_s1 + $0x1f40] ss:$16 sps:$4 sm:$0xff]  }
 0x3b3   :  { %7227 = vmatpush1.bf16.msra.mxu0 %v11060_v23  ;;  %8043 = vmatpush1.bf16.msra.mxu1 %v11063_v24  ;;  %v11149_v23 = vld [vmem:[%s14623_s1 + $0x1f48] ss:$16 sps:$4 sm:$0xff]   ;;  %v11154_v24 = vld [vmem:[%s14623_s1 + $0x1f64] ss:$16 sps:$4 sm:$0xff]  }
 0x3b4   :  { %7228 = vmatprep.subr.bf16.mxu0 %v11068_v25  ;;  %8044 = vmatprep.subr.bf16.mxu1 %v11071_v26  ;;  %v11157_v25 = vld [vmem:[%s14623_s1 + $0x1f6c] ss:$16 sps:$4 sm:$0xff]   ;;  %v11152_v26 = vld [vmem:[%s14623_s1 + $0x1f60] ss:$16 sps:$4 sm:$0xff]  }
 0x3b7   :  { %7229 = vmatpush1.bf16.msra.mxu0 %v11066_v27  ;;  %8045 = vmatpush1.bf16.msra.mxu1 %v11069_v28  ;;  %v11155_v27 = vld [vmem:[%s14623_s1 + $0x1f68] ss:$16 sps:$4 sm:$0xff]   ;;  %v11160_v28 = vld [vmem:[%s14623_s1 + $0x1f84] ss:$16 sps:$4 sm:$0xff]  }
 0x3b8   :  { %7230 = vmatprep.subr.bf16.mxu0 %v11075_v29  ;;  %8046 = vmatprep.subr.bf16.mxu1 %v11078_v30  ;;  %v11163_v29 = vld [vmem:[%s14623_s1 + $0x1f8c] ss:$16 sps:$4 sm:$0xff]   ;;  %v11158_v30 = vld [vmem:[%s14623_s1 + $0x1f80] ss:$16 sps:$4 sm:$0xff]  }
 0x3bb   :  { %7231 = vmatpush1.bf16.msra.mxu0 %v11073_v31  ;;  %8047 = vmatpush1.bf16.msra.mxu1 %v11076_v32  ;;  %v11161_v31 = vld [vmem:[%s14623_s1 + $0x1f88] ss:$16 sps:$4 sm:$0xff]   ;;  %v11166_v32 = vld [vmem:[%s14623_s1 + $0x1fa4] ss:$16 sps:$4 sm:$0xff]  }
 0x3bc   :  { %7232 = vmatprep.subr.bf16.mxu0 %v11082_v33  ;;  %8048 = vmatprep.subr.bf16.mxu1 %v11085_v34  ;;  %v11169_v33 = vld [vmem:[%s14623_s1 + $0x1fac] ss:$16 sps:$4 sm:$0xff]   ;;  %v11164_v34 = vld [vmem:[%s14623_s1 + $0x1fa0] ss:$16 sps:$4 sm:$0xff]  }
 0x3bf   :  { %7233 = vmatpush1.bf16.msra.mxu0 %v11080_v35  ;;  %8049 = vmatpush1.bf16.msra.mxu1 %v11083_v36  ;;  %v11167_v35 = vld [vmem:[%s14623_s1 + $0x1fa8] ss:$16 sps:$4 sm:$0xff]   ;;  %v11174_v36 = vld [vmem:[%s14623_s1 + $0x1fc4] ss:$16 sps:$4 sm:$0xff]  }
 0x3c0   :  { %7253 = vmatprep.subr.bf16.mxu0 %v11088_v37  ;;  %8069 = vmatprep.subr.bf16.mxu1 %v11091_v38  ;;  %v11177_v37 = vld [vmem:[%s14623_s1 + $0x1fcc] ss:$16 sps:$4 sm:$0xff]   ;;  %v11172_v38 = vld [vmem:[%s14623_s1 + $0x1fc0] ss:$16 sps:$4 sm:$0xff]  }
 0x3c2   :  { %7235 = vmatmul.mubr.bf16.vlgmr.msra.gmra.mrb[0].mxu0 %v8316_v39  ;;  %8051 = vmatmul.mubr.bf16.vlgmr.msra.gmra.mrb[0].mxu1 %v8316_v39  ;;  %v11175_v39 = vld [vmem:[%s14623_s1 + $0x1fc8] ss:$16 sps:$4 sm:$0xff]  }
 0x3c3   :  { %7254 = vmatpush1.bf16.msra.mxu0 %v11086_v41  ;;  %8070 = vmatpush1.bf16.msra.mxu1 %v11089_v42  ;;  %v11183_v41 = vld [vmem:[%s14623_s1 + $0x1fec] ss:$16 sps:$4 sm:$0xff]   ;;  %v11178_v42 = vld [vmem:[%s14623_s1 + $0x1fe0] ss:$16 sps:$4 sm:$0xff]  }
 0x3c4   :  { %7255 = vmatprep.subr.bf16.mxu0 %v11094_v43  ;;  %8071 = vmatprep.subr.bf16.mxu1 %v11097_v46  ;;  %v11181_v43 = vld [vmem:[%s14623_s1 + $0x1fe8] ss:$16 sps:$4 sm:$0xff]  }
 0x3c5   :  { %7244 = vmatprep.mubr.bf16.mxu0 %v8349_v44  ;;  %8060 = vmatprep.mubr.bf16.mxu1 %v8349_v44  ;;  %v71_v46 = vld [vmem:[%s14624_s0 + $0x178] sm:$0xff]  ;;  %v8318_v44 = vcombine.low %v14373_v53, %v14378_v51  ;;  %v11187_v53 = vmov 1966171168  }
 0x3c6   :  { %v8172_v51 = vunpack.c.l.s4 %v11187_v53 }
 0x3c7   :  { %7256 = vmatpush1.bf16.msra.mxu0 %v11092_v45  ;;  %8072 = vmatpush1.bf16.msra.mxu1 %v11095_v47  ;;  %v8351_v45 = vcombine.high %v71_v46, %v71_v46  ;;  %v8350_v47 = vcombine.low %v71_v46, %v71_v46 }
 0x3c8   :  { %7257 = vmatprep.subr.bf16.mxu0 %v11100_v48  ;;  %8073 = vmatprep.subr.bf16.mxu1 %v11103_v49  ;;  %v18_v48 = vlaneseq }
 0x3ca   :  { %7245 = vmatmul.mubr.bf16.gmra.mrb[4].mxu0 %v8348_v50  ;;  %8061 = vmatmul.mubr.bf16.gmra.mrb[4].mxu1 %v8348_v50  ;;  %vm14549_vm0 = vcmp.lt.s32.totalorder %v18_v48, 512  ;;  %v11186_v50 = vmov 0.0  }
 0x3cb   :  { %7258 = vmatpush1.bf16.msra.mxu0 %v11098_v52  ;;  %8074 = vmatpush1.bf16.msra.mxu1 %v11101_v54  ;;  %22 = vst.msk [vmem:[%s14625_s3] sm:$0xf] %vm14549_vm0, %v11186_v50  ;;  %23 = vst.msk [vmem:[%s14626_s4] sm:$0xf] %vm14549_vm0, %v11186_v50 }
 0x3cc   :  { %7259 = vmatprep.subr.bf16.mxu0 %v11106_v55  ;;  %8075 = vmatprep.subr.bf16.mxu1 %v11109_v56 }
 0x3cd   :  { %7285 = vmatprep.mubr.bf16.mxu0 %v8319_v57  ;;  %8101 = vmatprep.mubr.bf16.mxu1 %v8319_v57  ;;  %v8173_v57 = vunpack.c.0.s8 %v8172_v51 }
 0x3cf   :  { %7260 = vmatpush1.bf16.msra.mxu0 %v11104_v60  ;;  %8076 = vmatpush1.bf16.msra.mxu1 %v11107_v58  ;;  %v8175_v60 = vshrl.u32 %v18_v48, 7 }
 0x3d0   :  { %7261 = vmatprep.subr.bf16.mxu0 %v11112_v59  ;;  %8077 = vmatprep.subr.bf16.mxu1 %v11115_v61 }
 0x3d3   :  { %7262 = vmatpush1.bf16.msra.mxu0 %v11110_v62  ;;  %8078 = vmatpush1.bf16.msra.mxu1 %v11113_v63 }
 0x3d4   :  { %7263 = vmatprep.subr.bf16.mxu0 %v11118_v0  ;;  %8079 = vmatprep.subr.bf16.mxu1 %v11121_v3 }
 0x3d7   :  { %7264 = vmatpush1.bf16.msra.mxu0 %v11116_v1  ;;  %8080 = vmatpush1.bf16.msra.mxu1 %v11119_v2 }
 0x3d8   :  { %7265 = vmatprep.subr.bf16.mxu0 %v11124_v4  ;;  %8081 = vmatprep.subr.bf16.mxu1 %v11127_v5 }
 0x3db   :  { %7266 = vmatpush1.bf16.msra.mxu0 %v11122_v6  ;;  %8082 = vmatpush1.bf16.msra.mxu1 %v11125_v7 }
 0x3dc   :  { %7267 = vmatprep.subr.bf16.mxu0 %v11130_v8  ;;  %8083 = vmatprep.subr.bf16.mxu1 %v11133_v9 }
 0x3df   :  { %7268 = vmatpush1.bf16.msra.mxu0 %v11128_v10  ;;  %8084 = vmatpush1.bf16.msra.mxu1 %v11131_v11 }
 0x3e0   :  { %7269 = vmatprep.subr.bf16.mxu0 %v11136_v12  ;;  %8085 = vmatprep.subr.bf16.mxu1 %v11139_v13 }
 0x3e3   :  { %7270 = vmatpush1.bf16.msra.mxu0 %v11134_v14  ;;  %8086 = vmatpush1.bf16.msra.mxu1 %v11137_v15 }
 0x3e4   :  { %7271 = vmatprep.subr.bf16.mxu0 %v11142_v16  ;;  %8087 = vmatprep.subr.bf16.mxu1 %v11145_v17  ;;  %v14587_v17 = vsub.s32 %v8173_v57, %v8175_v60 }
 0x3e7   :  { %7272 = vmatpush1.bf16.msra.mxu0 %v11140_v18  ;;  %8088 = vmatpush1.bf16.msra.mxu1 %v11143_v19 }
 0x3e8   :  { %7273 = vmatprep.subr.bf16.mxu0 %v11148_v20  ;;  %8089 = vmatprep.subr.bf16.mxu1 %v11151_v21 }
 0x3eb   :  { %7274 = vmatpush1.bf16.msra.mxu0 %v11146_v22  ;;  %8090 = vmatpush1.bf16.msra.mxu1 %v11149_v23 }
 0x3ec   :  { %7275 = vmatprep.subr.bf16.mxu0 %v11154_v24  ;;  %8091 = vmatprep.subr.bf16.mxu1 %v11157_v25 }
 0x3ef   :  { %7276 = vmatpush1.bf16.msra.mxu0 %v11152_v26  ;;  %8092 = vmatpush1.bf16.msra.mxu1 %v11155_v27 }
 0x3f0   :  { %7277 = vmatprep.subr.bf16.mxu0 %v11160_v28  ;;  %8093 = vmatprep.subr.bf16.mxu1 %v11163_v29 }
 0x3f3   :  { %7278 = vmatpush1.bf16.msra.mxu0 %v11158_v30  ;;  %8094 = vmatpush1.bf16.msra.mxu1 %v11161_v31 }
 0x3f4   :  { %7279 = vmatprep.subr.bf16.mxu0 %v11166_v32  ;;  %8095 = vmatprep.subr.bf16.mxu1 %v11169_v33 }
 0x3f7   :  { %7280 = vmatpush1.bf16.msra.mxu0 %v11164_v34  ;;  %8096 = vmatpush1.bf16.msra.mxu1 %v11167_v35 }
 0x3f8   :  { %7281 = vmatprep.subr.bf16.mxu0 %v11174_v36  ;;  %8097 = vmatprep.subr.bf16.mxu1 %v11177_v37 }
 0x3fb   :  { %7282 = vmatpush1.bf16.msra.mxu0 %v11172_v38  ;;  %8098 = vmatpush1.bf16.msra.mxu1 %v11175_v39 }
 0x3fc   :  { %7283 = vmatprep.subr.bf16.mxu0 %v11180_v40  ;;  %8099 = vmatprep.subr.bf16.mxu1 %v11183_v41 }
 0x3ff   :  { %7284 = vmatpush1.bf16.msra.mxu0 %v11178_v42  ;;  %8100 = vmatpush1.bf16.msra.mxu1 %v11181_v43 }
 0x402   :  { %7286 = vmatmul.mubr.bf16.vlgmr.msra.gmra.mrb[0].mxu0 %v8318_v44  ;;  %8102 = vmatmul.mubr.bf16.vlgmr.msra.gmra.mrb[0].mxu1 %v8318_v44 }
 0x403   :  { %7295 = vmatprep.mubr.bf16.mxu0 %v8351_v45  ;;  %8111 = vmatprep.mubr.bf16.mxu1 %v8351_v45 }
 0x40a   :  { %7296 = vmatmul.mubr.bf16.gmra.mrb[4].mxu0 %v8350_v47  ;;  %8112 = vmatmul.mubr.bf16.gmra.mrb[4].mxu1 %v8350_v47 }
 0x4d5   :  { %v7287_v52 = vpop.f32.mrb[0].mxu0  ;;  %v8103_v54 = vpop.f32.mrb[0].mxu1 }
 0x4d6   :  { %8120 = vst [vmem:[%s14627_s2] sm:$0xff] %v7287_v52  ;;  %8122 = vst [vmem:[%s14627_s2 + $0x10] sm:$0xff] %v8103_v54  ;;  %v7289_v55 = vpop.f32.mrb[1].mxu0  ;;  %v8105_v56 = vpop.f32.mrb[1].mxu1  ;;  %v8201_v58 = vmul.f32 %v7287_v52, %v7287_v52  ;;  %v8203_v59 = vmul.f32 %v8103_v54, %v8103_v54 }
 0x4d7   :  { %8121 = vst [vmem:[%s14627_s2 + $0x8] sm:$0xff] %v7289_v55  ;;  %v8202_v61 = vmul.f32 %v7289_v55, %v7289_v55  ;;  %8123 = vst [vmem:[%s14627_s2 + $0x18] sm:$0xff] %v8105_v56  ;;  %v8204_v62 = vmul.f32 %v8105_v56, %v8105_v56  ;;  %v7291_v63 = vpop.f32.mrb[2].mxu0  ;;  %v8107_v0 = vpop.f32.mrb[2].mxu1 }
 0x4d8   :  { %8124 = vst [vmem:[%s14627_s2 + $0x20] sm:$0xff] %v7291_v63  ;;  %v8133_v3 = vadd.f32 %v7291_v63, %v7287_v52  ;;  %v8205_v1 = vmul.f32 %v7291_v63, %v7291_v63  ;;  %8126 = vst [vmem:[%s14627_s2 + $0x30] sm:$0xff] %v8107_v0  ;;  %v8149_v2 = vadd.f32 %v8107_v0, %v8103_v54  ;;  %v7293_v5 = vpop.f32.mrb[3].mxu0  ;;  %v8109_v6 = vpop.f32.mrb[3].mxu1 }
 0x4d9   :  { %v8207_v4 = vmul.f32 %v8107_v0, %v8107_v0  ;;  %8125 = vst [vmem:[%s14627_s2 + $0x28] sm:$0xff] %v7293_v5  ;;  %v8141_v7 = vadd.f32 %v7293_v5, %v7289_v55  ;;  %v8206_v8 = vmul.f32 %v7293_v5, %v7293_v5  ;;  %8127 = vst [vmem:[%s14627_s2 + $0x38] sm:$0xff] %v8109_v6 }
 0x4da   :  { %v8157_v9 = vadd.f32 %v8109_v6, %v8105_v56  ;;  %v8208_v10 = vmul.f32 %v8109_v6, %v8109_v6  ;;  %v8213_v11 = vadd.f32 %v8205_v1, %v8201_v58 }
 0x4db   :  { %v8229_v12 = vadd.f32 %v8207_v4, %v8203_v59  ;;  %v8221_v13 = vadd.f32 %v8206_v8, %v8202_v61 }
 0x4dc   :  { %v8237_v14 = vadd.f32 %v8208_v10, %v8204_v62 }
 0x4dd   :  { %v7297_v15 = vpop.f32.mrb[4].mxu0  ;;  %v8113_v16 = vpop.f32.mrb[4].mxu1 }
 0x4de   :  { %8128 = vst [vmem:[%s14627_s2 + $0x40] sm:$0xff] %v7297_v15  ;;  %v8134_v18 = vadd.f32 %v8133_v3, %v7297_v15  ;;  %v8209_v19 = vmul.f32 %v7297_v15, %v7297_v15  ;;  %8130 = vst [vmem:[%s14627_s2 + $0x50] sm:$0xff] %v8113_v16  ;;  %v8150_v20 = vadd.f32 %v8149_v2, %v8113_v16  ;;  %v7299_v22 = vpop.f32.mrb[5].mxu0  ;;  %v8115_v23 = vpop.f32.mrb[5].mxu1 }
 0x4df   :  { %v8211_v21 = vmul.f32 %v8113_v16, %v8113_v16  ;;  %8129 = vst [vmem:[%s14627_s2 + $0x48] sm:$0xff] %v7299_v22  ;;  %v8142_v24 = vadd.f32 %v8141_v7, %v7299_v22  ;;  %v8210_v25 = vmul.f32 %v7299_v22, %v7299_v22  ;;  %8131 = vst [vmem:[%s14627_s2 + $0x58] sm:$0xff] %v8115_v23  ;;  %v7301_v28 = vpop.f32.mrb[6].mxu0  ;;  %v8117_v29 = vpop.f32.mrb[6].mxu1 }
 0x4e0   :  { %v8158_v26 = vadd.f32 %v8157_v9, %v8115_v23  ;;  %v8212_v27 = vmul.f32 %v8115_v23, %v8115_v23  ;;  %v8135_v30 = vrot.slane %v8134_v18, 4  ;;  %v8214_v31 = vadd.f32 %v8213_v11, %v8209_v19  ;;  %v7302_v34 = vpop.f32.mrb[7].mxu0  ;;  %v8118_v35 = vpop.f32.mrb[7].mxu1 }
 0x4e1   :  { %v8151_v32 = vrot.slane %v8150_v20, 4  ;;  %v8230_v33 = vadd.f32 %v8229_v12, %v8211_v21  ;;  %v8143_v36 = vrot.slane %v8142_v24, 4  ;;  %v8222_v37 = vadd.f32 %v8221_v13, %v8210_v25  ;;  %v8200_v34 = vld [vmem:[%s14626_s4] sm:$0xf] }
 0x4e2   :  { %v8159_v38 = vrot.slane %v8158_v26, 4  ;;  %v8238_v39 = vadd.f32 %v8237_v14, %v8212_v27  ;;  %v8136_v40 = vadd.f32 %v8135_v30, %v8134_v18  ;;  %v8215_v41 = vrot.slane %v8214_v31, 4 }
 0x4e3   :  { %v8152_v42 = vadd.f32 %v8151_v32, %v8150_v20  ;;  %v8231_v43 = vrot.slane %v8230_v33, 4  ;;  %v8144_v46 = vadd.f32 %v8143_v36, %v8142_v24  ;;  %v8223_v44 = vrot.slane %v8222_v37, 4 }
 0x4e4   :  { %v8160_v45 = vadd.f32 %v8159_v38, %v8158_v26  ;;  %v8239_v47 = vrot.slane %v8238_v39, 4  ;;  %v8137_v48 = vrot.slane %v8136_v40, 2  ;;  %v8216_v50 = vadd.f32 %v8215_v41, %v8214_v31  ;;  %v8132_v31 = vld [vmem:[%s14625_s3] sm:$0xf] }
 0x4e5   :  { %v8153_v53 = vrot.slane %v8152_v42, 2  ;;  %v8232_v51 = vadd.f32 %v8231_v43, %v8230_v33  ;;  %v8145_v52 = vrot.slane %v8144_v46, 2  ;;  %v8224_v54 = vadd.f32 %v8223_v44, %v8222_v37 }
 0x4e6   :  { %v8161_v55 = vrot.slane %v8160_v45, 2  ;;  %v8240_v56 = vadd.f32 %v8239_v47, %v8238_v39  ;;  %v8138_v57 = vadd.f32 %v8137_v48, %v8136_v40  ;;  %v8217_v60 = vrot.slane %v8216_v50, 2 }
 0x4e7   :  { %v8154_v58 = vadd.f32 %v8153_v53, %v8152_v42  ;;  %v8233_v59 = vrot.slane %v8232_v51, 2  ;;  %v8146_v61 = vadd.f32 %v8145_v52, %v8144_v46  ;;  %v8225_v62 = vrot.slane %v8224_v54, 2 }
 0x4e8   :  { %v8162_v63 = vadd.f32 %v8161_v55, %v8160_v45  ;;  %v8241_v0 = vrot.slane %v8240_v56, 2  ;;  %v8139_v3 = vrot.slane %v8138_v57, 1  ;;  %v8218_v1 = vadd.f32 %v8217_v60, %v8216_v50 }
 0x4e9   :  { %v8155_v2 = vrot.slane %v8154_v58, 1  ;;  %v8234_v4 = vadd.f32 %v8233_v59, %v8232_v51  ;;  %v8147_v5 = vrot.slane %v8146_v61, 1  ;;  %v8226_v6 = vadd.f32 %v8225_v62, %v8224_v54 }
 0x4ea   :  { %v8163_v7 = vrot.slane %v8162_v63, 1  ;;  %v8242_v8 = vadd.f32 %v8241_v0, %v8240_v56  ;;  %v8140_v9 = vadd.f32 %v8139_v3, %v8138_v57  ;;  %v8219_v10 = vrot.slane %v8218_v1, 1 }
 0x4eb   :  { %v8156_v11 = vadd.f32 %v8155_v2, %v8154_v58  ;;  %v8235_v12 = vrot.slane %v8234_v4, 1  ;;  %v8148_v13 = vadd.f32 %v8147_v5, %v8146_v61  ;;  %v8227_v14 = vrot.slane %v8226_v6, 1 }
 0x4ec   :  { %v8164_v15 = vadd.f32 %v8163_v7, %v8162_v63  ;;  %v8243_v16 = vrot.slane %v8242_v8, 1  ;;  %v8220_v18 = vadd.f32 %v8219_v10, %v8218_v1 }
 0x4ed   :  { %v8236_v19 = vadd.f32 %v8235_v12, %v8234_v4  ;;  %v8169_v20 = vcombine.low %v8140_v9, %v8148_v13  ;;  %v8228_v21 = vadd.f32 %v8227_v14, %v8226_v6 }
 0x4ee   :  { %v8170_v22 = vcombine.low %v8156_v11, %v8164_v15  ;;  %v8244_v23 = vadd.f32 %v8243_v16, %v8242_v8 }
 0x4ef   :  { %v8177_v24 = vrot.slane %v8169_v20, %v14587_v17  ;;  %v8249_v25 = vcombine.low %v8220_v18, %v8228_v21 }
 0x4f0   :  { %v8184_v26 = vrot.slane %v8170_v22, %v14587_v17  ;;  %v8250_v27 = vcombine.low %v8236_v19, %v8244_v23 }
 0x4f1   :  { %v8257_v28 = vrot.slane %v8249_v25, %v14587_v17 }
 0x4f2   :  { %v8185_v29 = vcombine.low %v8177_v24, %v8184_v26  ;;  %v8264_v30 = vrot.slane %v8250_v27, %v14587_v17 }
 0x4f4   :  { %v8192_v32 = vrot.slane %v8185_v29, %v14587_v17  ;;  %v8265_v33 = vcombine.low %v8257_v28, %v8264_v30 }
 0x4f6   :  { %v8194_v35 = vadd.f32 %v8192_v32, %v8132_v31  ;;  %v8272_v36 = vrot.slane %v8265_v33, %v14587_v17 }
 0x4f8   :  { %8199 = vst.msk [vmem:[%s14625_s3] sm:$0xf] %vm14549_vm0, %v8194_v35  ;;  %v8274_v37 = vadd.f32 %v8272_v36, %v8200_v34 }
 0x4fa   :  { %8275 = vst.msk [vmem:[%s14626_s4] sm:$0xf] %vm14549_vm0, %v8274_v37 }

// kernel: nlayer_discriminator_forward.15
= control target key start
LH: loop header
LB: loop body
LE: loop exit
PB: predicated region body
PF: predicated region fallthrough
CT: control target
= control target key end

     0   :  { %vm5656_vm0 = vcmask 7168   ;;  %s9201_s1 = inlined_call_operand.vmem [shape: bf16[8192,1], index: 1, kind: input, shape index: {}]   ;;  %s9202_s0 = inlined_call_operand.vmem [shape: bf16[8,8192], index: 0, kind: input, shape index: {}]   ;;  %s9203_s2 = inlined_call_operand.<no memory space> [shape: f32[1,1], index: 2, kind: input, shape index: {}]   ;;  %s9204_s3 = inlined_call_operand.vmem [shape: f32[8,1], index: 3, kind: output, shape index: {}]  }
   0x1   :  { %v6943_v0 = vld [vmem:[%s9201_s1 + $0x40] sm:$0xff]   ;;  %v6947_v4 = vld [vmem:[%s9201_s1 + $0x48] sm:$0xff]   ;;  %v6951_v8 = vld [vmem:[%s9201_s1 + $0x50] sm:$0xff]  }
   0x2   :  { %v6944_v1 = vld [vmem:[%s9201_s1 + $0xc0] sm:$0xff]   ;;  %6239 = vmatprep.subr.bf16.mxu0 %v6943_v0  ;;  %v6948_v5 = vld [vmem:[%s9201_s1 + $0xc8] sm:$0xff]   ;;  %v6952_v9 = vld [vmem:[%s9201_s1 + $0xd0] sm:$0xff]  }
   0x3   :  { %v6945_v2 = vld [vmem:[%s9201_s1] sm:$0xff]   ;;  %6261 = vmatprep.subr.bf16.mxu1 %v6944_v1  ;;  %v6949_v6 = vld [vmem:[%s9201_s1 + $0x8] sm:$0xff]   ;;  %v6953_v10 = vld [vmem:[%s9201_s1 + $0x10] sm:$0xff]  }
   0x4   :  { %v6946_v3 = vld [vmem:[%s9201_s1 + $0x80] sm:$0xff]   ;;  %6240 = vmatpush3.bf16.msra.mxu0 %v6945_v2  ;;  %v6950_v7 = vld [vmem:[%s9201_s1 + $0x88] sm:$0xff]   ;;  %v6954_v11 = vld [vmem:[%s9201_s1 + $0x90] sm:$0xff]  }
   0x5   :  { %6262 = vmatpush3.bf16.msra.mxu1 %v6946_v3  ;;  %6241 = vmatprep.subr.bf16.mxu0 %v6947_v4  ;;  %v6955_v12 = vld [vmem:[%s9201_s1 + $0x58] sm:$0xff]   ;;  %v6959_v16 = vld [vmem:[%s9201_s1 + $0x60] sm:$0xff]   ;;  %v6963_v20 = vld [vmem:[%s9201_s1 + $0x68] sm:$0xff]  }
   0x6   :  { %6263 = vmatprep.subr.bf16.mxu1 %v6948_v5  ;;  %v6956_v13 = vld [vmem:[%s9201_s1 + $0xd8] sm:$0xff]   ;;  %v6960_v17 = vld [vmem:[%s9201_s1 + $0xe0] sm:$0xff]   ;;  %v6964_v21 = vld [vmem:[%s9201_s1 + $0xe8] sm:$0xff]  }
   0x7   :  { %v6957_v14 = vld [vmem:[%s9201_s1 + $0x18] sm:$0xff]   ;;  %v6961_v18 = vld [vmem:[%s9201_s1 + $0x20] sm:$0xff]   ;;  %v6965_v22 = vld [vmem:[%s9201_s1 + $0x28] sm:$0xff]  }
   0x8   :  { %6242 = vmatpush3.bf16.msra.mxu0 %v6949_v6  ;;  %v6958_v15 = vld [vmem:[%s9201_s1 + $0x98] sm:$0xff]   ;;  %v6962_v19 = vld [vmem:[%s9201_s1 + $0xa0] sm:$0xff]   ;;  %v6966_v23 = vld [vmem:[%s9201_s1 + $0xa8] sm:$0xff]  }
   0x9   :  { %6264 = vmatpush3.bf16.msra.mxu1 %v6950_v7  ;;  %6243 = vmatprep.subr.bf16.mxu0 %v6951_v8  ;;  %v6967_v24 = vld [vmem:[%s9201_s1 + $0x70] sm:$0xff]   ;;  %v6971_v28 = vld [vmem:[%s9201_s1 + $0x78] sm:$0xff]   ;;  %v17_v32 = vld [vmem:[%s9202_s0] sm:$0xff] }
   0xa   :  { %6265 = vmatprep.subr.bf16.mxu1 %v6952_v9  ;;  %v6968_v25 = vld [vmem:[%s9201_s1 + $0xf0] sm:$0xff]   ;;  %v6972_v29 = vld [vmem:[%s9201_s1 + $0xf8] sm:$0xff]   ;;  %v18_v33 = vld [vmem:[%s9202_s0 + $0x8] sm:$0xff]  ;;  %v5663_v34 = vcombine.low %v17_v32, %v17_v32  ;;  %v5664_v35 = vcombine.high %v17_v32, %v17_v32 }
   0xb   :  { %v6969_v26 = vld [vmem:[%s9201_s1 + $0x30] sm:$0xff]   ;;  %v6973_v30 = vld [vmem:[%s9201_s1 + $0x38] sm:$0xff]   ;;  %v5665_v36 = vcombine.low %v18_v33, %v18_v33  ;;  %v5666_v37 = vcombine.high %v18_v33, %v18_v33  ;;  %v6979_v38 = vld [vmem:[%s9201_s1 + $0x140] sm:$0xff]  }
   0xc   :  { %6244 = vmatpush3.bf16.msra.mxu0 %v6953_v10  ;;  %v6970_v27 = vld [vmem:[%s9201_s1 + $0xb0] sm:$0xff]   ;;  %v6974_v31 = vld [vmem:[%s9201_s1 + $0xb8] sm:$0xff]   ;;  %v6980_v39 = vld [vmem:[%s9201_s1 + $0x1c0] sm:$0xff]   ;;  %4408 = vmatprep.mubr.bf16.mxu0 %v5664_v35 }
   0xd   :  { %6266 = vmatpush3.bf16.msra.mxu1 %v6954_v11  ;;  %6245 = vmatprep.subr.bf16.mxu0 %v6955_v12  ;;  %v6981_v40 = vld [vmem:[%s9201_s1 + $0x100] sm:$0xff]   ;;  %v6983_v42 = vld [vmem:[%s9201_s1 + $0x148] sm:$0xff]   ;;  %v6987_v46 = vld [vmem:[%s9201_s1 + $0x150] sm:$0xff]  }
   0xe   :  { %6267 = vmatprep.subr.bf16.mxu1 %v6956_v13  ;;  %4448 = vmatprep.mubr.bf16.mxu1 %v5666_v37  ;;  %v6982_v41 = vld [vmem:[%s9201_s1 + $0x180] sm:$0xff]   ;;  %v6984_v43 = vld [vmem:[%s9201_s1 + $0x1c8] sm:$0xff]   ;;  %v6988_v47 = vld [vmem:[%s9201_s1 + $0x1d0] sm:$0xff]  }
   0xf   :  { %v6985_v44 = vld [vmem:[%s9201_s1 + $0x108] sm:$0xff]   ;;  %v6989_v48 = vld [vmem:[%s9201_s1 + $0x110] sm:$0xff]   ;;  %v6991_v50 = vld [vmem:[%s9201_s1 + $0x158] sm:$0xff]  }
  0x10   :  { %6246 = vmatpush3.bf16.msra.mxu0 %v6957_v14  ;;  %v6986_v45 = vld [vmem:[%s9201_s1 + $0x188] sm:$0xff]   ;;  %v6990_v49 = vld [vmem:[%s9201_s1 + $0x190] sm:$0xff]   ;;  %v6992_v51 = vld [vmem:[%s9201_s1 + $0x1d8] sm:$0xff]  }
  0x11   :  { %6268 = vmatpush3.bf16.msra.mxu1 %v6958_v15  ;;  %6247 = vmatprep.subr.bf16.mxu0 %v6959_v16  ;;  %v6993_v52 = vld [vmem:[%s9201_s1 + $0x118] sm:$0xff]   ;;  %v6995_v54 = vld [vmem:[%s9201_s1 + $0x160] sm:$0xff]   ;;  %v6999_v58 = vld [vmem:[%s9201_s1 + $0x168] sm:$0xff]  }
  0x12   :  { %6269 = vmatprep.subr.bf16.mxu1 %v6960_v17  ;;  %v6994_v53 = vld [vmem:[%s9201_s1 + $0x198] sm:$0xff]   ;;  %v6996_v55 = vld [vmem:[%s9201_s1 + $0x1e0] sm:$0xff]   ;;  %v7000_v59 = vld [vmem:[%s9201_s1 + $0x1e8] sm:$0xff]  }
  0x13   :  { %v6997_v56 = vld [vmem:[%s9201_s1 + $0x120] sm:$0xff]   ;;  %v7001_v60 = vld [vmem:[%s9201_s1 + $0x128] sm:$0xff]   ;;  %v7003_v62 = vld [vmem:[%s9201_s1 + $0x170] sm:$0xff]  }
  0x14   :  { %6248 = vmatpush3.bf16.msra.mxu0 %v6961_v18  ;;  %v6998_v57 = vld [vmem:[%s9201_s1 + $0x1a0] sm:$0xff]   ;;  %v7002_v61 = vld [vmem:[%s9201_s1 + $0x1a8] sm:$0xff]   ;;  %v7004_v63 = vld [vmem:[%s9201_s1 + $0x1f0] sm:$0xff]  }
  0x15   :  { %6270 = vmatpush3.bf16.msra.mxu1 %v6962_v19  ;;  %6249 = vmatprep.subr.bf16.mxu0 %v6963_v20  ;;  %v7005_v0 = vld [vmem:[%s9201_s1 + $0x130] sm:$0xff]   ;;  %v7007_v2 = vld [vmem:[%s9201_s1 + $0x178] sm:$0xff]   ;;  %v7015_v12 = vld [vmem:[%s9201_s1 + $0x240] sm:$0xff]  }
  0x16   :  { %6271 = vmatprep.subr.bf16.mxu1 %v6964_v21  ;;  %v7006_v1 = vld [vmem:[%s9201_s1 + $0x1b0] sm:$0xff]   ;;  %v7008_v3 = vld [vmem:[%s9201_s1 + $0x1f8] sm:$0xff]   ;;  %v7016_v13 = vld [vmem:[%s9201_s1 + $0x2c0] sm:$0xff]  }
  0x17   :  { %v7009_v4 = vld [vmem:[%s9201_s1 + $0x138] sm:$0xff]   ;;  %v19_v6 = vld [vmem:[%s9202_s0 + $0x10] sm:$0xff]  ;;  %v7017_v14 = vld [vmem:[%s9201_s1 + $0x200] sm:$0xff]  }
  0x18   :  { %6250 = vmatpush3.bf16.msra.mxu0 %v6965_v22  ;;  %v7010_v5 = vld [vmem:[%s9201_s1 + $0x1b8] sm:$0xff]   ;;  %v5667_v7 = vcombine.low %v19_v6, %v19_v6  ;;  %v5668_v8 = vcombine.high %v19_v6, %v19_v6  ;;  %v7018_v15 = vld [vmem:[%s9201_s1 + $0x280] sm:$0xff]   ;;  %v7019_v16 = vld [vmem:[%s9201_s1 + $0x248] sm:$0xff]  }
  0x19   :  { %6272 = vmatpush3.bf16.msra.mxu1 %v6966_v23  ;;  %6251 = vmatprep.subr.bf16.mxu0 %v6967_v24  ;;  %v20_v9 = vld [vmem:[%s9202_s0 + $0x18] sm:$0xff]  ;;  %v7020_v17 = vld [vmem:[%s9201_s1 + $0x2c8] sm:$0xff]   ;;  %v7023_v20 = vld [vmem:[%s9201_s1 + $0x250] sm:$0xff]  }
  0x1a   :  { %6273 = vmatprep.subr.bf16.mxu1 %v6968_v25  ;;  %v5669_v10 = vcombine.low %v20_v9, %v20_v9  ;;  %v5670_v11 = vcombine.high %v20_v9, %v20_v9  ;;  %v7021_v18 = vld [vmem:[%s9201_s1 + $0x208] sm:$0xff]   ;;  %v7024_v21 = vld [vmem:[%s9201_s1 + $0x2d0] sm:$0xff]   ;;  %v7027_v24 = vld [vmem:[%s9201_s1 + $0x258] sm:$0xff]  }
  0x1b   :  { %v7022_v19 = vld [vmem:[%s9201_s1 + $0x288] sm:$0xff]   ;;  %v7025_v22 = vld [vmem:[%s9201_s1 + $0x210] sm:$0xff]   ;;  %v7028_v25 = vld [vmem:[%s9201_s1 + $0x2d8] sm:$0xff]  }
  0x1c   :  { %6252 = vmatpush3.bf16.msra.mxu0 %v6969_v26  ;;  %v7026_v23 = vld [vmem:[%s9201_s1 + $0x290] sm:$0xff]   ;;  %v7029_v26 = vld [vmem:[%s9201_s1 + $0x218] sm:$0xff]   ;;  %v7035_v32 = vld [vmem:[%s9201_s1 + $0x268] sm:$0xff]  }
  0x1d   :  { %6274 = vmatpush3.bf16.msra.mxu1 %v6970_v27  ;;  %6253 = vmatprep.subr.bf16.mxu0 %v6971_v28  ;;  %v7030_v27 = vld [vmem:[%s9201_s1 + $0x298] sm:$0xff]   ;;  %v7031_v28 = vld [vmem:[%s9201_s1 + $0x260] sm:$0xff]   ;;  %v7036_v33 = vld [vmem:[%s9201_s1 + $0x2e8] sm:$0xff]  }
  0x1e   :  { %6275 = vmatprep.subr.bf16.mxu1 %v6972_v29  ;;  %v7032_v29 = vld [vmem:[%s9201_s1 + $0x2e0] sm:$0xff]   ;;  %v7038_v35 = vld [vmem:[%s9201_s1 + $0x2a8] sm:$0xff]   ;;  %v7040_v37 = vld [vmem:[%s9201_s1 + $0x2f0] sm:$0xff]  }
  0x1f   :  { %v7071_v6 = vld [vmem:[%s9201_s1 + $0x368] sm:$0xff]  }
  0x20   :  { %6254 = vmatpush3.bf16.msra.mxu0 %v6973_v30  ;;  %v7033_v30 = vld [vmem:[%s9201_s1 + $0x220] sm:$0xff]   ;;  %v7073_v9 = vld [vmem:[%s9201_s1 + $0x328] sm:$0xff]  }
  0x21   :  { %6276 = vmatpush3.bf16.msra.mxu1 %v6974_v31  ;;  %6283 = vmatprep.subr.bf16.mxu0 %v6979_v38  ;;  %v7034_v31 = vld [vmem:[%s9201_s1 + $0x2a0] sm:$0xff]   ;;  %v7041_v38 = vld [vmem:[%s9201_s1 + $0x230] sm:$0xff]  }
  0x22   :  { %6305 = vmatprep.subr.bf16.mxu1 %v6980_v39  ;;  %v7042_v39 = vld [vmem:[%s9201_s1 + $0x2b0] sm:$0xff]  }
  0x23   :  { %4409 = vmatmul.mubr.bf16.vlgmr.msra.gmra.mrb[0].mxu0 %v5663_v34  ;;  %v7037_v34 = vld [vmem:[%s9201_s1 + $0x228] sm:$0xff]  }
  0x24   :  { %4449 = vmatmul.mubr.bf16.vlgmr.msra.gmra.mrb[0].mxu1 %v5665_v36  ;;  %6284 = vmatpush3.bf16.msra.mxu0 %v6981_v40  ;;  %v7039_v36 = vld [vmem:[%s9201_s1 + $0x270] sm:$0xff]   ;;  %v7043_v40 = vld [vmem:[%s9201_s1 + $0x278] sm:$0xff]  }
  0x25   :  { %6306 = vmatpush3.bf16.msra.mxu1 %v6982_v41  ;;  %6285 = vmatprep.subr.bf16.mxu0 %v6983_v42  ;;  %v7044_v41 = vld [vmem:[%s9201_s1 + $0x2f8] sm:$0xff]  }
  0x26   :  { %6307 = vmatprep.subr.bf16.mxu1 %v6984_v43  ;;  %4488 = vmatprep.mubr.bf16.mxu0 %v5668_v8  ;;  %v7045_v42 = vld [vmem:[%s9201_s1 + $0x238] sm:$0xff]   ;;  %v8_v8 = vstv %s9203_s2 }
  0x27   :  { %4528 = vmatprep.mubr.bf16.mxu1 %v5670_v11  ;;  %v7046_v43 = vld [vmem:[%s9201_s1 + $0x2b8] sm:$0xff]   ;;  %9 = vst [vmem:[#allocation2] sm:$0x1] %v8_v8  ;;  %v7075_v11 = vld [vmem:[%s9201_s1 + $0x370] sm:$0xff]  }
  0x28   :  { %6286 = vmatpush3.bf16.msra.mxu0 %v6985_v44  ;;  %v21_v44 = vld [vmem:[%s9202_s0 + $0x20] sm:$0xff]  ;;  %v7132_v8 = vld [vmem:[%s9201_s1 + $0x5d0] sm:$0xff]  }
  0x29   :  { %6308 = vmatpush3.bf16.msra.mxu1 %v6986_v45  ;;  %6287 = vmatprep.subr.bf16.mxu0 %v6987_v46  ;;  %v22_v45 = vld [vmem:[%s9202_s0 + $0x28] sm:$0xff]  ;;  %v5671_v46 = vcombine.low %v21_v44, %v21_v44 }
  0x2a   :  { %6309 = vmatprep.subr.bf16.mxu1 %v6988_v47  ;;  %v5672_v47 = vcombine.high %v21_v44, %v21_v44  ;;  %v7106_v44 = vld [vmem:[%s9201_s1 + $0x4a0] sm:$0xff]  }
  0x2c   :  { %6288 = vmatpush3.bf16.msra.mxu0 %v6989_v48  ;;  %v5673_v48 = vcombine.low %v22_v45, %v22_v45 }
  0x2d   :  { %6310 = vmatpush3.bf16.msra.mxu1 %v6990_v49  ;;  %6289 = vmatprep.subr.bf16.mxu0 %v6991_v50  ;;  %v5674_v49 = vcombine.high %v22_v45, %v22_v45  ;;  %v7051_v50 = vld [vmem:[%s9201_s1 + $0x340] sm:$0xff]   ;;  %v7107_v45 = vld [vmem:[%s9201_s1 + $0x468] sm:$0xff]  }
  0x2e   :  { %6311 = vmatprep.subr.bf16.mxu1 %v6992_v51  ;;  %v7052_v51 = vld [vmem:[%s9201_s1 + $0x3c0] sm:$0xff]  }
  0x30   :  { %6290 = vmatpush3.bf16.msra.mxu0 %v6993_v52  ;;  %v7053_v52 = vld [vmem:[%s9201_s1 + $0x300] sm:$0xff]  }
  0x31   :  { %6312 = vmatpush3.bf16.msra.mxu1 %v6994_v53  ;;  %6291 = vmatprep.subr.bf16.mxu0 %v6995_v54  ;;  %v7054_v53 = vld [vmem:[%s9201_s1 + $0x380] sm:$0xff]   ;;  %v7055_v54 = vld [vmem:[%s9201_s1 + $0x348] sm:$0xff]  }
  0x32   :  { %6313 = vmatprep.subr.bf16.mxu1 %v6996_v55  ;;  %v7056_v55 = vld [vmem:[%s9201_s1 + $0x3c8] sm:$0xff]  }
  0x34   :  { %6292 = vmatpush3.bf16.msra.mxu0 %v6997_v56  ;;  %v7057_v56 = vld [vmem:[%s9201_s1 + $0x308] sm:$0xff]  }
  0x35   :  { %6314 = vmatpush3.bf16.msra.mxu1 %v6998_v57  ;;  %6293 = vmatprep.subr.bf16.mxu0 %v6999_v58  ;;  %v7058_v57 = vld [vmem:[%s9201_s1 + $0x388] sm:$0xff]   ;;  %v7059_v58 = vld [vmem:[%s9201_s1 + $0x350] sm:$0xff]  }
  0x36   :  { %6315 = vmatprep.subr.bf16.mxu1 %v7000_v59  ;;  %v7060_v59 = vld [vmem:[%s9201_s1 + $0x3d0] sm:$0xff]  }
  0x38   :  { %6294 = vmatpush3.bf16.msra.mxu0 %v7001_v60  ;;  %v7061_v60 = vld [vmem:[%s9201_s1 + $0x310] sm:$0xff]  }
  0x39   :  { %6316 = vmatpush3.bf16.msra.mxu1 %v7002_v61  ;;  %6295 = vmatprep.subr.bf16.mxu0 %v7003_v62  ;;  %v7062_v61 = vld [vmem:[%s9201_s1 + $0x390] sm:$0xff]   ;;  %v7063_v62 = vld [vmem:[%s9201_s1 + $0x358] sm:$0xff]  }
  0x3a   :  { %6317 = vmatprep.subr.bf16.mxu1 %v7004_v63  ;;  %v7064_v63 = vld [vmem:[%s9201_s1 + $0x3d8] sm:$0xff]  }
  0x3c   :  { %6296 = vmatpush3.bf16.msra.mxu0 %v7005_v0  ;;  %v7065_v0 = vld [vmem:[%s9201_s1 + $0x318] sm:$0xff]  }
  0x3d   :  { %6318 = vmatpush3.bf16.msra.mxu1 %v7006_v1  ;;  %6297 = vmatprep.subr.bf16.mxu0 %v7007_v2  ;;  %v7066_v1 = vld [vmem:[%s9201_s1 + $0x398] sm:$0xff]   ;;  %v7067_v2 = vld [vmem:[%s9201_s1 + $0x360] sm:$0xff]  }
  0x3e   :  { %6319 = vmatprep.subr.bf16.mxu1 %v7008_v3  ;;  %v7068_v3 = vld [vmem:[%s9201_s1 + $0x3e0] sm:$0xff]  }
  0x40   :  { %6298 = vmatpush3.bf16.msra.mxu0 %v7009_v4  ;;  %v7069_v4 = vld [vmem:[%s9201_s1 + $0x320] sm:$0xff]  }
  0x41   :  { %6320 = vmatpush3.bf16.msra.mxu1 %v7010_v5  ;;  %6327 = vmatprep.subr.bf16.mxu0 %v7015_v12  ;;  %v7070_v5 = vld [vmem:[%s9201_s1 + $0x3a0] sm:$0xff]   ;;  %v7076_v12 = vld [vmem:[%s9201_s1 + $0x3f0] sm:$0xff]  }
  0x42   :  { %6349 = vmatprep.subr.bf16.mxu1 %v7016_v13  ;;  %v7077_v13 = vld [vmem:[%s9201_s1 + $0x330] sm:$0xff]  }
  0x43   :  { %4489 = vmatmul.mubr.bf16.vlgmr.msra.gmra.mrb[4].mxu0 %v5667_v7  ;;  %v7072_v7 = vld [vmem:[%s9201_s1 + $0x3e8] sm:$0xff]  }
  0x44   :  { %4529 = vmatmul.mubr.bf16.vlgmr.msra.gmra.mrb[4].mxu1 %v5669_v10  ;;  %6328 = vmatpush3.bf16.msra.mxu0 %v7017_v14  ;;  %v7074_v10 = vld [vmem:[%s9201_s1 + $0x3a8] sm:$0xff]   ;;  %v7078_v14 = vld [vmem:[%s9201_s1 + $0x3b0] sm:$0xff]  }
  0x45   :  { %6350 = vmatpush3.bf16.msra.mxu1 %v7018_v15  ;;  %6329 = vmatprep.subr.bf16.mxu0 %v7019_v16  ;;  %v7079_v15 = vld [vmem:[%s9201_s1 + $0x378] sm:$0xff]  }
  0x46   :  { %6351 = vmatprep.subr.bf16.mxu1 %v7020_v17  ;;  %4568 = vmatprep.mubr.bf16.mxu0 %v5672_v47  ;;  %v7080_v16 = vld [vmem:[%s9201_s1 + $0x3f8] sm:$0xff]   ;;  %v7109_v47 = vld [vmem:[%s9201_s1 + $0x428] sm:$0xff]  }
  0x47   :  { %4608 = vmatprep.mubr.bf16.mxu1 %v5674_v49  ;;  %v7081_v17 = vld [vmem:[%s9201_s1 + $0x338] sm:$0xff]   ;;  %v7111_v49 = vld [vmem:[%s9201_s1 + $0x470] sm:$0xff]  }
  0x48   :  { %6330 = vmatpush3.bf16.msra.mxu0 %v7021_v18  ;;  %v7082_v18 = vld [vmem:[%s9201_s1 + $0x3b8] sm:$0xff]  }
  0x49   :  { %6352 = vmatpush3.bf16.msra.mxu1 %v7022_v19  ;;  %6331 = vmatprep.subr.bf16.mxu0 %v7023_v20  ;;  %v23_v19 = vld [vmem:[%s9202_s0 + $0x30] sm:$0xff]  ;;  %v24_v20 = vld [vmem:[%s9202_s0 + $0x38] sm:$0xff] }
  0x4a   :  { %6353 = vmatprep.subr.bf16.mxu1 %v7024_v21  ;;  %v5675_v21 = vcombine.low %v23_v19, %v23_v19 }
  0x4c   :  { %6332 = vmatpush3.bf16.msra.mxu0 %v7025_v22  ;;  %v5676_v22 = vcombine.high %v23_v19, %v23_v19  ;;  %v7143_v19 = vld [vmem:[%s9201_s1 + $0x568] sm:$0xff]  }
  0x4d   :  { %6354 = vmatpush3.bf16.msra.mxu1 %v7026_v23  ;;  %6333 = vmatprep.subr.bf16.mxu0 %v7027_v24  ;;  %v5677_v23 = vcombine.low %v24_v20, %v24_v20  ;;  %v7087_v24 = vld [vmem:[%s9201_s1 + $0x440] sm:$0xff]  }
  0x4e   :  { %6355 = vmatprep.subr.bf16.mxu1 %v7028_v25  ;;  %v5678_v25 = vcombine.high %v24_v20, %v24_v20  ;;  %v7144_v20 = vld [vmem:[%s9201_s1 + $0x5e8] sm:$0xff]  }
  0x50   :  { %6334 = vmatpush3.bf16.msra.mxu0 %v7029_v26  ;;  %v7088_v26 = vld [vmem:[%s9201_s1 + $0x4c0] sm:$0xff]  }
  0x51   :  { %6356 = vmatpush3.bf16.msra.mxu1 %v7030_v27  ;;  %6335 = vmatprep.subr.bf16.mxu0 %v7031_v28  ;;  %v7089_v27 = vld [vmem:[%s9201_s1 + $0x400] sm:$0xff]  }
  0x52   :  { %6357 = vmatprep.subr.bf16.mxu1 %v7032_v29  ;;  %v7090_v28 = vld [vmem:[%s9201_s1 + $0x480] sm:$0xff]   ;;  %v7091_v29 = vld [vmem:[%s9201_s1 + $0x448] sm:$0xff]  }
  0x54   :  { %6336 = vmatpush3.bf16.msra.mxu0 %v7033_v30  ;;  %v7092_v30 = vld [vmem:[%s9201_s1 + $0x4c8] sm:$0xff]  }
  0x55   :  { %6358 = vmatpush3.bf16.msra.mxu1 %v7034_v31  ;;  %6337 = vmatprep.subr.bf16.mxu0 %v7035_v32  ;;  %v7093_v31 = vld [vmem:[%s9201_s1 + $0x408] sm:$0xff]  }
  0x56   :  { %6359 = vmatprep.subr.bf16.mxu1 %v7036_v33  ;;  %v7094_v32 = vld [vmem:[%s9201_s1 + $0x488] sm:$0xff]   ;;  %v7095_v33 = vld [vmem:[%s9201_s1 + $0x450] sm:$0xff]  }
  0x58   :  { %6338 = vmatpush3.bf16.msra.mxu0 %v7037_v34  ;;  %v7096_v34 = vld [vmem:[%s9201_s1 + $0x4d0] sm:$0xff]  }
  0x59   :  { %6360 = vmatpush3.bf16.msra.mxu1 %v7038_v35  ;;  %6339 = vmatprep.subr.bf16.mxu0 %v7039_v36  ;;  %v7097_v35 = vld [vmem:[%s9201_s1 + $0x410] sm:$0xff]  }
  0x5a   :  { %6361 = vmatprep.subr.bf16.mxu1 %v7040_v37  ;;  %v7098_v36 = vld [vmem:[%s9201_s1 + $0x490] sm:$0xff]   ;;  %v7099_v37 = vld [vmem:[%s9201_s1 + $0x458] sm:$0xff]  }
  0x5c   :  { %6340 = vmatpush3.bf16.msra.mxu0 %v7041_v38  ;;  %v7100_v38 = vld [vmem:[%s9201_s1 + $0x4d8] sm:$0xff]  }
  0x5d   :  { %6362 = vmatpush3.bf16.msra.mxu1 %v7042_v39  ;;  %6341 = vmatprep.subr.bf16.mxu0 %v7043_v40  ;;  %v7101_v39 = vld [vmem:[%s9201_s1 + $0x418] sm:$0xff]  }
  0x5e   :  { %6363 = vmatprep.subr.bf16.mxu1 %v7044_v41  ;;  %v7102_v40 = vld [vmem:[%s9201_s1 + $0x498] sm:$0xff]   ;;  %v7103_v41 = vld [vmem:[%s9201_s1 + $0x460] sm:$0xff]  }
  0x60   :  { %6342 = vmatpush3.bf16.msra.mxu0 %v7045_v42  ;;  %v7104_v42 = vld [vmem:[%s9201_s1 + $0x4e0] sm:$0xff]  }
  0x61   :  { %6364 = vmatpush3.bf16.msra.mxu1 %v7046_v43  ;;  %6371 = vmatprep.subr.bf16.mxu0 %v7051_v50  ;;  %v7105_v43 = vld [vmem:[%s9201_s1 + $0x420] sm:$0xff]   ;;  %v7112_v50 = vld [vmem:[%s9201_s1 + $0x4f0] sm:$0xff]  }
  0x62   :  { %6393 = vmatprep.subr.bf16.mxu1 %v7052_v51  ;;  %v7113_v51 = vld [vmem:[%s9201_s1 + $0x430] sm:$0xff]  }
  0x63   :  { %4569 = vmatmul.mubr.bf16.vlgmr.msra.gmra.mrb[8].mxu0 %v5671_v46  ;;  %v7108_v46 = vld [vmem:[%s9201_s1 + $0x4e8] sm:$0xff]  }
  0x64   :  { %4609 = vmatmul.mubr.bf16.vlgmr.msra.gmra.mrb[8].mxu1 %v5673_v48  ;;  %6372 = vmatpush3.bf16.msra.mxu0 %v7053_v52  ;;  %v7110_v48 = vld [vmem:[%s9201_s1 + $0x4a8] sm:$0xff]   ;;  %v7114_v52 = vld [vmem:[%s9201_s1 + $0x4b0] sm:$0xff]  }
  0x65   :  { %6394 = vmatpush3.bf16.msra.mxu1 %v7054_v53  ;;  %6373 = vmatprep.subr.bf16.mxu0 %v7055_v54  ;;  %v7115_v53 = vld [vmem:[%s9201_s1 + $0x478] sm:$0xff]  }
  0x66   :  { %6395 = vmatprep.subr.bf16.mxu1 %v7056_v55  ;;  %4648 = vmatprep.mubr.bf16.mxu0 %v5676_v22  ;;  %v7116_v54 = vld [vmem:[%s9201_s1 + $0x4f8] sm:$0xff]   ;;  %v7146_v22 = vld [vmem:[%s9201_s1 + $0x5a8] sm:$0xff]  }
  0x67   :  { %4688 = vmatprep.mubr.bf16.mxu1 %v5678_v25  ;;  %v7117_v55 = vld [vmem:[%s9201_s1 + $0x438] sm:$0xff]   ;;  %v7149_v25 = vld [vmem:[%s9201_s1 + $0x530] sm:$0xff]  }
  0x68   :  { %6374 = vmatpush3.bf16.msra.mxu0 %v7057_v56  ;;  %v7118_v56 = vld [vmem:[%s9201_s1 + $0x4b8] sm:$0xff]  }
  0x69   :  { %6396 = vmatpush3.bf16.msra.mxu1 %v7058_v57  ;;  %6375 = vmatprep.subr.bf16.mxu0 %v7059_v58  ;;  %v25_v57 = vld [vmem:[%s9202_s0 + $0x40] sm:$0xff] }
  0x6a   :  { %6397 = vmatprep.subr.bf16.mxu1 %v7060_v59  ;;  %v5679_v58 = vcombine.low %v25_v57, %v25_v57  ;;  %v5680_v59 = vcombine.high %v25_v57, %v25_v57  ;;  %v7179_v57 = vld [vmem:[%s9201_s1 + $0x668] sm:$0xff]  }
  0x6c   :  { %6376 = vmatpush3.bf16.msra.mxu0 %v7061_v60  ;;  %v26_v60 = vld [vmem:[%s9202_s0 + $0x48] sm:$0xff] }
  0x6d   :  { %6398 = vmatpush3.bf16.msra.mxu1 %v7062_v61  ;;  %6377 = vmatprep.subr.bf16.mxu0 %v7063_v62  ;;  %v5681_v61 = vcombine.low %v26_v60, %v26_v60  ;;  %v5682_v62 = vcombine.high %v26_v60, %v26_v60  ;;  %v7182_v60 = vld [vmem:[%s9201_s1 + $0x6a8] sm:$0xff]  }
  0x6e   :  { %6399 = vmatprep.subr.bf16.mxu1 %v7064_v63  ;;  %v7123_v63 = vld [vmem:[%s9201_s1 + $0x540] sm:$0xff]  }
  0x70   :  { %6378 = vmatpush3.bf16.msra.mxu0 %v7065_v0  ;;  %v7124_v0 = vld [vmem:[%s9201_s1 + $0x5c0] sm:$0xff]  }
  0x71   :  { %6400 = vmatpush3.bf16.msra.mxu1 %v7066_v1  ;;  %6379 = vmatprep.subr.bf16.mxu0 %v7067_v2  ;;  %v7125_v1 = vld [vmem:[%s9201_s1 + $0x500] sm:$0xff]  }
  0x72   :  { %6401 = vmatprep.subr.bf16.mxu1 %v7068_v3  ;;  %v7126_v2 = vld [vmem:[%s9201_s1 + $0x580] sm:$0xff]   ;;  %v7127_v3 = vld [vmem:[%s9201_s1 + $0x548] sm:$0xff]  }
  0x74   :  { %6380 = vmatpush3.bf16.msra.mxu0 %v7069_v4  ;;  %v7128_v4 = vld [vmem:[%s9201_s1 + $0x5c8] sm:$0xff]  }
  0x75   :  { %6402 = vmatpush3.bf16.msra.mxu1 %v7070_v5  ;;  %6381 = vmatprep.subr.bf16.mxu0 %v7071_v6  ;;  %v7129_v5 = vld [vmem:[%s9201_s1 + $0x508] sm:$0xff]  }
  0x76   :  { %6403 = vmatprep.subr.bf16.mxu1 %v7072_v7  ;;  %v7130_v6 = vld [vmem:[%s9201_s1 + $0x588] sm:$0xff]   ;;  %v7131_v7 = vld [vmem:[%s9201_s1 + $0x550] sm:$0xff]  }
  0x78   :  { %6382 = vmatpush3.bf16.msra.mxu0 %v7073_v9  ;;  %v7133_v9 = vld [vmem:[%s9201_s1 + $0x510] sm:$0xff]  }
  0x79   :  { %6404 = vmatpush3.bf16.msra.mxu1 %v7074_v10  ;;  %6383 = vmatprep.subr.bf16.mxu0 %v7075_v11  ;;  %v7134_v10 = vld [vmem:[%s9201_s1 + $0x590] sm:$0xff]   ;;  %v7135_v11 = vld [vmem:[%s9201_s1 + $0x558] sm:$0xff]  }
  0x7a   :  { %6405 = vmatprep.subr.bf16.mxu1 %v7076_v12  ;;  %v7136_v12 = vld [vmem:[%s9201_s1 + $0x5d8] sm:$0xff]  }
  0x7c   :  { %6384 = vmatpush3.bf16.msra.mxu0 %v7077_v13  ;;  %v7137_v13 = vld [vmem:[%s9201_s1 + $0x518] sm:$0xff]  }
  0x7d   :  { %6406 = vmatpush3.bf16.msra.mxu1 %v7078_v14  ;;  %6385 = vmatprep.subr.bf16.mxu0 %v7079_v15  ;;  %v7138_v14 = vld [vmem:[%s9201_s1 + $0x598] sm:$0xff]   ;;  %v7139_v15 = vld [vmem:[%s9201_s1 + $0x560] sm:$0xff]  }
  0x7e   :  { %6407 = vmatprep.subr.bf16.mxu1 %v7080_v16  ;;  %v7140_v16 = vld [vmem:[%s9201_s1 + $0x5e0] sm:$0xff]  }
  0x80   :  { %6386 = vmatpush3.bf16.msra.mxu0 %v7081_v17  ;;  %v7141_v17 = vld [vmem:[%s9201_s1 + $0x520] sm:$0xff]  }
  0x81   :  { %6408 = vmatpush3.bf16.msra.mxu1 %v7082_v18  ;;  %6415 = vmatprep.subr.bf16.mxu0 %v7087_v24  ;;  %v7142_v18 = vld [vmem:[%s9201_s1 + $0x5a0] sm:$0xff]   ;;  %v7148_v24 = vld [vmem:[%s9201_s1 + $0x5f0] sm:$0xff]  }
  0x82   :  { %6437 = vmatprep.subr.bf16.mxu1 %v7088_v26  ;;  %v7150_v26 = vld [vmem:[%s9201_s1 + $0x5b0] sm:$0xff]  }
  0x83   :  { %4649 = vmatmul.mubr.bf16.vlgmr.msra.gmra.mrb[12].mxu0 %v5675_v21  ;;  %v7145_v21 = vld [vmem:[%s9201_s1 + $0x528] sm:$0xff]  }
  0x84   :  { %4689 = vmatmul.mubr.bf16.vlgmr.msra.gmra.mrb[12].mxu1 %v5677_v23  ;;  %6416 = vmatpush3.bf16.msra.mxu0 %v7089_v27  ;;  %v7147_v23 = vld [vmem:[%s9201_s1 + $0x570] sm:$0xff]   ;;  %v7151_v27 = vld [vmem:[%s9201_s1 + $0x578] sm:$0xff]  }
  0x85   :  { %6438 = vmatpush3.bf16.msra.mxu1 %v7090_v28  ;;  %6417 = vmatprep.subr.bf16.mxu0 %v7091_v29  ;;  %v7152_v28 = vld [vmem:[%s9201_s1 + $0x5f8] sm:$0xff]  }
  0x86   :  { %6439 = vmatprep.subr.bf16.mxu1 %v7092_v30  ;;  %4728 = vmatprep.mubr.bf16.mxu0 %v5680_v59  ;;  %v7153_v29 = vld [vmem:[%s9201_s1 + $0x538] sm:$0xff]   ;;  %v7181_v59 = vld [vmem:[%s9201_s1 + $0x628] sm:$0xff]  }
  0x87   :  { %4768 = vmatprep.mubr.bf16.mxu1 %v5682_v62  ;;  %v7154_v30 = vld [vmem:[%s9201_s1 + $0x5b8] sm:$0xff]   ;;  %v7184_v62 = vld [vmem:[%s9201_s1 + $0x6f0] sm:$0xff]  }
  0x88   :  { %6418 = vmatpush3.bf16.msra.mxu0 %v7093_v31  ;;  %v27_v31 = vld [vmem:[%s9202_s0 + $0x50] sm:$0xff] }
  0x89   :  { %6440 = vmatpush3.bf16.msra.mxu1 %v7094_v32  ;;  %6419 = vmatprep.subr.bf16.mxu0 %v7095_v33  ;;  %v28_v32 = vld [vmem:[%s9202_s0 + $0x58] sm:$0xff]  ;;  %v5683_v33 = vcombine.low %v27_v31, %v27_v31 }
  0x8a   :  { %6441 = vmatprep.subr.bf16.mxu1 %v7096_v34  ;;  %v5684_v34 = vcombine.high %v27_v31, %v27_v31  ;;  %v7214_v31 = vld [vmem:[%s9201_s1 + $0x7a0] sm:$0xff]  }
  0x8c   :  { %6420 = vmatpush3.bf16.msra.mxu0 %v7097_v35  ;;  %v5685_v35 = vcombine.low %v28_v32, %v28_v32 }
  0x8d   :  { %6442 = vmatpush3.bf16.msra.mxu1 %v7098_v36  ;;  %6421 = vmatprep.subr.bf16.mxu0 %v7099_v37  ;;  %v5686_v36 = vcombine.high %v28_v32, %v28_v32  ;;  %v7159_v37 = vld [vmem:[%s9201_s1 + $0x640] sm:$0xff]  }
  0x8e   :  { %6443 = vmatprep.subr.bf16.mxu1 %v7100_v38  ;;  %v7160_v38 = vld [vmem:[%s9201_s1 + $0x6c0] sm:$0xff]  }
  0x90   :  { %6422 = vmatpush3.bf16.msra.mxu0 %v7101_v39  ;;  %v7161_v39 = vld [vmem:[%s9201_s1 + $0x600] sm:$0xff]  }
  0x91   :  { %6444 = vmatpush3.bf16.msra.mxu1 %v7102_v40  ;;  %6423 = vmatprep.subr.bf16.mxu0 %v7103_v41  ;;  %v7162_v40 = vld [vmem:[%s9201_s1 + $0x680] sm:$0xff]   ;;  %v7163_v41 = vld [vmem:[%s9201_s1 + $0x648] sm:$0xff]  }
  0x92   :  { %6445 = vmatprep.subr.bf16.mxu1 %v7104_v42  ;;  %v7164_v42 = vld [vmem:[%s9201_s1 + $0x6c8] sm:$0xff]  }
  0x94   :  { %6424 = vmatpush3.bf16.msra.mxu0 %v7105_v43  ;;  %v7165_v43 = vld [vmem:[%s9201_s1 + $0x608] sm:$0xff]  }
  0x95   :  { %6446 = vmatpush3.bf16.msra.mxu1 %v7106_v44  ;;  %6425 = vmatprep.subr.bf16.mxu0 %v7107_v45  ;;  %v7166_v44 = vld [vmem:[%s9201_s1 + $0x688] sm:$0xff]   ;;  %v7167_v45 = vld [vmem:[%s9201_s1 + $0x650] sm:$0xff]  }
  0x96   :  { %6447 = vmatprep.subr.bf16.mxu1 %v7108_v46  ;;  %v7168_v46 = vld [vmem:[%s9201_s1 + $0x6d0] sm:$0xff]  }
  0x98   :  { %6426 = vmatpush3.bf16.msra.mxu0 %v7109_v47  ;;  %v7169_v47 = vld [vmem:[%s9201_s1 + $0x610] sm:$0xff]  }
  0x99   :  { %6448 = vmatpush3.bf16.msra.mxu1 %v7110_v48  ;;  %6427 = vmatprep.subr.bf16.mxu0 %v7111_v49  ;;  %v7170_v48 = vld [vmem:[%s9201_s1 + $0x690] sm:$0xff]   ;;  %v7171_v49 = vld [vmem:[%s9201_s1 + $0x658] sm:$0xff]  }
  0x9a   :  { %6449 = vmatprep.subr.bf16.mxu1 %v7112_v50  ;;  %v7172_v50 = vld [vmem:[%s9201_s1 + $0x6d8] sm:$0xff]  }
  0x9c   :  { %6428 = vmatpush3.bf16.msra.mxu0 %v7113_v51  ;;  %v7173_v51 = vld [vmem:[%s9201_s1 + $0x618] sm:$0xff]  }
  0x9d   :  { %6450 = vmatpush3.bf16.msra.mxu1 %v7114_v52  ;;  %6429 = vmatprep.subr.bf16.mxu0 %v7115_v53  ;;  %v7174_v52 = vld [vmem:[%s9201_s1 + $0x698] sm:$0xff]   ;;  %v7175_v53 = vld [vmem:[%s9201_s1 + $0x660] sm:$0xff]  }
  0x9e   :  { %6451 = vmatprep.subr.bf16.mxu1 %v7116_v54  ;;  %v7176_v54 = vld [vmem:[%s9201_s1 + $0x6e0] sm:$0xff]  }
  0xa0   :  { %6430 = vmatpush3.bf16.msra.mxu0 %v7117_v55  ;;  %v7177_v55 = vld [vmem:[%s9201_s1 + $0x620] sm:$0xff]  }
  0xa1   :  { %6452 = vmatpush3.bf16.msra.mxu1 %v7118_v56  ;;  %6459 = vmatprep.subr.bf16.mxu0 %v7123_v63  ;;  %v7178_v56 = vld [vmem:[%s9201_s1 + $0x6a0] sm:$0xff]   ;;  %v7185_v63 = vld [vmem:[%s9201_s1 + $0x630] sm:$0xff]  }
  0xa2   :  { %6481 = vmatprep.subr.bf16.mxu1 %v7124_v0  ;;  %v7186_v0 = vld [vmem:[%s9201_s1 + $0x6b0] sm:$0xff]  }
  0xa3   :  { %4729 = vmatmul.mubr.bf16.vlgmr.msra.gmra.mrb[16].mxu0 %v5679_v58  ;;  %v7180_v58 = vld [vmem:[%s9201_s1 + $0x6e8] sm:$0xff]  }
  0xa4   :  { %4769 = vmatmul.mubr.bf16.vlgmr.msra.gmra.mrb[16].mxu1 %v5681_v61  ;;  %6460 = vmatpush3.bf16.msra.mxu0 %v7125_v1  ;;  %v7183_v61 = vld [vmem:[%s9201_s1 + $0x670] sm:$0xff]   ;;  %v7187_v1 = vld [vmem:[%s9201_s1 + $0x678] sm:$0xff]  }
  0xa5   :  { %6482 = vmatpush3.bf16.msra.mxu1 %v7126_v2  ;;  %6461 = vmatprep.subr.bf16.mxu0 %v7127_v3  ;;  %v7188_v2 = vld [vmem:[%s9201_s1 + $0x6f8] sm:$0xff]  }
  0xa6   :  { %6483 = vmatprep.subr.bf16.mxu1 %v7128_v4  ;;  %4808 = vmatprep.mubr.bf16.mxu0 %v5684_v34  ;;  %v7189_v3 = vld [vmem:[%s9201_s1 + $0x638] sm:$0xff]  }
  0xa7   :  { %4848 = vmatprep.mubr.bf16.mxu1 %v5686_v36  ;;  %v7190_v4 = vld [vmem:[%s9201_s1 + $0x6b8] sm:$0xff]  }
  0xa8   :  { %6462 = vmatpush3.bf16.msra.mxu0 %v7129_v5  ;;  %v29_v5 = vld [vmem:[%s9202_s0 + $0x60] sm:$0xff] }
  0xa9   :  { %6484 = vmatpush3.bf16.msra.mxu1 %v7130_v6  ;;  %6463 = vmatprep.subr.bf16.mxu0 %v7131_v7  ;;  %v30_v6 = vld [vmem:[%s9202_s0 + $0x68] sm:$0xff]  ;;  %v5687_v7 = vcombine.low %v29_v5, %v29_v5 }
  0xaa   :  { %6485 = vmatprep.subr.bf16.mxu1 %v7132_v8  ;;  %v5688_v8 = vcombine.high %v29_v5, %v29_v5  ;;  %v7238_v5 = vld [vmem:[%s9201_s1 + $0x888] sm:$0xff]  }
  0xac   :  { %6464 = vmatpush3.bf16.msra.mxu0 %v7133_v9  ;;  %v5689_v9 = vcombine.low %v30_v6, %v30_v6 }
  0xad   :  { %6486 = vmatpush3.bf16.msra.mxu1 %v7134_v10  ;;  %6465 = vmatprep.subr.bf16.mxu0 %v7135_v11  ;;  %v7195_v10 = vld [vmem:[%s9201_s1 + $0x740] sm:$0xff]   ;;  %v5690_v11 = vcombine.high %v30_v6, %v30_v6  ;;  %v7239_v6 = vld [vmem:[%s9201_s1 + $0x850] sm:$0xff]  }
  0xae   :  { %6487 = vmatprep.subr.bf16.mxu1 %v7136_v12  ;;  %v7196_v12 = vld [vmem:[%s9201_s1 + $0x7c0] sm:$0xff]  }
  0xb0   :  { %6466 = vmatpush3.bf16.msra.mxu0 %v7137_v13  ;;  %v7197_v13 = vld [vmem:[%s9201_s1 + $0x700] sm:$0xff]  }
  0xb1   :  { %6488 = vmatpush3.bf16.msra.mxu1 %v7138_v14  ;;  %6467 = vmatprep.subr.bf16.mxu0 %v7139_v15  ;;  %v7198_v14 = vld [vmem:[%s9201_s1 + $0x780] sm:$0xff]   ;;  %v7199_v15 = vld [vmem:[%s9201_s1 + $0x748] sm:$0xff]  }
  0xb2   :  { %6489 = vmatprep.subr.bf16.mxu1 %v7140_v16  ;;  %v7200_v16 = vld [vmem:[%s9201_s1 + $0x7c8] sm:$0xff]  }
  0xb4   :  { %6468 = vmatpush3.bf16.msra.mxu0 %v7141_v17  ;;  %v7201_v17 = vld [vmem:[%s9201_s1 + $0x708] sm:$0xff]  }
  0xb5   :  { %6490 = vmatpush3.bf16.msra.mxu1 %v7142_v18  ;;  %6469 = vmatprep.subr.bf16.mxu0 %v7143_v19  ;;  %v7202_v18 = vld [vmem:[%s9201_s1 + $0x788] sm:$0xff]   ;;  %v7203_v19 = vld [vmem:[%s9201_s1 + $0x750] sm:$0xff]  }
  0xb6   :  { %6491 = vmatprep.subr.bf16.mxu1 %v7144_v20  ;;  %v7204_v20 = vld [vmem:[%s9201_s1 + $0x7d0] sm:$0xff]  }
  0xb8   :  { %6470 = vmatpush3.bf16.msra.mxu0 %v7145_v21  ;;  %v7205_v21 = vld [vmem:[%s9201_s1 + $0x710] sm:$0xff]  }
  0xb9   :  { %6492 = vmatpush3.bf16.msra.mxu1 %v7146_v22  ;;  %6471 = vmatprep.subr.bf16.mxu0 %v7147_v23  ;;  %v7206_v22 = vld [vmem:[%s9201_s1 + $0x790] sm:$0xff]   ;;  %v7207_v23 = vld [vmem:[%s9201_s1 + $0x758] sm:$0xff]  }
  0xba   :  { %6493 = vmatprep.subr.bf16.mxu1 %v7148_v24  ;;  %v7208_v24 = vld [vmem:[%s9201_s1 + $0x7d8] sm:$0xff]  }
  0xbc   :  { %6472 = vmatpush3.bf16.msra.mxu0 %v7149_v25  ;;  %v7209_v25 = vld [vmem:[%s9201_s1 + $0x718] sm:$0xff]  }
  0xbd   :  { %6494 = vmatpush3.bf16.msra.mxu1 %v7150_v26  ;;  %6473 = vmatprep.subr.bf16.mxu0 %v7151_v27  ;;  %v7210_v26 = vld [vmem:[%s9201_s1 + $0x798] sm:$0xff]   ;;  %v7211_v27 = vld [vmem:[%s9201_s1 + $0x760] sm:$0xff]  }
  0xbe   :  { %6495 = vmatprep.subr.bf16.mxu1 %v7152_v28  ;;  %v7212_v28 = vld [vmem:[%s9201_s1 + $0x7e0] sm:$0xff]  }
  0xc0   :  { %6474 = vmatpush3.bf16.msra.mxu0 %v7153_v29  ;;  %v7213_v29 = vld [vmem:[%s9201_s1 + $0x720] sm:$0xff]  }
  0xc1   :  { %6496 = vmatpush3.bf16.msra.mxu1 %v7154_v30  ;;  %6503 = vmatprep.subr.bf16.mxu0 %v7159_v37 }
  0xc2   :  { %6525 = vmatprep.subr.bf16.mxu1 %v7160_v38  ;;  %v7215_v38 = vld [vmem:[%s9201_s1 + $0x768] sm:$0xff]  }
  0xc3   :  { %4809 = vmatmul.mubr.bf16.vlgmr.msra.gmra.mrb[20].mxu0 %v5683_v33  ;;  %v5662_v33 = vld [vmem:[#allocation2] ss:$0 sm:$0xff] }
  0xc4   :  { %4849 = vmatmul.mubr.bf16.vlgmr.msra.gmra.mrb[20].mxu1 %v5685_v35  ;;  %6504 = vmatpush3.bf16.msra.mxu0 %v7161_v39 }
  0xc5   :  { %6526 = vmatpush3.bf16.msra.mxu1 %v7162_v40  ;;  %6505 = vmatprep.subr.bf16.mxu0 %v7163_v41  ;;  %v7216_v40 = vld [vmem:[%s9201_s1 + $0x7e8] sm:$0xff]  }
  0xc6   :  { %6527 = vmatprep.subr.bf16.mxu1 %v7164_v42  ;;  %4888 = vmatprep.mubr.bf16.mxu0 %v5688_v8  ;;  %v7241_v8 = vld [vmem:[%s9201_s1 + $0x810] sm:$0xff]  }
  0xc7   :  { %4928 = vmatprep.mubr.bf16.mxu1 %v5690_v11  ;;  %v7244_v11 = vld [vmem:[%s9201_s1 + $0x8d8] sm:$0xff]  }
  0xc8   :  { %6506 = vmatpush3.bf16.msra.mxu0 %v7165_v43  ;;  %v7217_v43 = vld [vmem:[%s9201_s1 + $0x728] sm:$0xff]  }
  0xc9   :  { %6528 = vmatpush3.bf16.msra.mxu1 %v7166_v44  ;;  %6507 = vmatprep.subr.bf16.mxu0 %v7167_v45  ;;  %v7218_v45 = vld [vmem:[%s9201_s1 + $0x7a8] sm:$0xff]  }
  0xca   :  { %6529 = vmatprep.subr.bf16.mxu1 %v7168_v46 }
  0xcc   :  { %6508 = vmatpush3.bf16.msra.mxu0 %v7169_v47 }
  0xcd   :  { %6530 = vmatpush3.bf16.msra.mxu1 %v7170_v48  ;;  %6509 = vmatprep.subr.bf16.mxu0 %v7171_v49  ;;  %v7219_v48 = vld [vmem:[%s9201_s1 + $0x770] sm:$0xff]  }
  0xce   :  { %6531 = vmatprep.subr.bf16.mxu1 %v7172_v50  ;;  %v7220_v49 = vld [vmem:[%s9201_s1 + $0x7f0] sm:$0xff]  }
  0xcf   :  { %v7221_v50 = vld [vmem:[%s9201_s1 + $0x730] sm:$0xff]  }
  0xd0   :  { %6510 = vmatpush3.bf16.msra.mxu0 %v7173_v51  ;;  %v7222_v51 = vld [vmem:[%s9201_s1 + $0x7b0] sm:$0xff]  }
  0xd1   :  { %6532 = vmatpush3.bf16.msra.mxu1 %v7174_v52  ;;  %6511 = vmatprep.subr.bf16.mxu0 %v7175_v53  ;;  %v7223_v52 = vld [vmem:[%s9201_s1 + $0x778] sm:$0xff]  }
  0xd2   :  { %6533 = vmatprep.subr.bf16.mxu1 %v7176_v54  ;;  %v7224_v53 = vld [vmem:[%s9201_s1 + $0x7f8] sm:$0xff]  }
  0xd3   :  { %v7225_v54 = vld [vmem:[%s9201_s1 + $0x738] sm:$0xff]  }
  0xd4   :  { %6512 = vmatpush3.bf16.msra.mxu0 %v7177_v55  ;;  %v7226_v55 = vld [vmem:[%s9201_s1 + $0x7b8] sm:$0xff]  }
  0xd5   :  { %6534 = vmatpush3.bf16.msra.mxu1 %v7178_v56  ;;  %6513 = vmatprep.subr.bf16.mxu0 %v7179_v57  ;;  %v31_v56 = vld [vmem:[%s9202_s0 + $0x70] sm:$0xff]  ;;  %v32_v57 = vld [vmem:[%s9202_s0 + $0x78] sm:$0xff] }
  0xd6   :  { %6535 = vmatprep.subr.bf16.mxu1 %v7180_v58  ;;  %v5691_v58 = vcombine.low %v31_v56, %v31_v56 }
  0xd8   :  { %6514 = vmatpush3.bf16.msra.mxu0 %v7181_v59  ;;  %v5692_v59 = vcombine.high %v31_v56, %v31_v56  ;;  %v7275_v56 = vld [vmem:[%s9201_s1 + $0x950] sm:$0xff]  }
  0xd9   :  { %6536 = vmatpush3.bf16.msra.mxu1 %v7182_v60  ;;  %6515 = vmatprep.subr.bf16.mxu0 %v7183_v61  ;;  %v5693_v60 = vcombine.low %v32_v57, %v32_v57  ;;  %v5694_v61 = vcombine.high %v32_v57, %v32_v57  ;;  %v7276_v57 = vld [vmem:[%s9201_s1 + $0x9d0] sm:$0xff]  }
  0xda   :  { %6537 = vmatprep.subr.bf16.mxu1 %v7184_v62  ;;  %v7231_v62 = vld [vmem:[%s9201_s1 + $0x840] sm:$0xff]  }
  0xdc   :  { %6516 = vmatpush3.bf16.msra.mxu0 %v7185_v63  ;;  %v7232_v63 = vld [vmem:[%s9201_s1 + $0x8c0] sm:$0xff]  }
  0xdd   :  { %6538 = vmatpush3.bf16.msra.mxu1 %v7186_v0  ;;  %6517 = vmatprep.subr.bf16.mxu0 %v7187_v1  ;;  %v7233_v0 = vld [vmem:[%s9201_s1 + $0x800] sm:$0xff]  }
  0xde   :  { %6539 = vmatprep.subr.bf16.mxu1 %v7188_v2  ;;  %v7234_v1 = vld [vmem:[%s9201_s1 + $0x880] sm:$0xff]   ;;  %v7235_v2 = vld [vmem:[%s9201_s1 + $0x848] sm:$0xff]  }
  0xe0   :  { %6518 = vmatpush3.bf16.msra.mxu0 %v7189_v3  ;;  %v7236_v3 = vld [vmem:[%s9201_s1 + $0x8c8] sm:$0xff]  }
  0xe1   :  { %6540 = vmatpush3.bf16.msra.mxu1 %v7190_v4  ;;  %6547 = vmatprep.subr.bf16.mxu0 %v7195_v10  ;;  %v7237_v4 = vld [vmem:[%s9201_s1 + $0x808] sm:$0xff]   ;;  %v7243_v10 = vld [vmem:[%s9201_s1 + $0x858] sm:$0xff]  }
  0xe2   :  { %6569 = vmatprep.subr.bf16.mxu1 %v7196_v12  ;;  %v7245_v12 = vld [vmem:[%s9201_s1 + $0x818] sm:$0xff]  }
  0xe3   :  { %4889 = vmatmul.mubr.bf16.vlgmr.msra.gmra.mrb[24].mxu0 %v5687_v7  ;;  %v7240_v7 = vld [vmem:[%s9201_s1 + $0x8d0] sm:$0xff]  }
  0xe4   :  { %4929 = vmatmul.mubr.bf16.vlgmr.msra.gmra.mrb[24].mxu1 %v5689_v9  ;;  %6548 = vmatpush3.bf16.msra.mxu0 %v7197_v13  ;;  %v7242_v9 = vld [vmem:[%s9201_s1 + $0x890] sm:$0xff]   ;;  %v7246_v13 = vld [vmem:[%s9201_s1 + $0x898] sm:$0xff]  }
  0xe5   :  { %6570 = vmatpush3.bf16.msra.mxu1 %v7198_v14  ;;  %6549 = vmatprep.subr.bf16.mxu0 %v7199_v15  ;;  %v7247_v14 = vld [vmem:[%s9201_s1 + $0x860] sm:$0xff]  }
  0xe6   :  { %6571 = vmatprep.subr.bf16.mxu1 %v7200_v16  ;;  %4968 = vmatprep.mubr.bf16.mxu0 %v5692_v59  ;;  %v7248_v15 = vld [vmem:[%s9201_s1 + $0x8e0] sm:$0xff]   ;;  %v7278_v59 = vld [vmem:[%s9201_s1 + $0x990] sm:$0xff]  }
  0xe7   :  { %5008 = vmatprep.mubr.bf16.mxu1 %v5694_v61  ;;  %v7249_v16 = vld [vmem:[%s9201_s1 + $0x820] sm:$0xff]   ;;  %v7280_v61 = vld [vmem:[%s9201_s1 + $0x9d8] sm:$0xff]  }
  0xe8   :  { %6550 = vmatpush3.bf16.msra.mxu0 %v7201_v17 }
  0xe9   :  { %6572 = vmatpush3.bf16.msra.mxu1 %v7202_v18  ;;  %6551 = vmatprep.subr.bf16.mxu0 %v7203_v19  ;;  %v7250_v18 = vld [vmem:[%s9201_s1 + $0x8a0] sm:$0xff]  }
  0xea   :  { %6573 = vmatprep.subr.bf16.mxu1 %v7204_v20 }
  0xec   :  { %6552 = vmatpush3.bf16.msra.mxu0 %v7205_v21 }
  0xed   :  { %6574 = vmatpush3.bf16.msra.mxu1 %v7206_v22  ;;  %6553 = vmatprep.subr.bf16.mxu0 %v7207_v23 }
  0xee   :  { %6575 = vmatprep.subr.bf16.mxu1 %v7208_v24  ;;  %v7251_v24 = vld [vmem:[%s9201_s1 + $0x868] sm:$0xff]  }
  0xf0   :  { %6554 = vmatpush3.bf16.msra.mxu0 %v7209_v25 }
  0xf1   :  { %6576 = vmatpush3.bf16.msra.mxu1 %v7210_v26  ;;  %6555 = vmatprep.subr.bf16.mxu0 %v7211_v27  ;;  %v7252_v26 = vld [vmem:[%s9201_s1 + $0x8e8] sm:$0xff]  }
  0xf2   :  { %6577 = vmatprep.subr.bf16.mxu1 %v7212_v28 }
  0xf4   :  { %6556 = vmatpush3.bf16.msra.mxu0 %v7213_v29  ;;  %v7253_v29 = vld [vmem:[%s9201_s1 + $0x828] sm:$0xff]  }
  0xf5   :  { %6578 = vmatpush3.bf16.msra.mxu1 %v7214_v31  ;;  %6557 = vmatprep.subr.bf16.mxu0 %v7215_v38  ;;  %v7254_v31 = vld [vmem:[%s9201_s1 + $0x8a8] sm:$0xff]   ;;  %v7259_v38 = vld [vmem:[%s9201_s1 + $0x878] sm:$0xff]  }
  0xf6   :  { %v6255_v30 = vpop.f32.mrb[0].mxu0  ;;  %6579 = vmatprep.subr.bf16.mxu1 %v7216_v40  ;;  %v7261_v40 = vld [vmem:[%s9201_s1 + $0x838] sm:$0xff]  }
  0xf7   :  { %v6277_v32 = vpop.f32.mrb[0].mxu1  ;;  %v6256_v34 = vpop.f32.mrb[1].mxu0 }
  0xf8   :  { %v6278_v35 = vpop.f32.mrb[1].mxu1  ;;  %v6257_v36 = vadd.f32 %v6256_v34, %v6255_v30  ;;  %v6258_v39 = vpop.f32.mrb[2].mxu0  ;;  %6558 = vmatpush3.bf16.msra.mxu0 %v7217_v43  ;;  %v7255_v34 = vld [vmem:[%s9201_s1 + $0x870] sm:$0xff]   ;;  %v34_v43 = vld [vmem:[%s9202_s0 + $0x88] sm:$0xff] }
  0xf9   :  { %v6279_v37 = vadd.f32 %v6278_v35, %v6277_v32  ;;  %v6280_v41 = vpop.f32.mrb[2].mxu1  ;;  %v6259_v44 = vpop.f32.mrb[3].mxu0  ;;  %6580 = vmatpush3.bf16.msra.mxu1 %v7218_v45  ;;  %6559 = vmatprep.subr.bf16.mxu0 %v7219_v48  ;;  %v7256_v35 = vld [vmem:[%s9201_s1 + $0x8f0] sm:$0xff]   ;;  %v7260_v39 = vld [vmem:[%s9201_s1 + $0x8f8] sm:$0xff]   ;;  %v7267_v48 = vld [vmem:[%s9201_s1 + $0x940] sm:$0xff]  }
  0xfa   :  { %v4411_v42 = vadd.f32 %v6257_v36, %v5662_v33  ;;  %v6281_v46 = vpop.f32.mrb[3].mxu1  ;;  %6581 = vmatprep.subr.bf16.mxu1 %v7220_v49  ;;  %v7257_v36 = vld [vmem:[%s9201_s1 + $0x830] sm:$0xff]   ;;  %v7262_v41 = vld [vmem:[%s9201_s1 + $0x8b8] sm:$0xff]   ;;  %v7268_v49 = vld [vmem:[%s9201_s1 + $0x9c0] sm:$0xff]  }
  0xfb   :  { %v5697_v46 = vcombine.low %v34_v43, %v34_v43 }
  0xfc   :  { %v8328_v47 = vadd.f32 %v6279_v37, %v4411_v42  ;;  %6560 = vmatpush3.bf16.msra.mxu0 %v7221_v50  ;;  %v7258_v37 = vld [vmem:[%s9201_s1 + $0x8b0] sm:$0xff]   ;;  %v33_v42 = vld [vmem:[%s9202_s0 + $0x80] sm:$0xff] }
  0xfd   :  { %6582 = vmatpush3.bf16.msra.mxu1 %v7222_v51  ;;  %6561 = vmatprep.subr.bf16.mxu0 %v7223_v52  ;;  %v5695_v44 = vcombine.low %v33_v42, %v33_v42  ;;  %v5696_v45 = vcombine.high %v33_v42, %v33_v42  ;;  %v7269_v50 = vld [vmem:[%s9201_s1 + $0x900] sm:$0xff]   ;;  %v7271_v52 = vld [vmem:[%s9201_s1 + $0x948] sm:$0xff]   ;;  %v7311_v42 = vld [vmem:[%s9201_s1 + $0xa50] sm:$0xff]  }
  0xfe   :  { %6583 = vmatprep.subr.bf16.mxu1 %v7224_v53  ;;  %v7270_v51 = vld [vmem:[%s9201_s1 + $0x980] sm:$0xff]   ;;  %v7272_v53 = vld [vmem:[%s9201_s1 + $0x9c8] sm:$0xff]  }
 0x100   :  { %6562 = vmatpush3.bf16.msra.mxu0 %v7225_v54  ;;  %v7273_v54 = vld [vmem:[%s9201_s1 + $0x908] sm:$0xff]  }
 0x101   :  { %6584 = vmatpush3.bf16.msra.mxu1 %v7226_v55  ;;  %6591 = vmatprep.subr.bf16.mxu0 %v7231_v62  ;;  %v7274_v55 = vld [vmem:[%s9201_s1 + $0x988] sm:$0xff]   ;;  %v7281_v62 = vld [vmem:[%s9201_s1 + $0x918] sm:$0xff]  }
 0x102   :  { %6613 = vmatprep.subr.bf16.mxu1 %v7232_v63  ;;  %v7282_v63 = vld [vmem:[%s9201_s1 + $0x998] sm:$0xff]  }
 0x103   :  { %4969 = vmatmul.mubr.bf16.vlgmr.msra.gmra.mrb[28].mxu0 %v5691_v58  ;;  %v7277_v58 = vld [vmem:[%s9201_s1 + $0x910] sm:$0xff]  }
 0x104   :  { %5009 = vmatmul.mubr.bf16.vlgmr.msra.gmra.mrb[28].mxu1 %v5693_v60  ;;  %6592 = vmatpush3.bf16.msra.mxu0 %v7233_v0  ;;  %v7279_v60 = vld [vmem:[%s9201_s1 + $0x958] sm:$0xff]   ;;  %v7283_v0 = vld [vmem:[%s9201_s1 + $0x960] sm:$0xff]  }
 0x105   :  { %6614 = vmatpush3.bf16.msra.mxu1 %v7234_v1  ;;  %6593 = vmatprep.subr.bf16.mxu0 %v7235_v2  ;;  %v7284_v1 = vld [vmem:[%s9201_s1 + $0x9e0] sm:$0xff]  }
 0x106   :  { %6615 = vmatprep.subr.bf16.mxu1 %v7236_v3  ;;  %5048 = vmatprep.mubr.bf16.mxu0 %v5696_v45  ;;  %v7285_v3 = vld [vmem:[%s9201_s1 + $0x920] sm:$0xff]   ;;  %v7314_v45 = vld [vmem:[%s9201_s1 + $0xa90] sm:$0xff]  }
 0x108   :  { %6594 = vmatpush3.bf16.msra.mxu0 %v7237_v4 }
 0x109   :  { %6616 = vmatpush3.bf16.msra.mxu1 %v7238_v5  ;;  %6595 = vmatprep.subr.bf16.mxu0 %v7239_v6  ;;  %v7286_v5 = vld [vmem:[%s9201_s1 + $0x9a0] sm:$0xff]  }
 0x10a   :  { %6617 = vmatprep.subr.bf16.mxu1 %v7240_v7 }
 0x10c   :  { %6596 = vmatpush3.bf16.msra.mxu0 %v7241_v8 }
 0x10d   :  { %6618 = vmatpush3.bf16.msra.mxu1 %v7242_v9  ;;  %6597 = vmatprep.subr.bf16.mxu0 %v7243_v10  ;;  %v7287_v9 = vld [vmem:[%s9201_s1 + $0x968] sm:$0xff]  }
 0x10e   :  { %6619 = vmatprep.subr.bf16.mxu1 %v7244_v11  ;;  %v7288_v11 = vld [vmem:[%s9201_s1 + $0x9e8] sm:$0xff]  }
 0x110   :  { %6598 = vmatpush3.bf16.msra.mxu0 %v7245_v12 }
 0x111   :  { %6620 = vmatpush3.bf16.msra.mxu1 %v7246_v13  ;;  %6599 = vmatprep.subr.bf16.mxu0 %v7247_v14 }
 0x112   :  { %6621 = vmatprep.subr.bf16.mxu1 %v7248_v15  ;;  %v7289_v15 = vld [vmem:[%s9201_s1 + $0x928] sm:$0xff]  }
 0x114   :  { %6600 = vmatpush3.bf16.msra.mxu0 %v7249_v16  ;;  %v7290_v16 = vld [vmem:[%s9201_s1 + $0x9a8] sm:$0xff]  }
 0x115   :  { %6622 = vmatpush3.bf16.msra.mxu1 %v7250_v18  ;;  %6601 = vmatprep.subr.bf16.mxu0 %v7251_v24  ;;  %v7295_v24 = vld [vmem:[%s9201_s1 + $0x978] sm:$0xff]  }
 0x116   :  { %v6299_v17 = vpop.f32.mrb[4].mxu0  ;;  %6623 = vmatprep.subr.bf16.mxu1 %v7252_v26  ;;  %v7297_v26 = vld [vmem:[%s9201_s1 + $0x938] sm:$0xff]  }
 0x117   :  { %v6321_v19 = vpop.f32.mrb[4].mxu1  ;;  %v6300_v20 = vpop.f32.mrb[5].mxu0 }
 0x118   :  { %v6322_v21 = vpop.f32.mrb[5].mxu1  ;;  %v6301_v22 = vadd.f32 %v6300_v20, %v6299_v17  ;;  %v6302_v25 = vpop.f32.mrb[6].mxu0  ;;  %6602 = vmatpush3.bf16.msra.mxu0 %v7253_v29  ;;  %v7291_v20 = vld [vmem:[%s9201_s1 + $0x970] sm:$0xff]   ;;  %v36_v29 = vld [vmem:[%s9202_s0 + $0x98] sm:$0xff] }
 0x119   :  { %v6323_v23 = vadd.f32 %v6322_v21, %v6321_v19  ;;  %v6324_v27 = vpop.f32.mrb[6].mxu1  ;;  %v6303_v30 = vpop.f32.mrb[7].mxu0  ;;  %6624 = vmatpush3.bf16.msra.mxu1 %v7254_v31  ;;  %6603 = vmatprep.subr.bf16.mxu0 %v7255_v34  ;;  %v7292_v21 = vld [vmem:[%s9201_s1 + $0x9f0] sm:$0xff]   ;;  %v7296_v25 = vld [vmem:[%s9201_s1 + $0x9f8] sm:$0xff]   ;;  %v5702_v34 = vcombine.high %v36_v29, %v36_v29 }
 0x11a   :  { %v4491_v28 = vadd.f32 %v6301_v22, %v8328_v47  ;;  %v6325_v32 = vpop.f32.mrb[7].mxu1  ;;  %6625 = vmatprep.subr.bf16.mxu1 %v7256_v35  ;;  %v5698_v47 = vcombine.high %v34_v43, %v34_v43  ;;  %v7293_v22 = vld [vmem:[%s9201_s1 + $0x930] sm:$0xff]   ;;  %v7298_v27 = vld [vmem:[%s9201_s1 + $0x9b8] sm:$0xff]   ;;  %v7304_v35 = vld [vmem:[%s9201_s1 + $0xac0] sm:$0xff]  }
 0x11b   :  { %v5701_v32 = vcombine.low %v36_v29, %v36_v29  ;;  %v7312_v43 = vld [vmem:[%s9201_s1 + $0xad0] sm:$0xff]  }
 0x11c   :  { %v8433_v33 = vadd.f32 %v6323_v23, %v4491_v28  ;;  %6604 = vmatpush3.bf16.msra.mxu0 %v7257_v36  ;;  %5088 = vmatprep.mubr.bf16.mxu1 %v5698_v47  ;;  %v7294_v23 = vld [vmem:[%s9201_s1 + $0x9b0] sm:$0xff]   ;;  %v7305_v36 = vld [vmem:[%s9201_s1 + $0xa00] sm:$0xff]   ;;  %v7316_v47 = vld [vmem:[%s9201_s1 + $0xad8] sm:$0xff]  }
 0x11d   :  { %6626 = vmatpush3.bf16.msra.mxu1 %v7258_v37  ;;  %6605 = vmatprep.subr.bf16.mxu0 %v7259_v38  ;;  %v35_v28 = vld [vmem:[%s9202_s0 + $0x90] sm:$0xff]  ;;  %v7306_v37 = vld [vmem:[%s9201_s1 + $0xa80] sm:$0xff]   ;;  %v7307_v38 = vld [vmem:[%s9201_s1 + $0xa48] sm:$0xff]  }
 0x11e   :  { %6627 = vmatprep.subr.bf16.mxu1 %v7260_v39  ;;  %v5699_v30 = vcombine.low %v35_v28, %v35_v28  ;;  %v5700_v31 = vcombine.high %v35_v28, %v35_v28  ;;  %v7308_v39 = vld [vmem:[%s9201_s1 + $0xac8] sm:$0xff]   ;;  %v7347_v28 = vld [vmem:[%s9201_s1 + $0xb50] sm:$0xff]  }
 0x11f   :  { %v7348_v29 = vld [vmem:[%s9201_s1 + $0xbd0] sm:$0xff]  }
 0x120   :  { %6606 = vmatpush3.bf16.msra.mxu0 %v7261_v40  ;;  %v7309_v40 = vld [vmem:[%s9201_s1 + $0xa08] sm:$0xff]  }
 0x121   :  { %6628 = vmatpush3.bf16.msra.mxu1 %v7262_v41  ;;  %6635 = vmatprep.subr.bf16.mxu0 %v7267_v48  ;;  %v7310_v41 = vld [vmem:[%s9201_s1 + $0xa88] sm:$0xff]   ;;  %v7317_v48 = vld [vmem:[%s9201_s1 + $0xa18] sm:$0xff]  }
 0x122   :  { %6657 = vmatprep.subr.bf16.mxu1 %v7268_v49  ;;  %v7318_v49 = vld [vmem:[%s9201_s1 + $0xa98] sm:$0xff]  }
 0x123   :  { %5049 = vmatmul.mubr.bf16.vlgmr.msra.gmra.mrb[32].mxu0 %v5695_v44  ;;  %v7313_v44 = vld [vmem:[%s9201_s1 + $0xa10] sm:$0xff]  }
 0x124   :  { %5089 = vmatmul.mubr.bf16.vlgmr.msra.gmra.mrb[32].mxu1 %v5697_v46  ;;  %6636 = vmatpush3.bf16.msra.mxu0 %v7269_v50  ;;  %v7315_v46 = vld [vmem:[%s9201_s1 + $0xa58] sm:$0xff]   ;;  %v7319_v50 = vld [vmem:[%s9201_s1 + $0xa60] sm:$0xff]  }
 0x125   :  { %6658 = vmatpush3.bf16.msra.mxu1 %v7270_v51  ;;  %6637 = vmatprep.subr.bf16.mxu0 %v7271_v52  ;;  %v7320_v51 = vld [vmem:[%s9201_s1 + $0xae0] sm:$0xff]  }
 0x126   :  { %6659 = vmatprep.subr.bf16.mxu1 %v7272_v53  ;;  %5128 = vmatprep.mubr.bf16.mxu0 %v5700_v31  ;;  %v7321_v53 = vld [vmem:[%s9201_s1 + $0xa20] sm:$0xff]   ;;  %v7350_v31 = vld [vmem:[%s9201_s1 + $0xb90] sm:$0xff]  }
 0x127   :  { %5168 = vmatprep.mubr.bf16.mxu1 %v5702_v34  ;;  %v7353_v34 = vld [vmem:[%s9201_s1 + $0xb18] sm:$0xff]  }
 0x128   :  { %6638 = vmatpush3.bf16.msra.mxu0 %v7273_v54 }
 0x129   :  { %6660 = vmatpush3.bf16.msra.mxu1 %v7274_v55  ;;  %6639 = vmatprep.subr.bf16.mxu0 %v7275_v56  ;;  %v7322_v55 = vld [vmem:[%s9201_s1 + $0xaa0] sm:$0xff]  }
 0x12a   :  { %6661 = vmatprep.subr.bf16.mxu1 %v7276_v57 }
 0x12c   :  { %6640 = vmatpush3.bf16.msra.mxu0 %v7277_v58  ;;  %v7323_v58 = vld [vmem:[%s9201_s1 + $0xa68] sm:$0xff]  }
 0x12d   :  { %6662 = vmatpush3.bf16.msra.mxu1 %v7278_v59  ;;  %6641 = vmatprep.subr.bf16.mxu0 %v7279_v60 }
 0x12e   :  { %6663 = vmatprep.subr.bf16.mxu1 %v7280_v61  ;;  %v7324_v61 = vld [vmem:[%s9201_s1 + $0xae8] sm:$0xff]  }
 0x130   :  { %6642 = vmatpush3.bf16.msra.mxu0 %v7281_v62 }
 0x131   :  { %6664 = vmatpush3.bf16.msra.mxu1 %v7282_v63  ;;  %6643 = vmatprep.subr.bf16.mxu0 %v7283_v0  ;;  %v7325_v0 = vld [vmem:[%s9201_s1 + $0xa28] sm:$0xff]  }
 0x132   :  { %6665 = vmatprep.subr.bf16.mxu1 %v7284_v1 }
 0x134   :  { %6644 = vmatpush3.bf16.msra.mxu0 %v7285_v3 }
 0x135   :  { %6666 = vmatpush3.bf16.msra.mxu1 %v7286_v5  ;;  %6645 = vmatprep.subr.bf16.mxu0 %v7287_v9  ;;  %v7327_v5 = vld [vmem:[%s9201_s1 + $0xa70] sm:$0xff]  }
 0x136   :  { %v6343_v2 = vpop.f32.mrb[8].mxu0  ;;  %6667 = vmatprep.subr.bf16.mxu1 %v7288_v11  ;;  %v7330_v9 = vld [vmem:[%s9201_s1 + $0xab0] sm:$0xff]   ;;  %v7332_v11 = vld [vmem:[%s9201_s1 + $0xaf8] sm:$0xff]  }
 0x137   :  { %v6365_v4 = vpop.f32.mrb[8].mxu1  ;;  %v6344_v6 = vpop.f32.mrb[9].mxu0 }
 0x138   :  { %v6345_v7 = vadd.f32 %v6344_v6, %v6343_v2  ;;  %v6366_v8 = vpop.f32.mrb[9].mxu1  ;;  %v6346_v12 = vpop.f32.mrb[10].mxu0  ;;  %6646 = vmatpush3.bf16.msra.mxu0 %v7289_v15  ;;  %v7326_v2 = vld [vmem:[%s9201_s1 + $0xaa8] sm:$0xff]  }
 0x139   :  { %v6367_v10 = vadd.f32 %v6366_v8, %v6365_v4  ;;  %v6368_v14 = vpop.f32.mrb[10].mxu1  ;;  %v6347_v17 = vpop.f32.mrb[11].mxu0  ;;  %6668 = vmatpush3.bf16.msra.mxu1 %v7290_v16  ;;  %6647 = vmatprep.subr.bf16.mxu0 %v7291_v20  ;;  %v7329_v8 = vld [vmem:[%s9201_s1 + $0xa30] sm:$0xff]   ;;  %v7333_v12 = vld [vmem:[%s9201_s1 + $0xa38] sm:$0xff]   ;;  %v7339_v20 = vld [vmem:[%s9201_s1 + $0xb40] sm:$0xff]  }
 0x13a   :  { %v4571_v13 = vadd.f32 %v6345_v7, %v8433_v33  ;;  %v6369_v19 = vpop.f32.mrb[11].mxu1  ;;  %6669 = vmatprep.subr.bf16.mxu1 %v7292_v21  ;;  %v7303_v33 = vld [vmem:[%s9201_s1 + $0xa40] sm:$0xff]   ;;  %v7328_v7 = vld [vmem:[%s9201_s1 + $0xaf0] sm:$0xff]   ;;  %v38_v17 = vld [vmem:[%s9202_s0 + $0xa8] sm:$0xff] }
 0x13b   :  { %v37_v14 = vld [vmem:[%s9202_s0 + $0xa0] sm:$0xff]  ;;  %v5706_v19 = vcombine.high %v38_v17, %v38_v17 }
 0x13c   :  { %v8538_v18 = vadd.f32 %v6367_v10, %v4571_v13  ;;  %6648 = vmatpush3.bf16.msra.mxu0 %v7293_v22  ;;  %v7331_v10 = vld [vmem:[%s9201_s1 + $0xa78] sm:$0xff]   ;;  %v5703_v15 = vcombine.low %v37_v14, %v37_v14  ;;  %v5704_v16 = vcombine.high %v37_v14, %v37_v14  ;;  %v7340_v21 = vld [vmem:[%s9201_s1 + $0xbc0] sm:$0xff]   ;;  %v7383_v14 = vld [vmem:[%s9201_s1 + $0xc50] sm:$0xff]  }
 0x13d   :  { %6670 = vmatpush3.bf16.msra.mxu1 %v7294_v23  ;;  %6649 = vmatprep.subr.bf16.mxu0 %v7295_v24  ;;  %v7334_v13 = vld [vmem:[%s9201_s1 + $0xab8] sm:$0xff]   ;;  %v7341_v22 = vld [vmem:[%s9201_s1 + $0xb00] sm:$0xff]   ;;  %v7343_v24 = vld [vmem:[%s9201_s1 + $0xb48] sm:$0xff]  }
 0x13e   :  { %6671 = vmatprep.subr.bf16.mxu1 %v7296_v25  ;;  %v7342_v23 = vld [vmem:[%s9201_s1 + $0xb80] sm:$0xff]   ;;  %v7344_v25 = vld [vmem:[%s9201_s1 + $0xbc8] sm:$0xff]  }
 0x140   :  { %6650 = vmatpush3.bf16.msra.mxu0 %v7297_v26  ;;  %v7345_v26 = vld [vmem:[%s9201_s1 + $0xb08] sm:$0xff]  }
 0x141   :  { %6672 = vmatpush3.bf16.msra.mxu1 %v7298_v27  ;;  %6679 = vmatprep.subr.bf16.mxu0 %v7303_v33  ;;  %v7346_v27 = vld [vmem:[%s9201_s1 + $0xb88] sm:$0xff]   ;;  %v7352_v33 = vld [vmem:[%s9201_s1 + $0xbd8] sm:$0xff]  }
 0x142   :  { %6701 = vmatprep.subr.bf16.mxu1 %v7304_v35  ;;  %v7354_v35 = vld [vmem:[%s9201_s1 + $0xb98] sm:$0xff]  }
 0x143   :  { %5129 = vmatmul.mubr.bf16.vlgmr.msra.gmra.mrb[36].mxu0 %v5699_v30  ;;  %v7349_v30 = vld [vmem:[%s9201_s1 + $0xb10] sm:$0xff]  }
 0x144   :  { %5169 = vmatmul.mubr.bf16.vlgmr.msra.gmra.mrb[36].mxu1 %v5701_v32  ;;  %6680 = vmatpush3.bf16.msra.mxu0 %v7305_v36  ;;  %v7351_v32 = vld [vmem:[%s9201_s1 + $0xb58] sm:$0xff]   ;;  %v7355_v36 = vld [vmem:[%s9201_s1 + $0xb60] sm:$0xff]  }
 0x145   :  { %6702 = vmatpush3.bf16.msra.mxu1 %v7306_v37  ;;  %6681 = vmatprep.subr.bf16.mxu0 %v7307_v38  ;;  %v7356_v37 = vld [vmem:[%s9201_s1 + $0xbe0] sm:$0xff]  }
 0x146   :  { %6703 = vmatprep.subr.bf16.mxu1 %v7308_v39  ;;  %5208 = vmatprep.mubr.bf16.mxu0 %v5704_v16  ;;  %v7357_v39 = vld [vmem:[%s9201_s1 + $0xb20] sm:$0xff]   ;;  %v7385_v16 = vld [vmem:[%s9201_s1 + $0xc10] sm:$0xff]  }
 0x147   :  { %5248 = vmatprep.mubr.bf16.mxu1 %v5706_v19  ;;  %v7388_v19 = vld [vmem:[%s9201_s1 + $0xcd8] sm:$0xff]  }
 0x148   :  { %6682 = vmatpush3.bf16.msra.mxu0 %v7309_v40 }
 0x149   :  { %6704 = vmatpush3.bf16.msra.mxu1 %v7310_v41  ;;  %6683 = vmatprep.subr.bf16.mxu0 %v7311_v42  ;;  %v7358_v41 = vld [vmem:[%s9201_s1 + $0xba0] sm:$0xff]  }
 0x14a   :  { %6705 = vmatprep.subr.bf16.mxu1 %v7312_v43 }
 0x14c   :  { %6684 = vmatpush3.bf16.msra.mxu0 %v7313_v44  ;;  %v7359_v44 = vld [vmem:[%s9201_s1 + $0xb68] sm:$0xff]  }
 0x14d   :  { %6706 = vmatpush3.bf16.msra.mxu1 %v7314_v45  ;;  %6685 = vmatprep.subr.bf16.mxu0 %v7315_v46 }
 0x14e   :  { %6707 = vmatprep.subr.bf16.mxu1 %v7316_v47  ;;  %v7360_v47 = vld [vmem:[%s9201_s1 + $0xbe8] sm:$0xff]  }
 0x150   :  { %6686 = vmatpush3.bf16.msra.mxu0 %v7317_v48 }
 0x151   :  { %6708 = vmatpush3.bf16.msra.mxu1 %v7318_v49  ;;  %6687 = vmatprep.subr.bf16.mxu0 %v7319_v50  ;;  %v7361_v50 = vld [vmem:[%s9201_s1 + $0xb28] sm:$0xff]  }
 0x152   :  { %6709 = vmatprep.subr.bf16.mxu1 %v7320_v51 }
 0x154   :  { %6688 = vmatpush3.bf16.msra.mxu0 %v7321_v53 }
 0x155   :  { %6710 = vmatpush3.bf16.msra.mxu1 %v7322_v55  ;;  %6689 = vmatprep.subr.bf16.mxu0 %v7323_v58  ;;  %v7363_v55 = vld [vmem:[%s9201_s1 + $0xb70] sm:$0xff]  }
 0x156   :  { %v6387_v52 = vpop.f32.mrb[12].mxu0  ;;  %6711 = vmatprep.subr.bf16.mxu1 %v7324_v61  ;;  %v7365_v58 = vld [vmem:[%s9201_s1 + $0xb30] sm:$0xff]   ;;  %v7368_v61 = vld [vmem:[%s9201_s1 + $0xbf8] sm:$0xff]  }
 0x157   :  { %v6409_v54 = vpop.f32.mrb[12].mxu1  ;;  %v6388_v56 = vpop.f32.mrb[13].mxu0 }
 0x158   :  { %v6410_v57 = vpop.f32.mrb[13].mxu1  ;;  %v6389_v59 = vadd.f32 %v6388_v56, %v6387_v52  ;;  %v6390_v62 = vpop.f32.mrb[14].mxu0  ;;  %6690 = vmatpush3.bf16.msra.mxu0 %v7325_v0  ;;  %v7362_v52 = vld [vmem:[%s9201_s1 + $0xba8] sm:$0xff]   ;;  %v39_v0 = vld [vmem:[%s9202_s0 + $0xb0] sm:$0xff] }
 0x159   :  { %v6411_v60 = vadd.f32 %v6410_v57, %v6409_v54  ;;  %v6412_v63 = vpop.f32.mrb[14].mxu1  ;;  %v6391_v3 = vpop.f32.mrb[15].mxu0  ;;  %6712 = vmatpush3.bf16.msra.mxu1 %v7326_v2  ;;  %6691 = vmatprep.subr.bf16.mxu0 %v7327_v5  ;;  %v7364_v57 = vld [vmem:[%s9201_s1 + $0xbf0] sm:$0xff]   ;;  %v7369_v62 = vld [vmem:[%s9201_s1 + $0xb38] sm:$0xff]   ;;  %v5707_v2 = vcombine.low %v39_v0, %v39_v0 }
 0x15a   :  { %v4651_v1 = vadd.f32 %v6389_v59, %v8538_v18  ;;  %v6413_v4 = vpop.f32.mrb[15].mxu1  ;;  %6713 = vmatprep.subr.bf16.mxu1 %v7328_v7  ;;  %v5705_v18 = vcombine.low %v38_v17, %v38_v17  ;;  %v7366_v59 = vld [vmem:[%s9201_s1 + $0xbb0] sm:$0xff]   ;;  %v7370_v63 = vld [vmem:[%s9201_s1 + $0xbb8] sm:$0xff]   ;;  %v5708_v3 = vcombine.high %v39_v0, %v39_v0  ;;  %v7376_v7 = vld [vmem:[%s9201_s1 + $0xcc0] sm:$0xff]  }
 0x15b   :  { %v7386_v17 = vld [vmem:[%s9201_s1 + $0xc90] sm:$0xff]  }
 0x15c   :  { %v8646_v6 = vadd.f32 %v6411_v60, %v4651_v1  ;;  %6692 = vmatpush3.bf16.msra.mxu0 %v7329_v8  ;;  %v7367_v60 = vld [vmem:[%s9201_s1 + $0xb78] sm:$0xff]   ;;  %v7377_v8 = vld [vmem:[%s9201_s1 + $0xc00] sm:$0xff]   ;;  %v7419_v0 = vld [vmem:[%s9201_s1 + $0xd50] sm:$0xff]  }
 0x15d   :  { %6714 = vmatpush3.bf16.msra.mxu1 %v7330_v9  ;;  %6693 = vmatprep.subr.bf16.mxu0 %v7331_v10  ;;  %v40_v1 = vld [vmem:[%s9202_s0 + $0xb8] sm:$0xff]  ;;  %v7378_v9 = vld [vmem:[%s9201_s1 + $0xc80] sm:$0xff]   ;;  %v7379_v10 = vld [vmem:[%s9201_s1 + $0xc48] sm:$0xff]  }
 0x15e   :  { %6715 = vmatprep.subr.bf16.mxu1 %v7332_v11  ;;  %v5709_v4 = vcombine.low %v40_v1, %v40_v1  ;;  %v5710_v5 = vcombine.high %v40_v1, %v40_v1  ;;  %v7380_v11 = vld [vmem:[%s9201_s1 + $0xcc8] sm:$0xff]   ;;  %v7420_v1 = vld [vmem:[%s9201_s1 + $0xdd0] sm:$0xff]  }
 0x160   :  { %6694 = vmatpush3.bf16.msra.mxu0 %v7333_v12  ;;  %v7381_v12 = vld [vmem:[%s9201_s1 + $0xc08] sm:$0xff]  }
 0x161   :  { %6716 = vmatpush3.bf16.msra.mxu1 %v7334_v13  ;;  %6723 = vmatprep.subr.bf16.mxu0 %v7339_v20  ;;  %v7382_v13 = vld [vmem:[%s9201_s1 + $0xc88] sm:$0xff]   ;;  %v7389_v20 = vld [vmem:[%s9201_s1 + $0xc18] sm:$0xff]  }
 0x162   :  { %6745 = vmatprep.subr.bf16.mxu1 %v7340_v21  ;;  %v7390_v21 = vld [vmem:[%s9201_s1 + $0xc98] sm:$0xff]  }
 0x163   :  { %5209 = vmatmul.mubr.bf16.vlgmr.msra.gmra.mrb[40].mxu0 %v5703_v15  ;;  %v7384_v15 = vld [vmem:[%s9201_s1 + $0xcd0] sm:$0xff]  }
 0x164   :  { %5249 = vmatmul.mubr.bf16.vlgmr.msra.gmra.mrb[40].mxu1 %v5705_v18  ;;  %6724 = vmatpush3.bf16.msra.mxu0 %v7341_v22  ;;  %v7387_v18 = vld [vmem:[%s9201_s1 + $0xc58] sm:$0xff]   ;;  %v7391_v22 = vld [vmem:[%s9201_s1 + $0xc60] sm:$0xff]  }
 0x165   :  { %6746 = vmatpush3.bf16.msra.mxu1 %v7342_v23  ;;  %6725 = vmatprep.subr.bf16.mxu0 %v7343_v24  ;;  %v7392_v23 = vld [vmem:[%s9201_s1 + $0xce0] sm:$0xff]  }
 0x166   :  { %6747 = vmatprep.subr.bf16.mxu1 %v7344_v25  ;;  %5288 = vmatprep.mubr.bf16.mxu0 %v5708_v3  ;;  %v7393_v25 = vld [vmem:[%s9201_s1 + $0xc20] sm:$0xff]   ;;  %v7422_v3 = vld [vmem:[%s9201_s1 + $0xd90] sm:$0xff]  }
 0x167   :  { %5328 = vmatprep.mubr.bf16.mxu1 %v5710_v5  ;;  %v7424_v5 = vld [vmem:[%s9201_s1 + $0xdd8] sm:$0xff]  }
 0x168   :  { %6726 = vmatpush3.bf16.msra.mxu0 %v7345_v26 }
 0x169   :  { %6748 = vmatpush3.bf16.msra.mxu1 %v7346_v27  ;;  %6727 = vmatprep.subr.bf16.mxu0 %v7347_v28  ;;  %v7394_v27 = vld [vmem:[%s9201_s1 + $0xca0] sm:$0xff]  }
 0x16a   :  { %6749 = vmatprep.subr.bf16.mxu1 %v7348_v29 }
 0x16c   :  { %6728 = vmatpush3.bf16.msra.mxu0 %v7349_v30 }
 0x16d   :  { %6750 = vmatpush3.bf16.msra.mxu1 %v7350_v31  ;;  %6729 = vmatprep.subr.bf16.mxu0 %v7351_v32  ;;  %v7395_v31 = vld [vmem:[%s9201_s1 + $0xc68] sm:$0xff]  }
 0x16e   :  { %6751 = vmatprep.subr.bf16.mxu1 %v7352_v33  ;;  %v7396_v33 = vld [vmem:[%s9201_s1 + $0xce8] sm:$0xff]  }
 0x170   :  { %6730 = vmatpush3.bf16.msra.mxu0 %v7353_v34 }
 0x171   :  { %6752 = vmatpush3.bf16.msra.mxu1 %v7354_v35  ;;  %6731 = vmatprep.subr.bf16.mxu0 %v7355_v36 }
 0x172   :  { %6753 = vmatprep.subr.bf16.mxu1 %v7356_v37  ;;  %v7397_v37 = vld [vmem:[%s9201_s1 + $0xc28] sm:$0xff]  }
 0x174   :  { %6732 = vmatpush3.bf16.msra.mxu0 %v7357_v39 }
 0x175   :  { %6754 = vmatpush3.bf16.msra.mxu1 %v7358_v41  ;;  %6733 = vmatprep.subr.bf16.mxu0 %v7359_v44  ;;  %v7401_v44 = vld [vmem:[%s9201_s1 + $0xc30] sm:$0xff]  }
 0x176   :  { %v6431_v38 = vpop.f32.mrb[16].mxu0  ;;  %6755 = vmatprep.subr.bf16.mxu1 %v7360_v47  ;;  %v7404_v47 = vld [vmem:[%s9201_s1 + $0xcf8] sm:$0xff]  }
 0x177   :  { %v6453_v40 = vpop.f32.mrb[16].mxu1  ;;  %v6432_v42 = vpop.f32.mrb[17].mxu0 }
 0x178   :  { %v6454_v43 = vpop.f32.mrb[17].mxu1  ;;  %v6433_v45 = vadd.f32 %v6432_v42, %v6431_v38  ;;  %v6434_v48 = vpop.f32.mrb[18].mxu0  ;;  %6734 = vmatpush3.bf16.msra.mxu0 %v7361_v50  ;;  %v7398_v38 = vld [vmem:[%s9201_s1 + $0xca8] sm:$0xff]   ;;  %v7399_v42 = vld [vmem:[%s9201_s1 + $0xc70] sm:$0xff]   ;;  %v41_v50 = vld [vmem:[%s9202_s0 + $0xc0] sm:$0xff] }
 0x179   :  { %v6455_v46 = vadd.f32 %v6454_v43, %v6453_v40  ;;  %v6456_v49 = vpop.f32.mrb[18].mxu1  ;;  %v6435_v53 = vpop.f32.mrb[19].mxu0  ;;  %6756 = vmatpush3.bf16.msra.mxu1 %v7362_v52  ;;  %6735 = vmatprep.subr.bf16.mxu0 %v7363_v55  ;;  %v7400_v43 = vld [vmem:[%s9201_s1 + $0xcf0] sm:$0xff]   ;;  %v7405_v48 = vld [vmem:[%s9201_s1 + $0xc38] sm:$0xff]   ;;  %v5711_v52 = vcombine.low %v41_v50, %v41_v50  ;;  %v7411_v55 = vld [vmem:[%s9201_s1 + $0xd40] sm:$0xff]  }
 0x17a   :  { %v4731_v51 = vadd.f32 %v6433_v45, %v8646_v6  ;;  %v6457_v54 = vpop.f32.mrb[19].mxu1  ;;  %6757 = vmatprep.subr.bf16.mxu1 %v7364_v57  ;;  %v7375_v6 = vld [vmem:[%s9201_s1 + $0xc40] sm:$0xff]   ;;  %v7402_v45 = vld [vmem:[%s9201_s1 + $0xcb0] sm:$0xff]   ;;  %v7406_v49 = vld [vmem:[%s9201_s1 + $0xcb8] sm:$0xff]   ;;  %v5712_v53 = vcombine.high %v41_v50, %v41_v50 }
 0x17b   :  { %v7412_v57 = vld [vmem:[%s9201_s1 + $0xdc0] sm:$0xff]   ;;  %v7455_v50 = vld [vmem:[%s9201_s1 + $0xe50] sm:$0xff]  }
 0x17c   :  { %v8751_v56 = vadd.f32 %v6455_v46, %v4731_v51  ;;  %6736 = vmatpush3.bf16.msra.mxu0 %v7365_v58  ;;  %v7403_v46 = vld [vmem:[%s9201_s1 + $0xc78] sm:$0xff]   ;;  %v42_v51 = vld [vmem:[%s9202_s0 + $0xc8] sm:$0xff]  ;;  %v7413_v58 = vld [vmem:[%s9201_s1 + $0xd00] sm:$0xff]  }
 0x17d   :  { %6758 = vmatpush3.bf16.msra.mxu1 %v7366_v59  ;;  %6737 = vmatprep.subr.bf16.mxu0 %v7367_v60  ;;  %v5713_v54 = vcombine.low %v42_v51, %v42_v51  ;;  %v7414_v59 = vld [vmem:[%s9201_s1 + $0xd80] sm:$0xff]   ;;  %v7415_v60 = vld [vmem:[%s9201_s1 + $0xd48] sm:$0xff]  }
 0x17e   :  { %6759 = vmatprep.subr.bf16.mxu1 %v7368_v61  ;;  %v7416_v61 = vld [vmem:[%s9201_s1 + $0xdc8] sm:$0xff]  }
 0x180   :  { %6738 = vmatpush3.bf16.msra.mxu0 %v7369_v62  ;;  %v7417_v62 = vld [vmem:[%s9201_s1 + $0xd08] sm:$0xff]  }
 0x181   :  { %6760 = vmatpush3.bf16.msra.mxu1 %v7370_v63  ;;  %6767 = vmatprep.subr.bf16.mxu0 %v7375_v6  ;;  %v7418_v63 = vld [vmem:[%s9201_s1 + $0xd88] sm:$0xff]   ;;  %v7425_v6 = vld [vmem:[%s9201_s1 + $0xd18] sm:$0xff]  }
 0x182   :  { %6789 = vmatprep.subr.bf16.mxu1 %v7376_v7  ;;  %v7426_v7 = vld [vmem:[%s9201_s1 + $0xd98] sm:$0xff]  }
 0x183   :  { %5289 = vmatmul.mubr.bf16.vlgmr.msra.gmra.mrb[44].mxu0 %v5707_v2  ;;  %v7421_v2 = vld [vmem:[%s9201_s1 + $0xd10] sm:$0xff]  }
 0x184   :  { %5329 = vmatmul.mubr.bf16.vlgmr.msra.gmra.mrb[44].mxu1 %v5709_v4  ;;  %6768 = vmatpush3.bf16.msra.mxu0 %v7377_v8  ;;  %v7423_v4 = vld [vmem:[%s9201_s1 + $0xd58] sm:$0xff]   ;;  %v7427_v8 = vld [vmem:[%s9201_s1 + $0xd60] sm:$0xff]  }
 0x185   :  { %6790 = vmatpush3.bf16.msra.mxu1 %v7378_v9  ;;  %6769 = vmatprep.subr.bf16.mxu0 %v7379_v10  ;;  %v7428_v9 = vld [vmem:[%s9201_s1 + $0xde0] sm:$0xff]  }
 0x186   :  { %6791 = vmatprep.subr.bf16.mxu1 %v7380_v11  ;;  %5368 = vmatprep.mubr.bf16.mxu0 %v5712_v53  ;;  %v7429_v11 = vld [vmem:[%s9201_s1 + $0xd20] sm:$0xff]   ;;  %v7458_v53 = vld [vmem:[%s9201_s1 + $0xe90] sm:$0xff]  }
 0x188   :  { %6770 = vmatpush3.bf16.msra.mxu0 %v7381_v12 }
 0x189   :  { %6792 = vmatpush3.bf16.msra.mxu1 %v7382_v13  ;;  %6771 = vmatprep.subr.bf16.mxu0 %v7383_v14  ;;  %v7430_v13 = vld [vmem:[%s9201_s1 + $0xda0] sm:$0xff]  }
 0x18a   :  { %6793 = vmatprep.subr.bf16.mxu1 %v7384_v15 }
 0x18c   :  { %6772 = vmatpush3.bf16.msra.mxu0 %v7385_v16  ;;  %v7431_v16 = vld [vmem:[%s9201_s1 + $0xd68] sm:$0xff]  }
 0x18d   :  { %6794 = vmatpush3.bf16.msra.mxu1 %v7386_v17  ;;  %6773 = vmatprep.subr.bf16.mxu0 %v7387_v18 }
 0x18e   :  { %6795 = vmatprep.subr.bf16.mxu1 %v7388_v19  ;;  %v7432_v19 = vld [vmem:[%s9201_s1 + $0xde8] sm:$0xff]  }
 0x190   :  { %6774 = vmatpush3.bf16.msra.mxu0 %v7389_v20 }
 0x191   :  { %6796 = vmatpush3.bf16.msra.mxu1 %v7390_v21  ;;  %6775 = vmatprep.subr.bf16.mxu0 %v7391_v22  ;;  %v7433_v22 = vld [vmem:[%s9201_s1 + $0xd28] sm:$0xff]  }
 0x192   :  { %6797 = vmatprep.subr.bf16.mxu1 %v7392_v23 }
 0x194   :  { %6776 = vmatpush3.bf16.msra.mxu0 %v7393_v25 }
 0x195   :  { %6798 = vmatpush3.bf16.msra.mxu1 %v7394_v27  ;;  %6777 = vmatprep.subr.bf16.mxu0 %v7395_v31  ;;  %v7435_v27 = vld [vmem:[%s9201_s1 + $0xd70] sm:$0xff]  }
 0x196   :  { %v6475_v24 = vpop.f32.mrb[20].mxu0  ;;  %6799 = vmatprep.subr.bf16.mxu1 %v7396_v33  ;;  %v7438_v31 = vld [vmem:[%s9201_s1 + $0xdb0] sm:$0xff]   ;;  %v7440_v33 = vld [vmem:[%s9201_s1 + $0xdf8] sm:$0xff]  }
 0x197   :  { %v6497_v26 = vpop.f32.mrb[20].mxu1  ;;  %v6476_v28 = vpop.f32.mrb[21].mxu0 }
 0x198   :  { %v6477_v29 = vadd.f32 %v6476_v28, %v6475_v24  ;;  %v6498_v30 = vpop.f32.mrb[21].mxu1  ;;  %v6478_v34 = vpop.f32.mrb[22].mxu0  ;;  %6778 = vmatpush3.bf16.msra.mxu0 %v7397_v37  ;;  %v7434_v24 = vld [vmem:[%s9201_s1 + $0xda8] sm:$0xff]  }
 0x199   :  { %v6499_v32 = vadd.f32 %v6498_v30, %v6497_v26  ;;  %v6500_v36 = vpop.f32.mrb[22].mxu1  ;;  %v6479_v39 = vpop.f32.mrb[23].mxu0  ;;  %6800 = vmatpush3.bf16.msra.mxu1 %v7398_v38  ;;  %6779 = vmatprep.subr.bf16.mxu0 %v7399_v42  ;;  %v7437_v30 = vld [vmem:[%s9201_s1 + $0xd30] sm:$0xff]   ;;  %v7441_v34 = vld [vmem:[%s9201_s1 + $0xd38] sm:$0xff]   ;;  %v7447_v42 = vld [vmem:[%s9201_s1 + $0xe40] sm:$0xff]  }
 0x19a   :  { %v4811_v35 = vadd.f32 %v6477_v29, %v8751_v56  ;;  %v6501_v41 = vpop.f32.mrb[23].mxu1  ;;  %6801 = vmatprep.subr.bf16.mxu1 %v7400_v43  ;;  %v5714_v56 = vcombine.high %v42_v51, %v42_v51  ;;  %v7436_v29 = vld [vmem:[%s9201_s1 + $0xdf0] sm:$0xff]   ;;  %v44_v39 = vld [vmem:[%s9202_s0 + $0xd8] sm:$0xff]  ;;  %v7448_v43 = vld [vmem:[%s9201_s1 + $0xec0] sm:$0xff]  }
 0x19b   :  { %v43_v36 = vld [vmem:[%s9202_s0 + $0xd0] sm:$0xff]  ;;  %v5718_v41 = vcombine.high %v44_v39, %v44_v39 }
 0x19c   :  { %v8853_v40 = vadd.f32 %v6499_v32, %v4811_v35  ;;  %6780 = vmatpush3.bf16.msra.mxu0 %v7401_v44  ;;  %5408 = vmatprep.mubr.bf16.mxu1 %v5714_v56  ;;  %v7439_v32 = vld [vmem:[%s9201_s1 + $0xd78] sm:$0xff]   ;;  %v5715_v37 = vcombine.low %v43_v36, %v43_v36  ;;  %v5716_v38 = vcombine.high %v43_v36, %v43_v36  ;;  %v7449_v44 = vld [vmem:[%s9201_s1 + $0xe00] sm:$0xff]   ;;  %v7456_v51 = vld [vmem:[%s9201_s1 + $0xed0] sm:$0xff]  }
 0x19d   :  { %6802 = vmatpush3.bf16.msra.mxu1 %v7402_v45  ;;  %6781 = vmatprep.subr.bf16.mxu0 %v7403_v46  ;;  %v7442_v35 = vld [vmem:[%s9201_s1 + $0xdb8] sm:$0xff]   ;;  %v7450_v45 = vld [vmem:[%s9201_s1 + $0xe80] sm:$0xff]   ;;  %v7451_v46 = vld [vmem:[%s9201_s1 + $0xe48] sm:$0xff]  }
 0x19e   :  { %6803 = vmatprep.subr.bf16.mxu1 %v7404_v47  ;;  %v7452_v47 = vld [vmem:[%s9201_s1 + $0xec8] sm:$0xff]   ;;  %v7461_v56 = vld [vmem:[%s9201_s1 + $0xe18] sm:$0xff]   ;;  %v7491_v36 = vld [vmem:[%s9201_s1 + $0xf50] sm:$0xff]  }
 0x1a0   :  { %6782 = vmatpush3.bf16.msra.mxu0 %v7405_v48  ;;  %v7453_v48 = vld [vmem:[%s9201_s1 + $0xe08] sm:$0xff]  }
 0x1a1   :  { %6804 = vmatpush3.bf16.msra.mxu1 %v7406_v49  ;;  %6811 = vmatprep.subr.bf16.mxu0 %v7411_v55  ;;  %v7454_v49 = vld [vmem:[%s9201_s1 + $0xe88] sm:$0xff]   ;;  %v7460_v55 = vld [vmem:[%s9201_s1 + $0xed8] sm:$0xff]  }
 0x1a2   :  { %6833 = vmatprep.subr.bf16.mxu1 %v7412_v57  ;;  %v7462_v57 = vld [vmem:[%s9201_s1 + $0xe98] sm:$0xff]  }
 0x1a3   :  { %5369 = vmatmul.mubr.bf16.vlgmr.msra.gmra.mrb[48].mxu0 %v5711_v52  ;;  %v7457_v52 = vld [vmem:[%s9201_s1 + $0xe10] sm:$0xff]  }
 0x1a4   :  { %5409 = vmatmul.mubr.bf16.vlgmr.msra.gmra.mrb[48].mxu1 %v5713_v54  ;;  %6812 = vmatpush3.bf16.msra.mxu0 %v7413_v58  ;;  %v7459_v54 = vld [vmem:[%s9201_s1 + $0xe58] sm:$0xff]   ;;  %v7463_v58 = vld [vmem:[%s9201_s1 + $0xe60] sm:$0xff]  }
 0x1a5   :  { %6834 = vmatpush3.bf16.msra.mxu1 %v7414_v59  ;;  %6813 = vmatprep.subr.bf16.mxu0 %v7415_v60  ;;  %v7464_v59 = vld [vmem:[%s9201_s1 + $0xee0] sm:$0xff]  }
 0x1a6   :  { %6835 = vmatprep.subr.bf16.mxu1 %v7416_v61  ;;  %5448 = vmatprep.mubr.bf16.mxu0 %v5716_v38  ;;  %v7465_v61 = vld [vmem:[%s9201_s1 + $0xe20] sm:$0xff]   ;;  %v7493_v38 = vld [vmem:[%s9201_s1 + $0xf10] sm:$0xff]  }
 0x1a7   :  { %5488 = vmatprep.mubr.bf16.mxu1 %v5718_v41  ;;  %v7496_v41 = vld [vmem:[%s9201_s1 + $0xfd8] sm:$0xff]  }
 0x1a8   :  { %6814 = vmatpush3.bf16.msra.mxu0 %v7417_v62 }
 0x1a9   :  { %6836 = vmatpush3.bf16.msra.mxu1 %v7418_v63  ;;  %6815 = vmatprep.subr.bf16.mxu0 %v7419_v0  ;;  %v7466_v63 = vld [vmem:[%s9201_s1 + $0xea0] sm:$0xff]  }
 0x1aa   :  { %6837 = vmatprep.subr.bf16.mxu1 %v7420_v1 }
 0x1ac   :  { %6816 = vmatpush3.bf16.msra.mxu0 %v7421_v2  ;;  %v7467_v2 = vld [vmem:[%s9201_s1 + $0xe68] sm:$0xff]  }
 0x1ad   :  { %6838 = vmatpush3.bf16.msra.mxu1 %v7422_v3  ;;  %6817 = vmatprep.subr.bf16.mxu0 %v7423_v4 }
 0x1ae   :  { %6839 = vmatprep.subr.bf16.mxu1 %v7424_v5  ;;  %v7468_v5 = vld [vmem:[%s9201_s1 + $0xee8] sm:$0xff]  }
 0x1b0   :  { %6818 = vmatpush3.bf16.msra.mxu0 %v7425_v6 }
 0x1b1   :  { %6840 = vmatpush3.bf16.msra.mxu1 %v7426_v7  ;;  %6819 = vmatprep.subr.bf16.mxu0 %v7427_v8  ;;  %v7469_v8 = vld [vmem:[%s9201_s1 + $0xe28] sm:$0xff]  }
 0x1b2   :  { %6841 = vmatprep.subr.bf16.mxu1 %v7428_v9 }
 0x1b4   :  { %6820 = vmatpush3.bf16.msra.mxu0 %v7429_v11 }
 0x1b5   :  { %6842 = vmatpush3.bf16.msra.mxu1 %v7430_v13  ;;  %6821 = vmatprep.subr.bf16.mxu0 %v7431_v16  ;;  %v7471_v13 = vld [vmem:[%s9201_s1 + $0xe70] sm:$0xff]  }
 0x1b6   :  { %v6519_v10 = vpop.f32.mrb[24].mxu0  ;;  %6843 = vmatprep.subr.bf16.mxu1 %v7432_v19  ;;  %v7473_v16 = vld [vmem:[%s9201_s1 + $0xe30] sm:$0xff]   ;;  %v7476_v19 = vld [vmem:[%s9201_s1 + $0xef8] sm:$0xff]  }
 0x1b7   :  { %v6541_v12 = vpop.f32.mrb[24].mxu1  ;;  %v6520_v14 = vpop.f32.mrb[25].mxu0 }
 0x1b8   :  { %v6542_v15 = vpop.f32.mrb[25].mxu1  ;;  %v6521_v17 = vadd.f32 %v6520_v14, %v6519_v10  ;;  %v6522_v20 = vpop.f32.mrb[26].mxu0  ;;  %6822 = vmatpush3.bf16.msra.mxu0 %v7433_v22  ;;  %v7470_v10 = vld [vmem:[%s9201_s1 + $0xea8] sm:$0xff]   ;;  %v45_v22 = vld [vmem:[%s9202_s0 + $0xe0] sm:$0xff] }
 0x1b9   :  { %v6543_v18 = vadd.f32 %v6542_v15, %v6541_v12  ;;  %v6544_v21 = vpop.f32.mrb[26].mxu1  ;;  %v6523_v25 = vpop.f32.mrb[27].mxu0  ;;  %6844 = vmatpush3.bf16.msra.mxu1 %v7434_v24  ;;  %6823 = vmatprep.subr.bf16.mxu0 %v7435_v27  ;;  %v7472_v15 = vld [vmem:[%s9201_s1 + $0xef0] sm:$0xff]   ;;  %v7477_v20 = vld [vmem:[%s9201_s1 + $0xe38] sm:$0xff]   ;;  %v5719_v24 = vcombine.low %v45_v22, %v45_v22 }
 0x1ba   :  { %v4891_v23 = vadd.f32 %v6521_v17, %v8853_v40  ;;  %v6545_v26 = vpop.f32.mrb[27].mxu1  ;;  %6845 = vmatprep.subr.bf16.mxu1 %v7436_v29  ;;  %v5717_v40 = vcombine.low %v44_v39, %v44_v39  ;;  %v7474_v17 = vld [vmem:[%s9201_s1 + $0xeb0] sm:$0xff]   ;;  %v7478_v21 = vld [vmem:[%s9201_s1 + $0xeb8] sm:$0xff]   ;;  %v5720_v25 = vcombine.high %v45_v22, %v45_v22  ;;  %v7484_v29 = vld [vmem:[%s9201_s1 + $0xfc0] sm:$0xff]  }
 0x1bb   :  { %v7494_v39 = vld [vmem:[%s9201_s1 + $0xf90] sm:$0xff]  }
 0x1bc   :  { %v8961_v28 = vadd.f32 %v6543_v18, %v4891_v23  ;;  %6824 = vmatpush3.bf16.msra.mxu0 %v7437_v30  ;;  %v7475_v18 = vld [vmem:[%s9201_s1 + $0xe78] sm:$0xff]   ;;  %v46_v23 = vld [vmem:[%s9202_s0 + $0xe8] sm:$0xff]  ;;  %v7485_v30 = vld [vmem:[%s9201_s1 + $0xf00] sm:$0xff]  }
 0x1bd   :  { %6846 = vmatpush3.bf16.msra.mxu1 %v7438_v31  ;;  %6825 = vmatprep.subr.bf16.mxu0 %v7439_v32  ;;  %v5721_v26 = vcombine.low %v46_v23, %v46_v23  ;;  %v5722_v27 = vcombine.high %v46_v23, %v46_v23  ;;  %v7486_v31 = vld [vmem:[%s9201_s1 + $0xf80] sm:$0xff]   ;;  %v7487_v32 = vld [vmem:[%s9201_s1 + $0xf48] sm:$0xff]  }
 0x1be   :  { %6847 = vmatprep.subr.bf16.mxu1 %v7440_v33  ;;  %v7488_v33 = vld [vmem:[%s9201_s1 + $0xfc8] sm:$0xff]  }
 0x1c0   :  { %6826 = vmatpush3.bf16.msra.mxu0 %v7441_v34  ;;  %v7489_v34 = vld [vmem:[%s9201_s1 + $0xf08] sm:$0xff]  }
 0x1c1   :  { %6848 = vmatpush3.bf16.msra.mxu1 %v7442_v35  ;;  %6855 = vmatprep.subr.bf16.mxu0 %v7447_v42  ;;  %v7490_v35 = vld [vmem:[%s9201_s1 + $0xf88] sm:$0xff]   ;;  %v7497_v42 = vld [vmem:[%s9201_s1 + $0xf18] sm:$0xff]  }
 0x1c2   :  { %6877 = vmatprep.subr.bf16.mxu1 %v7448_v43  ;;  %v7498_v43 = vld [vmem:[%s9201_s1 + $0xf98] sm:$0xff]  }
 0x1c3   :  { %5449 = vmatmul.mubr.bf16.vlgmr.msra.gmra.mrb[52].mxu0 %v5715_v37  ;;  %v7492_v37 = vld [vmem:[%s9201_s1 + $0xfd0] sm:$0xff]  }
 0x1c4   :  { %5489 = vmatmul.mubr.bf16.vlgmr.msra.gmra.mrb[52].mxu1 %v5717_v40  ;;  %6856 = vmatpush3.bf16.msra.mxu0 %v7449_v44  ;;  %v7495_v40 = vld [vmem:[%s9201_s1 + $0xf58] sm:$0xff]   ;;  %v7499_v44 = vld [vmem:[%s9201_s1 + $0xf60] sm:$0xff]  }
 0x1c5   :  { %6878 = vmatpush3.bf16.msra.mxu1 %v7450_v45  ;;  %6857 = vmatprep.subr.bf16.mxu0 %v7451_v46  ;;  %v7500_v45 = vld [vmem:[%s9201_s1 + $0xfe0] sm:$0xff]  }
 0x1c6   :  { %6879 = vmatprep.subr.bf16.mxu1 %v7452_v47  ;;  %5528 = vmatprep.mubr.bf16.mxu0 %v5720_v25  ;;  %v7501_v46 = vld [vmem:[%s9201_s1 + $0xf20] sm:$0xff]  }
 0x1c7   :  { %5568 = vmatprep.mubr.bf16.mxu1 %v5722_v27 }
 0x1c8   :  { %6858 = vmatpush3.bf16.msra.mxu0 %v7453_v48  ;;  %v7502_v48 = vld [vmem:[%s9201_s1 + $0xfa0] sm:$0xff]  }
 0x1c9   :  { %6880 = vmatpush3.bf16.msra.mxu1 %v7454_v49  ;;  %6859 = vmatprep.subr.bf16.mxu0 %v7455_v50 }
 0x1ca   :  { %6881 = vmatprep.subr.bf16.mxu1 %v7456_v51 }
 0x1cc   :  { %6860 = vmatpush3.bf16.msra.mxu0 %v7457_v52 }
 0x1cd   :  { %6882 = vmatpush3.bf16.msra.mxu1 %v7458_v53  ;;  %6861 = vmatprep.subr.bf16.mxu0 %v7459_v54  ;;  %v7503_v54 = vld [vmem:[%s9201_s1 + $0xf68] sm:$0xff]  }
 0x1ce   :  { %6883 = vmatprep.subr.bf16.mxu1 %v7460_v55 }
 0x1d0   :  { %6862 = vmatpush3.bf16.msra.mxu0 %v7461_v56  ;;  %v7504_v56 = vld [vmem:[%s9201_s1 + $0xfe8] sm:$0xff]  }
 0x1d1   :  { %6884 = vmatpush3.bf16.msra.mxu1 %v7462_v57  ;;  %6863 = vmatprep.subr.bf16.mxu0 %v7463_v58 }
 0x1d2   :  { %6885 = vmatprep.subr.bf16.mxu1 %v7464_v59  ;;  %v7505_v59 = vld [vmem:[%s9201_s1 + $0xf28] sm:$0xff]  }
 0x1d4   :  { %6864 = vmatpush3.bf16.msra.mxu0 %v7465_v61  ;;  %v7506_v61 = vld [vmem:[%s9201_s1 + $0xfa8] sm:$0xff]  }
 0x1d5   :  { %6886 = vmatpush3.bf16.msra.mxu1 %v7466_v63  ;;  %6865 = vmatprep.subr.bf16.mxu0 %v7467_v2  ;;  %v7509_v2 = vld [vmem:[%s9201_s1 + $0xf30] sm:$0xff]  }
 0x1d6   :  { %v6563_v60 = vpop.f32.mrb[28].mxu0  ;;  %6887 = vmatprep.subr.bf16.mxu1 %v7468_v5  ;;  %v7512_v5 = vld [vmem:[%s9201_s1 + $0xff8] sm:$0xff]  }
 0x1d7   :  { %v6585_v62 = vpop.f32.mrb[28].mxu1  ;;  %v6564_v0 = vpop.f32.mrb[29].mxu0 }
 0x1d8   :  { %v6586_v1 = vpop.f32.mrb[29].mxu1  ;;  %v6565_v3 = vadd.f32 %v6564_v0, %v6563_v60  ;;  %v6566_v6 = vpop.f32.mrb[30].mxu0  ;;  %6866 = vmatpush3.bf16.msra.mxu0 %v7469_v8  ;;  %v7507_v0 = vld [vmem:[%s9201_s1 + $0xf70] sm:$0xff]  }
 0x1d9   :  { %v6587_v4 = vadd.f32 %v6586_v1, %v6585_v62  ;;  %v6588_v7 = vpop.f32.mrb[30].mxu1  ;;  %v6567_v11 = vpop.f32.mrb[31].mxu0  ;;  %6888 = vmatpush3.bf16.msra.mxu1 %v7470_v10  ;;  %6867 = vmatprep.subr.bf16.mxu0 %v7471_v13  ;;  %v7508_v1 = vld [vmem:[%s9201_s1 + $0xff0] sm:$0xff]   ;;  %v7513_v6 = vld [vmem:[%s9201_s1 + $0xf38] sm:$0xff]  }
 0x1da   :  { %v4971_v9 = vadd.f32 %v6565_v3, %v8961_v28  ;;  %v6589_v12 = vpop.f32.mrb[31].mxu1  ;;  %6889 = vmatprep.subr.bf16.mxu1 %v7472_v15  ;;  %v7483_v28 = vld [vmem:[%s9201_s1 + $0xf40] sm:$0xff]   ;;  %v7510_v3 = vld [vmem:[%s9201_s1 + $0xfb0] sm:$0xff]   ;;  %v7514_v7 = vld [vmem:[%s9201_s1 + $0xfb8] sm:$0xff]  }
 0x1db   :  { %v47_v8 = vld [vmem:[%s9202_s0 + $0xf0] sm:$0xff] }
 0x1dc   :  { %v9066_v14 = vadd.f32 %v6587_v4, %v4971_v9  ;;  %6868 = vmatpush3.bf16.msra.mxu0 %v7473_v16  ;;  %v7511_v4 = vld [vmem:[%s9201_s1 + $0xf78] sm:$0xff]   ;;  %v5723_v10 = vcombine.low %v47_v8, %v47_v8  ;;  %v5724_v11 = vcombine.high %v47_v8, %v47_v8 }
 0x1dd   :  { %6890 = vmatpush3.bf16.msra.mxu1 %v7474_v17  ;;  %6869 = vmatprep.subr.bf16.mxu0 %v7475_v18  ;;  %v48_v9 = vld [vmem:[%s9202_s0 + $0xf8] sm:$0xff] }
 0x1de   :  { %6891 = vmatprep.subr.bf16.mxu1 %v7476_v19  ;;  %v5725_v12 = vcombine.low %v48_v9, %v48_v9  ;;  %v5726_v13 = vcombine.high %v48_v9, %v48_v9 }
 0x1e0   :  { %6870 = vmatpush3.bf16.msra.mxu0 %v7477_v20 }
 0x1e1   :  { %6892 = vmatpush3.bf16.msra.mxu1 %v7478_v21  ;;  %6899 = vmatprep.subr.bf16.mxu0 %v7483_v28 }
 0x1e2   :  { %6921 = vmatprep.subr.bf16.mxu1 %v7484_v29 }
 0x1e3   :  { %5529 = vmatmul.mubr.bf16.vlgmr.msra.gmra.mrb[56].mxu0 %v5719_v24 }
 0x1e4   :  { %5569 = vmatmul.mubr.bf16.vlgmr.msra.gmra.mrb[56].mxu1 %v5721_v26  ;;  %6900 = vmatpush3.bf16.msra.mxu0 %v7485_v30 }
 0x1e5   :  { %6922 = vmatpush3.bf16.msra.mxu1 %v7486_v31  ;;  %6901 = vmatprep.subr.bf16.mxu0 %v7487_v32 }
 0x1e6   :  { %6923 = vmatprep.subr.bf16.mxu1 %v7488_v33  ;;  %5608 = vmatprep.mubr.bf16.mxu0 %v5724_v11 }
 0x1e7   :  { %5648 = vmatprep.mubr.bf16.mxu1 %v5726_v13 }
 0x1e8   :  { %6902 = vmatpush3.bf16.msra.mxu0 %v7489_v34 }
 0x1e9   :  { %6924 = vmatpush3.bf16.msra.mxu1 %v7490_v35  ;;  %6903 = vmatprep.subr.bf16.mxu0 %v7491_v36 }
 0x1ea   :  { %6925 = vmatprep.subr.bf16.mxu1 %v7492_v37 }
 0x1ec   :  { %6904 = vmatpush3.bf16.msra.mxu0 %v7493_v38 }
 0x1ed   :  { %6926 = vmatpush3.bf16.msra.mxu1 %v7494_v39  ;;  %6905 = vmatprep.subr.bf16.mxu0 %v7495_v40 }
 0x1ee   :  { %6927 = vmatprep.subr.bf16.mxu1 %v7496_v41 }
 0x1f0   :  { %6906 = vmatpush3.bf16.msra.mxu0 %v7497_v42 }
 0x1f1   :  { %6928 = vmatpush3.bf16.msra.mxu1 %v7498_v43  ;;  %6907 = vmatprep.subr.bf16.mxu0 %v7499_v44 }
 0x1f2   :  { %6929 = vmatprep.subr.bf16.mxu1 %v7500_v45 }
 0x1f4   :  { %6908 = vmatpush3.bf16.msra.mxu0 %v7501_v46 }
 0x1f5   :  { %6930 = vmatpush3.bf16.msra.mxu1 %v7502_v48  ;;  %6909 = vmatprep.subr.bf16.mxu0 %v7503_v54 }
 0x1f6   :  { %v6607_v47 = vpop.f32.mrb[32].mxu0  ;;  %6931 = vmatprep.subr.bf16.mxu1 %v7504_v56 }
 0x1f7   :  { %v6629_v49 = vpop.f32.mrb[32].mxu1  ;;  %v6608_v50 = vpop.f32.mrb[33].mxu0 }
 0x1f8   :  { %v6630_v51 = vpop.f32.mrb[33].mxu1  ;;  %v6609_v52 = vadd.f32 %v6608_v50, %v6607_v47  ;;  %v6610_v55 = vpop.f32.mrb[34].mxu0  ;;  %6910 = vmatpush3.bf16.msra.mxu0 %v7505_v59 }
 0x1f9   :  { %v6631_v53 = vadd.f32 %v6630_v51, %v6629_v49  ;;  %v6632_v57 = vpop.f32.mrb[34].mxu1  ;;  %v6611_v60 = vpop.f32.mrb[35].mxu0  ;;  %6932 = vmatpush3.bf16.msra.mxu1 %v7506_v61  ;;  %6911 = vmatprep.subr.bf16.mxu0 %v7507_v0 }
 0x1fa   :  { %v5051_v58 = vadd.f32 %v6609_v52, %v9066_v14  ;;  %v6633_v62 = vpop.f32.mrb[35].mxu1  ;;  %6933 = vmatprep.subr.bf16.mxu1 %v7508_v1 }
 0x1fc   :  { %v5091_v63 = vadd.f32 %v6631_v53, %v5051_v58  ;;  %6912 = vmatpush3.bf16.msra.mxu0 %v7509_v2 }
 0x1fd   :  { %6934 = vmatpush3.bf16.msra.mxu1 %v7510_v3  ;;  %6913 = vmatprep.subr.bf16.mxu0 %v7511_v4 }
 0x1fe   :  { %6935 = vmatprep.subr.bf16.mxu1 %v7512_v5 }
 0x200   :  { %6914 = vmatpush3.bf16.msra.mxu0 %v7513_v6 }
 0x201   :  { %6936 = vmatpush3.bf16.msra.mxu1 %v7514_v7 }
 0x203   :  { %5609 = vmatmul.mubr.bf16.vlgmr.msra.gmra.mrb[60].mxu0 %v5723_v10 }
 0x204   :  { %5649 = vmatmul.mubr.bf16.vlgmr.msra.gmra.mrb[60].mxu1 %v5725_v12 }
 0x216   :  { %v6651_v14 = vpop.f32.mrb[36].mxu0 }
 0x217   :  { %v6673_v15 = vpop.f32.mrb[36].mxu1  ;;  %v6652_v16 = vpop.f32.mrb[37].mxu0 }
 0x218   :  { %v6653_v17 = vadd.f32 %v6652_v16, %v6651_v14  ;;  %v6674_v18 = vpop.f32.mrb[37].mxu1  ;;  %v6654_v19 = vpop.f32.mrb[38].mxu0 }
 0x219   :  { %v6675_v20 = vadd.f32 %v6674_v18, %v6673_v15  ;;  %v6676_v21 = vpop.f32.mrb[38].mxu1  ;;  %v6655_v22 = vpop.f32.mrb[39].mxu0 }
 0x21a   :  { %v5131_v23 = vadd.f32 %v6653_v17, %v5091_v63  ;;  %v6677_v24 = vpop.f32.mrb[39].mxu1 }
 0x21c   :  { %v5171_v25 = vadd.f32 %v6675_v20, %v5131_v23 }
 0x236   :  { %v6695_v26 = vpop.f32.mrb[40].mxu0 }
 0x237   :  { %v6717_v27 = vpop.f32.mrb[40].mxu1  ;;  %v6696_v28 = vpop.f32.mrb[41].mxu0 }
 0x238   :  { %v6718_v29 = vpop.f32.mrb[41].mxu1  ;;  %v6697_v30 = vadd.f32 %v6696_v28, %v6695_v26  ;;  %v6698_v32 = vpop.f32.mrb[42].mxu0 }
 0x239   :  { %v6719_v31 = vadd.f32 %v6718_v29, %v6717_v27  ;;  %v6720_v33 = vpop.f32.mrb[42].mxu1  ;;  %v6699_v34 = vpop.f32.mrb[43].mxu0 }
 0x23a   :  { %v6721_v35 = vpop.f32.mrb[43].mxu1  ;;  %v5211_v36 = vadd.f32 %v6697_v30, %v5171_v25 }
 0x23c   :  { %v5251_v37 = vadd.f32 %v6719_v31, %v5211_v36 }
 0x256   :  { %v6739_v38 = vpop.f32.mrb[44].mxu0 }
 0x257   :  { %v6761_v39 = vpop.f32.mrb[44].mxu1  ;;  %v6740_v40 = vpop.f32.mrb[45].mxu0 }
 0x258   :  { %v6741_v41 = vadd.f32 %v6740_v40, %v6739_v38  ;;  %v6762_v42 = vpop.f32.mrb[45].mxu1  ;;  %v6742_v43 = vpop.f32.mrb[46].mxu0 }
 0x259   :  { %v6763_v44 = vadd.f32 %v6762_v42, %v6761_v39  ;;  %v6764_v45 = vpop.f32.mrb[46].mxu1  ;;  %v6743_v46 = vpop.f32.mrb[47].mxu0 }
 0x25a   :  { %v5291_v47 = vadd.f32 %v6741_v41, %v5251_v37  ;;  %v6765_v48 = vpop.f32.mrb[47].mxu1 }
 0x25c   :  { %v5331_v49 = vadd.f32 %v6763_v44, %v5291_v47 }
 0x276   :  { %v6783_v50 = vpop.f32.mrb[48].mxu0 }
 0x277   :  { %v6805_v51 = vpop.f32.mrb[48].mxu1  ;;  %v6784_v52 = vpop.f32.mrb[49].mxu0 }
 0x278   :  { %v6785_v53 = vadd.f32 %v6784_v52, %v6783_v50  ;;  %v6806_v54 = vpop.f32.mrb[49].mxu1  ;;  %v6786_v55 = vpop.f32.mrb[50].mxu0 }
 0x279   :  { %v6807_v56 = vadd.f32 %v6806_v54, %v6805_v51  ;;  %v6808_v57 = vpop.f32.mrb[50].mxu1  ;;  %v6787_v58 = vpop.f32.mrb[51].mxu0 }
 0x27a   :  { %v5371_v59 = vadd.f32 %v6785_v53, %v5331_v49  ;;  %v6809_v60 = vpop.f32.mrb[51].mxu1 }
 0x27c   :  { %v5411_v61 = vadd.f32 %v6807_v56, %v5371_v59 }
 0x296   :  { %v6827_v62 = vpop.f32.mrb[52].mxu0 }
 0x297   :  { %v6849_v63 = vpop.f32.mrb[52].mxu1  ;;  %v6828_v0 = vpop.f32.mrb[53].mxu0 }
 0x298   :  { %v6850_v1 = vpop.f32.mrb[53].mxu1  ;;  %v6829_v2 = vadd.f32 %v6828_v0, %v6827_v62  ;;  %v6830_v4 = vpop.f32.mrb[54].mxu0 }
 0x299   :  { %v6851_v3 = vadd.f32 %v6850_v1, %v6849_v63  ;;  %v6852_v5 = vpop.f32.mrb[54].mxu1  ;;  %v6831_v6 = vpop.f32.mrb[55].mxu0 }
 0x29a   :  { %v6853_v7 = vpop.f32.mrb[55].mxu1  ;;  %v5451_v8 = vadd.f32 %v6829_v2, %v5411_v61 }
 0x29c   :  { %v5491_v9 = vadd.f32 %v6851_v3, %v5451_v8 }
 0x2b6   :  { %v6871_v10 = vpop.f32.mrb[56].mxu0 }
 0x2b7   :  { %v6893_v11 = vpop.f32.mrb[56].mxu1  ;;  %v6872_v12 = vpop.f32.mrb[57].mxu0 }
 0x2b8   :  { %v6873_v13 = vadd.f32 %v6872_v12, %v6871_v10  ;;  %v6894_v14 = vpop.f32.mrb[57].mxu1  ;;  %v6874_v15 = vpop.f32.mrb[58].mxu0 }
 0x2b9   :  { %v6895_v16 = vadd.f32 %v6894_v14, %v6893_v11  ;;  %v6896_v17 = vpop.f32.mrb[58].mxu1  ;;  %v6875_v18 = vpop.f32.mrb[59].mxu0 }
 0x2ba   :  { %v5531_v19 = vadd.f32 %v6873_v13, %v5491_v9  ;;  %v6897_v20 = vpop.f32.mrb[59].mxu1 }
 0x2bc   :  { %v5571_v21 = vadd.f32 %v6895_v16, %v5531_v19 }
 0x2d6   :  { %v6915_v22 = vpop.f32.mrb[60].mxu0 }
 0x2d7   :  { %v6937_v23 = vpop.f32.mrb[60].mxu1  ;;  %v6916_v24 = vpop.f32.mrb[61].mxu0 }
 0x2d8   :  { %v6917_v25 = vadd.f32 %v6916_v24, %v6915_v22  ;;  %v6938_v26 = vpop.f32.mrb[61].mxu1  ;;  %v6918_v27 = vpop.f32.mrb[62].mxu0 }
 0x2d9   :  { %v6939_v28 = vadd.f32 %v6938_v26, %v6937_v23  ;;  %v6940_v29 = vpop.f32.mrb[62].mxu1  ;;  %v6919_v30 = vpop.f32.mrb[63].mxu0 }
 0x2da   :  { %v5611_v31 = vadd.f32 %v6917_v25, %v5571_v21  ;;  %v6941_v32 = vpop.f32.mrb[63].mxu1 }
 0x2dc   :  { %v5651_v33 = vadd.f32 %v6939_v28, %v5611_v31 }
 0x2de   :  { %5657 = vst.msk [vmem:[%s9204_s3] sm:$0xff] %vm5656_vm0, %v5651_v33 }

</bundles_post_ra>
